<compile_context>
chip_gen: v5e
topology: v5e:2x2
jax: 0.10.0
libtpu: 0.0.40
codegen_flags: <defaults>
</compile_context>

<pallas_src>
import functools

import jax
import jax.numpy as jnp
from jax.experimental import pallas as pl
from jax.experimental.pallas import tpu as pltpu

HIDDEN = 768
SCORE_PAD = 128          # lane-dense width for the (768 -> 1) score head
DEFAULT_TM = 256         # rows (tokens) per grid step


def _verifier_kernel(
    x_ref,       # (TM, D)        bf16
    w1_ref,      # (D, D)         bf16  (BN1 scale folded into columns)
    t1_ref,      # (1, D)         f32   (BN1 shift + folded linear bias)
    w2_ref,      # (D, D)         bf16
    t2_ref,      # (1, D)         f32
    w3_ref,      # (D, D)         bf16
    b3_ref,      # (1, D)         f32
    wo_ref,      # (D, SCORE_PAD) bf16  (only column 0 is the real head weight)
    bo_ref,      # (1, SCORE_PAD) f32
    scores_ref,  # (TM, SCORE_PAD) f32  (column 0 holds the score)
):
    x = x_ref[...]

    # Layer 1: Linear (+ folded BN scale) -> BN shift -> SiLU (f32)
    h = jnp.dot(x, w1_ref[...], preferred_element_type=jnp.float32)
    h = h + t1_ref[...]
    h = h * jax.nn.sigmoid(h)

    # Layer 2: Linear (+ folded BN scale) -> BN shift -> SiLU (f32)
    h = jnp.dot(h.astype(jnp.bfloat16), w2_ref[...],
                preferred_element_type=jnp.float32)
    h = h + t2_ref[...]
    h = h * jax.nn.sigmoid(h)

    # Layer 3: Linear
    h = jnp.dot(h.astype(jnp.bfloat16), w3_ref[...],
                preferred_element_type=jnp.float32)
    h = h + b3_ref[...]

    # Score head: Linear(768, 1), lane-padded to 128 output columns so the
    # output store is unmasked / lane-dense.
    s = jnp.dot(h.astype(jnp.bfloat16), wo_ref[...],
                preferred_element_type=jnp.float32)
    scores_ref[...] = (s + bo_ref[...]).astype(scores_ref.dtype)


@functools.partial(jax.jit, static_argnames=("tm",))
def verifier_sep_forward(embs, params, tm=DEFAULT_TM):
    """embs: (B, L, 768) or (N, 768). Returns scores (B, L, 1) or (N, 1)."""
    orig_ndim = embs.ndim
    if orig_ndim == 3:
        B, L, D = embs.shape
        x = embs.reshape(B * L, D)
    else:
        x = embs
    N, D = x.shape
    assert D == HIDDEN

    # Choose the row tile: big (256) for real workloads, shrunk (multiple of 8)
    # for tiny inputs so we do not pad 16 rows up to 256.
    TM = min(tm, ((N + 7) // 8) * 8)

    # bf16 activations feeding the MXU (f32 accumulation inside the kernel).
    x = x.astype(jnp.bfloat16)

    n_pad = (-N) % TM
    if n_pad:
        x = jnp.pad(x, ((0, n_pad), (0, 0)))
    Np = x.shape[0]
    grid = (Np // TM,)

    full = lambda i: (0, 0)
    row_spec = pl.BlockSpec((TM, D), lambda i: (i, 0))

    scores_padded = pl.pallas_call(
        _verifier_kernel,
        out_shape=jax.ShapeDtypeStruct((Np, SCORE_PAD), jnp.float32),
        grid_spec=pltpu.PrefetchScalarGridSpec(
            num_scalar_prefetch=0,
            grid=grid,
            in_specs=[
                row_spec,                                  # x
                pl.BlockSpec((D, D), full),                # w1 (scale-folded)
                pl.BlockSpec((1, D), full),                # t1
                pl.BlockSpec((D, D), full),                # w2 (scale-folded)
                pl.BlockSpec((1, D), full),                # t2
                pl.BlockSpec((D, D), full),                # w3
                pl.BlockSpec((1, D), full),                # b3
                pl.BlockSpec((D, SCORE_PAD), full),        # w_out (lane-padded)
                pl.BlockSpec((1, SCORE_PAD), full),        # b_out (lane-padded)
            ],
            out_specs=pl.BlockSpec((TM, SCORE_PAD), lambda i: (i, 0)),
        ),
        compiler_params=pltpu.CompilerParams(
            dimension_semantics=("parallel",),
            vmem_limit_bytes=48 * 1024 * 1024,   # <= 64 MiB (v7x physical VMEM)
        ),
    )(
        x,
        params["w1"], params["t1"],
        params["w2"], params["t2"],
        params["w3"], params["b3"],
        params["w_out"], params["b_out"],
    )

    scores = scores_padded[:N, 0:1]
    if orig_ndim == 3:
        scores = scores.reshape(B, L, 1)
    return scores


def init_params(key):
    """Deterministic synthetic parameters matching the module's shapes,
    with eval-mode BatchNorm folded and matmul operands cast to bf16."""
    D = HIDDEN
    keys = jax.random.split(key, 4)
    eps = 1e-5

    def lin(k, din, dout):
        w = jax.random.normal(k, (din, dout), jnp.float32) * 0.02
        b = jnp.zeros((1, dout), jnp.float32)
        return w, b

    w1, b1 = lin(keys[0], D, D)
    w2, b2 = lin(keys[1], D, D)
    w3, b3 = lin(keys[2], D, D)
    w_out, _ = lin(keys[3], D, 1)
    b_out_val = jnp.float32(0.01)

    # Eval-mode BatchNorm1d with PyTorch-fresh stats/affine:
    #   gamma=1, beta=0, running_mean=0, running_var=1.
    #   bn(z) = gamma*(z - mean)/sqrt(var+eps) + beta = z*s + t'
    #   s = gamma*rsqrt(var+eps), t' = beta - mean*s
    # Fold s into the weight COLUMNS (per output feature) and the linear bias
    # into the shift:  (x @ (W*s)) + (b*s + t').
    gamma = jnp.ones((1, D), jnp.float32)
    beta = jnp.zeros((1, D), jnp.float32)
    mean = jnp.zeros((1, D), jnp.float32)
    var = jnp.ones((1, D), jnp.float32)
    s = gamma * jax.lax.rsqrt(var + eps)

    w1f = (w1 * s).astype(jnp.bfloat16)
    t1 = (beta - mean * s) + b1 * s
    w2f = (w2 * s).astype(jnp.bfloat16)
    t2 = (beta - mean * s) + b2 * s

    # Score head: pad (768,1) -> (768,128) with zeros so the kernel's output
    # block is lane-dense; column 0 carries the real score.
    wo = jnp.zeros((D, SCORE_PAD), jnp.float32).at[:, 0:1].set(w_out)
    bo = jnp.zeros((1, SCORE_PAD), jnp.float32).at[0, 0].set(b_out_val)

    return {
        "w1": w1f, "t1": t1,
        "w2": w2f, "t2": t2,
        "w3": w3.astype(jnp.bfloat16), "b3": b3,
        "w_out": wo.astype(jnp.bfloat16), "b_out": bo,
    }


def reference_forward(embs, params):
    """Pure-JAX reference of the same math (bf16 matmuls, f32 accumulate)."""
    x = embs.reshape(-1, HIDDEN).astype(jnp.bfloat16)
    h = jnp.dot(x, params["w1"], preferred_element_type=jnp.float32) + params["t1"]
    h = h * jax.nn.sigmoid(h)
    h = jnp.dot(h.astype(jnp.bfloat16), params["w2"],
                preferred_element_type=jnp.float32) + params["t2"]
    h = h * jax.nn.sigmoid(h)
    h = jnp.dot(h.astype(jnp.bfloat16), params["w3"],
                preferred_element_type=jnp.float32) + params["b3"]
    s = jnp.dot(h.astype(jnp.bfloat16), params["w_out"],
                preferred_element_type=jnp.float32) + params["b_out"]
    s = s[:, 0:1]
    if embs.ndim == 3:
        s = s.reshape(embs.shape[0], embs.shape[1], 1)
    return s


if __name__ == "__main__":
    key = jax.random.PRNGKey(0)
    k_params, k_x = jax.random.split(key)

    params = init_params(k_params)

    # Small input consistent with the module: (B, L, D) with D fixed at 768.
    B, L = 2, 8
    embs = jax.random.normal(k_x, (B, L, HIDDEN), jnp.float32)

    scores = verifier_sep_forward(embs, params)
    scores = jax.block_until_ready(scores)

    ref = reference_forward(embs, params)
    assert scores.shape == (B, L, 1), scores.shape
    assert jnp.allclose(scores, ref, atol=2e-3, rtol=2e-3), (
        float(jnp.max(jnp.abs(scores - ref)))
    )

    print("KERNEL_OK")
</pallas_src>

<mosaic_0001>
module attributes {stable_mosaic.version = 11 : i64} {
  func.func @_verifier_kernel(%arg0: i32, %arg1: memref<16x768xbf16, #tpu.memory_space<vmem>>, %arg2: memref<768x768xbf16, #tpu.memory_space<vmem>>, %arg3: memref<1x768xf32, #tpu.memory_space<vmem>>, %arg4: memref<768x768xbf16, #tpu.memory_space<vmem>>, %arg5: memref<1x768xf32, #tpu.memory_space<vmem>>, %arg6: memref<768x768xbf16, #tpu.memory_space<vmem>>, %arg7: memref<1x768xf32, #tpu.memory_space<vmem>>, %arg8: memref<768x128xbf16, #tpu.memory_space<vmem>>, %arg9: memref<1x128xf32, #tpu.memory_space<vmem>>, %arg10: memref<16x128xf32, #tpu.memory_space<vmem>>) attributes {dimension_semantics = [#tpu.dimension_semantics<parallel>], iteration_bounds = array<i64: 1>, scalar_prefetch = 0 : i64, scratch_operands = 0 : i64, tpu.core_type = #tpu.core_type<tc>, window_params = [{transform_indices = @transform_0, window_bounds = array<i64: 16, 768>}, {pipeline_mode = #tpu.pipeline_mode<synchronous>, transform_indices = @transform_1, window_bounds = array<i64: 768, 768>}, {pipeline_mode = #tpu.pipeline_mode<synchronous>, transform_indices = @transform_2, window_bounds = array<i64: 1, 768>}, {pipeline_mode = #tpu.pipeline_mode<synchronous>, transform_indices = @transform_3, window_bounds = array<i64: 768, 768>}, {pipeline_mode = #tpu.pipeline_mode<synchronous>, transform_indices = @transform_4, window_bounds = array<i64: 1, 768>}, {pipeline_mode = #tpu.pipeline_mode<synchronous>, transform_indices = @transform_5, window_bounds = array<i64: 768, 768>}, {pipeline_mode = #tpu.pipeline_mode<synchronous>, transform_indices = @transform_6, window_bounds = array<i64: 1, 768>}, {pipeline_mode = #tpu.pipeline_mode<synchronous>, transform_indices = @transform_7, window_bounds = array<i64: 768, 128>}, {pipeline_mode = #tpu.pipeline_mode<synchronous>, transform_indices = @transform_8, window_bounds = array<i64: 1, 128>}, {transform_indices = @transform_9, window_bounds = array<i64: 16, 128>}]} {
    %c0 = arith.constant 0 : index
    %c0_0 = arith.constant 0 : index
    %0 = vector.load %arg1[%c0, %c0_0] : memref<16x768xbf16, #tpu.memory_space<vmem>>, vector<16x768xbf16>
    %c0_1 = arith.constant 0 : index
    %c0_2 = arith.constant 0 : index
    %1 = vector.load %arg2[%c0_1, %c0_2] : memref<768x768xbf16, #tpu.memory_space<vmem>>, vector<768x768xbf16>
    %cst = arith.constant dense<0.000000e+00> : vector<16x768xf32>
    %2 = tpu.matmul %0, %1, %cst {dimension_numbers = #tpu.dot_dimension_numbers<[1], [0], [0], [1], [0, 0, 1, 1], [], []>} : vector<16x768xbf16>, vector<768x768xbf16>, vector<16x768xf32> -> vector<16x768xf32>
    %c0_3 = arith.constant 0 : index
    %c0_4 = arith.constant 0 : index
    %3 = vector.load %arg3[%c0_3, %c0_4] : memref<1x768xf32, #tpu.memory_space<vmem>>, vector<1x768xf32>
    %4 = vector.broadcast %3 : vector<1x768xf32> to vector<16x768xf32>
    %5 = arith.addf %2, %4 : vector<16x768xf32>
    %6 = arith.negf %5 : vector<16x768xf32>
    %7 = math.exp %6 : vector<16x768xf32>
    %cst_5 = arith.constant 1.000000e+00 : f32
    %8 = vector.broadcast %cst_5 : f32 to vector<16x768xf32>
    %9 = arith.addf %8, %7 : vector<16x768xf32>
    %10 = arith.divf %8, %9 : vector<16x768xf32>
    %11 = arith.mulf %5, %10 : vector<16x768xf32>
    %12 = arith.truncf %11 : vector<16x768xf32> to vector<16x768xbf16>
    %c0_6 = arith.constant 0 : index
    %c0_7 = arith.constant 0 : index
    %13 = vector.load %arg4[%c0_6, %c0_7] : memref<768x768xbf16, #tpu.memory_space<vmem>>, vector<768x768xbf16>
    %cst_8 = arith.constant dense<0.000000e+00> : vector<16x768xf32>
    %14 = tpu.matmul %12, %13, %cst_8 {dimension_numbers = #tpu.dot_dimension_numbers<[1], [0], [0], [1], [0, 0, 1, 1], [], []>} : vector<16x768xbf16>, vector<768x768xbf16>, vector<16x768xf32> -> vector<16x768xf32>
    %c0_9 = arith.constant 0 : index
    %c0_10 = arith.constant 0 : index
    %15 = vector.load %arg5[%c0_9, %c0_10] : memref<1x768xf32, #tpu.memory_space<vmem>>, vector<1x768xf32>
    %16 = vector.broadcast %15 : vector<1x768xf32> to vector<16x768xf32>
    %17 = arith.addf %14, %16 : vector<16x768xf32>
    %18 = arith.negf %17 : vector<16x768xf32>
    %19 = math.exp %18 : vector<16x768xf32>
    %cst_11 = arith.constant 1.000000e+00 : f32
    %20 = vector.broadcast %cst_11 : f32 to vector<16x768xf32>
    %21 = arith.addf %20, %19 : vector<16x768xf32>
    %22 = arith.divf %20, %21 : vector<16x768xf32>
    %23 = arith.mulf %17, %22 : vector<16x768xf32>
    %24 = arith.truncf %23 : vector<16x768xf32> to vector<16x768xbf16>
    %c0_12 = arith.constant 0 : index
    %c0_13 = arith.constant 0 : index
    %25 = vector.load %arg6[%c0_12, %c0_13] : memref<768x768xbf16, #tpu.memory_space<vmem>>, vector<768x768xbf16>
    %cst_14 = arith.constant dense<0.000000e+00> : vector<16x768xf32>
    %26 = tpu.matmul %24, %25, %cst_14 {dimension_numbers = #tpu.dot_dimension_numbers<[1], [0], [0], [1], [0, 0, 1, 1], [], []>} : vector<16x768xbf16>, vector<768x768xbf16>, vector<16x768xf32> -> vector<16x768xf32>
    %c0_15 = arith.constant 0 : index
    %c0_16 = arith.constant 0 : index
    %27 = vector.load %arg7[%c0_15, %c0_16] : memref<1x768xf32, #tpu.memory_space<vmem>>, vector<1x768xf32>
    %28 = vector.broadcast %27 : vector<1x768xf32> to vector<16x768xf32>
    %29 = arith.addf %26, %28 : vector<16x768xf32>
    %30 = arith.truncf %29 : vector<16x768xf32> to vector<16x768xbf16>
    %c0_17 = arith.constant 0 : index
    %c0_18 = arith.constant 0 : index
    %31 = vector.load %arg8[%c0_17, %c0_18] : memref<768x128xbf16, #tpu.memory_space<vmem>>, vector<768x128xbf16>
    %cst_19 = arith.constant dense<0.000000e+00> : vector<16x128xf32>
    %32 = tpu.matmul %30, %31, %cst_19 {dimension_numbers = #tpu.dot_dimension_numbers<[1], [0], [0], [1], [0, 0, 1, 1], [], []>} : vector<16x768xbf16>, vector<768x128xbf16>, vector<16x128xf32> -> vector<16x128xf32>
    %c0_20 = arith.constant 0 : index
    %c0_21 = arith.constant 0 : index
    %33 = vector.load %arg9[%c0_20, %c0_21] : memref<1x128xf32, #tpu.memory_space<vmem>>, vector<1x128xf32>
    %34 = vector.broadcast %33 : vector<1x128xf32> to vector<16x128xf32>
    %35 = arith.addf %32, %34 : vector<16x128xf32>
    %c0_22 = arith.constant 0 : index
    %c0_23 = arith.constant 0 : index
    %36 = vector.load %arg10[%c0_22, %c0_23] : memref<16x128xf32, #tpu.memory_space<vmem>>, vector<16x128xf32>
    tpu.vector_store %arg10[%c0_22, %c0_23], %35 {strides = array<i32>} : memref<16x128xf32, #tpu.memory_space<vmem>>, vector<16x128xf32>,
    return
  }
  func.func @transform_0(%arg0: i32) -> (i32, i32) {
    %c0_i32 = arith.constant 0 : i32
    %c0_i32_0 = arith.constant 0 : i32
    return %arg0, %c0_i32 : i32, i32
  }
  func.func @transform_1(%arg0: i32) -> (i32, i32) {
    %c0_i32 = arith.constant 0 : i32
    %c0_i32_0 = arith.constant 0 : i32
    %c0_i32_1 = arith.constant 0 : i32
    return %c0_i32, %c0_i32_0 : i32, i32
  }
  func.func @transform_2(%arg0: i32) -> (i32, i32) {
    %c0_i32 = arith.constant 0 : i32
    %c0_i32_0 = arith.constant 0 : i32
    %c0_i32_1 = arith.constant 0 : i32
    return %c0_i32, %c0_i32_0 : i32, i32
  }
  func.func @transform_3(%arg0: i32) -> (i32, i32) {
    %c0_i32 = arith.constant 0 : i32
    %c0_i32_0 = arith.constant 0 : i32
    %c0_i32_1 = arith.constant 0 : i32
    return %c0_i32, %c0_i32_0 : i32, i32
  }
  func.func @transform_4(%arg0: i32) -> (i32, i32) {
    %c0_i32 = arith.constant 0 : i32
    %c0_i32_0 = arith.constant 0 : i32
    %c0_i32_1 = arith.constant 0 : i32
    return %c0_i32, %c0_i32_0 : i32, i32
  }
  func.func @transform_5(%arg0: i32) -> (i32, i32) {
    %c0_i32 = arith.constant 0 : i32
    %c0_i32_0 = arith.constant 0 : i32
    %c0_i32_1 = arith.constant 0 : i32
    return %c0_i32, %c0_i32_0 : i32, i32
  }
  func.func @transform_6(%arg0: i32) -> (i32, i32) {
    %c0_i32 = arith.constant 0 : i32
    %c0_i32_0 = arith.constant 0 : i32
    %c0_i32_1 = arith.constant 0 : i32
    return %c0_i32, %c0_i32_0 : i32, i32
  }
  func.func @transform_7(%arg0: i32) -> (i32, i32) {
    %c0_i32 = arith.constant 0 : i32
    %c0_i32_0 = arith.constant 0 : i32
    %c0_i32_1 = arith.constant 0 : i32
    return %c0_i32, %c0_i32_0 : i32, i32
  }
  func.func @transform_8(%arg0: i32) -> (i32, i32) {
    %c0_i32 = arith.constant 0 : i32
    %c0_i32_0 = arith.constant 0 : i32
    %c0_i32_1 = arith.constant 0 : i32
    return %c0_i32, %c0_i32_0 : i32, i32
  }
  func.func @transform_9(%arg0: i32) -> (i32, i32) {
    %c0_i32 = arith.constant 0 : i32
    %c0_i32_0 = arith.constant 0 : i32
    return %arg0, %c0_i32 : i32, i32
  }
}

</mosaic_0001>

<bundles_post_ra>
// kernel: verifier_sep_forward.1
= control target key start
LH: loop header
LB: loop body
LE: loop exit
PB: predicated region body
PF: predicated region fallthrough
CT: control target
= control target key end

     0   :  { %14 = vsyncpa [#allocation3], 0  ;;  %s13841_s0 = inlined_call_operand.vmem [shape: bf16[16,768], index: 0, kind: input, shape index: {}]   ;;  %s13842_s1 = inlined_call_operand.hbm [shape: bf16[768,768], index: 1, kind: input, shape index: {}]   ;;  %s13843_s2 = inlined_call_operand.hbm [shape: f32[1,768], index: 2, kind: input, shape index: {}]   ;;  %s13844_s3 = inlined_call_operand.hbm [shape: bf16[768,768], index: 3, kind: input, shape index: {}]   ;;  %s13845_s4 = inlined_call_operand.hbm [shape: f32[1,768], index: 4, kind: input, shape index: {}]   ;;  %s13846_s5 = inlined_call_operand.hbm [shape: bf16[768,768], index: 5, kind: input, shape index: {}]   ;;  %s13847_s6 = inlined_call_operand.hbm [shape: f32[1,768], index: 6, kind: input, shape index: {}]   ;;  %s13848_s7 = inlined_call_operand.hbm [shape: bf16[768,128], index: 7, kind: input, shape index: {}]   ;;  %s13849_s8 = inlined_call_operand.hbm [shape: f32[1,128], index: 8, kind: input, shape index: {}]   ;;  %s13850_s9 = inlined_call_operand.vmem [shape: f32[16,128], index: 9, kind: output, shape index: {}]  }
   0x1   :  { %15 = vsyncpa [#allocation5], 0 }
   0x2   :  { %16 = vsyncpa [#allocation8], 0 }
   0x3   :  { %17 = vsyncpa [#allocation11], 0  ;;  %s39_s11 = sshll.u32 %s13843_s2, 4  ;;  %s40_s11 = int_to_ptr.hbm [resolvable:$true] %s39_s11 }
   0x4   :  { %18 = vsyncpa [#allocation14], 0  ;;  %s12831_s12 = smov [#allocation4]   ;;  %s63_s16 = sshll.u32 %s13845_s4, 4  ;;  %s64_s16 = int_to_ptr.hbm [resolvable:$true] %s63_s16 }
   0x5   :  { %s41_s13 = sshll.u32 %s12831_s12, 4  ;;  %s12832_s17 = smov [#allocation7]   ;;  %s42_s13 = int_to_ptr.vmem [resolvable:$true] %s41_s13 }
   0x6   :  { %44 = dma.hbm_to_vmem [thread:$0]  %s40_s11, 96, %s42_s13, [#allocation5]  }
   0x7   :  { %s65_s18 = sshll.u32 %s12832_s17, 4  ;;  %s87_s21 = sshll.u32 %s13847_s6, 4  ;;  %s66_s18 = int_to_ptr.vmem [resolvable:$true] %s65_s18  ;;  %s88_s21 = int_to_ptr.hbm [resolvable:$true] %s87_s21 }
   0x8   :  { %68 = dma.hbm_to_vmem [thread:$0]  %s64_s16, 96, %s66_s18, [#allocation8]  }
   0x9   :  { %s25_s23 = sshll.u32 %s13842_s1, 4  ;;  %s12833_s24 = smov [#allocation10]   ;;  %s26_s23 = int_to_ptr.hbm [resolvable:$true] %s25_s23 }
   0xa   :  { %s89_s25 = sshll.u32 %s12833_s24, 4  ;;  %s12834_s4 = smov [#allocation2]   ;;  %s90_s25 = int_to_ptr.vmem [resolvable:$true] %s89_s25 }
   0xb   :  { %92 = dma.hbm_to_vmem [thread:$0]  %s88_s21, 96, %s90_s25, [#allocation11]  }
   0xc   :  { %s27_s26 = sshll.u32 %s12834_s4, 4  ;;  %s12835_s27 = smov 384   ;;  %s28_s26 = int_to_ptr.vmem [resolvable:$true] %s27_s26 }
   0xd   :  { %s12836_s28 = smov 24   ;;  %s49_s30 = sshll.u32 %s13844_s3, 4  ;;  %s50_s30 = int_to_ptr.hbm [resolvable:$true] %s49_s30 }
   0xe   :  { %33 = dma.hbm_to_vmem [thread:$0]  %s26_s23, 36864, %s28_s26, [#allocation3], %s12835_s27, %s12835_s27, %s12836_s28  }
   0xf   :  { %s12837_s10 = smov [#allocation6]   ;;  %s73_s13 = sshll.u32 %s13846_s5, 4  ;;  %s74_s13 = int_to_ptr.hbm [resolvable:$true] %s73_s13 }
  0x10   :  { %s51_s11 = sshll.u32 %s12837_s10, 4  ;;  %s12838_s14 = smov [#allocation9]   ;;  %s52_s11 = int_to_ptr.vmem [resolvable:$true] %s51_s11 }
  0x11   :  { %57 = dma.hbm_to_vmem [thread:$0]  %s50_s30, 36864, %s52_s11, [#allocation5], %s12835_s27, %s12835_s27, %s12836_s28  }
  0x12   :  { %s75_s15 = sshll.u32 %s12838_s14, 4  ;;  %s97_s18 = sshll.u32 %s13848_s7, 4  ;;  %s76_s15 = int_to_ptr.vmem [resolvable:$true] %s75_s15  ;;  %s98_s18 = int_to_ptr.hbm [resolvable:$true] %s97_s18 }
  0x13   :  { %81 = dma.hbm_to_vmem [thread:$0]  %s74_s13, 36864, %s76_s15, [#allocation8], %s12835_s27, %s12835_s27, %s12836_s28  }
  0x14   :  { %s12839_s3 = smov [#allocation12]   ;;  %s111_s2 = sshll.u32 %s13849_s8, 4  ;;  %s112_s2 = int_to_ptr.hbm [resolvable:$true] %s111_s2 }
  0x15   :  { %s99_s19 = sshll.u32 %s12839_s3, 4  ;;  %s12840_s22 = smov 64   ;;  %s100_s19 = int_to_ptr.vmem [resolvable:$true] %s99_s19 }
  0x16   :  { %s12841_s5 = smov 4   ;;  %s12842_s23 = smov [#allocation13]  }
  0x17   :  { %105 = dma.hbm_to_vmem [thread:$0]  %s98_s18, 6144, %s100_s19, [#allocation11], %s12840_s22, %s12840_s22, %s12841_s5  }
  0x18   :  { %s113_s24 = sshll.u32 %s12842_s23, 4  ;;  %s114_s24 = int_to_ptr.vmem [resolvable:$true] %s113_s24 }
  0x19   :  { %116 = dma.hbm_to_vmem [thread:$0]  %s112_s2, 16, %s114_s24, [#allocation14]  }
  0x1a   :  { %12821 = dma.done.wait [#allocation3], 36864  }
  0x1b   :  { %12822 = vsyncadd [#allocation3], 4294930432 }
  0x1c   :  { %12823 = dma.done.wait [#allocation5], 36960  }
  0x1d   :  { %12824 = vsyncadd [#allocation5], 4294930336 }
  0x1e   :  { %12825 = dma.done.wait [#allocation8], 36960  }
  0x1f   :  { %12826 = vsyncadd [#allocation8], 4294930336 }
  0x20   :  { %12827 = dma.done.wait [#allocation11], 6240  }
  0x21   :  { %12828 = vsyncadd [#allocation11], 4294961056 }
  0x22   :  { %12829 = dma.done.wait [#allocation14], 16  }
  0x23   :  { %12830 = vsyncadd [#allocation14], 4294967280  ;;  %v8098_v0 = vld [vmem:[#allocation2 + $0x150] sm:$0xf]  ;;  %v11651_v1 = vld [vmem:[#allocation2 + $0x164] sm:$0xf0] }
  0x24   :  { %v8290_v2 = vld [vmem:[#allocation2 + $0x2d0] sm:$0xf]  ;;  %v8099_v3 = vor.u32 %v11651_v1, %v8098_v0  ;;  %v11699_v4 = vld [vmem:[#allocation2 + $0x2e4] sm:$0xf0]  ;;  %v8074_v11 = vld [vmem:[#allocation2 + $0x120] sm:$0xf] }
  0x25   :  { %v8482_v5 = vld [vmem:[#allocation2 + $0x450] sm:$0xf]  ;;  %v11747_v6 = vld [vmem:[#allocation2 + $0x464] sm:$0xf0]  ;;  %v8291_v7 = vor.u32 %v11699_v4, %v8290_v2  ;;  %v11645_v13 = vld [vmem:[#allocation2 + $0x134] sm:$0xf0] }
  0x26   :  { %v8483_v8 = vor.u32 %v11747_v6, %v8482_v5  ;;  %v8674_v9 = vld [vmem:[#allocation2 + $0x5d0] sm:$0xf]  ;;  %v11795_v10 = vld [vmem:[#allocation2 + $0x5e4] sm:$0xf0]  ;;  %1927 = vmatpush.bf16.msra.mxu0 %v8099_v3  ;;  %v8266_v14 = vld [vmem:[#allocation2 + $0x2a0] sm:$0xf]  ;;  %v8075_v16 = vor.u32 %v11645_v13, %v8074_v11 }
  0x27   :  { %v8675_v12 = vor.u32 %v11795_v10, %v8674_v9  ;;  %v11693_v15 = vld [vmem:[#allocation2 + $0x2b4] sm:$0xf0]  ;;  %1941 = vmatpush.bf16.msra.mxu1 %v8291_v7  ;;  %v8458_v18 = vld [vmem:[#allocation2 + $0x420] sm:$0xf]  ;;  %v8050_v23 = vld [vmem:[#allocation2 + $0xf0] sm:$0xf] }
  0x28   :  { %1955 = vmatpush.bf16.msra.mxu2 %v8483_v8  ;;  %v8267_v17 = vor.u32 %v11693_v15, %v8266_v14  ;;  %v11741_v19 = vld [vmem:[#allocation2 + $0x434] sm:$0xf0]  ;;  %v8650_v20 = vld [vmem:[#allocation2 + $0x5a0] sm:$0xf]  ;;  %v11639_v24 = vld [vmem:[#allocation2 + $0x104] sm:$0xf0] }
  0x29   :  { %1969 = vmatpush.bf16.msra.mxu3 %v8675_v12  ;;  %v8459_v21 = vor.u32 %v11741_v19, %v8458_v18  ;;  %v11789_v22 = vld [vmem:[#allocation2 + $0x5b4] sm:$0xf0]  ;;  %v8242_v26 = vld [vmem:[#allocation2 + $0x270] sm:$0xf]  ;;  %v11687_v27 = vld [vmem:[#allocation2 + $0x284] sm:$0xf0]  ;;  %v8051_v29 = vor.u32 %v11639_v24, %v8050_v23 }
  0x2a   :  { %v8651_v25 = vor.u32 %v11789_v22, %v8650_v20  ;;  %v8434_v28 = vld [vmem:[#allocation2 + $0x3f0] sm:$0xf]  ;;  %1928 = vmatpush.bf16.msra.mxu0 %v8075_v16  ;;  %v11735_v30 = vld [vmem:[#allocation2 + $0x404] sm:$0xf0]  ;;  %v8243_v33 = vor.u32 %v11687_v27, %v8242_v26  ;;  %v8026_v35 = vld [vmem:[#allocation2 + $0xc0] sm:$0xf] }
  0x2b   :  { %v8626_v31 = vld [vmem:[#allocation2 + $0x570] sm:$0xf]  ;;  %v11783_v32 = vld [vmem:[#allocation2 + $0x584] sm:$0xf0]  ;;  %1942 = vmatpush.bf16.msra.mxu1 %v8267_v17  ;;  %v8435_v34 = vor.u32 %v11735_v30, %v8434_v28  ;;  %v11633_v36 = vld [vmem:[#allocation2 + $0xd4] sm:$0xf0] }
  0x2c   :  { %1956 = vmatpush.bf16.msra.mxu2 %v8459_v21  ;;  %v8218_v37 = vld [vmem:[#allocation2 + $0x240] sm:$0xf]  ;;  %v8627_v38 = vor.u32 %v11783_v32, %v8626_v31  ;;  %v11681_v39 = vld [vmem:[#allocation2 + $0x254] sm:$0xf0]  ;;  %v8027_v44 = vor.u32 %v11633_v36, %v8026_v35  ;;  %v8002_v47 = vld [vmem:[#allocation2 + $0x90] sm:$0xf] }
  0x2d   :  { %1970 = vmatpush.bf16.msra.mxu3 %v8651_v25  ;;  %v8410_v40 = vld [vmem:[#allocation2 + $0x3c0] sm:$0xf]  ;;  %v11729_v41 = vld [vmem:[#allocation2 + $0x3d4] sm:$0xf0]  ;;  %v8219_v45 = vor.u32 %v11681_v39, %v8218_v37  ;;  %v11627_v48 = vld [vmem:[#allocation2 + $0xa4] sm:$0xf0] }
  0x2e   :  { %v8602_v42 = vld [vmem:[#allocation2 + $0x540] sm:$0xf]  ;;  %v11777_v43 = vld [vmem:[#allocation2 + $0x554] sm:$0xf0]  ;;  %1929 = vmatpush.bf16.msra.mxu0 %v8051_v29  ;;  %v8411_v46 = vor.u32 %v11729_v41, %v8410_v40  ;;  %v8194_v49 = vld [vmem:[#allocation2 + $0x210] sm:$0xf]  ;;  %v8003_v56 = vor.u32 %v11627_v48, %v8002_v47 }
  0x2f   :  { %1943 = vmatpush.bf16.msra.mxu1 %v8243_v33  ;;  %v8603_v50 = vor.u32 %v11777_v43, %v8602_v42  ;;  %v11675_v51 = vld [vmem:[#allocation2 + $0x224] sm:$0xf0]  ;;  %v8386_v52 = vld [vmem:[#allocation2 + $0x390] sm:$0xf]  ;;  %v7978_v59 = vld [vmem:[#allocation2 + $0x60] sm:$0xf] }
  0x30   :  { %1957 = vmatpush.bf16.msra.mxu2 %v8435_v34  ;;  %v11723_v53 = vld [vmem:[#allocation2 + $0x3a4] sm:$0xf0]  ;;  %v8578_v54 = vld [vmem:[#allocation2 + $0x510] sm:$0xf]  ;;  %v8195_v57 = vor.u32 %v11675_v51, %v8194_v49  ;;  %v11621_v60 = vld [vmem:[#allocation2 + $0x74] sm:$0xf0] }
  0x31   :  { %1971 = vmatpush.bf16.msra.mxu3 %v8627_v38  ;;  %v11771_v55 = vld [vmem:[#allocation2 + $0x524] sm:$0xf0]  ;;  %v8387_v58 = vor.u32 %v11723_v53, %v8386_v52  ;;  %v8170_v61 = vld [vmem:[#allocation2 + $0x1e0] sm:$0xf]  ;;  %v11669_v63 = vld [vmem:[#allocation2 + $0x1f4] sm:$0xf0]  ;;  %v7979_v4 = vor.u32 %v11621_v60, %v7978_v59 }
  0x32   :  { %1930 = vmatpush.bf16.msra.mxu0 %v8027_v44  ;;  %v8579_v62 = vor.u32 %v11771_v55, %v8578_v54  ;;  %v8362_v0 = vld [vmem:[#allocation2 + $0x360] sm:$0xf]  ;;  %v11717_v1 = vld [vmem:[#allocation2 + $0x374] sm:$0xf0]  ;;  %v8171_v5 = vor.u32 %v11669_v63, %v8170_v61  ;;  %v7954_v7 = vld [vmem:[#allocation2 + $0x30] sm:$0xf] }
  0x33   :  { %1944 = vmatpush.bf16.msra.mxu1 %v8219_v45  ;;  %v8554_v2 = vld [vmem:[#allocation2 + $0x4e0] sm:$0xf]  ;;  %v11765_v3 = vld [vmem:[#allocation2 + $0x4f4] sm:$0xf0]  ;;  %v8363_v6 = vor.u32 %v11717_v1, %v8362_v0  ;;  %v11615_v8 = vld [vmem:[#allocation2 + $0x44] sm:$0xf0] }
  0x34   :  { %1958 = vmatpush.bf16.msra.mxu2 %v8411_v46  ;;  %v8146_v9 = vld [vmem:[#allocation2 + $0x1b0] sm:$0xf]  ;;  %v8555_v10 = vor.u32 %v11765_v3, %v8554_v2  ;;  %v11663_v11 = vld [vmem:[#allocation2 + $0x1c4] sm:$0xf0]  ;;  %v7955_v16 = vor.u32 %v11615_v8, %v7954_v7  ;;  %v7930_v17 = vld [vmem:[#allocation2] sm:$0xf] }
  0x35   :  { %1972 = vmatpush.bf16.msra.mxu3 %v8603_v50  ;;  %v8338_v12 = vld [vmem:[#allocation2 + $0x330] sm:$0xf]  ;;  %v11711_v13 = vld [vmem:[#allocation2 + $0x344] sm:$0xf0]  ;;  %v11609_v18 = vld [vmem:[#allocation2 + $0x14] sm:$0xf0]  ;;  %v8147_v19 = vor.u32 %v11663_v11, %v8146_v9 }
  0x36   :  { %1931 = vmatpush.bf16.msra.mxu0 %v8003_v56  ;;  %v8530_v14 = vld [vmem:[#allocation2 + $0x4b0] sm:$0xf]  ;;  %v11759_v15 = vld [vmem:[#allocation2 + $0x4c4] sm:$0xf0]  ;;  %v8339_v20 = vor.u32 %v11711_v13, %v8338_v12  ;;  %v8122_v21 = vld [vmem:[#allocation2 + $0x180] sm:$0xf]  ;;  %v7931_v31 = vor.u32 %v11609_v18, %v7930_v17 }
  0x37   :  { %1945 = vmatpush.bf16.msra.mxu1 %v8195_v57  ;;  %v11657_v22 = vld [vmem:[#allocation2 + $0x194] sm:$0xf0]  ;;  %v8314_v23 = vld [vmem:[#allocation2 + $0x300] sm:$0xf]  ;;  %v8531_v24 = vor.u32 %v11759_v15, %v8530_v14  ;;  %v8866_v28 = vld [vmem:[#allocation2 + $0x750] sm:$0xf] }
  0x38   :  { %1959 = vmatpush.bf16.msra.mxu2 %v8387_v58  ;;  %v11705_v25 = vld [vmem:[#allocation2 + $0x314] sm:$0xf0]  ;;  %v8506_v26 = vld [vmem:[#allocation2 + $0x480] sm:$0xf]  ;;  %v11843_v29 = vld [vmem:[#allocation2 + $0x764] sm:$0xf0]  ;;  %v8123_v35 = vor.u32 %v11657_v22, %v8122_v21 }
  0x39   :  { %1973 = vmatpush.bf16.msra.mxu3 %v8579_v62  ;;  %v11753_v27 = vld [vmem:[#allocation2 + $0x494] sm:$0xf0]  ;;  %v9058_v30 = vld [vmem:[#allocation2 + $0x8d0] sm:$0xf]  ;;  %v11891_v32 = vld [vmem:[#allocation2 + $0x8e4] sm:$0xf0]  ;;  %v8315_v36 = vor.u32 %v11705_v25, %v8314_v23  ;;  %v8867_v40 = vor.u32 %v11843_v29, %v8866_v28 }
  0x3a   :  { %1932 = vmatpush.bf16.msra.mxu0 %v7979_v4  ;;  %v11648_v33 = vld [vmem:[#allocation2 + $0x154] sm:$0xf]  ;;  %v8100_v34 = vld [vmem:[#allocation2 + $0x168] sm:$0xf0]  ;;  %v8507_v39 = vor.u32 %v11753_v27, %v8506_v26  ;;  %v8842_v41 = vld [vmem:[#allocation2 + $0x720] sm:$0xf]  ;;  %v9059_v42 = vor.u32 %v11891_v32, %v9058_v30 }
  0x3b   :  { %1946 = vmatpush.bf16.msra.mxu1 %v8171_v5  ;;  %v11696_v37 = vld [vmem:[#allocation2 + $0x2d4] sm:$0xf]  ;;  %v8292_v38 = vld [vmem:[#allocation2 + $0x2e8] sm:$0xf0]  ;;  %v8103_v43 = vor.u32 %v11648_v33, %v8100_v34  ;;  %v11837_v44 = vld [vmem:[#allocation2 + $0x734] sm:$0xf0] }
  0x3c   :  { %1960 = vmatpush.bf16.msra.mxu2 %v8363_v6  ;;  %v9034_v45 = vld [vmem:[#allocation2 + $0x8a0] sm:$0xf]  ;;  %v11885_v46 = vld [vmem:[#allocation2 + $0x8b4] sm:$0xf0]  ;;  %v8295_v47 = vor.u32 %v11696_v37, %v8292_v38  ;;  %v11642_v48 = vld [vmem:[#allocation2 + $0x124] sm:$0xf]  ;;  %v8843_v54 = vor.u32 %v11837_v44, %v8842_v41 }
  0x3d   :  { %1974 = vmatpush.bf16.msra.mxu3 %v8555_v10  ;;  %v8076_v49 = vld [vmem:[#allocation2 + $0x138] sm:$0xf0]  ;;  %v11690_v50 = vld [vmem:[#allocation2 + $0x2a4] sm:$0xf]  ;;  %v7906_v52 = vld [vmem:[%s13841_s0] sm:$0xf]  ;;  %v9035_v58 = vor.u32 %v11885_v46, %v9034_v45 }
  0x3e   :  { %1933 = vmatpush.bf16.msra.mxu0 %v7955_v16  ;;  %v8268_v51 = vld [vmem:[#allocation2 + $0x2b8] sm:$0xf0]  ;;  %v11603_v53 = vld [vmem:[%s13841_s0 + $0x14] sm:$0xf0]  ;;  %v8818_v55 = vld [vmem:[#allocation2 + $0x6f0] sm:$0xf]  ;;  %v8079_v59 = vor.u32 %v11642_v48, %v8076_v49 }
  0x3f   :  { %1947 = vmatpush.bf16.msra.mxu1 %v8147_v19  ;;  %v11831_v56 = vld [vmem:[#allocation2 + $0x704] sm:$0xf0]  ;;  %v12923_v57 = vor.u32 %v11603_v53, %v7906_v52  ;;  %v9010_v60 = vld [vmem:[#allocation2 + $0x870] sm:$0xf]  ;;  %v11636_v62 = vld [vmem:[#allocation2 + $0xf4] sm:$0xf]  ;;  %v8271_v63 = vor.u32 %v11690_v50, %v8268_v51 }
  0x40   :  { %1961 = vmatpush.bf16.msra.mxu2 %v8339_v20  ;;  %v11879_v61 = vld [vmem:[#allocation2 + $0x884] sm:$0xf0]  ;;  %v8052_v0 = vld [vmem:[#allocation2 + $0x108] sm:$0xf0]  ;;  %v11600_v1 = vld [vmem:[%s13841_s0 + $0x4] sm:$0xf]  ;;  %v8819_v7 = vor.u32 %v11831_v56, %v8818_v55 }
  0x41   :  { %1975 = vmatpush.bf16.msra.mxu3 %v8531_v24  ;;  %v7908_v2 = vld [vmem:[%s13841_s0 + $0x18] sm:$0xf0]  ;;  %v11684_v3 = vld [vmem:[#allocation2 + $0x274] sm:$0xf]  ;;  %v8244_v4 = vld [vmem:[#allocation2 + $0x288] sm:$0xf0]  ;;  %v9011_v11 = vor.u32 %v11879_v61, %v9010_v60  ;;  %v8055_v12 = vor.u32 %v11636_v62, %v8052_v0 }
  0x42   :  { %1934 = vmatpush.bf16.msra.mxu0 %v7931_v31  ;;  %v8794_v5 = vld [vmem:[#allocation2 + $0x6c0] sm:$0xf]  ;;  %v12932_v6 = vor.u32 %v11600_v1, %v7908_v2  ;;  %v11825_v8 = vld [vmem:[#allocation2 + $0x6d4] sm:$0xf0]  ;;  %v11630_v13 = vld [vmem:[#allocation2 + $0xc4] sm:$0xf]  ;;  %v8247_v16 = vor.u32 %v11684_v3, %v8244_v4 }
  0x43   :  { %1948 = vmatpush.bf16.msra.mxu1 %v8123_v35  ;;  %v8986_v9 = vld [vmem:[#allocation2 + $0x840] sm:$0xf]  ;;  %v11873_v10 = vld [vmem:[#allocation2 + $0x854] sm:$0xf0]  ;;  %v8028_v14 = vld [vmem:[#allocation2 + $0xd8] sm:$0xf0]  ;;  %v8795_v24 = vor.u32 %v11825_v8, %v8794_v5 }
  0x44   :  { %1962 = vmatpush.bf16.msra.mxu2 %v8315_v36  ;;  %v7914_v15 = vld [vmem:[%s13841_s0 + $0x8] sm:$0xf]  ;;  %v11604_v17 = vld [vmem:[%s13841_s0 + $0x1c] sm:$0xf0]  ;;  %v11601_v18 = vld [vmem:[%s13841_s0 + $0xc] sm:$0xf]  ;;  %v8987_v25 = vor.u32 %v11873_v10, %v8986_v9  ;;  %v8031_v26 = vor.u32 %v11630_v13, %v8028_v14 }
  0x45   :  { %1976 = vmatpush.bf16.msra.mxu3 %v8507_v39  ;;  %1935 = vmatmul.bf16.vlgmr.msra.gmra.mxu0 %v12923_v57  ;;  %v7916_v19 = vld [vmem:[%s13841_s0 + $0x20] sm:$0xf0]  ;;  %v8220_v21 = vld [vmem:[#allocation2 + $0x258] sm:$0xf0]  ;;  %v12947_v22 = vor.u32 %v11604_v17, %v7914_v15  ;;  %v8770_v27 = vld [vmem:[#allocation2 + $0x690] sm:$0xf] }
  0x46   :  { %1983 = vmatpush.bf16.msrb.mxu0 %v8867_v40  ;;  %1949 = vmatmul.bf16.vlgmr.msra.gmra.mxu1 %v12932_v6  ;;  %v11678_v20 = vld [vmem:[#allocation2 + $0x244] sm:$0xf]  ;;  %v12949_v23 = vor.u32 %v11601_v18, %v7916_v19  ;;  %v11819_v28 = vld [vmem:[#allocation2 + $0x6a4] sm:$0xf0]  ;;  %v8962_v29 = vld [vmem:[#allocation2 + $0x810] sm:$0xf] }
  0x47   :  { %1997 = vmatpush.bf16.msrb.mxu1 %v9059_v42  ;;  %v8223_v30 = vor.u32 %v11678_v20, %v8220_v21  ;;  %v11867_v31 = vld [vmem:[#allocation2 + $0x824] sm:$0xf0]  ;;  %v11624_v32 = vld [vmem:[#allocation2 + $0x94] sm:$0xf]  ;;  %v8004_v33 = vld [vmem:[#allocation2 + $0xa8] sm:$0xf0]  ;;  %1963 = vmatmul.bf16.vlgmr.msra.gmra.mxu2 %v12947_v22  ;;  %v8771_v36 = vor.u32 %v11819_v28, %v8770_v27 }
  0x48   :  { %2011 = vmatpush.bf16.msrb.mxu2 %v8103_v43  ;;  %v11672_v34 = vld [vmem:[#allocation2 + $0x214] sm:$0xf]  ;;  %v8196_v35 = vld [vmem:[#allocation2 + $0x228] sm:$0xf0]  ;;  %1977 = vmatmul.bf16.vlgmr.msra.gmra.mxu3 %v12949_v23  ;;  %v8963_v37 = vor.u32 %v11867_v31, %v8962_v29  ;;  %v8007_v38 = vor.u32 %v11624_v32, %v8004_v33  ;;  %v8746_v39 = vld [vmem:[#allocation2 + $0x660] sm:$0xf] }
  0x49   :  { %2025 = vmatpush.bf16.msrb.mxu3 %v8295_v47  ;;  %v11813_v40 = vld [vmem:[#allocation2 + $0x674] sm:$0xf0]  ;;  %v8938_v41 = vld [vmem:[#allocation2 + $0x7e0] sm:$0xf]  ;;  %v8199_v42 = vor.u32 %v11672_v34, %v8196_v35  ;;  %v11618_v44 = vld [vmem:[#allocation2 + $0x64] sm:$0xf] }
  0x4a   :  { %1984 = vmatpush.bf16.msrb.mxu0 %v8843_v54  ;;  %v11861_v43 = vld [vmem:[#allocation2 + $0x7f4] sm:$0xf0]  ;;  %v7980_v45 = vld [vmem:[#allocation2 + $0x78] sm:$0xf0]  ;;  %v11666_v46 = vld [vmem:[#allocation2 + $0x1e4] sm:$0xf]  ;;  %v8747_v48 = vor.u32 %v11813_v40, %v8746_v39 }
  0x4b   :  { %1998 = vmatpush.bf16.msrb.mxu1 %v9035_v58  ;;  %v8172_v47 = vld [vmem:[#allocation2 + $0x1f8] sm:$0xf0]  ;;  %v8939_v49 = vor.u32 %v11861_v43, %v8938_v41  ;;  %v7983_v50 = vor.u32 %v11618_v44, %v7980_v45  ;;  %v8722_v51 = vld [vmem:[#allocation2 + $0x630] sm:$0xf]  ;;  %v11807_v52 = vld [vmem:[#allocation2 + $0x644] sm:$0xf0] }
  0x4c   :  { %2012 = vmatpush.bf16.msrb.mxu2 %v8079_v59  ;;  %v8914_v53 = vld [vmem:[#allocation2 + $0x7b0] sm:$0xf]  ;;  %v8175_v54 = vor.u32 %v11666_v46, %v8172_v47  ;;  %v11855_v55 = vld [vmem:[#allocation2 + $0x7c4] sm:$0xf0]  ;;  %v11612_v56 = vld [vmem:[#allocation2 + $0x34] sm:$0xf]  ;;  %v8723_v61 = vor.u32 %v11807_v52, %v8722_v51 }
  0x4d   :  { %2026 = vmatpush.bf16.msrb.mxu3 %v8271_v63  ;;  %v7956_v58 = vld [vmem:[#allocation2 + $0x48] sm:$0xf0]  ;;  %v11660_v59 = vld [vmem:[#allocation2 + $0x1b4] sm:$0xf]  ;;  %v8698_v62 = vld [vmem:[#allocation2 + $0x600] sm:$0xf]  ;;  %v8915_v1 = vor.u32 %v11855_v55, %v8914_v53 }
  0x4e   :  { %1985 = vmatpush.bf16.msrb.mxu0 %v8819_v7  ;;  %v8148_v60 = vld [vmem:[#allocation2 + $0x1c8] sm:$0xf0]  ;;  %v11801_v63 = vld [vmem:[#allocation2 + $0x614] sm:$0xf0]  ;;  %v8890_v0 = vld [vmem:[#allocation2 + $0x780] sm:$0xf]  ;;  %v7959_v2 = vor.u32 %v11612_v56, %v7956_v58 }
  0x4f   :  { %1999 = vmatpush.bf16.msrb.mxu1 %v9011_v11  ;;  %v11849_v3 = vld [vmem:[#allocation2 + $0x794] sm:$0xf0]  ;;  %v11606_v4 = vld [vmem:[#allocation2 + $0x4] sm:$0xf]  ;;  %v7932_v5 = vld [vmem:[#allocation2 + $0x18] sm:$0xf0]  ;;  %v8151_v7 = vor.u32 %v11660_v59, %v8148_v60  ;;  %v8699_v14 = vor.u32 %v11801_v63, %v8698_v62 }
  0x50   :  { %2013 = vmatpush.bf16.msrb.mxu2 %v8055_v12  ;;  %v11654_v8 = vld [vmem:[#allocation2 + $0x184] sm:$0xf]  ;;  %v8124_v9 = vld [vmem:[#allocation2 + $0x198] sm:$0xf0]  ;;  %v11744_v10 = vld [vmem:[#allocation2 + $0x454] sm:$0xf]  ;;  %v8891_v18 = vor.u32 %v11849_v3, %v8890_v0  ;;  %v7935_v19 = vor.u32 %v11606_v4, %v7932_v5 }
  0x51   :  { %2027 = vmatpush.bf16.msrb.mxu3 %v8247_v16  ;;  %v8484_v11 = vld [vmem:[#allocation2 + $0x468] sm:$0xf0]  ;;  %v11792_v12 = vld [vmem:[#allocation2 + $0x5d4] sm:$0xf]  ;;  %v7922_v21 = vld [vmem:[%s13841_s0 + $0x10] sm:$0xf] }
  0x52   :  { %1986 = vmatpush.bf16.msrb.mxu0 %v8795_v24  ;;  %v8676_v13 = vld [vmem:[#allocation2 + $0x5e8] sm:$0xf0]  ;;  %v11840_v15 = vld [vmem:[#allocation2 + $0x754] sm:$0xf]  ;;  %v11605_v24 = vld [vmem:[%s13841_s0 + $0x24] sm:$0xf0] }
  0x53   :  { %2000 = vmatpush.bf16.msrb.mxu1 %v8987_v25  ;;  %v8868_v16 = vld [vmem:[#allocation2 + $0x768] sm:$0xf0]  ;;  %v11888_v17 = vld [vmem:[#allocation2 + $0x8d4] sm:$0xf]  ;;  %v8127_v25 = vor.u32 %v11654_v8, %v8124_v9  ;;  %v8679_v29 = vor.u32 %v11792_v12, %v8676_v13  ;;  %v11738_v31 = vld [vmem:[#allocation2 + $0x424] sm:$0xf]  ;;  %v12965_v35 = vor.u32 %v11605_v24, %v7922_v21 }
  0x54   :  { %2014 = vmatpush.bf16.msrb.mxu2 %v8031_v26  ;;  %v9060_v20 = vld [vmem:[#allocation2 + $0x8e8] sm:$0xf0]  ;;  %v8487_v26 = vor.u32 %v11744_v10, %v8484_v11  ;;  %v11602_v27 = vld [vmem:[%s13841_s0 + $0x14] sm:$0xf]  ;;  %v8460_v32 = vld [vmem:[#allocation2 + $0x438] sm:$0xf0] }
  0x55   :  { %2028 = vmatpush.bf16.msrb.mxu3 %v8223_v30  ;;  %v7924_v28 = vld [vmem:[%s13841_s0 + $0x28] sm:$0xf0]  ;;  %v8871_v30 = vor.u32 %v11840_v15, %v8868_v16  ;;  %v11786_v33 = vld [vmem:[#allocation2 + $0x5a4] sm:$0xf]  ;;  %v9063_v34 = vor.u32 %v11888_v17, %v9060_v20  ;;  %v9036_v41 = vld [vmem:[#allocation2 + $0x8b8] sm:$0xf0] }
  0x56   :  { %1987 = vmatpush.bf16.msrb.mxu0 %v8771_v36  ;;  %v8652_v36 = vld [vmem:[#allocation2 + $0x5b8] sm:$0xf0]  ;;  %v12967_v39 = vor.u32 %v11602_v27, %v7924_v28  ;;  %v11882_v40 = vld [vmem:[#allocation2 + $0x8a4] sm:$0xf]  ;;  %v11732_v45 = vld [vmem:[#allocation2 + $0x3f4] sm:$0xf] }
  0x57   :  { %2001 = vmatpush.bf16.msrb.mxu1 %v8963_v37  ;;  %v11834_v37 = vld [vmem:[#allocation2 + $0x724] sm:$0xf]  ;;  %v8655_v43 = vor.u32 %v11786_v33, %v8652_v36  ;;  %v8436_v46 = vld [vmem:[#allocation2 + $0x408] sm:$0xf0]  ;;  %v11780_v47 = vld [vmem:[#allocation2 + $0x574] sm:$0xf] }
  0x58   :  { %2015 = vmatpush.bf16.msrb.mxu2 %v8007_v38  ;;  %v8844_v38 = vld [vmem:[#allocation2 + $0x738] sm:$0xf0]  ;;  %v8820_v51 = vld [vmem:[#allocation2 + $0x708] sm:$0xf0]  ;;  %v11876_v52 = vld [vmem:[#allocation2 + $0x874] sm:$0xf] }
  0x59   :  { %2029 = vmatpush.bf16.msrb.mxu3 %v8199_v42  ;;  %v8463_v42 = vor.u32 %v11738_v31, %v8460_v32  ;;  %v8847_v44 = vor.u32 %v11834_v37, %v8844_v38  ;;  %v9012_v53 = vld [vmem:[#allocation2 + $0x888] sm:$0xf0]  ;;  %v11726_v58 = vld [vmem:[#allocation2 + $0x3c4] sm:$0xf]  ;;  %v8412_v59 = vld [vmem:[#allocation2 + $0x3d8] sm:$0xf0] }
  0x5a   :  { %1988 = vmatpush.bf16.msrb.mxu0 %v8747_v48  ;;  %v9039_v48 = vor.u32 %v11882_v40, %v9036_v41  ;;  %v11774_v60 = vld [vmem:[#allocation2 + $0x544] sm:$0xf]  ;;  %v8604_v62 = vld [vmem:[#allocation2 + $0x558] sm:$0xf0]  ;;  %v8415_v3 = vor.u32 %v11726_v58, %v8412_v59  ;;  %v8388_v8 = vld [vmem:[#allocation2 + $0x3a8] sm:$0xf0] }
  0x5b   :  { %2002 = vmatpush.bf16.msrb.mxu1 %v8939_v49  ;;  %v8628_v49 = vld [vmem:[#allocation2 + $0x588] sm:$0xf0]  ;;  %v11822_v63 = vld [vmem:[#allocation2 + $0x6c4] sm:$0xf]  ;;  %v8796_v0 = vld [vmem:[#allocation2 + $0x6d8] sm:$0xf0]  ;;  %v8607_v4 = vor.u32 %v11774_v60, %v8604_v62 }
  0x5c   :  { %2016 = vmatpush.bf16.msrb.mxu2 %v7983_v50  ;;  %v11828_v50 = vld [vmem:[#allocation2 + $0x6f4] sm:$0xf]  ;;  %v8631_v55 = vor.u32 %v11780_v47, %v8628_v49  ;;  %v8799_v5 = vor.u32 %v11822_v63, %v8796_v0  ;;  %v8580_v11 = vld [vmem:[#allocation2 + $0x528] sm:$0xf0]  ;;  %v8364_v20 = vld [vmem:[#allocation2 + $0x378] sm:$0xf0] }
  0x5d   :  { %2030 = vmatpush.bf16.msrb.mxu3 %v8175_v54  ;;  %v8439_v54 = vor.u32 %v11732_v45, %v8436_v46  ;;  %v8823_v56 = vor.u32 %v11828_v50, %v8820_v51  ;;  %v11768_v9 = vld [vmem:[#allocation2 + $0x514] sm:$0xf]  ;;  %v8772_v13 = vld [vmem:[#allocation2 + $0x6a8] sm:$0xf0]  ;;  %v11762_v21 = vld [vmem:[#allocation2 + $0x4e4] sm:$0xf] }
  0x5e   :  { %1989 = vmatpush.bf16.msrb.mxu0 %v8723_v61  ;;  %v9015_v61 = vor.u32 %v11876_v52, %v9012_v53  ;;  %v11816_v12 = vld [vmem:[#allocation2 + $0x694] sm:$0xf]  ;;  %v8964_v15 = vld [vmem:[#allocation2 + $0x828] sm:$0xf0]  ;;  %v8583_v17 = vor.u32 %v11768_v9, %v8580_v11  ;;  %v8748_v27 = vld [vmem:[#allocation2 + $0x678] sm:$0xf0] }
  0x5f   :  { %2003 = vmatpush.bf16.msrb.mxu1 %v8915_v1  ;;  %v11870_v1 = vld [vmem:[#allocation2 + $0x844] sm:$0xf]  ;;  %v11708_v33 = vld [vmem:[#allocation2 + $0x334] sm:$0xf]  ;;  %v8532_v38 = vld [vmem:[#allocation2 + $0x4c8] sm:$0xf0] }
  0x60   :  { %2017 = vmatpush.bf16.msrb.mxu2 %v7959_v2  ;;  %v8988_v2 = vld [vmem:[#allocation2 + $0x858] sm:$0xf0]  ;;  %v11858_v28 = vld [vmem:[#allocation2 + $0x7e4] sm:$0xf]  ;;  %v11756_v36 = vld [vmem:[#allocation2 + $0x4b4] sm:$0xf] }
  0x61   :  { %2031 = vmatpush.bf16.msrb.mxu3 %v8151_v7  ;;  %v11720_v7 = vld [vmem:[#allocation2 + $0x394] sm:$0xf]  ;;  %v8991_v10 = vor.u32 %v11870_v1, %v8988_v2  ;;  %v8724_v41 = vld [vmem:[#allocation2 + $0x648] sm:$0xf0]  ;;  %v11702_v45 = vld [vmem:[#allocation2 + $0x304] sm:$0xf] }
  0x62   :  { %1990 = vmatpush.bf16.msrb.mxu0 %v8699_v14  ;;  %v11864_v14 = vld [vmem:[#allocation2 + $0x814] sm:$0xf]  ;;  %v8391_v16 = vor.u32 %v11720_v7, %v8388_v8  ;;  %v8316_v46 = vld [vmem:[#allocation2 + $0x318] sm:$0xf0]  ;;  %v11750_v47 = vld [vmem:[#allocation2 + $0x484] sm:$0xf] }
  0x63   :  { %2004 = vmatpush.bf16.msrb.mxu1 %v8891_v18  ;;  %v8775_v18 = vor.u32 %v11816_v12, %v8772_v13  ;;  %v8967_v24 = vor.u32 %v11864_v14, %v8964_v15  ;;  %v11804_v40 = vld [vmem:[#allocation2 + $0x634] sm:$0xf]  ;;  %v8508_v50 = vld [vmem:[#allocation2 + $0x498] sm:$0xf0]  ;;  %v11798_v51 = vld [vmem:[#allocation2 + $0x604] sm:$0xf]  ;;  %v8319_v60 = vor.u32 %v11702_v45, %v8316_v46 }
  0x64   :  { %2018 = vmatpush.bf16.msrb.mxu2 %v7935_v19  ;;  %v11714_v19 = vld [vmem:[#allocation2 + $0x364] sm:$0xf]  ;;  %v8727_v49 = vor.u32 %v11804_v40, %v8724_v41  ;;  %v8700_v52 = vld [vmem:[#allocation2 + $0x618] sm:$0xf0]  ;;  %v11652_v58 = vld [vmem:[#allocation2 + $0x16c] sm:$0xf0]  ;;  %v8511_v0 = vor.u32 %v11750_v47, %v8508_v50 }
  0x65   :  { %2032 = vmatpush.bf16.msrb.mxu3 %v8127_v25  ;;  %1991 = vmatmul.bf16.vlgmr.msrb.gmra.mxu0 %v12965_v35  ;;  %v8556_v25 = vld [vmem:[#allocation2 + $0x4f8] sm:$0xf0]  ;;  %v8298_v59 = vld [vmem:[#allocation2 + $0x2d8] sm:$0xf]  ;;  %v11748_v63 = vld [vmem:[#allocation2 + $0x46c] sm:$0xf0]  ;;  %v8703_v1 = vor.u32 %v11798_v51, %v8700_v52 }
  0x66   :  { %2039 = vmatpush.bf16.msra.mxu0 %v8487_v26  ;;  %2005 = vmatmul.bf16.vlgmr.msrb.gmra.mxu1 %v12967_v39  ;;  %v11810_v26 = vld [vmem:[#allocation2 + $0x664] sm:$0xf]  ;;  %v8559_v31 = vor.u32 %v11762_v21, %v8556_v25  ;;  %v8490_v62 = vld [vmem:[#allocation2 + $0x458] sm:$0xf]  ;;  %v8082_v9 = vld [vmem:[#allocation2 + $0x128] sm:$0xf] }
  0x67   :  { %2053 = vmatpush.bf16.msra.mxu1 %v8679_v29  ;;  %2019 = vmatmul.bf16.vlgmr.msrb.gmra.mxu2 %v12923_v57  ;;  %v8940_v29 = vld [vmem:[#allocation2 + $0x7f8] sm:$0xf0]  ;;  %v8751_v32 = vor.u32 %v11810_v26, %v8748_v27  ;;  %v8682_v2 = vld [vmem:[#allocation2 + $0x5d8] sm:$0xf]  ;;  %v8491_v8 = vor.u32 %v11748_v63, %v8490_v62  ;;  %v8274_v11 = vld [vmem:[#allocation2 + $0x2a8] sm:$0xf] }
  0x68   :  { %2067 = vmatpush.bf16.msra.mxu2 %v8871_v30  ;;  %2033 = vmatmul.bf16.vlgmr.msrb.gmra.mxu3 %v12932_v6  ;;  %v8367_v30 = vor.u32 %v11714_v19, %v8364_v20  ;;  %v8943_v37 = vor.u32 %v11858_v28, %v8940_v29  ;;  %v11694_v13 = vld [vmem:[#allocation2 + $0x2bc] sm:$0xf0]  ;;  %v8466_v14 = vld [vmem:[#allocation2 + $0x428] sm:$0xf]  ;;  %v8058_v21 = vld [vmem:[#allocation2 + $0xf8] sm:$0xf] }
  0x69   :  { %2081 = vmatpush.bf16.msra.mxu3 %v9063_v34  ;;  %v8340_v34 = vld [vmem:[#allocation2 + $0x348] sm:$0xf0]  ;;  %v11742_v15 = vld [vmem:[#allocation2 + $0x43c] sm:$0xf0]  ;;  %v8275_v19 = vor.u32 %v11694_v13, %v8274_v11  ;;  %v8250_v25 = vld [vmem:[#allocation2 + $0x278] sm:$0xf] }
  0x6a   :  { %2040 = vmatpush.bf16.msra.mxu0 %v8463_v42  ;;  %v11852_v42 = vld [vmem:[#allocation2 + $0x7b4] sm:$0xf]  ;;  %v8467_v20 = vor.u32 %v11742_v15, %v8466_v14  ;;  %v11688_v27 = vld [vmem:[#allocation2 + $0x28c] sm:$0xf0]  ;;  %v8442_v28 = vld [vmem:[#allocation2 + $0x3f8] sm:$0xf] }
  0x6b   :  { %2054 = vmatpush.bf16.msra.mxu1 %v8655_v43  ;;  %v8916_v43 = vld [vmem:[#allocation2 + $0x7c8] sm:$0xf0]  ;;  %v11736_v29 = vld [vmem:[#allocation2 + $0x40c] sm:$0xf0]  ;;  %v11682_v41 = vld [vmem:[#allocation2 + $0x25c] sm:$0xf0] }
  0x6c   :  { %2068 = vmatpush.bf16.msra.mxu2 %v8847_v44  ;;  %v8343_v44 = vor.u32 %v11708_v33, %v8340_v34  ;;  %v8919_v53 = vor.u32 %v11852_v42, %v8916_v43  ;;  %v8251_v33 = vor.u32 %v11688_v27, %v8250_v25  ;;  %v8443_v34 = vor.u32 %v11736_v29, %v8442_v28  ;;  %v8418_v42 = vld [vmem:[#allocation2 + $0x3c8] sm:$0xf]  ;;  %v11730_v43 = vld [vmem:[#allocation2 + $0x3dc] sm:$0xf0]  ;;  %v11628_v50 = vld [vmem:[#allocation2 + $0xac] sm:$0xf0] }
  0x6d   :  { %2082 = vmatpush.bf16.msra.mxu3 %v9039_v48  ;;  %v8535_v48 = vor.u32 %v11756_v36, %v8532_v38  ;;  %v8034_v36 = vld [vmem:[#allocation2 + $0xc8] sm:$0xf]  ;;  %v11778_v45 = vld [vmem:[#allocation2 + $0x55c] sm:$0xf0]  ;;  %v8202_v51 = vld [vmem:[#allocation2 + $0x218] sm:$0xf] }
  0x6e   :  { %2041 = vmatpush.bf16.msra.mxu0 %v8439_v54  ;;  %v11846_v54 = vld [vmem:[#allocation2 + $0x784] sm:$0xf]  ;;  %v8226_v38 = vld [vmem:[#allocation2 + $0x248] sm:$0xf]  ;;  %v11622_v63 = vld [vmem:[#allocation2 + $0x7c] sm:$0xf0] }
  0x6f   :  { %2055 = vmatpush.bf16.msra.mxu1 %v8631_v55  ;;  %v8892_v55 = vld [vmem:[#allocation2 + $0x798] sm:$0xf0]  ;;  %v8227_v47 = vor.u32 %v11682_v41, %v8226_v38  ;;  %v7986_v62 = vld [vmem:[#allocation2 + $0x68] sm:$0xf]  ;;  %v7962_v11 = vld [vmem:[#allocation2 + $0x38] sm:$0xf] }
  0x70   :  { %2069 = vmatpush.bf16.msra.mxu2 %v8823_v56  ;;  %v8106_v56 = vld [vmem:[#allocation2 + $0x158] sm:$0xf]  ;;  %v11664_v15 = vld [vmem:[#allocation2 + $0x1cc] sm:$0xf0]  ;;  %v8130_v27 = vld [vmem:[#allocation2 + $0x188] sm:$0xf] }
  0x71   :  { %2083 = vmatpush.bf16.msra.mxu3 %v9015_v61  ;;  %v11700_v61 = vld [vmem:[#allocation2 + $0x2ec] sm:$0xf0]  ;;  %v8154_v13 = vld [vmem:[#allocation2 + $0x1b8] sm:$0xf]  ;;  %v11658_v28 = vld [vmem:[#allocation2 + $0x19c] sm:$0xf0] }
  0x72   :  { %2042 = vmatpush.bf16.msra.mxu0 %v8415_v3  ;;  %v11796_v3 = vld [vmem:[#allocation2 + $0x5ec] sm:$0xf0]  ;;  %v8299_v7 = vor.u32 %v11700_v61, %v8298_v59  ;;  %v8155_v25 = vor.u32 %v11664_v15, %v8154_v13  ;;  %v8322_v29 = vld [vmem:[#allocation2 + $0x308] sm:$0xf]  ;;  %v11649_v41 = vld [vmem:[#allocation2 + $0x15c] sm:$0xf] }
  0x73   :  { %2056 = vmatpush.bf16.msra.mxu1 %v8607_v4  ;;  %v8895_v4 = vor.u32 %v11846_v54, %v8892_v55  ;;  %v8683_v12 = vor.u32 %v11796_v3, %v8682_v2  ;;  %v8394_v54 = vld [vmem:[#allocation2 + $0x398] sm:$0xf]  ;;  %v11724_v55 = vld [vmem:[#allocation2 + $0x3ac] sm:$0xf0]  ;;  %v11670_v2 = vld [vmem:[#allocation2 + $0x1fc] sm:$0xf0] }
  0x74   :  { %2070 = vmatpush.bf16.msra.mxu2 %v8799_v5  ;;  %v8107_v5 = vor.u32 %v11652_v58, %v8106_v56  ;;  %v8586_v56 = vld [vmem:[#allocation2 + $0x518] sm:$0xf]  ;;  %v11772_v58 = vld [vmem:[#allocation2 + $0x52c] sm:$0xf0]  ;;  %v8395_v61 = vor.u32 %v11724_v55, %v8394_v54  ;;  %v8370_v3 = vld [vmem:[#allocation2 + $0x368] sm:$0xf] }
  0x75   :  { %2084 = vmatpush.bf16.msra.mxu3 %v8991_v10  ;;  %v11646_v10 = vld [vmem:[#allocation2 + $0x13c] sm:$0xf0]  ;;  %v8802_v13 = vld [vmem:[#allocation2 + $0x6c8] sm:$0xf] }
  0x76   :  { %2043 = vmatpush.bf16.msra.mxu0 %v8391_v16  ;;  %v8658_v16 = vld [vmem:[#allocation2 + $0x5a8] sm:$0xf]  ;;  %v11886_v55 = vld [vmem:[#allocation2 + $0x8bc] sm:$0xf0] }
  0x77   :  { %2057 = vmatpush.bf16.msra.mxu1 %v8583_v17  ;;  %v11790_v17 = vld [vmem:[#allocation2 + $0x5bc] sm:$0xf0]  ;;  %v8994_v15 = vld [vmem:[#allocation2 + $0x848] sm:$0xf] }
  0x78   :  { %2071 = vmatpush.bf16.msra.mxu2 %v8775_v18  ;;  %v8083_v18 = vor.u32 %v11646_v10, %v8082_v9  ;;  %v8659_v26 = vor.u32 %v11790_v17, %v8658_v16  ;;  %v8346_v16 = vld [vmem:[#allocation2 + $0x338] sm:$0xf]  ;;  %v11712_v17 = vld [vmem:[#allocation2 + $0x34c] sm:$0xf0] }
  0x79   :  { %2085 = vmatpush.bf16.msra.mxu3 %v8967_v24  ;;  %v11640_v24 = vld [vmem:[#allocation2 + $0x10c] sm:$0xf0] }
  0x7a   :  { %2044 = vmatpush.bf16.msra.mxu0 %v8367_v30  ;;  %v8634_v30 = vld [vmem:[#allocation2 + $0x578] sm:$0xf] }
  0x7b   :  { %2058 = vmatpush.bf16.msra.mxu1 %v8559_v31  ;;  %v11784_v31 = vld [vmem:[#allocation2 + $0x58c] sm:$0xf0] }
  0x7c   :  { %2072 = vmatpush.bf16.msra.mxu2 %v8751_v32  ;;  %v8059_v32 = vor.u32 %v11640_v24, %v8058_v21  ;;  %v8635_v40 = vor.u32 %v11784_v31, %v8634_v30  ;;  %v7938_v21 = vld [vmem:[#allocation2 + $0x8] sm:$0xf]  ;;  %v11610_v24 = vld [vmem:[#allocation2 + $0x1c] sm:$0xf0] }
  0x7d   :  { %2086 = vmatpush.bf16.msra.mxu3 %v8943_v37  ;;  %v11634_v37 = vld [vmem:[#allocation2 + $0xdc] sm:$0xf0]  ;;  %v7939_v38 = vor.u32 %v11610_v24, %v7938_v21  ;;  %v8228_v21 = vld [vmem:[#allocation2 + $0x260] sm:$0xf0] }
  0x7e   :  { %2045 = vmatpush.bf16.msra.mxu0 %v8343_v44  ;;  %v8610_v44 = vld [vmem:[#allocation2 + $0x548] sm:$0xf]  ;;  %v8035_v46 = vor.u32 %v11634_v37, %v8034_v36  ;;  %v11706_v31 = vld [vmem:[#allocation2 + $0x31c] sm:$0xf0]  ;;  %v11844_v36 = vld [vmem:[#allocation2 + $0x76c] sm:$0xf0] }
  0x7f   :  { %2059 = vmatpush.bf16.msra.mxu1 %v8535_v48  ;;  %v8419_v48 = vor.u32 %v11730_v43, %v8418_v42  ;;  %v8611_v52 = vor.u32 %v11778_v45, %v8610_v44  ;;  %v9066_v37 = vld [vmem:[#allocation2 + $0x8d8] sm:$0xf]  ;;  %v8108_v42 = vld [vmem:[#allocation2 + $0x170] sm:$0xf0]  ;;  %v8131_v43 = vor.u32 %v11658_v28, %v8130_v27  ;;  %v8323_v44 = vor.u32 %v11706_v31, %v8322_v29  ;;  %v11697_v45 = vld [vmem:[#allocation2 + $0x2dc] sm:$0xf] }
  0x80   :  { %2073 = vmatpush.bf16.msra.mxu2 %v8727_v49  ;;  %v8010_v49 = vld [vmem:[#allocation2 + $0x98] sm:$0xf]  ;;  %v11820_v28 = vld [vmem:[#allocation2 + $0x6ac] sm:$0xf0] }
  0x81   :  { %2087 = vmatpush.bf16.msra.mxu3 %v8919_v53  ;;  %v11676_v53 = vld [vmem:[#allocation2 + $0x22c] sm:$0xf0]  ;;  %v8011_v59 = vor.u32 %v11628_v50, %v8010_v49  ;;  %v8111_v50 = vor.u32 %v11649_v41, %v8108_v42  ;;  %v8778_v27 = vld [vmem:[#allocation2 + $0x698] sm:$0xf]  ;;  %v8754_v41 = vld [vmem:[#allocation2 + $0x668] sm:$0xf] }
  0x82   :  { %2046 = vmatpush.bf16.msra.mxu0 %v8319_v60  ;;  %v8203_v60 = vor.u32 %v11676_v53, %v8202_v51  ;;  %v8850_v51 = vld [vmem:[#allocation2 + $0x728] sm:$0xf]  ;;  %v8970_v29 = vld [vmem:[#allocation2 + $0x818] sm:$0xf]  ;;  %v11868_v31 = vld [vmem:[#allocation2 + $0x82c] sm:$0xf0] }
  0x83   :  { %2060 = vmatpush.bf16.msra.mxu1 %v8511_v0  ;;  %v8178_v0 = vld [vmem:[#allocation2 + $0x1e8] sm:$0xf]  ;;  %v11814_v42 = vld [vmem:[#allocation2 + $0x67c] sm:$0xf0] }
  0x84   :  { %2074 = vmatpush.bf16.msra.mxu2 %v8703_v1  ;;  %v8587_v1 = vor.u32 %v11772_v58, %v8586_v56  ;;  %v8179_v9 = vor.u32 %v11670_v2, %v8178_v0  ;;  %v9042_v53 = vld [vmem:[#allocation2 + $0x8a8] sm:$0xf]  ;;  %v11643_v56 = vld [vmem:[#allocation2 + $0x12c] sm:$0xf]  ;;  %v8084_v58 = vld [vmem:[#allocation2 + $0x140] sm:$0xf0] }
  0x85   :  { %2088 = vmatpush.bf16.msra.mxu3 %v8895_v4  ;;  %2047 = vmatmul.bf16.vlgmr.msra.gmra.mxu0 %v12947_v22  ;;  %v11718_v4 = vld [vmem:[#allocation2 + $0x37c] sm:$0xf0]  ;;  %v8826_v0 = vld [vmem:[#allocation2 + $0x6f8] sm:$0xf] }
  0x86   :  { %2095 = vmatpush.bf16.msrb.mxu0 %v8107_v5  ;;  %2061 = vmatmul.bf16.vlgmr.msra.gmra.mxu1 %v12949_v23  ;;  %v8562_v5 = vld [vmem:[#allocation2 + $0x4e8] sm:$0xf]  ;;  %v8371_v10 = vor.u32 %v11718_v4, %v8370_v3  ;;  %v9018_v2 = vld [vmem:[#allocation2 + $0x878] sm:$0xf]  ;;  %v11880_v4 = vld [vmem:[#allocation2 + $0x88c] sm:$0xf0] }
  0x87   :  { %2109 = vmatpush.bf16.msrb.mxu1 %v8299_v7  ;;  %2075 = vmatmul.bf16.vlgmr.msra.gmra.mxu2 %v12965_v35  ;;  %v11766_v7 = vld [vmem:[#allocation2 + $0x4fc] sm:$0xf0] }
  0x88   :  { %2123 = vmatpush.bf16.msrb.mxu2 %v8491_v8  ;;  %2089 = vmatmul.bf16.vlgmr.msra.gmra.mxu3 %v12967_v39  ;;  %v7987_v8 = vor.u32 %v11622_v63, %v7986_v62  ;;  %v8563_v14 = vor.u32 %v11766_v7, %v8562_v5  ;;  %v9043_v62 = vor.u32 %v11886_v55, %v9042_v53  ;;  %v11637_v5 = vld [vmem:[#allocation2 + $0xfc] sm:$0xf]  ;;  %v8060_v7 = vld [vmem:[#allocation2 + $0x110] sm:$0xf0]  ;;  %v8730_v53 = vld [vmem:[#allocation2 + $0x638] sm:$0xf] }
  0x89   :  { %2137 = vmatpush.bf16.msrb.mxu3 %v8683_v12  ;;  %v11616_v12 = vld [vmem:[#allocation2 + $0x4c] sm:$0xf0]  ;;  %v8087_v63 = vor.u32 %v11643_v56, %v8084_v58  ;;  %v8922_v55 = vld [vmem:[#allocation2 + $0x7b8] sm:$0xf] }
  0x8a   :  { %2096 = vmatpush.bf16.msrb.mxu0 %v8083_v18  ;;  %v8538_v18 = vld [vmem:[#allocation2 + $0x4b8] sm:$0xf]  ;;  %v11856_v58 = vld [vmem:[#allocation2 + $0x7cc] sm:$0xf0] }
  0x8b   :  { %2110 = vmatpush.bf16.msrb.mxu1 %v8275_v19  ;;  %v11760_v19 = vld [vmem:[#allocation2 + $0x4cc] sm:$0xf0] }
  0x8c   :  { %2124 = vmatpush.bf16.msrb.mxu2 %v8467_v20  ;;  %v7963_v20 = vor.u32 %v11616_v12, %v7962_v11  ;;  %v8539_v30 = vor.u32 %v11760_v19, %v8538_v18  ;;  %v9019_v11 = vor.u32 %v11880_v4, %v9018_v2  ;;  %v8063_v12 = vor.u32 %v11637_v5, %v8060_v7  ;;  %v11631_v18 = vld [vmem:[#allocation2 + $0xcc] sm:$0xf]  ;;  %v8036_v19 = vld [vmem:[#allocation2 + $0xe0] sm:$0xf0]  ;;  %v8898_v4 = vld [vmem:[#allocation2 + $0x788] sm:$0xf] }
  0x8d   :  { %2138 = vmatpush.bf16.msrb.mxu3 %v8659_v26  ;;  %v8347_v26 = vor.u32 %v11712_v17, %v8346_v16  ;;  %v11874_v17 = vld [vmem:[#allocation2 + $0x85c] sm:$0xf0]  ;;  %v8923_v2 = vor.u32 %v11856_v58, %v8922_v55  ;;  %v11607_v7 = vld [vmem:[#allocation2 + $0xc] sm:$0xf] }
  0x8e   :  { %2097 = vmatpush.bf16.msrb.mxu0 %v8059_v32  ;;  %v8514_v32 = vld [vmem:[#allocation2 + $0x488] sm:$0xf]  ;;  %v11850_v5 = vld [vmem:[#allocation2 + $0x79c] sm:$0xf0]  ;;  %v11727_v55 = vld [vmem:[#allocation2 + $0x3cc] sm:$0xf] }
  0x8f   :  { %2111 = vmatpush.bf16.msrb.mxu1 %v8251_v33  ;;  %v11754_v33 = vld [vmem:[#allocation2 + $0x49c] sm:$0xf0]  ;;  %v11775_v58 = vld [vmem:[#allocation2 + $0x54c] sm:$0xf] }
  0x90   :  { %2125 = vmatpush.bf16.msrb.mxu2 %v8443_v34  ;;  %v8874_v34 = vld [vmem:[#allocation2 + $0x758] sm:$0xf] }
  0x91   :  { %2139 = vmatpush.bf16.msrb.mxu3 %v8635_v40  ;;  %v11892_v40 = vld [vmem:[#allocation2 + $0x8ec] sm:$0xf0] }
  0x92   :  { %2098 = vmatpush.bf16.msrb.mxu0 %v8035_v46  ;;  %v8300_v46 = vld [vmem:[#allocation2 + $0x2f0] sm:$0xf0]  ;;  %v9067_v49 = vor.u32 %v11892_v40, %v9066_v37  ;;  %v8779_v37 = vor.u32 %v11820_v28, %v8778_v27 }
  0x93   :  { %2112 = vmatpush.bf16.msrb.mxu1 %v8227_v47  ;;  %v8515_v47 = vor.u32 %v11754_v33, %v8514_v32  ;;  %v8303_v54 = vor.u32 %v11697_v45, %v8300_v46  ;;  %v11625_v32 = vld [vmem:[#allocation2 + $0x9c] sm:$0xf]  ;;  %v8012_v33 = vld [vmem:[#allocation2 + $0xb0] sm:$0xf0]  ;;  %v11862_v45 = vld [vmem:[#allocation2 + $0x7fc] sm:$0xf0] }
  0x94   :  { %2126 = vmatpush.bf16.msrb.mxu2 %v8419_v48  ;;  %v8875_v48 = vor.u32 %v11844_v36, %v8874_v34  ;;  %v11673_v34 = vld [vmem:[#allocation2 + $0x21c] sm:$0xf]  ;;  %v8204_v36 = vld [vmem:[#allocation2 + $0x230] sm:$0xf0]  ;;  %v8015_v40 = vor.u32 %v11625_v32, %v8012_v33  ;;  %v11619_v46 = vld [vmem:[#allocation2 + $0x6c] sm:$0xf] }
  0x95   :  { %2140 = vmatpush.bf16.msrb.mxu3 %v8611_v52  ;;  %v11838_v52 = vld [vmem:[#allocation2 + $0x73c] sm:$0xf0]  ;;  %v8660_v33 = vld [vmem:[#allocation2 + $0x5c0] sm:$0xf0] }
  0x96   :  { %2099 = vmatpush.bf16.msrb.mxu0 %v8011_v59  ;;  %v11691_v59 = vld [vmem:[#allocation2 + $0x2ac] sm:$0xf] }
  0x97   :  { %2113 = vmatpush.bf16.msrb.mxu1 %v8203_v60  ;;  %v8276_v60 = vld [vmem:[#allocation2 + $0x2c0] sm:$0xf0] }
  0x98   :  { %2127 = vmatpush.bf16.msrb.mxu2 %v8395_v61  ;;  %v8851_v61 = vor.u32 %v11838_v52, %v8850_v51  ;;  %v8279_v3 = vor.u32 %v11691_v59, %v8276_v60  ;;  %v11613_v59 = vld [vmem:[#allocation2 + $0x3c] sm:$0xf]  ;;  %v7964_v60 = vld [vmem:[#allocation2 + $0x50] sm:$0xf0] }
  0x99   :  { %2141 = vmatpush.bf16.msrb.mxu3 %v8587_v1  ;;  %v11832_v1 = vld [vmem:[#allocation2 + $0x70c] sm:$0xf0] }
  0x9a   :  { %2100 = vmatpush.bf16.msrb.mxu0 %v7987_v8  ;;  %v11685_v8 = vld [vmem:[#allocation2 + $0x27c] sm:$0xf] }
  0x9b   :  { %2114 = vmatpush.bf16.msrb.mxu1 %v8179_v9  ;;  %v8252_v9 = vld [vmem:[#allocation2 + $0x290] sm:$0xf0] }
  0x9c   :  { %2128 = vmatpush.bf16.msrb.mxu2 %v8371_v10  ;;  %v8827_v10 = vor.u32 %v11832_v1, %v8826_v0  ;;  %v8255_v16 = vor.u32 %v11685_v8, %v8252_v9  ;;  %v8706_v0 = vld [vmem:[#allocation2 + $0x608] sm:$0xf]  ;;  %v11802_v1 = vld [vmem:[#allocation2 + $0x61c] sm:$0xf0]  ;;  %v7940_v9 = vld [vmem:[#allocation2 + $0x20] sm:$0xf0] }
  0x9d   :  { %2142 = vmatpush.bf16.msrb.mxu3 %v8563_v14  ;;  %v11826_v14 = vld [vmem:[#allocation2 + $0x6dc] sm:$0xf0] }
  0x9e   :  { %2101 = vmatpush.bf16.msrb.mxu0 %v7963_v20  ;;  %v11679_v20 = vld [vmem:[#allocation2 + $0x24c] sm:$0xf]  ;;  %v8803_v24 = vor.u32 %v11826_v14, %v8802_v13  ;;  %v8492_v13 = vld [vmem:[#allocation2 + $0x470] sm:$0xf0]  ;;  %v11793_v14 = vld [vmem:[#allocation2 + $0x5dc] sm:$0xf] }
  0x9f   :  { %2115 = vmatpush.bf16.msrb.mxu1 %v8155_v25  ;;  %v8995_v25 = vor.u32 %v11874_v17, %v8994_v15  ;;  %v8707_v15 = vor.u32 %v11802_v1, %v8706_v0  ;;  %v11841_v17 = vld [vmem:[#allocation2 + $0x75c] sm:$0xf]  ;;  %v8996_v0 = vld [vmem:[#allocation2 + $0x860] sm:$0xf0] }
  0xa0   :  { %2129 = vmatpush.bf16.msrb.mxu2 %v8347_v26  ;;  %v8039_v26 = vor.u32 %v11631_v18, %v8036_v19  ;;  %v8876_v18 = vld [vmem:[#allocation2 + $0x770] sm:$0xf0]  ;;  %v8899_v19 = vor.u32 %v11850_v5, %v8898_v4  ;;  %v11721_v4 = vld [vmem:[#allocation2 + $0x39c] sm:$0xf] }
  0xa1   :  { %2143 = vmatpush.bf16.msrb.mxu3 %v8539_v30  ;;  %v8231_v30 = vor.u32 %v11679_v20, %v8228_v21  ;;  %v7943_v20 = vor.u32 %v11607_v7, %v7940_v9  ;;  %v11889_v21 = vld [vmem:[#allocation2 + $0x8dc] sm:$0xf]  ;;  %v8879_v28 = vor.u32 %v11841_v17, %v8876_v18  ;;  %v8396_v5 = vld [vmem:[#allocation2 + $0x3b0] sm:$0xf0]  ;;  %v11715_v17 = vld [vmem:[#allocation2 + $0x36c] sm:$0xf] }
  0xa2   :  { %2102 = vmatpush.bf16.msrb.mxu0 %v7939_v38  ;;  %v8971_v38 = vor.u32 %v11868_v31, %v8970_v29  ;;  %v11739_v29 = vld [vmem:[#allocation2 + $0x42c] sm:$0xf]  ;;  %v11769_v7 = vld [vmem:[#allocation2 + $0x51c] sm:$0xf]  ;;  %v8588_v9 = vld [vmem:[#allocation2 + $0x530] sm:$0xf0] }
  0xa3   :  { %2116 = vmatpush.bf16.msrb.mxu1 %v8131_v43  ;;  %v8946_v43 = vld [vmem:[#allocation2 + $0x7e8] sm:$0xf]  ;;  %v11787_v31 = vld [vmem:[#allocation2 + $0x5ac] sm:$0xf]  ;;  %v8372_v18 = vld [vmem:[#allocation2 + $0x380] sm:$0xf0] }
  0xa4   :  { %2130 = vmatpush.bf16.msrb.mxu2 %v8323_v44  ;;  %v8207_v44 = vor.u32 %v11673_v34, %v8204_v36  ;;  %v8947_v51 = vor.u32 %v11862_v45, %v8946_v43  ;;  %v11835_v34 = vld [vmem:[#allocation2 + $0x72c] sm:$0xf]  ;;  %v8852_v36 = vld [vmem:[#allocation2 + $0x740] sm:$0xf0]  ;;  %v11733_v43 = vld [vmem:[#allocation2 + $0x3fc] sm:$0xf] }
  0xa5   :  { %2144 = vmatpush.bf16.msrb.mxu3 %v8515_v47  ;;  %2103 = vmatmul.bf16.vlgmr.msrb.gmra.mxu0 %v12923_v57  ;;  %v7988_v47 = vld [vmem:[#allocation2 + $0x80] sm:$0xf0]  ;;  %v11781_v45 = vld [vmem:[#allocation2 + $0x57c] sm:$0xf] }
  0xa6   :  { %2151 = vmatpush.bf16.msra.mxu0 %v8875_v48  ;;  %2117 = vmatmul.bf16.vlgmr.msrb.gmra.mxu1 %v12932_v6  ;;  %v11667_v48 = vld [vmem:[#allocation2 + $0x1ec] sm:$0xf]  ;;  %v7991_v52 = vor.u32 %v11619_v46, %v7988_v47  ;;  %v8636_v47 = vld [vmem:[#allocation2 + $0x590] sm:$0xf0] }
  0xa7   :  { %2165 = vmatpush.bf16.msra.mxu1 %v9067_v49  ;;  %2131 = vmatmul.bf16.vlgmr.msrb.gmra.mxu2 %v12947_v22  ;;  %v8180_v49 = vld [vmem:[#allocation2 + $0x200] sm:$0xf0] }
  0xa8   :  { %2179 = vmatpush.bf16.msra.mxu2 %v8111_v50  ;;  %2145 = vmatmul.bf16.vlgmr.msrb.gmra.mxu3 %v12949_v23  ;;  %v8755_v50 = vor.u32 %v11814_v42, %v8754_v41  ;;  %v8183_v56 = vor.u32 %v11667_v48, %v8180_v49  ;;  %v8663_v41 = vor.u32 %v11787_v31, %v8660_v33  ;;  %v11829_v48 = vld [vmem:[#allocation2 + $0x6fc] sm:$0xf]  ;;  %v8828_v49 = vld [vmem:[#allocation2 + $0x710] sm:$0xf0] }
  0xa9   :  { %2193 = vmatpush.bf16.msra.mxu3 %v8303_v54  ;;  %v11808_v54 = vld [vmem:[#allocation2 + $0x64c] sm:$0xf0]  ;;  %v8855_v42 = vor.u32 %v11835_v34, %v8852_v36  ;;  %v11709_v31 = vld [vmem:[#allocation2 + $0x33c] sm:$0xf]  ;;  %v8540_v36 = vld [vmem:[#allocation2 + $0x4d0] sm:$0xf0] }
  0xaa   :  { %2152 = vmatpush.bf16.msra.mxu0 %v8851_v61  ;;  %v11661_v61 = vld [vmem:[#allocation2 + $0x1bc] sm:$0xf] }
  0xab   :  { %2166 = vmatpush.bf16.msra.mxu1 %v9043_v62  ;;  %v8156_v62 = vld [vmem:[#allocation2 + $0x1d0] sm:$0xf0]  ;;  %v11757_v33 = vld [vmem:[#allocation2 + $0x4bc] sm:$0xf] }
  0xac   :  { %2180 = vmatpush.bf16.msra.mxu2 %v8087_v63  ;;  %v8731_v63 = vor.u32 %v11808_v54, %v8730_v53  ;;  %v8159_v8 = vor.u32 %v11661_v61, %v8156_v62  ;;  %v8639_v53 = vor.u32 %v11781_v45, %v8636_v47  ;;  %v8831_v54 = vor.u32 %v11829_v48, %v8828_v49  ;;  %v11823_v61 = vld [vmem:[#allocation2 + $0x6cc] sm:$0xf]  ;;  %v8804_v62 = vld [vmem:[#allocation2 + $0x6e0] sm:$0xf0] }
  0xad   :  { %2194 = vmatpush.bf16.msra.mxu3 %v8279_v3  ;;  %v7967_v3 = vor.u32 %v11613_v59, %v7964_v60  ;;  %v8612_v60 = vld [vmem:[#allocation2 + $0x560] sm:$0xf0]  ;;  %v8543_v45 = vor.u32 %v11757_v33, %v8540_v36  ;;  %v11751_v47 = vld [vmem:[#allocation2 + $0x48c] sm:$0xf]  ;;  %v11635_v36 = vld [vmem:[#allocation2 + $0xe4] sm:$0xf0] }
  0xae   :  { %2153 = vmatpush.bf16.msra.mxu0 %v8827_v10  ;;  %v11655_v10 = vld [vmem:[#allocation2 + $0x18c] sm:$0xf]  ;;  %v8516_v48 = vld [vmem:[#allocation2 + $0x4a0] sm:$0xf0] }
  0xaf   :  { %2167 = vmatpush.bf16.msra.mxu1 %v9019_v11  ;;  %v8132_v11 = vld [vmem:[#allocation2 + $0x1a0] sm:$0xf0]  ;;  %v11799_v49 = vld [vmem:[#allocation2 + $0x60c] sm:$0xf] }
  0xb0   :  { %2181 = vmatpush.bf16.msra.mxu2 %v8063_v12  ;;  %v11745_v12 = vld [vmem:[#allocation2 + $0x45c] sm:$0xf] }
  0xb1   :  { %2195 = vmatpush.bf16.msra.mxu3 %v8255_v16  ;;  %v8684_v16 = vld [vmem:[#allocation2 + $0x5f0] sm:$0xf0] }
  0xb2   :  { %2154 = vmatpush.bf16.msra.mxu0 %v8803_v24  ;;  %v9068_v24 = vld [vmem:[#allocation2 + $0x8f0] sm:$0xf0]  ;;  %v8687_v27 = vor.u32 %v11793_v14, %v8684_v16  ;;  %v8399_v14 = vor.u32 %v11721_v4, %v8396_v5 }
  0xb3   :  { %2168 = vmatpush.bf16.msra.mxu1 %v8995_v25  ;;  %v8135_v25 = vor.u32 %v11655_v10, %v8132_v11  ;;  %v9071_v32 = vor.u32 %v11889_v21, %v9068_v24  ;;  %v11817_v10 = vld [vmem:[#allocation2 + $0x69c] sm:$0xf]  ;;  %v8780_v11 = vld [vmem:[#allocation2 + $0x6b0] sm:$0xf0]  ;;  %v8564_v21 = vld [vmem:[#allocation2 + $0x500] sm:$0xf0] }
  0xb4   :  { %2182 = vmatpush.bf16.msra.mxu2 %v8039_v26  ;;  %v8495_v26 = vor.u32 %v11745_v12, %v8492_v13  ;;  %v11865_v12 = vld [vmem:[#allocation2 + $0x81c] sm:$0xf]  ;;  %v8972_v13 = vld [vmem:[#allocation2 + $0x830] sm:$0xf0]  ;;  %v8783_v16 = vor.u32 %v11817_v10, %v8780_v11  ;;  %v11811_v24 = vld [vmem:[#allocation2 + $0x66c] sm:$0xf] }
  0xb5   :  { %2196 = vmatpush.bf16.msra.mxu3 %v8231_v30  ;;  %v8468_v30 = vld [vmem:[#allocation2 + $0x440] sm:$0xf0]  ;;  %v11695_v11 = vld [vmem:[#allocation2 + $0x2c4] sm:$0xf0] }
  0xb6   :  { %2155 = vmatpush.bf16.msra.mxu0 %v8779_v37  ;;  %v11883_v37 = vld [vmem:[#allocation2 + $0x8ac] sm:$0xf] }
  0xb7   :  { %2169 = vmatpush.bf16.msra.mxu1 %v8971_v38  ;;  %v9044_v38 = vld [vmem:[#allocation2 + $0x8c0] sm:$0xf0] }
  0xb8   :  { %2183 = vmatpush.bf16.msra.mxu2 %v8015_v40  ;;  %v8471_v40 = vor.u32 %v11739_v29, %v8468_v30  ;;  %v9047_v46 = vor.u32 %v11883_v37, %v9044_v38  ;;  %v11805_v37 = vld [vmem:[#allocation2 + $0x63c] sm:$0xf]  ;;  %v8732_v38 = vld [vmem:[#allocation2 + $0x650] sm:$0xf0] }
  0xb9   :  { %2197 = vmatpush.bf16.msra.mxu3 %v8207_v44  ;;  %v8444_v44 = vld [vmem:[#allocation2 + $0x410] sm:$0xf0] }
  0xba   :  { %2156 = vmatpush.bf16.msra.mxu0 %v8755_v50  ;;  %v11877_v50 = vld [vmem:[#allocation2 + $0x87c] sm:$0xf] }
  0xbb   :  { %2170 = vmatpush.bf16.msra.mxu1 %v8947_v51  ;;  %v9020_v51 = vld [vmem:[#allocation2 + $0x890] sm:$0xf0] }
  0xbc   :  { %2184 = vmatpush.bf16.msra.mxu2 %v7991_v52  ;;  %v8447_v52 = vor.u32 %v11733_v43, %v8444_v44  ;;  %v9023_v59 = vor.u32 %v11877_v50, %v9020_v51  ;;  %v11703_v43 = vld [vmem:[#allocation2 + $0x30c] sm:$0xf]  ;;  %v8324_v44 = vld [vmem:[#allocation2 + $0x320] sm:$0xf0] }
  0xbd   :  { %2198 = vmatpush.bf16.msra.mxu3 %v8183_v56  ;;  %v8420_v56 = vld [vmem:[#allocation2 + $0x3e0] sm:$0xf0] }
  0xbe   :  { %2157 = vmatpush.bf16.msra.mxu0 %v8731_v63  ;;  %v11871_v63 = vld [vmem:[#allocation2 + $0x84c] sm:$0xf]  ;;  %v8423_v1 = vor.u32 %v11727_v55, %v8420_v56  ;;  %v8708_v51 = vld [vmem:[#allocation2 + $0x620] sm:$0xf0]  ;;  %v11653_v55 = vld [vmem:[#allocation2 + $0x174] sm:$0xf0] }
  0xbf   :  { %2171 = vmatpush.bf16.msra.mxu1 %v8923_v2  ;;  %v8615_v2 = vor.u32 %v11775_v58, %v8612_v60  ;;  %v8306_v56 = vld [vmem:[#allocation2 + $0x2e0] sm:$0xf]  ;;  %v8327_v58 = vor.u32 %v11703_v43, %v8324_v44  ;;  %v8618_v44 = vld [vmem:[#allocation2 + $0x550] sm:$0xf] }
  0xc0   :  { %2185 = vmatpush.bf16.msra.mxu2 %v7967_v3  ;;  %v8807_v3 = vor.u32 %v11823_v61, %v8804_v62  ;;  %v8498_v60 = vld [vmem:[#allocation2 + $0x460] sm:$0xf]  ;;  %v11749_v61 = vld [vmem:[#allocation2 + $0x474] sm:$0xf0]  ;;  %v8519_v62 = vor.u32 %v11751_v47, %v8516_v48 }
  0xc1   :  { %2199 = vmatpush.bf16.msra.mxu3 %v8159_v8  ;;  %v8999_v8 = vor.u32 %v11871_v63, %v8996_v0  ;;  %v8711_v63 = vor.u32 %v11799_v49, %v8708_v51  ;;  %v8690_v0 = vld [vmem:[#allocation2 + $0x5e0] sm:$0xf]  ;;  %v8499_v5 = vor.u32 %v11749_v61, %v8498_v60  ;;  %v11629_v51 = vld [vmem:[#allocation2 + $0xb4] sm:$0xf0] }
  0xc2   :  { %2158 = vmatpush.bf16.msra.mxu0 %v8707_v15  ;;  %v8591_v15 = vor.u32 %v11769_v7, %v8588_v9  ;;  %v8090_v7 = vld [vmem:[#allocation2 + $0x130] sm:$0xf] }
  0xc3   :  { %2172 = vmatpush.bf16.msra.mxu1 %v8899_v19  ;;  %v11763_v19 = vld [vmem:[#allocation2 + $0x4ec] sm:$0xf]  ;;  %v8282_v9 = vld [vmem:[#allocation2 + $0x2b0] sm:$0xf]  ;;  %v12991_v43 = vpop.f32.mrf.mxu1 }
  0xc4   :  { %2186 = vmatpush.bf16.msra.mxu2 %v7943_v20  ;;  %v8975_v20 = vor.u32 %v11865_v12, %v8972_v13  ;;  %v8567_v29 = vor.u32 %v11763_v19, %v8564_v21  ;;  %v8474_v12 = vld [vmem:[#allocation2 + $0x430] sm:$0xf]  ;;  %v11743_v13 = vld [vmem:[#allocation2 + $0x444] sm:$0xf0]  ;;  %v8066_v19 = vld [vmem:[#allocation2 + $0x100] sm:$0xf] }
  0xc5   :  { %2200 = vmatpush.bf16.msra.mxu3 %v8135_v25  ;;  %2159 = vmatmul.bf16.vlgmr.msra.gmra.mxu0 %v12965_v35  ;;  %v8756_v25 = vld [vmem:[#allocation2 + $0x680] sm:$0xf0]  ;;  %v8258_v21 = vld [vmem:[#allocation2 + $0x280] sm:$0xf] }
  0xc6   :  { %2207 = vmatpush.bf16.msrb.mxu0 %v8495_v26  ;;  %2173 = vmatmul.bf16.vlgmr.msra.gmra.mxu1 %v12967_v39  ;;  %v11859_v26 = vld [vmem:[#allocation2 + $0x7ec] sm:$0xf]  ;;  %v8759_v30 = vor.u32 %v11811_v24, %v8756_v25  ;;  %v11689_v25 = vld [vmem:[#allocation2 + $0x294] sm:$0xf0] }
  0xc7   :  { %2221 = vmatpush.bf16.msrb.mxu1 %v8687_v27  ;;  %2187 = vmatmul.bf16.vlgmr.msra.gmra.mxu2 %v12923_v57  ;;  %v8948_v27 = vld [vmem:[#allocation2 + $0x800] sm:$0xf0] }
  0xc8   :  { %2235 = vmatpush.bf16.msrb.mxu2 %v8879_v28  ;;  %2201 = vmatmul.bf16.vlgmr.msra.gmra.mxu3 %v12932_v6  ;;  %v8375_v28 = vor.u32 %v11715_v17, %v8372_v18  ;;  %v8951_v34 = vor.u32 %v11859_v26, %v8948_v27  ;;  %v8283_v17 = vor.u32 %v11695_v11, %v8282_v9  ;;  %v8450_v26 = vld [vmem:[#allocation2 + $0x400] sm:$0xf]  ;;  %v11737_v27 = vld [vmem:[#allocation2 + $0x414] sm:$0xf0]  ;;  %v8570_v9 = vld [vmem:[#allocation2 + $0x4f0] sm:$0xf] }
  0xc9   :  { %2249 = vmatpush.bf16.msrb.mxu3 %v9071_v32  ;;  %v8348_v32 = vld [vmem:[#allocation2 + $0x350] sm:$0xf0]  ;;  %v8475_v18 = vor.u32 %v11743_v13, %v8474_v12  ;;  %v8451_v33 = vor.u32 %v11737_v27, %v8450_v26  ;;  %v11761_v26 = vld [vmem:[#allocation2 + $0x4d4] sm:$0xf0] }
  0xca   :  { %2208 = vmatpush.bf16.msrb.mxu0 %v8471_v40  ;;  %v11853_v40 = vld [vmem:[#allocation2 + $0x7bc] sm:$0xf]  ;;  %v12993_v47 = vpop.f32.mrf.mxu2 }
  0xcb   :  { %2222 = vmatpush.bf16.msrb.mxu1 %v8663_v41  ;;  %v8924_v41 = vld [vmem:[#allocation2 + $0x7d0] sm:$0xf0]  ;;  %v12999_v12 = vpop.f32.mrf.mxu1 }
  0xcc   :  { %2236 = vmatpush.bf16.msrb.mxu2 %v8855_v42  ;;  %v8351_v42 = vor.u32 %v11709_v31, %v8348_v32  ;;  %v8927_v50 = vor.u32 %v11853_v40, %v8924_v41  ;;  %v8259_v32 = vor.u32 %v11689_v25, %v8258_v21  ;;  %v11683_v40 = vld [vmem:[#allocation2 + $0x264] sm:$0xf0]  ;;  %v8426_v41 = vld [vmem:[#allocation2 + $0x3d0] sm:$0xf]  ;;  %v11713_v21 = vld [vmem:[#allocation2 + $0x354] sm:$0xf0] }
  0xcd   :  { %2250 = vmatpush.bf16.msrb.mxu3 %v9047_v46  ;;  %v8735_v46 = vor.u32 %v11805_v37, %v8732_v38  ;;  %v8234_v37 = vld [vmem:[#allocation2 + $0x250] sm:$0xf]  ;;  %v8546_v25 = vld [vmem:[#allocation2 + $0x4c0] sm:$0xf] }
  0xce   :  { %2209 = vmatpush.bf16.msrb.mxu0 %v8447_v52  ;;  %v11847_v52 = vld [vmem:[#allocation2 + $0x78c] sm:$0xf]  ;;  %v8235_v48 = vor.u32 %v11683_v40, %v8234_v37  ;;  %v8547_v37 = vor.u32 %v11761_v26, %v8546_v25  ;;  %v8522_v40 = vld [vmem:[#allocation2 + $0x490] sm:$0xf]  ;;  %v11881_v25 = vld [vmem:[#allocation2 + $0x894] sm:$0xf0] }
  0xcf   :  { %2223 = vmatpush.bf16.msrb.mxu1 %v8639_v53  ;;  %v8900_v53 = vld [vmem:[#allocation2 + $0x7a0] sm:$0xf0] }
  0xd0   :  { %2237 = vmatpush.bf16.msrb.mxu2 %v8831_v54  ;;  %v8114_v54 = vld [vmem:[#allocation2 + $0x160] sm:$0xf]  ;;  %v11638_v26 = vld [vmem:[#allocation2 + $0x104] sm:$0xf] }
  0xd1   :  { %2251 = vmatpush.bf16.msrb.mxu3 %v9023_v59  ;;  %v11701_v59 = vld [vmem:[#allocation2 + $0x2f4] sm:$0xf0] }
  0xd2   :  { %2210 = vmatpush.bf16.msrb.mxu0 %v8423_v1  ;;  %v11797_v1 = vld [vmem:[#allocation2 + $0x5f4] sm:$0xf0]  ;;  %v8307_v4 = vor.u32 %v11701_v59, %v8306_v56 }
  0xd3   :  { %2224 = vmatpush.bf16.msrb.mxu1 %v8615_v2  ;;  %v8903_v2 = vor.u32 %v11847_v52, %v8900_v53  ;;  %v8691_v10 = vor.u32 %v11797_v1, %v8690_v0  ;;  %v8210_v52 = vld [vmem:[#allocation2 + $0x220] sm:$0xf]  ;;  %v11725_v56 = vld [vmem:[#allocation2 + $0x3b4] sm:$0xf0]  ;;  %v7994_v1 = vld [vmem:[#allocation2 + $0x70] sm:$0xf] }
  0xd4   :  { %2238 = vmatpush.bf16.msrb.mxu2 %v8807_v3  ;;  %v8115_v3 = vor.u32 %v11653_v55, %v8114_v54  ;;  %v11677_v54 = vld [vmem:[#allocation2 + $0x234] sm:$0xf0]  ;;  %v8402_v55 = vld [vmem:[#allocation2 + $0x3a0] sm:$0xf] }
  0xd5   :  { %2252 = vmatpush.bf16.msrb.mxu3 %v8999_v8  ;;  %v11647_v8 = vld [vmem:[#allocation2 + $0x144] sm:$0xf0]  ;;  %v11773_v59 = vld [vmem:[#allocation2 + $0x534] sm:$0xf0]  ;;  %v8403_v0 = vor.u32 %v11725_v56, %v8402_v55  ;;  %v11698_v55 = vld [vmem:[#allocation2 + $0x2e4] sm:$0xf] }
  0xd6   :  { %2211 = vmatpush.bf16.msrb.mxu0 %v8399_v14  ;;  %v8666_v14 = vld [vmem:[#allocation2 + $0x5b0] sm:$0xf]  ;;  %v8308_v56 = vld [vmem:[#allocation2 + $0x2f8] sm:$0xf0] }
  0xd7   :  { %2225 = vmatpush.bf16.msrb.mxu1 %v8591_v15  ;;  %v11791_v15 = vld [vmem:[#allocation2 + $0x5c4] sm:$0xf0] }
  0xd8   :  { %2239 = vmatpush.bf16.msrb.mxu2 %v8783_v16  ;;  %v8091_v16 = vor.u32 %v11647_v8, %v8090_v7  ;;  %v8667_v24 = vor.u32 %v11791_v15, %v8666_v14  ;;  %v8378_v7 = vld [vmem:[#allocation2 + $0x370] sm:$0xf]  ;;  %v11719_v8 = vld [vmem:[#allocation2 + $0x384] sm:$0xf0]  ;;  %v7970_v15 = vld [vmem:[#allocation2 + $0x40] sm:$0xf] }
  0xd9   :  { %2253 = vmatpush.bf16.msrb.mxu3 %v8975_v20  ;;  %v11641_v20 = vld [vmem:[#allocation2 + $0x114] sm:$0xf0]  ;;  %v8379_v14 = vor.u32 %v11719_v8, %v8378_v7  ;;  %v11887_v7 = vld [vmem:[#allocation2 + $0x8c4] sm:$0xf0]  ;;  %v11644_v8 = vld [vmem:[#allocation2 + $0x134] sm:$0xf] }
  0xda   :  { %2212 = vmatpush.bf16.msrb.mxu0 %v8375_v28  ;;  %v12986_v28 = vpop.f32.mrf.mxu0  ;;  %v8067_v31 = vor.u32 %v11641_v20, %v8066_v19  ;;  %v11665_v19 = vld [vmem:[#allocation2 + $0x1d4] sm:$0xf0]  ;;  %v8354_v20 = vld [vmem:[#allocation2 + $0x340] sm:$0xf] }
  0xdb   :  { %2226 = vmatpush.bf16.msrb.mxu1 %v8567_v29  ;;  %v8642_v29 = vld [vmem:[#allocation2 + $0x580] sm:$0xf] }
  0xdc   :  { %2240 = vmatpush.bf16.msrb.mxu2 %v8759_v30  ;;  %v11785_v30 = vld [vmem:[#allocation2 + $0x594] sm:$0xf0] }
  0xdd   :  { %2254 = vmatpush.bf16.msrb.mxu3 %v8951_v34  ;;  %v8042_v34 = vld [vmem:[#allocation2 + $0xd0] sm:$0xf]  ;;  %v8643_v38 = vor.u32 %v11785_v30, %v8642_v29  ;;  %v11611_v30 = vld [vmem:[#allocation2 + $0x24] sm:$0xf0] }
  0xde   :  { %2213 = vmatpush.bf16.msrb.mxu0 %v8351_v42  ;;  %v11731_v42 = vld [vmem:[#allocation2 + $0x3e4] sm:$0xf0]  ;;  %v7946_v29 = vld [vmem:[#allocation2 + $0x10] sm:$0xf] }
  0xdf   :  { %2227 = vmatpush.bf16.msrb.mxu1 %v8543_v45  ;;  %v11779_v45 = vld [vmem:[#allocation2 + $0x564] sm:$0xf0]  ;;  %v8427_v49 = vor.u32 %v11731_v42, %v8426_v41 }
  0xe0   :  { %2241 = vmatpush.bf16.msrb.mxu2 %v8735_v46  ;;  %v8043_v46 = vor.u32 %v11635_v36, %v8042_v34  ;;  %v8619_v53 = vor.u32 %v11779_v45, %v8618_v44  ;;  %v11659_v34 = vld [vmem:[#allocation2 + $0x1a4] sm:$0xf0]  ;;  %v8330_v36 = vld [vmem:[#allocation2 + $0x310] sm:$0xf]  ;;  %v8882_v45 = vld [vmem:[#allocation2 + $0x760] sm:$0xf] }
  0xe1   :  { %2255 = vmatpush.bf16.msrb.mxu3 %v8927_v50  ;;  %v8018_v50 = vld [vmem:[#allocation2 + $0xa0] sm:$0xf]  ;;  %v11755_v41 = vld [vmem:[#allocation2 + $0x4a4] sm:$0xf0] }
  0xe2   :  { %2214 = vmatpush.bf16.msrb.mxu0 %v8327_v58  ;;  %v8594_v58 = vld [vmem:[#allocation2 + $0x520] sm:$0xf]  ;;  %v8019_v60 = vor.u32 %v11629_v51, %v8018_v50  ;;  %v12995_v61 = vpop.f32.mrf.mxu0  ;;  %v11893_v50 = vld [vmem:[#allocation2 + $0x8f4] sm:$0xf0]  ;;  %v11650_v51 = vld [vmem:[#allocation2 + $0x164] sm:$0xf] }
  0xe3   :  { %2228 = vmatpush.bf16.msrb.mxu1 %v8519_v62  ;;  %v12997_v62 = vpop.f32.mrf.mxu3 }
  0xe4   :  { %2242 = vmatpush.bf16.msrb.mxu2 %v8711_v63  ;;  %v8211_v63 = vor.u32 %v11677_v54, %v8210_v52  ;;  %v8116_v52 = vld [vmem:[#allocation2 + $0x178] sm:$0xf0] }
  0xe5   :  { %2256 = vmatpush.bf16.msrb.mxu3 %v8903_v2  ;;  %2215 = vmatmul.bf16.vlgmr.msrb.gmra.mxu0 %v12947_v22  ;;  %v11623_v2 = vld [vmem:[#allocation2 + $0x84] sm:$0xf0] }
  0xe6   :  { %2263 = vmatpush.bf16.msra.mxu0 %v8115_v3  ;;  %2229 = vmatmul.bf16.vlgmr.msrb.gmra.mxu1 %v12949_v23  ;;  %v8186_v3 = vld [vmem:[#allocation2 + $0x1f0] sm:$0xf]  ;;  %v7995_v11 = vor.u32 %v11623_v2, %v7994_v1 }
  0xe7   :  { %2277 = vmatpush.bf16.msra.mxu1 %v8307_v4  ;;  %2243 = vmatmul.bf16.vlgmr.msrb.gmra.mxu2 %v12965_v35  ;;  %v8595_v4 = vor.u32 %v11773_v59, %v8594_v58  ;;  %v8523_v58 = vor.u32 %v11755_v41, %v8522_v40  ;;  %v8858_v2 = vld [vmem:[#allocation2 + $0x730] sm:$0xf] }
  0xe8   :  { %2291 = vmatpush.bf16.msra.mxu2 %v8499_v5  ;;  %2257 = vmatmul.bf16.vlgmr.msrb.gmra.mxu3 %v12967_v39  ;;  %v11671_v5 = vld [vmem:[#allocation2 + $0x204] sm:$0xf0]  ;;  %v9002_v40 = vld [vmem:[#allocation2 + $0x850] sm:$0xf] }
  0xe9   :  { %2305 = vmatpush.bf16.msra.mxu3 %v8691_v10  ;;  %v11767_v10 = vld [vmem:[#allocation2 + $0x504] sm:$0xf0]  ;;  %v8187_v13 = vor.u32 %v11671_v5, %v8186_v3  ;;  %v8311_v5 = vor.u32 %v11698_v55, %v8308_v56 }
  0xea   :  { %2264 = vmatpush.bf16.msra.mxu0 %v8091_v16  ;;  %v11617_v16 = vld [vmem:[#allocation2 + $0x54] sm:$0xf0]  ;;  %v13003_v42 = vpop.f32.mrf.mxu0  ;;  %v11839_v3 = vld [vmem:[#allocation2 + $0x744] sm:$0xf0] }
  0xeb   :  { %2278 = vmatpush.bf16.msra.mxu1 %v8283_v17  ;;  %v8162_v17 = vld [vmem:[#allocation2 + $0x1c0] sm:$0xf]  ;;  %v7971_v27 = vor.u32 %v11617_v16, %v7970_v15  ;;  %v13005_v44 = vpop.f32.mrf.mxu3 }
  0xec   :  { %2292 = vmatpush.bf16.msra.mxu2 %v8475_v18  ;;  %v8571_v18 = vor.u32 %v11767_v10, %v8570_v9  ;;  %v8092_v9 = vld [vmem:[#allocation2 + $0x148] sm:$0xf0]  ;;  %v11692_v10 = vld [vmem:[#allocation2 + $0x2b4] sm:$0xf] }
  0xed   :  { %2306 = vmatpush.bf16.msra.mxu3 %v8667_v24  ;;  %v13001_v24 = vpop.f32.mrf.mxu2 }
  0xee   :  { %2265 = vmatpush.bf16.msra.mxu0 %v8067_v31  ;;  %v8163_v31 = vor.u32 %v11665_v19, %v8162_v17  ;;  %v8095_v17 = vor.u32 %v11644_v8, %v8092_v9  ;;  %v11833_v19 = vld [vmem:[#allocation2 + $0x714] sm:$0xf0] }
  0xef   :  { %2279 = vmatpush.bf16.msra.mxu1 %v8259_v32  ;;  %v8355_v32 = vor.u32 %v11713_v21, %v8354_v20  ;;  %v9026_v20 = vld [vmem:[#allocation2 + $0x880] sm:$0xf] }
  0xf0   :  { %2293 = vmatpush.bf16.msra.mxu2 %v8451_v33  ;;  %v8138_v33 = vld [vmem:[#allocation2 + $0x190] sm:$0xf] }
  0xf1   :  { %2307 = vmatpush.bf16.msra.mxu3 %v8643_v38  ;;  %v11707_v38 = vld [vmem:[#allocation2 + $0x324] sm:$0xf0] }
  0xf2   :  { %2266 = vmatpush.bf16.msra.mxu0 %v8043_v46  ;;  %v11845_v46 = vld [vmem:[#allocation2 + $0x774] sm:$0xf0]  ;;  %v8331_v54 = vor.u32 %v11707_v38, %v8330_v36  ;;  %v11827_v38 = vld [vmem:[#allocation2 + $0x6e4] sm:$0xf0] }
  0xf3   :  { %2280 = vmatpush.bf16.msra.mxu1 %v8235_v48  ;;  %v9074_v48 = vld [vmem:[#allocation2 + $0x8e0] sm:$0xf]  ;;  %v8883_v59 = vor.u32 %v11845_v46, %v8882_v45  ;;  %v13013_v15 = vpop.f32.mrf.mxu3  ;;  %v11875_v45 = vld [vmem:[#allocation2 + $0x864] sm:$0xf0]  ;;  %v11632_v46 = vld [vmem:[#allocation2 + $0xd4] sm:$0xf] }
  0xf4   :  { %2294 = vmatpush.bf16.msra.mxu2 %v8427_v49  ;;  %v7947_v49 = vor.u32 %v11611_v30, %v7946_v29  ;;  %v13016_v29 = vpop.f32.mrf.mxu0  ;;  %v11686_v30 = vld [vmem:[#allocation2 + $0x284] sm:$0xf]  ;;  %v9003_v55 = vor.u32 %v11875_v45, %v9002_v40  ;;  %v8738_v40 = vld [vmem:[#allocation2 + $0x640] sm:$0xf] }
  0xf5   :  { %2308 = vmatpush.bf16.msra.mxu3 %v8619_v53  ;;  %v8139_v53 = vor.u32 %v11659_v34, %v8138_v33  ;;  %v13009_v1 = vpop.f32.mrf.mxu2  ;;  %v9027_v34 = vor.u32 %v11881_v25, %v9026_v20  ;;  %v11863_v25 = vld [vmem:[#allocation2 + $0x804] sm:$0xf0]  ;;  %v8930_v45 = vld [vmem:[#allocation2 + $0x7c0] sm:$0xf] }
  0xf6   :  { %2267 = vmatpush.bf16.msra.mxu0 %v8019_v60  ;;  %v13007_v60 = vpop.f32.mrf.mxu1 }
  0xf7   :  { %2281 = vmatpush.bf16.msra.mxu1 %v8211_v63  ;;  %v9075_v63 = vor.u32 %v11893_v50, %v9074_v48  ;;  %v8044_v48 = vld [vmem:[#allocation2 + $0xe8] sm:$0xf0] }
  0xf8   :  { %2295 = vmatpush.bf16.msra.mxu2 %v8403_v0  ;;  %v8119_v0 = vor.u32 %v11650_v51, %v8116_v52  ;;  %v11680_v51 = vld [vmem:[#allocation2 + $0x254] sm:$0xf]  ;;  %v8236_v52 = vld [vmem:[#allocation2 + $0x268] sm:$0xf0]  ;;  %v8047_v56 = vor.u32 %v11632_v46, %v8044_v48  ;;  %v11857_v48 = vld [vmem:[#allocation2 + $0x7d4] sm:$0xf0] }
  0xf9   :  { %2309 = vmatpush.bf16.msra.mxu3 %v8595_v4  ;;  %v9050_v4 = vld [vmem:[#allocation2 + $0x8b0] sm:$0xf] }
  0xfa   :  { %2268 = vmatpush.bf16.msra.mxu0 %v7995_v11  ;;  %v8284_v11 = vld [vmem:[#allocation2 + $0x2c8] sm:$0xf0]  ;;  %v9051_v16 = vor.u32 %v11887_v7, %v9050_v4  ;;  %v11626_v4 = vld [vmem:[#allocation2 + $0xa4] sm:$0xf] }
  0xfb   :  { %2282 = vmatpush.bf16.msra.mxu1 %v8187_v13  ;;  %v13011_v13 = vld [vmem:[#allocation4] sm:$0x3f]  ;;  %v8287_v21 = vor.u32 %v11692_v10, %v8284_v11  ;;  %v2036_v8 = vpop.f32.mrf.mxu3  ;;  %v8212_v10 = vld [vmem:[#allocation2 + $0x238] sm:$0xf0] }
  0xfc   :  { %2296 = vmatpush.bf16.msra.mxu2 %v8379_v14  ;;  %v8859_v14 = vor.u32 %v11839_v3, %v8858_v2  ;;  %v8239_v2 = vor.u32 %v11680_v51, %v8236_v52  ;;  %v11869_v3 = vld [vmem:[#allocation2 + $0x834] sm:$0xf0]  ;;  %v446_v7 = vperm.slane %v13011_v13, 1  ;;  %v11614_v51 = vld [vmem:[#allocation2 + $0x44] sm:$0xf] }
  0xfd   :  { %2310 = vmatpush.bf16.msra.mxu3 %v8571_v18  ;;  %v8834_v18 = vld [vmem:[#allocation2 + $0x700] sm:$0xf]  ;;  %v2022_v50 = vpop.f32.mrf.mxu2 }
  0xfe   :  { %2269 = vmatpush.bf16.msra.mxu0 %v7971_v27  ;;  %v8068_v27 = vld [vmem:[#allocation2 + $0x118] sm:$0xf0]  ;;  %v8835_v33 = vor.u32 %v11833_v19, %v8834_v18  ;;  %v11815_v18 = vld [vmem:[#allocation2 + $0x684] sm:$0xf0]  ;;  %v8954_v19 = vld [vmem:[#allocation2 + $0x7f0] sm:$0xf] }
  0xff   :  { %2283 = vmatpush.bf16.msra.mxu1 %v8163_v31  ;;  %v8260_v31 = vld [vmem:[#allocation2 + $0x298] sm:$0xf0]  ;;  %v8071_v36 = vor.u32 %v11638_v26, %v8068_v27  ;;  %v11620_v26 = vld [vmem:[#allocation2 + $0x74] sm:$0xf]  ;;  %v7996_v27 = vld [vmem:[#allocation2 + $0x88] sm:$0xf0] }
 0x100   :  { %2297 = vmatpush.bf16.msra.mxu2 %v8355_v32  ;;  %v445_v32 = vperm.slane %v13011_v13, 0  ;;  %v8263_v41 = vor.u32 %v11686_v30, %v8260_v31  ;;  %v2021_v30 = vadd.f32 %v13009_v1, %v446_v7 }
 0x101   :  { %2311 = vmatpush.bf16.msra.mxu3 %v8547_v37  ;;  %v8810_v37 = vld [vmem:[#allocation2 + $0x6d0] sm:$0xf] }
 0x102   :  { %2270 = vmatpush.bf16.msra.mxu0 %v7947_v49  ;;  %v13022_v49 = vpop.f32.mrf.mxu1  ;;  %v13027_v9 = vpop.f32.mrf.mxu0  ;;  %v2035_v52 = vadd.f32 %v13013_v15, %v2021_v30  ;;  %v9076_v30 = vld [vmem:[#allocation2 + $0x8f8] sm:$0xf0] }
 0x103   :  { %2284 = vmatpush.bf16.msra.mxu1 %v8139_v53  ;;  %v8811_v53 = vor.u32 %v11827_v38, %v8810_v37  ;;  %v7999_v38 = vor.u32 %v11620_v26, %v7996_v27  ;;  %v11890_v27 = vld [vmem:[#allocation2 + $0x8e4] sm:$0xf] }
 0x104   :  { %2298 = vmatpush.bf16.msra.mxu2 %v8331_v54  ;;  %v1939_v54 = vadd.f32 %v12995_v61, %v445_v32  ;;  %v11674_v61 = vld [vmem:[#allocation2 + $0x224] sm:$0xf] }
 0x105   :  { %2312 = vmatpush.bf16.msra.mxu3 %v8523_v58  ;;  %2271 = vmatmul.bf16.vlgmr.msra.gmra.mxu0 %v12923_v57  ;;  %v8786_v58 = vld [vmem:[#allocation2 + $0x6a0] sm:$0xf] }
 0x106   :  { %2319 = vmatpush.bf16.msrb.mxu0 %v8883_v59  ;;  %2285 = vmatmul.bf16.vlgmr.msra.gmra.mxu1 %v12932_v6  ;;  %v11821_v59 = vld [vmem:[#allocation2 + $0x6b4] sm:$0xf0] }
 0x107   :  { %2333 = vmatpush.bf16.msrb.mxu1 %v9075_v63  ;;  %2299 = vmatmul.bf16.vlgmr.msra.gmra.mxu2 %v12947_v22  ;;  %v8978_v63 = vld [vmem:[#allocation2 + $0x820] sm:$0xf]  ;;  %v8787_v11 = vor.u32 %v11821_v59, %v8786_v58  ;;  %v11803_v58 = vld [vmem:[#allocation2 + $0x624] sm:$0xf0] }
 0x108   :  { %2347 = vmatpush.bf16.msrb.mxu2 %v8119_v0  ;;  %2313 = vmatmul.bf16.vlgmr.msra.gmra.mxu3 %v12949_v23  ;;  %v1937_v0 = vadd.f32 %v12986_v28, %v445_v32  ;;  %v11668_v32 = vld [vmem:[#allocation2 + $0x1f4] sm:$0xf] }
 0x109   :  { %2361 = vmatpush.bf16.msrb.mxu3 %v8311_v5  ;;  %v8020_v5 = vld [vmem:[#allocation2 + $0xb8] sm:$0xf0] }
 0x10a   :  { %2320 = vmatpush.bf16.msrb.mxu0 %v8859_v14  ;;  %v1953_v14 = vadd.f32 %v12999_v12, %v1939_v54  ;;  %v8023_v28 = vor.u32 %v11626_v4, %v8020_v5  ;;  %v1951_v20 = vadd.f32 %v12991_v43, %v1937_v0  ;;  %v13032_v31 = vpop.f32.mrf.mxu1  ;;  %v8188_v12 = vld [vmem:[#allocation2 + $0x208] sm:$0xf0]  ;;  %v13035_v37 = vpop.f32.mrf.mxu2  ;;  %v8955_v43 = vor.u32 %v11863_v25, %v8954_v19  ;;  %v11851_v4 = vld [vmem:[#allocation2 + $0x7a4] sm:$0xf0]  ;;  %v11608_v5 = vld [vmem:[#allocation2 + $0x14] sm:$0xf] }
 0x10b   :  { %2334 = vmatpush.bf16.msrb.mxu1 %v9051_v16  ;;  %v8979_v16 = vor.u32 %v11869_v3, %v8978_v63  ;;  %v8191_v46 = vor.u32 %v11668_v32, %v8188_v12  ;;  %v2050_v63 = vpop.f32.mrf.mxu0  ;;  %v13040_v0 = vpop.f32.mrf.mxu3  ;;  %v8906_v3 = vld [vmem:[#allocation2 + $0x790] sm:$0xf]  ;;  %v11842_v19 = vld [vmem:[#allocation2 + $0x764] sm:$0xf] }
 0x10c   :  { %2348 = vmatpush.bf16.msrb.mxu2 %v8095_v17  ;;  %v8762_v17 = vld [vmem:[#allocation2 + $0x670] sm:$0xf]  ;;  %v1965_v1 = vadd.f32 %v12993_v47, %v1951_v20  ;;  %v8931_v47 = vor.u32 %v11857_v48, %v8930_v45  ;;  %v8884_v20 = vld [vmem:[#allocation2 + $0x778] sm:$0xf0]  ;;  %v9079_v45 = vor.u32 %v11890_v27, %v9076_v30  ;;  %v8860_v48 = vld [vmem:[#allocation2 + $0x748] sm:$0xf0] }
 0x10d   :  { %2362 = vmatpush.bf16.msrb.mxu3 %v8287_v21  ;;  %v8215_v21 = vor.u32 %v11674_v61, %v8212_v10  ;;  %v11656_v61 = vld [vmem:[#allocation2 + $0x194] sm:$0xf]  ;;  %v8140_v10 = vld [vmem:[#allocation2 + $0x1a8] sm:$0xf0]  ;;  %v11770_v27 = vld [vmem:[#allocation2 + $0x524] sm:$0xf] }
 0x10e   :  { %2321 = vmatpush.bf16.msrb.mxu0 %v8835_v33  ;;  %v2023_v33 = vadd.f32 %v2022_v50, %v446_v7  ;;  %v7972_v50 = vld [vmem:[#allocation2 + $0x58] sm:$0xf0]  ;;  %v1979_v15 = vadd.f32 %v12997_v62, %v1965_v1  ;;  %v8907_v62 = vor.u32 %v11851_v4, %v8906_v3  ;;  %v8143_v32 = vor.u32 %v11656_v61, %v8140_v10  ;;  %v8668_v1 = vld [vmem:[#allocation2 + $0x5c8] sm:$0xf0] }
 0x10f   :  { %2335 = vmatpush.bf16.msrb.mxu1 %v9027_v34  ;;  %v8763_v34 = vor.u32 %v11815_v18, %v8762_v17  ;;  %v8692_v18 = vld [vmem:[#allocation2 + $0x5f8] sm:$0xf0] }
 0x110   :  { %2349 = vmatpush.bf16.msrb.mxu2 %v8071_v36  ;;  %v1967_v36 = vadd.f32 %v13001_v24, %v1953_v14  ;;  %v8164_v24 = vld [vmem:[#allocation2 + $0x1d8] sm:$0xf0]  ;;  %v2037_v54 = vadd.f32 %v2036_v8, %v2023_v33  ;;  %v7948_v8 = vld [vmem:[#allocation2 + $0x28] sm:$0xf0] }
 0x111   :  { %2363 = vmatpush.bf16.msrb.mxu3 %v8263_v41  ;;  %v11809_v41 = vld [vmem:[#allocation2 + $0x654] sm:$0xf0]  ;;  %v8500_v14 = vld [vmem:[#allocation2 + $0x478] sm:$0xf0]  ;;  %v7951_v26 = vor.u32 %v11608_v5, %v7948_v8 }
 0x112   :  { %2322 = vmatpush.bf16.msrb.mxu0 %v8811_v53  ;;  %v11662_v53 = vld [vmem:[#allocation2 + $0x1c4] sm:$0xf]  ;;  %v1981_v59 = vadd.f32 %v13005_v44, %v1967_v36  ;;  %v2064_v25 = vpop.f32.mrf.mxu1  ;;  %v9028_v4 = vld [vmem:[#allocation2 + $0x898] sm:$0xf0] }
 0x113   :  { %2336 = vmatpush.bf16.msrb.mxu1 %v9003_v55  ;;  %v8739_v55 = vor.u32 %v11809_v41, %v8738_v40  ;;  %v8167_v7 = vor.u32 %v11662_v53, %v8164_v24  ;;  %v11746_v44 = vld [vmem:[#allocation2 + $0x464] sm:$0xf]  ;;  %v8476_v40 = vld [vmem:[#allocation2 + $0x448] sm:$0xf0] }
 0x114   :  { %2350 = vmatpush.bf16.msrb.mxu2 %v8047_v56  ;;  %v8714_v56 = vld [vmem:[#allocation2 + $0x610] sm:$0xf]  ;;  %v8503_v12 = vor.u32 %v11746_v44, %v8500_v14  ;;  %v8428_v44 = vld [vmem:[#allocation2 + $0x3e8] sm:$0xf0] }
 0x115   :  { %2364 = vmatpush.bf16.msrb.mxu3 %v8239_v2  ;;  %v7975_v2 = vor.u32 %v11614_v51, %v7972_v50  ;;  %v8715_v17 = vor.u32 %v11803_v58, %v8714_v56  ;;  %v9052_v50 = vld [vmem:[#allocation2 + $0x8c8] sm:$0xf0]  ;;  %v8452_v58 = vld [vmem:[#allocation2 + $0x418] sm:$0xf0] }
 0x116   :  { %2323 = vmatpush.bf16.msrb.mxu0 %v8787_v11  ;;  %v2049_v11 = vadd.f32 %v13027_v9, %v2035_v52  ;;  %v1993_v9 = vadd.f32 %v13003_v42, %v1979_v15  ;;  %v11884_v42 = vld [vmem:[#allocation2 + $0x8b4] sm:$0xf] }
 0x117   :  { %2337 = vmatpush.bf16.msrb.mxu1 %v8979_v16  ;;  %v11794_v16 = vld [vmem:[#allocation2 + $0x5e4] sm:$0xf] }
 0x118   :  { %2351 = vmatpush.bf16.msrb.mxu2 %v8023_v28  ;;  %v2051_v28 = vadd.f32 %v2050_v63, %v2037_v54  ;;  %v2063_v33 = vadd.f32 %v13032_v31, %v2049_v11  ;;  %v8695_v36 = vor.u32 %v11794_v16, %v8692_v18  ;;  %v13051_v31 = vadd.f32 %v13007_v60, %v1993_v9  ;;  %v2092_v54 = vpop.f32.mrf.mxu3  ;;  %v8644_v60 = vld [vmem:[#allocation2 + $0x598] sm:$0xf0]  ;;  %v11728_v11 = vld [vmem:[#allocation2 + $0x3d4] sm:$0xf]  ;;  %v8620_v16 = vld [vmem:[#allocation2 + $0x568] sm:$0xf0] }
 0x119   :  { %2365 = vmatpush.bf16.msrb.mxu3 %v8215_v21  ;;  %v1995_v21 = vadd.f32 %v13016_v29, %v1981_v59  ;;  %v11788_v29 = vld [vmem:[#allocation2 + $0x5b4] sm:$0xf]  ;;  %v11782_v59 = vld [vmem:[#allocation2 + $0x584] sm:$0xf]  ;;  %v9055_v63 = vor.u32 %v11884_v42, %v9052_v50  ;;  %v8596_v9 = vld [vmem:[#allocation2 + $0x538] sm:$0xf0] }
 0x11a   :  { %2324 = vmatpush.bf16.msrb.mxu0 %v8763_v34  ;;  %v2078_v34 = vpop.f32.mrf.mxu2  ;;  %v2065_v41 = vadd.f32 %v2064_v25, %v2051_v28  ;;  %v2077_v24 = vadd.f32 %v13035_v37, %v2063_v33  ;;  %v11878_v37 = vld [vmem:[#allocation2 + $0x884] sm:$0xf]  ;;  %v9080_v5 = vmul.f32 -1.442695, %v13051_v31  ;;  %v8647_v61 = vor.u32 %v11782_v59, %v8644_v60  ;;  %v11824_v28 = vld [vmem:[#allocation2 + $0x6d4] sm:$0xf] }
 0x11b   :  { %2338 = vmatpush.bf16.msrb.mxu1 %v8955_v43  ;;  %v8887_v43 = vor.u32 %v11842_v19, %v8884_v20  ;;  %v13048_v51 = vadd.f32 %v13022_v49, %v1995_v21  ;;  %v11734_v49 = vld [vmem:[#allocation2 + $0x404] sm:$0xf]  ;;  %v9031_v14 = vor.u32 %v11878_v37, %v9028_v4  ;;  %v11872_v18 = vld [vmem:[#allocation2 + $0x854] sm:$0xf]  ;;  %v9004_v19 = vld [vmem:[#allocation2 + $0x868] sm:$0xf0] }
 0x11c   :  { %2352 = vmatpush.bf16.msrb.mxu2 %v7999_v38  ;;  %v11740_v38 = vld [vmem:[#allocation2 + $0x434] sm:$0xf]  ;;  %v2079_v52 = vadd.f32 %v2078_v34, %v2065_v41  ;;  %v13063_v8 = vadd.f32 %v13040_v0, %v2077_v24  ;;  %v8431_v0 = vor.u32 %v11728_v11, %v8428_v44  ;;  %v11722_v20 = vld [vmem:[#allocation2 + $0x3a4] sm:$0xf]  ;;  %v9007_v30 = vor.u32 %v11872_v18, %v9004_v19  ;;  %v8980_v34 = vld [vmem:[#allocation2 + $0x838] sm:$0xf0] }
 0x11d   :  { %2366 = vmatpush.bf16.msrb.mxu3 %v8191_v46  ;;  %v11836_v46 = vld [vmem:[#allocation2 + $0x734] sm:$0xf]  ;;  %v8479_v53 = vor.u32 %v11740_v38, %v8476_v40  ;;  %v9086_v3 = vmul.f32 -1.442695, %v13048_v51  ;;  %v11866_v33 = vld [vmem:[#allocation2 + $0x824] sm:$0xf]  ;;  %v8599_v38 = vor.u32 %v11770_v27, %v8596_v9 }
 0x11e   :  { %2325 = vmatpush.bf16.msrb.mxu0 %v8739_v55  ;;  %v8671_v55 = vor.u32 %v11788_v29, %v8668_v1  ;;  %v8863_v56 = vor.u32 %v11836_v46, %v8860_v48  ;;  %v13059_v15 = vadd.f32 %v2092_v54, %v2079_v52  ;;  %v9081_v21 = vmul.f32 -1.442695, %v13063_v8  ;;  %v11716_v29 = vld [vmem:[#allocation2 + $0x374] sm:$0xf]  ;;  %v8380_v41 = vld [vmem:[#allocation2 + $0x388] sm:$0xf0] }
 0x11f   :  { %2339 = vmatpush.bf16.msrb.mxu1 %v8931_v47  ;;  %v11830_v47 = vld [vmem:[#allocation2 + $0x704] sm:$0xf]  ;;  %12531 = vpow2.f32 %v9086_v3  ;;  %v8983_v1 = vor.u32 %v11866_v33, %v8980_v34  ;;  %v8572_v46 = vld [vmem:[#allocation2 + $0x508] sm:$0xf0]  ;;  %v11812_v48 = vld [vmem:[#allocation2 + $0x674] sm:$0xf]  ;;  %v8383_v54 = vor.u32 %v11716_v29, %v8380_v41 }
 0x120   :  { %2353 = vmatpush.bf16.msrb.mxu2 %v7975_v2  ;;  %v8836_v2 = vld [vmem:[#allocation2 + $0x718] sm:$0xf0]  ;;  %12533 = vpow2.f32 %v9080_v5  ;;  %v8764_v42 = vld [vmem:[#allocation2 + $0x688] sm:$0xf0]  ;;  %v11860_v50 = vld [vmem:[#allocation2 + $0x7f4] sm:$0xf] }
 0x121   :  { %2367 = vmatpush.bf16.msrb.mxu3 %v8167_v7  ;;  %v8455_v7 = vor.u32 %v11734_v49, %v8452_v58  ;;  %v8839_v10 = vor.u32 %v11830_v47, %v8836_v2  ;;  %v8956_v52 = vld [vmem:[#allocation2 + $0x808] sm:$0xf0]  ;;  %v8767_v49 = vor.u32 %v11812_v48, %v8764_v42  ;;  %v8356_v59 = vld [vmem:[#allocation2 + $0x358] sm:$0xf0]  ;;  %v447_v3 = vperm.slane %v13011_v13, 2 }
 0x122   :  { %2326 = vmatpush.bf16.msrb.mxu0 %v8715_v17  ;;  %v8812_v17 = vld [vmem:[#allocation2 + $0x6e8] sm:$0xf0]  ;;  %v2104_v58 = vpop.f32.mrf.mxu0  ;;  %v8548_v60 = vld [vmem:[#allocation2 + $0x4d8] sm:$0xf0]  ;;  %v8959_v2 = vor.u32 %v11860_v50, %v8956_v52  ;;  %v11806_v37 = vld [vmem:[#allocation2 + $0x644] sm:$0xf] }
 0x123   :  { %2340 = vmatpush.bf16.msrb.mxu1 %v8907_v62  ;;  %v8815_v62 = vor.u32 %v11824_v28, %v8812_v17  ;;  %v8740_v4 = vld [vmem:[#allocation2 + $0x658] sm:$0xf0]  ;;  %v2118_v5 = vpop.f32.mrf.mxu1  ;;  %v8524_v19 = vld [vmem:[#allocation2 + $0x4a8] sm:$0xf0]  ;;  %v9262_v27 = vld [vmem:[#allocation6 + $0x150] sm:$0xf] }
 0x124   :  { %2354 = vmatpush.bf16.msrb.mxu2 %v7951_v26  ;;  %v8404_v26 = vld [vmem:[#allocation2 + $0x3b8] sm:$0xf0]  ;;  %v8743_v18 = vor.u32 %v11806_v37, %v8740_v4  ;;  %v9646_v41 = vld [vmem:[#allocation6 + $0x450] sm:$0xf]  ;;  %v9238_v48 = vld [vmem:[#allocation6 + $0x120] sm:$0xf] }
 0x125   :  { %2368 = vmatpush.bf16.msrb.mxu3 %v8143_v32  ;;  %2327 = vmatmul.bf16.vlgmr.msrb.gmra.mxu0 %v12965_v35  ;;  %v11818_v32 = vld [vmem:[#allocation2 + $0x6a4] sm:$0xf]  ;;  %v8932_v11 = vld [vmem:[#allocation2 + $0x7d8] sm:$0xf0]  ;;  %v9214_v4 = vld [vmem:[#allocation6 + $0xf0] sm:$0xf] }
 0x126   :  { %2375 = vmatpush.bf16.msra.mxu0 %v8503_v12  ;;  %2341 = vmatmul.bf16.vlgmr.msrb.gmra.mxu1 %v12967_v39  ;;  %v8788_v12 = vld [vmem:[#allocation2 + $0x6b8] sm:$0xf0]  ;;  %v9430_v50 = vld [vmem:[#allocation6 + $0x2a0] sm:$0xf] }
 0x127   :  { %2389 = vmatpush.bf16.msra.mxu1 %v8695_v36  ;;  %2355 = vmatmul.bf16.vlgmr.msrb.gmra.mxu2 %v12923_v57  ;;  %v11776_v57 = vld [vmem:[#allocation2 + $0x554] sm:$0xf]  ;;  %v8407_v36 = vor.u32 %v11722_v20, %v8404_v26  ;;  %v8791_v40 = vor.u32 %v11818_v32, %v8788_v12  ;;  %v2105_v20 = vadd.f32 %v2104_v58, %v447_v3  ;;  %v8908_v26 = vld [vmem:[#allocation2 + $0x7a8] sm:$0xf0]  ;;  %v11933_v42 = vld [vmem:[#allocation6 + $0x134] sm:$0xf0] }
 0x128   :  { %2403 = vmatpush.bf16.msra.mxu2 %v8887_v43  ;;  %2369 = vmatmul.bf16.vlgmr.msrb.gmra.mxu3 %v12932_v6  ;;  %v9087_v6 = vmul.f32 -1.442695, %v13059_v15  ;;  %v8623_v25 = vor.u32 %v11776_v57, %v8620_v16  ;;  %v12532_v43 = vpop.eup %12531  ;;  %v11704_v57 = vld [vmem:[#allocation2 + $0x314] sm:$0xf]  ;;  %v11987_v12 = vld [vmem:[#allocation6 + $0x2e4] sm:$0xf0] }
 0x129   :  { %2417 = vmatpush.bf16.msra.mxu3 %v9079_v45  ;;  %v11764_v45 = vld [vmem:[#allocation2 + $0x4f4] sm:$0xf]  ;;  %v13067_v24 = vadd.f32 1.0, %v12532_v43  ;;  %v11981_v52 = vld [vmem:[#allocation6 + $0x2b4] sm:$0xf0] }
 0x12a   :  { %2376 = vmatpush.bf16.msra.mxu0 %v8479_v53  ;;  %12535 = vpow2.f32 %v9087_v6  ;;  %v12534_v53 = vpop.eup %12533  ;;  %v11752_v16 = vld [vmem:[#allocation2 + $0x494] sm:$0xf]  ;;  %v9431_v37 = vor.u32 %v11981_v52, %v9430_v50 }
 0x12b   :  { %2390 = vmatpush.bf16.msra.mxu1 %v8671_v55  ;;  %12537 = vpow2.f32 %v9081_v21  ;;  %v11710_v55 = vld [vmem:[#allocation2 + $0x344] sm:$0xf]  ;;  %v11800_v6 = vld [vmem:[#allocation2 + $0x614] sm:$0xf]  ;;  %v8527_v33 = vor.u32 %v11752_v16, %v8524_v19  ;;  %vm2574_vm4 = vweird.f32 %v13067_v24 }
 0x12c   :  { %2404 = vmatpush.bf16.msra.mxu2 %v8863_v56  ;;  %v8575_v56 = vor.u32 %v11764_v45, %v8572_v46  ;;  %12539 = vrcp.f32 %v13067_v24  ;;  %v8359_v44 = vor.u32 %v11710_v55, %v8356_v59  ;;  %v9454_v32 = vld [vmem:[#allocation6 + $0x2d0] sm:$0xf]  ;;  %v12035_v45 = vld [vmem:[#allocation6 + $0x464] sm:$0xf0]  ;;  %v2106_v46 = vpop.f32.mrf.mxu0  ;;  %v9239_v59 = vor.u32 %v11933_v42, %v9238_v48  ;;  %v9190_v19 = vld [vmem:[#allocation6 + $0xc0] sm:$0xf] }
 0x12d   :  { %2418 = vmatpush.bf16.msra.mxu3 %v9055_v63  ;;  %v11758_v63 = vld [vmem:[#allocation2 + $0x4c4] sm:$0xf]  ;;  %v2107_v58 = vadd.f32 %v2106_v46, %v447_v3  ;;  %v9406_v3 = vld [vmem:[#allocation6 + $0x270] sm:$0xf]  ;;  %v11915_v48 = vld [vmem:[#allocation6 + $0xa4] sm:$0xf0] }
 0x12e   :  { %2377 = vmatpush.bf16.msra.mxu0 %v8455_v7  ;;  %v8551_v17 = vor.u32 %v11758_v63, %v8548_v60  ;;  %v9622_v60 = vld [vmem:[#allocation6 + $0x420] sm:$0xf]  ;;  %v9166_v46 = vld [vmem:[#allocation6 + $0x90] sm:$0xf] }
 0x12f   :  { %2391 = vmatpush.bf16.msra.mxu1 %v8647_v61  ;;  %v13070_v61 = vadd.f32 1.0, %v12534_v53  ;;  %v2120_v53 = vpop.f32.mrf.mxu1 }
 0x130   :  { %2405 = vmatpush.bf16.msra.mxu2 %v8839_v10  ;;  %v12536_v47 = vpop.eup %12535  ;;  %v11854_v10 = vld [vmem:[#allocation2 + $0x7c4] sm:$0xf] }
 0x131   :  { %2419 = vmatpush.bf16.msra.mxu3 %v9031_v14  ;;  %v12538_v7 = vpop.eup %12537  ;;  %v8332_v14 = vld [vmem:[#allocation2 + $0x328] sm:$0xf0]  ;;  %v13073_v28 = vadd.f32 1.0, %v12536_v47  ;;  %v8935_v21 = vor.u32 %v11854_v10, %v8932_v11  ;;  %12541 = vrcp.f32 %v13070_v61  ;;  %v12029_v47 = vld [vmem:[#allocation6 + $0x434] sm:$0xf0]  ;;  %vm2484_vm2 = vweird.f32 %v13070_v61 }
 0x132   :  { %2378 = vmatpush.bf16.msra.mxu0 %v8431_v0  ;;  %v13075_v0 = vadd.f32 1.0, %v12538_v7  ;;  %v8335_v9 = vor.u32 %v11704_v57, %v8332_v14  ;;  %v13081_v43 = vpop.eup %12539  ;;  %v11975_v10 = vld [vmem:[#allocation6 + $0x284] sm:$0xf0]  ;;  %v9623_v57 = vor.u32 %v12029_v47, %v9622_v60  ;;  %v2121_v14 = vadd.f32 %v2120_v53, %v2107_v58 }
 0x133   :  { %2392 = vmatpush.bf16.msra.mxu1 %v8623_v25  ;;  %v8716_v25 = vld [vmem:[#allocation2 + $0x628] sm:$0xf0]  ;;  %12543 = vrcp.f32 %v13073_v28  ;;  %v2570_v55 = vmul.f32 %v13081_v43, %v13067_v24  ;;  %vm2575_vm0 = vweird.f32 %v13081_v43  ;;  %vm2589_vm10 = vweird.f32 %v13073_v28 }
 0x134   :  { %2406 = vmatpush.bf16.msra.mxu2 %v8815_v62  ;;  %v11848_v62 = vld [vmem:[#allocation2 + $0x794] sm:$0xf]  ;;  %v8719_v34 = vor.u32 %v11800_v6, %v8716_v25  ;;  %12545 = vrcp.f32 %v13075_v0  ;;  %v11921_v6 = vld [vmem:[#allocation6 + $0xd4] sm:$0xf0]  ;;  %v2490_v25 = vand.u32 2147483648, %v13070_v61  ;;  %vm13136_vm5 = vmor %vm2574_vm4, %vm2575_vm0  ;;  %vm2499_vm8 = vweird.f32 %v13075_v0 }
 0x135   :  { %2420 = vmatpush.bf16.msra.mxu3 %v9007_v30  ;;  %v11939_v30 = vld [vmem:[#allocation6 + $0x164] sm:$0xf0] }
 0x136   :  { %2379 = vmatpush.bf16.msra.mxu0 %v8407_v36  ;;  %v2132_v36 = vpop.f32.mrf.mxu2  ;;  %v9263_v29 = vor.u32 %v11939_v30, %v9262_v27  ;;  %v2578_v30 = vand.u32 2147483647, %v13067_v24  ;;  %v13110_v52 = vor.u32 1.1754944e-38, %v2490_v25 }
 0x137   :  { %2393 = vmatpush.bf16.msra.mxu1 %v8599_v38  ;;  %v2119_v38 = vadd.f32 %v2118_v5, %v2105_v20  ;;  %v11927_v5 = vld [vmem:[#allocation6 + $0x104] sm:$0xf0] }
 0x138   :  { %2407 = vmatpush.bf16.msra.mxu2 %v8791_v40  ;;  %v8911_v40 = vor.u32 %v11848_v62, %v8908_v26  ;;  %v9215_v16 = vor.u32 %v11927_v5, %v9214_v4  ;;  %v9382_v62 = vld [vmem:[#allocation6 + $0x240] sm:$0xf]  ;;  %v11969_v26 = vld [vmem:[#allocation6 + $0x254] sm:$0xf0]  ;;  %vm13122_vm1 = vcmp.eq.f32.partialorder %v2578_v30, 8.507059e+37  ;;  %v9167_v5 = vor.u32 %v11915_v48, %v9166_v46 }
 0x139   :  { %2421 = vmatpush.bf16.msra.mxu3 %v8983_v1  ;;  %v9455_v1 = vor.u32 %v11987_v12, %v9454_v32  ;;  %v2133_v63 = vadd.f32 %v2132_v36, %v2119_v38  ;;  %v9191_v36 = vor.u32 %v11921_v6, %v9190_v19  ;;  %v448_v19 = vperm.slane %v13011_v13, 3  ;;  %v9742_v13 = vld [vmem:[#allocation6 + $0x510] sm:$0xf]  ;;  %v9216_v48 = vld [vmem:[#allocation6 + $0x108] sm:$0xf0] }
 0x13a   :  { %2380 = vmatpush.bf16.msra.mxu0 %v8383_v54  ;;  %v13084_v54 = vpop.eup %12541 }
 0x13b   :  { %2394 = vmatpush.bf16.msra.mxu1 %v8575_v56  ;;  %v2146_v56 = vpop.f32.mrf.mxu3  ;;  %v2480_v7 = vmul.f32 %v13084_v54, %v13070_v61  ;;  %vm2485_vm3 = vweird.f32 %v13084_v54 }
 0x13c   :  { %2408 = vmatpush.bf16.msra.mxu2 %v8767_v49  ;;  %v9647_v49 = vor.u32 %v12035_v45, %v9646_v41  ;;  %v12017_v41 = vld [vmem:[#allocation6 + $0x3d4] sm:$0xf0]  ;;  %v2488_v45 = vand.u32 2147483647, %v13070_v61  ;;  %vm13161_vm11 = vmor %vm2484_vm2, %vm2485_vm3 }
 0x13d   :  { %2422 = vmatpush.bf16.msra.mxu3 %v8959_v2  ;;  %v13090_v2 = vpop.eup %12543  ;;  %v12053_v61 = vld [vmem:[#allocation6 + $0x4f4] sm:$0xf0] }
 0x13e   :  { %2381 = vmatpush.bf16.msra.mxu0 %v8359_v44  ;;  %v13097_v11 = vpop.eup %12545  ;;  %v2571_v44 = vsub.f32 1.0, %v2570_v55  ;;  %v2134_v20 = vpop.f32.mrf.mxu2  ;;  %vm13141_vm6 = vcmp.eq.f32.partialorder %v2488_v45, 8.507059e+37  ;;  %vm2590_vm7 = vweird.f32 %v13090_v2  ;;  %v9310_v45 = vld [vmem:[#allocation6 + $0x1b0] sm:$0xf] }
 0x13f   :  { %2395 = vmatpush.bf16.msra.mxu1 %v8551_v17  ;;  %v2147_v17 = vadd.f32 %v2146_v56, %v2133_v63  ;;  %v9358_v56 = vld [vmem:[#allocation6 + $0x210] sm:$0xf]  ;;  %v13120_v63 = vld [vmem:[#allocation6 + $0x60] sm:$0xf]  ;;  %vm2500_vm9 = vweird.f32 %v13097_v11  ;;  %vm13178_vm13 = vmor %vm2589_vm10, %vm2590_vm7 }
 0x140   :  { %2409 = vmatpush.bf16.msra.mxu2 %v8743_v18  ;;  %v9598_v18 = vld [vmem:[#allocation6 + $0x3f0] sm:$0xf]  ;;  %v2572_v27 = vmul.f32 %v13081_v43, %v2571_v44  ;;  %vm13197_vm14 = vmor %vm2499_vm8, %vm2500_vm9 }
 0x141   :  { %2423 = vmatpush.bf16.msra.mxu3 %v8935_v21  ;;  %v2481_v21 = vsub.f32 1.0, %v2480_v7 }
 0x142   :  { %2382 = vmatpush.bf16.msra.mxu0 %v8335_v9  ;;  %v2580_v9 = vand.u32 2147483648, %v13067_v24  ;;  %v2160_v32 = vpop.f32.mrf.mxu0  ;;  %v13115_v58 = vadd.f32 %v13081_v43, %v2572_v27 }
 0x143   :  { %2396 = vmatpush.bf16.msra.mxu1 %v8527_v33  ;;  %v2174_v38 = vpop.f32.mrf.mxu1  ;;  %v2148_v42 = vpop.f32.mrf.mxu3  ;;  %v2482_v50 = vmul.f32 %v13084_v54, %v2481_v21  ;;  %v2595_v21 = vand.u32 2147483648, %v13073_v28 }
 0x144   :  { %2410 = vmatpush.bf16.msra.mxu2 %v8719_v34  ;;  %v2161_v34 = vadd.f32 %v2160_v32, %v2147_v17  ;;  %v2577_v6 = vsel %vm13136_vm5, %v13081_v43, %v13115_v58  ;;  %v9526_v32 = vld [vmem:[#allocation6 + $0x360] sm:$0xf] }
 0x145   :  { %2424 = vmatpush.bf16.msra.mxu3 %v8911_v40  ;;  %2383 = vmatmul.bf16.vlgmr.msra.gmra.mxu0 %v12947_v22  ;;  %v2585_v22 = vmul.f32 %v13090_v2, %v13073_v28  ;;  %v2135_v40 = vadd.f32 %v2134_v20, %v2121_v14  ;;  %v12083_v14 = vld [vmem:[#allocation6 + $0x5e4] sm:$0xf0]  ;;  %v2503_v20 = vand.u32 2147483647, %v13075_v0 }
 0x146   :  { %4419 = vmatpush.bf16.msrb.mxu0 %v9263_v29  ;;  %2397 = vmatmul.bf16.vlgmr.msra.gmra.mxu1 %v12949_v23  ;;  %v12023_v23 = vld [vmem:[#allocation6 + $0x404] sm:$0xf0]  ;;  %v9574_v29 = vld [vmem:[#allocation6 + $0x3c0] sm:$0xf]  ;;  %v13112_v55 = vadd.f32 %v2174_v38, %v2161_v34 }
 0x147   :  { %4433 = vmatpush.bf16.msrb.mxu1 %v9455_v1  ;;  %2411 = vmatmul.bf16.vlgmr.msra.gmra.mxu2 %v12965_v35  ;;  %v9407_v35 = vor.u32 %v11975_v10, %v9406_v3  ;;  %v9599_v12 = vor.u32 %v12023_v23, %v9598_v18  ;;  %v2586_v33 = vsub.f32 1.0, %v2585_v22  ;;  %v9383_v1 = vor.u32 %v11969_v26, %v9382_v62  ;;  %v9550_v3 = vld [vmem:[#allocation6 + $0x390] sm:$0xf]  ;;  %v12011_v10 = vld [vmem:[#allocation6 + $0x3a4] sm:$0xf0] }
 0x148   :  { %2425 = vmatmul.bf16.vlgmr.msra.gmra.mxu3 %v12967_v39  ;;  %4447 = vmatpush.bf16.msrb.mxu2 %v9647_v49  ;;  %v2495_v39 = vmul.f32 %v13097_v11, %v13075_v0  ;;  %v11963_v49 = vld [vmem:[#allocation6 + $0x224] sm:$0xf0]  ;;  %v9575_v60 = vor.u32 %v12017_v41, %v9574_v29  ;;  %v9082_v4 = vmul.f32 -1.442695, %v13112_v55  ;;  %v2149_v7 = vadd.f32 %v2148_v42, %v2135_v40  ;;  %v9838_v22 = vld [vmem:[#allocation6 + $0x5d0] sm:$0xf] }
 0x149   :  { %v9359_v44 = vor.u32 %v11963_v49, %v9358_v56  ;;  %v9334_v23 = vld [vmem:[#allocation6 + $0x1e0] sm:$0xf]  ;;  %v9839_v24 = vor.u32 %v12083_v14, %v9838_v22  ;;  %v2593_v29 = vand.u32 2147483647, %v13073_v28  ;;  %vm13169_vm12 = vcmp.eq.f32.partialorder %v2503_v20, 8.507059e+37 }
 0x14a   :  { %4420 = vmatpush.bf16.msrb.mxu0 %v9239_v59  ;;  %v2496_v53 = vsub.f32 1.0, %v2495_v39  ;;  %v13118_v59 = vor.u32 1.1754944e-38, %v2580_v9  ;;  %12547 = vpow2.f32 %v9082_v4  ;;  %v2162_v25 = vpop.f32.mrf.mxu0  ;;  %v9551_v39 = vor.u32 %v12011_v10, %v9550_v3  ;;  %v9118_v9 = vld [vmem:[#allocation6 + $0x30] sm:$0xf]  ;;  %v9814_v34 = vld [vmem:[#allocation6 + $0x5a0] sm:$0xf] }
 0x14b   :  { %4434 = vmatpush.bf16.msrb.mxu1 %v9431_v37  ;;  %v2587_v37 = vmul.f32 %v13090_v2, %v2586_v33  ;;  %v2163_v26 = vadd.f32 %v2162_v25, %v2149_v7  ;;  %v2176_v30 = vpop.f32.mrf.mxu1  ;;  %4461 = vmatpush.bf16.msrb.mxu3 %v9839_v24  ;;  %v11903_v33 = vld [vmem:[#allocation6 + $0x44] sm:$0xf0]  ;;  %v2505_v42 = vand.u32 2147483648, %v13075_v0  ;;  %v9790_v10 = vld [vmem:[#allocation6 + $0x570] sm:$0xf]  ;;  %vm2594_vm15 = vcmp.eq.f32.partialorder %v2593_v29, 8.507059e+37  ;;  %v2202_v25 = vpop.f32.mrf.mxu3 }
 0x14c   :  { %4448 = vmatpush.bf16.msrb.mxu2 %v9623_v57  ;;  %v11909_v57 = vld [vmem:[#allocation6 + $0x74] sm:$0xf0]  ;;  %v2497_v18 = vmul.f32 %v13097_v11, %v2496_v53  ;;  %v11999_v4 = vld [vmem:[#allocation6 + $0x344] sm:$0xf0]  ;;  %v11936_v24 = vld [vmem:[#allocation6 + $0x154] sm:$0xf] }
 0x14d   :  { %v2588_v62 = vadd.f32 %v13090_v2, %v2587_v37  ;;  %v9143_v27 = vor.u32 %v11909_v57, %v13120_v63  ;;  %v13167_v41 = vadd.f32 %v2176_v30, %v2163_v26  ;;  %v11897_v53 = vld [vmem:[#allocation6 + $0x14] sm:$0xf0]  ;;  %v9502_v37 = vld [vmem:[#allocation6 + $0x330] sm:$0xf]  ;;  %v2506_v22 = vor.u32 1.1754944e-38, %v2505_v42 }
 0x14e   :  { %4421 = vmatpush.bf16.msrb.mxu0 %v9215_v16  ;;  %v13132_v16 = vadd.f32 %v13084_v54, %v2482_v50  ;;  %v2498_v40 = vadd.f32 %v13097_v11, %v2497_v18  ;;  %v9094_v50 = vld [vmem:[#allocation6] sm:$0xf]  ;;  %v11945_v57 = vld [vmem:[#allocation6 + $0x194] sm:$0xf0]  ;;  %v12059_v38 = vld [vmem:[#allocation6 + $0x524] sm:$0xf0] }
 0x14f   :  { %4435 = vmatpush.bf16.msrb.mxu1 %v9407_v35  ;;  %v11957_v35 = vld [vmem:[#allocation6 + $0x1f4] sm:$0xf0]  ;;  %v2592_v63 = vsel %vm13178_vm13, %v13090_v2, %v2588_v62  ;;  %v9088_v28 = vmul.f32 -1.442695, %v13167_v41  ;;  %v2596_v2 = vor.u32 1.1754944e-38, %v2595_v21  ;;  %v9095_v18 = vor.u32 %v11897_v53, %v9094_v50 }
 0x150   :  { %4449 = vmatpush.bf16.msrb.mxu2 %v9599_v12  ;;  %v12005_v12 = vld [vmem:[#allocation6 + $0x374] sm:$0xf0]  ;;  %v9335_v43 = vor.u32 %v11957_v35, %v9334_v23  ;;  %v12548_v49 = vpop.eup %12547  ;;  %v2487_v58 = vsel %vm13161_vm11, %v13084_v54, %v13132_v16  ;;  %v2502_v47 = vsel %vm13197_vm14, %v13097_v11, %v2498_v40  ;;  %v9503_v16 = vor.u32 %v11999_v4, %v9502_v37  ;;  %v2188_v23 = vpop.f32.mrf.mxu2  ;;  %v9478_v35 = vld [vmem:[#allocation6 + $0x300] sm:$0xf]  ;;  %v9192_v4 = vld [vmem:[#allocation6 + $0xd8] sm:$0xf0] }
 0x151   :  { %v9527_v56 = vor.u32 %v12005_v12, %v9526_v32  ;;  %v13201_v7 = vadd.f32 1.0, %v12548_v49  ;;  %12549 = vpow2.f32 %v9088_v28  ;;  %v2597_v14 = vsel %vm2594_vm15, %v2596_v2, %v2592_v63  ;;  %v11993_v11 = vld [vmem:[#allocation6 + $0x314] sm:$0xf0]  ;;  %v9766_v62 = vld [vmem:[#allocation6 + $0x540] sm:$0xf] }
 0x152   :  { %4422 = vmatpush.bf16.msrb.mxu0 %v9191_v36  ;;  %v12077_v36 = vld [vmem:[#allocation6 + $0x5b4] sm:$0xf0]  ;;  %v2492_v17 = vsel %vm13141_vm6, %v13110_v52, %v2487_v58  ;;  %v2507_v20 = vsel %vm13169_vm12, %v2506_v22, %v2502_v47  ;;  %v2666_v52 = vmul.f32 %v2597_v14, %v13059_v15  ;;  %v9743_v29 = vor.u32 %v12059_v38, %v9742_v13  ;;  %v9718_v42 = vld [vmem:[#allocation6 + $0x4e0] sm:$0xf]  ;;  %v11918_v28 = vld [vmem:[#allocation6 + $0xc4] sm:$0xf] }
 0x153   :  { %4436 = vmatpush.bf16.msrb.mxu1 %v9383_v1  ;;  %v11951_v1 = vld [vmem:[#allocation6 + $0x1c4] sm:$0xf0]  ;;  %v9815_v46 = vor.u32 %v12077_v36, %v9814_v34  ;;  %12551 = vrcp.f32 %v13201_v7  ;;  %v12065_v26 = vld [vmem:[#allocation6 + $0x554] sm:$0xf0]  ;;  %v2659_v30 = vmul.f32 %v2492_v17, %v13051_v31  ;;  %v9719_v49 = vor.u32 %v12053_v61, %v9718_v42  ;;  %v2204_v58 = vpop.f32.mrf.mxu3  ;;  %v11978_v38 = vld [vmem:[#allocation6 + $0x2a4] sm:$0xf] }
 0x154   :  { %4450 = vmatpush.bf16.msrb.mxu2 %v9575_v60  ;;  %v9119_v60 = vor.u32 %v11903_v33, %v9118_v9  ;;  %v9311_v3 = vor.u32 %v11951_v1, %v9310_v45  ;;  %v9479_v9 = vor.u32 %v11993_v11, %v9478_v35  ;;  %v9240_v33 = vld [vmem:[#allocation6 + $0x138] sm:$0xf0]  ;;  %vm2514_vm0 = vweird.f32 %v13201_v7  ;;  %v12047_v54 = vld [vmem:[#allocation6 + $0x4c4] sm:$0xf0] }
 0x155   :  { %4462 = vmatpush.bf16.msrb.mxu3 %v9815_v46  ;;  %v11924_v46 = vld [vmem:[#allocation6 + $0xf4] sm:$0xf]  ;;  %v2518_v47 = vand.u32 2147483647, %v13201_v7  ;;  %v9195_v17 = vor.u32 %v11918_v28, %v9192_v4 }
 0x156   :  { %4423 = vmatpush.bf16.msrb.mxu0 %v9167_v5  ;;  %v2582_v5 = vsel %vm13122_vm1, %v13118_v59, %v2577_v6  ;;  %v9286_v59 = vld [vmem:[#allocation6 + $0x180] sm:$0xf]  ;;  %v9219_v63 = vor.u32 %v11924_v46, %v9216_v48 }
 0x157   :  { %4437 = vmatpush.bf16.msrb.mxu1 %v9359_v44  ;;  %v12071_v44 = vld [vmem:[#allocation6 + $0x584] sm:$0xf0]  ;;  %v2665_v6 = vmul.f32 %v2582_v5, %v13048_v51  ;;  %v9287_v21 = vor.u32 %v11945_v57, %v9286_v59  ;;  %v12550_v32 = vpop.eup %12549  ;;  %v2660_v51 = vmul.f32 %v2507_v20, %v13063_v8  ;;  %v2189_v8 = vadd.f32 %v2188_v23, %v448_v19  ;;  %v9694_v5 = vld [vmem:[#allocation6 + $0x4b0] sm:$0xf] }
 0x158   :  { %4451 = vmatpush.bf16.msrb.mxu2 %v9551_v39  ;;  %v9791_v0 = vor.u32 %v12071_v44, %v9790_v10  ;;  %v9264_v39 = vld [vmem:[#allocation6 + $0x168] sm:$0xf0]  ;;  %v13221_v15 = vadd.f32 1.0, %v12550_v32  ;;  %v2520_v59 = vand.u32 2147483648, %v13201_v7  ;;  %v9695_v22 = vor.u32 %v12047_v54, %v9694_v5 }
 0x159   :  { %v9267_v12 = vor.u32 %v11936_v24, %v9264_v39  ;;  %v13217_v34 = vpop.eup %12551  ;;  %v13219_v36 = vpack.c.bf16 %v2665_v6, %v2659_v30  ;;  %v13223_v31 = vpack.c.bf16 %v2666_v52, %v2660_v51  ;;  %v2203_v53 = vadd.f32 %v2202_v25, %v2189_v8  ;;  %v9670_v24 = vld [vmem:[#allocation6 + $0x480] sm:$0xf]  ;;  %v12041_v6 = vld [vmem:[#allocation6 + $0x494] sm:$0xf0]  ;;  %v11984_v39 = vld [vmem:[#allocation6 + $0x2d4] sm:$0xf] }
 0x15a   :  { %4424 = vmatpush.bf16.msrb.mxu0 %v9143_v27  ;;  %4463 = vmatpush.bf16.msrb.mxu3 %v9791_v0  ;;  %v9767_v27 = vor.u32 %v12065_v26, %v9766_v62  ;;  %v2510_v40 = vmul.f32 %v13217_v34, %v13201_v7  ;;  %12553 = vrcp.f32 %v13221_v15  ;;  %vm2515_vm1 = vweird.f32 %v13217_v34  ;;  %v11912_v0 = vld [vmem:[#allocation6 + $0x94] sm:$0xf]  ;;  %v9456_v62 = vld [vmem:[#allocation6 + $0x2e8] sm:$0xf0] }
 0x15b   :  { %4438 = vmatpush.bf16.msrb.mxu1 %v9335_v43  ;;  %v11930_v43 = vld [vmem:[#allocation6 + $0x124] sm:$0xf]  ;;  %vm13240_vm2 = vmor %vm2514_vm0, %vm2515_vm1  ;;  %v2610_v35 = vand.u32 2147483648, %v13221_v15  ;;  %v9671_v25 = vor.u32 %v12041_v6, %v9670_v24  ;;  %v2521_v7 = vor.u32 1.1754944e-38, %v2520_v59  ;;  %v9459_v52 = vor.u32 %v11984_v39, %v9456_v62  ;;  %v10008_v62 = vld [vmem:[#allocation6 + $0x738] sm:$0xf0] }
 0x15c   :  { %4452 = vmatpush.bf16.msrb.mxu2 %v9527_v56  ;;  %v2511_v45 = vsub.f32 1.0, %v2510_v40  ;;  %v9243_v1 = vor.u32 %v11930_v43, %v9240_v33  ;;  %v2190_v56 = vpop.f32.mrf.mxu2  ;;  %vm2519_vm4 = vcmp.eq.f32.partialorder %v2518_v47, 8.507059e+37  ;;  %vm2604_vm5 = vweird.f32 %v13221_v15  ;;  %v11906_v33 = vld [vmem:[#allocation6 + $0x64] sm:$0xf]  ;;  %v9432_v40 = vld [vmem:[#allocation6 + $0x2b8] sm:$0xf0] }
 0x15d   :  { %v2191_v57 = vadd.f32 %v2190_v56, %v448_v19  ;;  %v2611_v32 = vor.u32 1.1754944e-38, %v2610_v35  ;;  %v9120_v56 = vld [vmem:[#allocation6 + $0x48] sm:$0xf0]  ;;  %v9384_v47 = vld [vmem:[#allocation6 + $0x258] sm:$0xf0] }
 0x15e   :  { %4425 = vmatpush.bf16.msrb.mxu0 %v9119_v60  ;;  %4464 = vmatpush.bf16.msrb.mxu3 %v9767_v27  ;;  %v2512_v50 = vmul.f32 %v13217_v34, %v2511_v45  ;;  %v9435_v45 = vor.u32 %v11978_v38, %v9432_v40  ;;  %v11960_v35 = vld [vmem:[#allocation6 + $0x214] sm:$0xf]  ;;  %v12122_v39 = vld [vmem:[#allocation6 + $0x724] sm:$0xf] }
 0x15f   :  { %4439 = vmatpush.bf16.msrb.mxu1 %v9311_v3  ;;  %v2205_v26 = vadd.f32 %v2204_v58, %v2191_v57  ;;  %v9408_v58 = vld [vmem:[#allocation6 + $0x288] sm:$0xf0]  ;;  %v11948_v40 = vld [vmem:[#allocation6 + $0x1b4] sm:$0xf] }
 0x160   :  { %4453 = vmatpush.bf16.msrb.mxu2 %v9503_v16  ;;  %v12554_v60 = vpop.eup %12553  ;;  %v2513_v2 = vadd.f32 %v13217_v34, %v2512_v50  ;;  %v2608_v16 = vand.u32 2147483647, %v13221_v15  ;;  %v11900_v50 = vld [vmem:[#allocation6 + $0x34] sm:$0xf]  ;;  %v10032_v57 = vld [vmem:[#allocation6 + $0x768] sm:$0xf0] }
 0x161   :  { %v2600_v3 = vmul.f32 %v12554_v60, %v13221_v15  ;;  %vm2605_vm3 = vweird.f32 %v12554_v60  ;;  %v9123_v54 = vor.u32 %v11900_v50, %v9120_v56  ;;  %v12104_v56 = vld [vmem:[#allocation6 + $0x694] sm:$0xf] }
 0x162   :  { %4426 = vmatpush.bf16.msrb.mxu0 %v9095_v18  ;;  %4465 = vmatpush.bf16.msrb.mxu3 %v9743_v29  ;;  %v2216_v37 = vpop.f32.mrf.mxu0  ;;  %v9168_v18 = vld [vmem:[#allocation6 + $0xa8] sm:$0xf0]  ;;  %v2517_v20 = vsel %vm13240_vm2, %v13217_v34, %v2513_v2  ;;  %vm2606_vm6 = vmor %vm2604_vm5, %vm2605_vm3  ;;  %v9144_v34 = vld [vmem:[#allocation6 + $0x78] sm:$0xf0]  ;;  %vm2609_vm7 = vcmp.eq.f32.partialorder %v2608_v16, 8.507059e+37 }
 0x163   :  { %4440 = vmatpush.bf16.msrb.mxu1 %v9287_v21  ;;  %v2217_v10 = vadd.f32 %v2216_v37, %v2203_v53  ;;  %v2230_v44 = vpop.f32.mrf.mxu1  ;;  %v2601_v14 = vsub.f32 1.0, %v2600_v3  ;;  %v9171_v30 = vor.u32 %v11912_v0, %v9168_v18  ;;  %v9147_v61 = vor.u32 %v11906_v33, %v9144_v34  ;;  %v12131_v37 = vld [vmem:[#allocation6 + $0x764] sm:$0xf0]  ;;  %v11894_v2 = vld [vmem:[#allocation6 + $0x4] sm:$0xf] }
 0x164   :  { %4454 = vmatpush.bf16.msrb.mxu2 %v9479_v9  ;;  %v2522_v9 = vsel %vm2519_vm4, %v2521_v7, %v2517_v20  ;;  %v9096_v3 = vld [vmem:[#allocation6 + $0x18] sm:$0xf0]  ;;  %v12110_v33 = vld [vmem:[#allocation6 + $0x6c4] sm:$0xf] }
 0x165   :  { %4427 = vmatmul.bf16.vlgmr.msrb.gmra.mxu0 %v13219_v36  ;;  %v2231_v11 = vadd.f32 %v2230_v44, %v2217_v10  ;;  %v2602_v21 = vmul.f32 %v12554_v60, %v2601_v14  ;;  %v12128_v10 = vld [vmem:[#allocation6 + $0x754] sm:$0xf]  ;;  %v11966_v44 = vld [vmem:[#allocation6 + $0x244] sm:$0xf]  ;;  %v12125_v14 = vld [vmem:[#allocation6 + $0x734] sm:$0xf0]  ;;  %v9099_v23 = vor.u32 %v11894_v2, %v9096_v3 }
 0x166   :  { %4441 = vmatmul.bf16.vlgmr.msrb.gmra.mxu1 %v13223_v31  ;;  %4466 = vmatpush.bf16.msrb.mxu3 %v9719_v49  ;;  %v11972_v49 = vld [vmem:[#allocation6 + $0x274] sm:$0xf]  ;;  %v9387_v0 = vor.u32 %v11966_v44, %v9384_v47  ;;  %v10035_v6 = vor.u32 %v12128_v10, %v10032_v57  ;;  %v9912_v10 = vld [vmem:[#allocation6 + $0x678] sm:$0xf0]  ;;  %v9886_v44 = vld [vmem:[#allocation6 + $0x630] sm:$0xf] }
 0x167   :  { %v2603_v19 = vadd.f32 %v12554_v60, %v2602_v21  ;;  %v9411_v28 = vor.u32 %v11972_v49, %v9408_v58  ;;  %v9982_v21 = vld [vmem:[#allocation6 + $0x6f0] sm:$0xf]  ;;  %v11942_v49 = vld [vmem:[#allocation6 + $0x184] sm:$0xf]  ;;  %v9288_v58 = vld [vmem:[#allocation6 + $0x198] sm:$0xf0] }
 0x168   :  { %4503 = vmatpush.bf16.msra.mxu2 %v9267_v12  ;;  %v12095_v47 = vld [vmem:[#allocation6 + $0x644] sm:$0xf0] }
 0x169   :  { %v2607_v13 = vsel %vm2606_vm6, %v12554_v60, %v2603_v19  ;;  %v10030_v60 = vld [vmem:[#allocation6 + $0x750] sm:$0xf]  ;;  %v9958_v19 = vld [vmem:[#allocation6 + $0x6c0] sm:$0xf] }
 0x16a   :  { %4467 = vmatpush.bf16.msrb.mxu3 %v9695_v22  ;;  %v2244_v27 = vpop.f32.mrf.mxu2  ;;  %v2218_v12 = vpop.f32.mrf.mxu0  ;;  %v2612_v8 = vsel %vm2609_vm7, %v2611_v32, %v2607_v13  ;;  %v10006_v22 = vld [vmem:[#allocation6 + $0x720] sm:$0xf]  ;;  %v12116_v32 = vld [vmem:[#allocation6 + $0x6f4] sm:$0xf] }
 0x16b   :  { %v2245_v51 = vadd.f32 %v2244_v27, %v2231_v11  ;;  %v2258_v43 = vpop.f32.mrf.mxu3  ;;  %v2219_v29 = vadd.f32 %v2218_v12, %v2205_v26  ;;  %v2667_v46 = vmul.f32 %v2612_v8, %v13167_v41  ;;  %v2232_v48 = vpop.f32.mrf.mxu1  ;;  %v10031_v41 = vor.u32 %v12131_v37, %v10030_v60  ;;  %v9360_v11 = vld [vmem:[#allocation6 + $0x228] sm:$0xf0]  ;;  %v11954_v26 = vld [vmem:[#allocation6 + $0x1e4] sm:$0xf]  ;;  %v12113_v27 = vld [vmem:[#allocation6 + $0x6d4] sm:$0xf0] }
 0x16c   :  { %4504 = vmatpush.bf16.msra.mxu2 %v9243_v1  ;;  %v2661_v1 = vmul.f32 %v2522_v9, %v13112_v55  ;;  %v10007_v16 = vor.u32 %v12125_v14, %v10006_v22  ;;  %v9363_v20 = vor.u32 %v11960_v35, %v9360_v11  ;;  %v9959_v12 = vor.u32 %v12113_v27, %v9958_v19  ;;  %v9312_v8 = vld [vmem:[#allocation6 + $0x1c8] sm:$0xf0]  ;;  %v9910_v37 = vld [vmem:[#allocation6 + $0x660] sm:$0xf]  ;;  %v12032_v19 = vld [vmem:[#allocation6 + $0x454] sm:$0xf] }
 0x16d   :  { %v13249_v15 = vadd.f32 %v2258_v43, %v2245_v51  ;;  %4475 = vmatpush.bf16.msra.mxu0 %v10031_v41  ;;  %v9984_v51 = vld [vmem:[#allocation6 + $0x708] sm:$0xf0]  ;;  %v9291_v60 = vor.u32 %v11942_v49, %v9288_v58  ;;  %v9887_v22 = vor.u32 %v12095_v47, %v9886_v44  ;;  %v12179_v49 = vld [vmem:[#allocation6 + $0x8e4] sm:$0xf0]  ;;  %v12176_v58 = vld [vmem:[#allocation6 + $0x8d4] sm:$0xf] }
 0x16e   :  { %4468 = vmatpush.bf16.msrb.mxu3 %v9671_v25  ;;  %v13254_v53 = vpack.c.bf16 %v2667_v46, %v2661_v1  ;;  %v12119_v25 = vld [vmem:[#allocation6 + $0x704] sm:$0xf0]  ;;  %v9987_v38 = vor.u32 %v12116_v32, %v9984_v51  ;;  %v9315_v1 = vor.u32 %v11948_v40, %v9312_v8  ;;  %v9934_v46 = vld [vmem:[#allocation6 + $0x690] sm:$0xf]  ;;  %v9648_v27 = vld [vmem:[#allocation6 + $0x468] sm:$0xf0] }
 0x16f   :  { %v9083_v42 = vmul.f32 -1.442695, %v13249_v15  ;;  %v9983_v7 = vor.u32 %v12119_v25, %v9982_v21  ;;  %v12092_v21 = vld [vmem:[#allocation6 + $0x634] sm:$0xf]  ;;  %v9651_v32 = vor.u32 %v12032_v19, %v9648_v27  ;;  %v9654_v40 = vld [vmem:[#allocation6 + $0x458] sm:$0xf] }
 0x170   :  { %4505 = vmatpush.bf16.msra.mxu2 %v9219_v63  ;;  %v2233_v63 = vadd.f32 %v2232_v48, %v2219_v29  ;;  %v12107_v48 = vld [vmem:[#allocation6 + $0x6a4] sm:$0xf0]  ;;  %v10198_v47 = vld [vmem:[#allocation6 + $0x8a0] sm:$0xf]  ;;  %v10176_v27 = vld [vmem:[#allocation6 + $0x888] sm:$0xf0] }
 0x171   :  { %12555 = vpow2.f32 %v9083_v42  ;;  %4455 = vmatmul.bf16.vlgmr.msrb.gmra.mxu2 %v13254_v53  ;;  %4476 = vmatpush.bf16.msra.mxu0 %v10007_v16  ;;  %v13278_v16 = vld [vmem:[#allocation4] sm:$0x3f] }
 0x172   :  { %4517 = vmatpush.bf16.msra.mxu3 %v9459_v52  ;;  %v2246_v55 = vpop.f32.mrf.mxu2  ;;  %v9336_v52 = vld [vmem:[#allocation6 + $0x1f8] sm:$0xf0] }
 0x173   :  { %v2247_v4 = vadd.f32 %v2246_v55, %v2233_v63  ;;  %v2260_v5 = vpop.f32.mrf.mxu3  ;;  %v9339_v9 = vor.u32 %v11954_v26, %v9336_v52  ;;  %v12101_v55 = vld [vmem:[#allocation6 + $0x674] sm:$0xf0] }
 0x174   :  { %4506 = vmatpush.bf16.msra.mxu2 %v9195_v17  ;;  %v9911_v41 = vor.u32 %v12101_v55, %v9910_v37  ;;  %v9630_v37 = vld [vmem:[#allocation6 + $0x428] sm:$0xf] }
 0x175   :  { %v13257_v59 = vadd.f32 %v2260_v5, %v2247_v4  ;;  %4477 = vmatpush.bf16.msra.mxu0 %v9983_v7  ;;  %v12089_v7 = vld [vmem:[#allocation6 + $0x614] sm:$0xf0] }
 0x176   :  { %4518 = vmatpush.bf16.msra.mxu3 %v9435_v45  ;;  %v9960_v45 = vld [vmem:[#allocation6 + $0x6d8] sm:$0xf0] }
 0x177   :  { %v12556_v17 = vpop.eup %12555  ;;  %v9089_v18 = vmul.f32 -1.442695, %v13257_v59  ;;  %v9963_v50 = vor.u32 %v12110_v33, %v9960_v45  ;;  %v9624_v45 = vld [vmem:[#allocation6 + $0x438] sm:$0xf0] }
 0x178   :  { %4507 = vmatpush.bf16.msra.mxu2 %v9171_v30  ;;  %v13260_v24 = vadd.f32 1.0, %v12556_v17  ;;  %v10011_v30 = vor.u32 %v12122_v39, %v10008_v62  ;;  %v449_v17 = vperm.slane %v13278_v16, 4  ;;  %v9888_v39 = vld [vmem:[#allocation6 + $0x648] sm:$0xf0]  ;;  %v9862_v62 = vld [vmem:[#allocation6 + $0x600] sm:$0xf] }
 0x179   :  { %12557 = vpow2.f32 %v9089_v18  ;;  %4478 = vmatpush.bf16.msra.mxu0 %v9959_v12  ;;  %v9863_v52 = vor.u32 %v12089_v7, %v9862_v62  ;;  %v12164_v62 = vld [vmem:[#allocation6 + $0x874] sm:$0xf] }
 0x17a   :  { %4519 = vmatpush.bf16.msra.mxu3 %v9411_v28  ;;  %12559 = vrcp.f32 %v13260_v24  ;;  %v9936_v28 = vld [vmem:[#allocation6 + $0x6a8] sm:$0xf0]  ;;  %vm2529_vm8 = vweird.f32 %v13260_v24  ;;  %v2533_v57 = vand.u32 2147483647, %v13260_v24 }
 0x17b   :  { %v9939_v5 = vor.u32 %v12104_v56, %v9936_v28  ;;  %v10222_v56 = vld [vmem:[#allocation6 + $0x8d0] sm:$0xf] }
 0x17c   :  { %4508 = vmatpush.bf16.msra.mxu2 %v9147_v61  ;;  %v9935_v61 = vor.u32 %v12107_v48, %v9934_v46  ;;  %vm2534_vm12 = vcmp.eq.f32.partialorder %v2533_v57, 8.507059e+37  ;;  %v10223_v55 = vor.u32 %v12179_v49, %v10222_v56  ;;  %v12173_v57 = vld [vmem:[#allocation6 + $0x8b4] sm:$0xf0]  ;;  %v12002_v56 = vld [vmem:[#allocation6 + $0x364] sm:$0xf] }
 0x17d   :  { %v9528_v49 = vld [vmem:[#allocation6 + $0x378] sm:$0xf0] }
 0x17e   :  { %4520 = vmatpush.bf16.msra.mxu3 %v9387_v0  ;;  %4479 = vmatpush.bf16.msra.mxu0 %v9935_v61  ;;  %v2535_v0 = vand.u32 2147483648, %v13260_v24 }
 0x17f   :  { %v12558_v43 = vpop.eup %12557  ;;  %4489 = vmatpush.bf16.msra.mxu1 %v10223_v55  ;;  %v12155_v55 = vld [vmem:[#allocation6 + $0x824] sm:$0xf0] }
 0x180   :  { %4509 = vmatpush.bf16.msra.mxu2 %v9123_v54  ;;  %v13263_v34 = vpop.eup %12559  ;;  %v13265_v13 = vadd.f32 1.0, %v12558_v43  ;;  %v12098_v54 = vld [vmem:[#allocation6 + $0x664] sm:$0xf]  ;;  %v2536_v26 = vor.u32 1.1754944e-38, %v2535_v0  ;;  %v9891_v43 = vor.u32 %v12092_v21, %v9888_v39  ;;  %v12167_v39 = vld [vmem:[#allocation6 + $0x884] sm:$0xf0] }
 0x181   :  { %v2525_v29 = vmul.f32 %v13263_v34, %v13260_v24  ;;  %vm2530_vm9 = vweird.f32 %v13263_v34  ;;  %v12170_v0 = vld [vmem:[#allocation6 + $0x8a4] sm:$0xf] }
 0x182   :  { %4521 = vmatpush.bf16.msra.mxu3 %v9363_v20  ;;  %12561 = vrcp.f32 %v13265_v13  ;;  %4480 = vmatpush.bf16.msra.mxu0 %v9911_v41  ;;  %v2272_v18 = vpop.f32.mrf.mxu0  ;;  %vm13281_vm10 = vmor %vm2529_vm8, %vm2530_vm9  ;;  %v2623_v35 = vand.u32 2147483647, %v13265_v13  ;;  %v2625_v11 = vand.u32 2147483648, %v13265_v13  ;;  %v9915_v20 = vor.u32 %v12098_v54, %v9912_v10  ;;  %v10224_v41 = vld [vmem:[#allocation6 + $0x8e8] sm:$0xf0] }
 0x183   :  { %v2526_v42 = vsub.f32 1.0, %v2525_v29  ;;  %vm2619_vm13 = vweird.f32 %v13265_v13  ;;  %v12036_v29 = vld [vmem:[#allocation6 + $0x46c] sm:$0xf0]  ;;  %v9600_v54 = vld [vmem:[#allocation6 + $0x408] sm:$0xf0] }
 0x184   :  { %4510 = vmatpush.bf16.msra.mxu2 %v9099_v23  ;;  %vm2624_vm15 = vcmp.eq.f32.partialorder %v2623_v35, 8.507059e+37  ;;  %v2626_v12 = vor.u32 1.1754944e-38, %v2625_v11  ;;  %v10200_v23 = vld [vmem:[#allocation6 + $0x8b8] sm:$0xf0]  ;;  %v12024_v35 = vld [vmem:[#allocation6 + $0x40c] sm:$0xf0] }
 0x185   :  { %v2527_v63 = vmul.f32 %v13263_v34, %v2526_v42  ;;  %v10203_v11 = vor.u32 %v12170_v0, %v10200_v23 }
 0x186   :  { %4522 = vmatpush.bf16.msra.mxu3 %v9339_v9  ;;  %4481 = vmatpush.bf16.msra.mxu0 %v9887_v22  ;;  %v2273_v9 = vadd.f32 %v2272_v18, %v449_v17  ;;  %v10199_v18 = vor.u32 %v12173_v57, %v10198_v47 }
 0x187   :  { %4511 = vmatmul.bf16.vlgmr.msra.gmra.mxu2 %v13219_v36  ;;  %v2528_v2 = vadd.f32 %v13263_v34, %v2527_v63 }
 0x188   :  { %4559 = vmatpush.bf16.msrb.mxu2 %v10035_v6  ;;  %v12562_v4 = vpop.eup %12561  ;;  %v2286_v6 = vpop.f32.mrf.mxu1  ;;  %4490 = vmatpush.bf16.msra.mxu1 %v10199_v18  ;;  %v12146_v18 = vld [vmem:[#allocation6 + $0x7e4] sm:$0xf] }
 0x189   :  { %v2615_v3 = vmul.f32 %v12562_v4, %v13265_v13  ;;  %v2532_v24 = vsel %vm13281_vm10, %v13263_v34, %v2528_v2  ;;  %vm2620_vm11 = vweird.f32 %v12562_v4  ;;  %v12086_v34 = vld [vmem:[#allocation6 + $0x604] sm:$0xf]  ;;  %v2287_v61 = vadd.f32 %v2286_v6, %v2273_v9 }
 0x18a   :  { %4523 = vmatpush.bf16.msra.mxu3 %v9315_v1  ;;  %v2537_v51 = vsel %vm2534_vm12, %v2536_v26, %v2532_v24  ;;  %vm2621_vm14 = vmor %vm2619_vm13, %vm2620_vm11  ;;  %4482 = vmatpush.bf16.msra.mxu0 %v9863_v52  ;;  %v12026_v13 = vld [vmem:[#allocation6 + $0x424] sm:$0xf]  ;;  %v2300_v48 = vpop.f32.mrf.mxu2  ;;  %v2274_v28 = vpop.f32.mrf.mxu0  ;;  %v9582_v52 = vld [vmem:[#allocation6 + $0x3c8] sm:$0xf]  ;;  %v10179_v9 = vor.u32 %v12164_v62, %v10176_v27 }
 0x18b   :  { %v2616_v14 = vsub.f32 1.0, %v2615_v3  ;;  %v2662_v1 = vmul.f32 %v2537_v51, %v13249_v15  ;;  %v9627_v42 = vor.u32 %v12026_v13, %v9624_v45  ;;  %v12030_v15 = vld [vmem:[#allocation6 + $0x43c] sm:$0xf0]  ;;  %v2314_v2 = vpop.f32.mrf.mxu3  ;;  %v2275_v10 = vadd.f32 %v2274_v28, %v449_v17  ;;  %v12014_v6 = vld [vmem:[#allocation6 + $0x3c4] sm:$0xf] }
 0x18c   :  { %4560 = vmatpush.bf16.msrb.mxu2 %v10011_v30  ;;  %v2301_v44 = vadd.f32 %v2300_v48, %v2287_v61  ;;  %v9631_v22 = vor.u32 %v12030_v15, %v9630_v37  ;;  %v9552_v51 = vld [vmem:[#allocation6 + $0x3a8] sm:$0xf0]  ;;  %v10152_v48 = vld [vmem:[#allocation6 + $0x858] sm:$0xf0]  ;;  %v12012_v61 = vld [vmem:[#allocation6 + $0x3ac] sm:$0xf0] }
 0x18d   :  { %v2617_v25 = vmul.f32 %v12562_v4, %v2616_v14  ;;  %v9606_v14 = vld [vmem:[#allocation6 + $0x3f8] sm:$0xf]  ;;  %v10126_v37 = vld [vmem:[#allocation6 + $0x810] sm:$0xf] }
 0x18e   :  { %4524 = vmatpush.bf16.msra.mxu3 %v9291_v60  ;;  %4531 = vmatpush.bf16.msrb.mxu0 %v9651_v32  ;;  %v9655_v60 = vor.u32 %v12036_v29, %v9654_v40  ;;  %v2315_v17 = vadd.f32 %v2314_v2, %v2301_v44  ;;  %v9607_v26 = vor.u32 %v12024_v35, %v9606_v14  ;;  %v12008_v32 = vld [vmem:[#allocation6 + $0x394] sm:$0xf]  ;;  %v10150_v40 = vld [vmem:[#allocation6 + $0x840] sm:$0xf]  ;;  %v12158_v29 = vld [vmem:[#allocation6 + $0x844] sm:$0xf] }
 0x18f   :  { %v2618_v30 = vadd.f32 %v12562_v4, %v2617_v25  ;;  %v10174_v25 = vld [vmem:[#allocation6 + $0x870] sm:$0xf]  ;;  %v10127_v15 = vor.u32 %v12155_v55, %v10126_v37  ;;  %v12149_v14 = vld [vmem:[#allocation6 + $0x7f4] sm:$0xf0]  ;;  %v12074_v55 = vld [vmem:[#allocation6 + $0x5a4] sm:$0xf] }
 0x190   :  { %4561 = vmatpush.bf16.msrb.mxu2 %v9987_v38  ;;  %v9864_v38 = vld [vmem:[#allocation6 + $0x618] sm:$0xf0]  ;;  %v10175_v19 = vor.u32 %v12167_v39, %v10174_v25  ;;  %v9510_v35 = vld [vmem:[#allocation6 + $0x338] sm:$0xf]  ;;  %v10078_v27 = vld [vmem:[#allocation6 + $0x7b0] sm:$0xf] }
 0x191   :  { %v2622_v33 = vsel %vm2621_vm14, %v12562_v4, %v2618_v30  ;;  %v2288_v4 = vpop.f32.mrf.mxu1  ;;  %v12018_v30 = vld [vmem:[#allocation6 + $0x3dc] sm:$0xf0]  ;;  %v9480_v25 = vld [vmem:[#allocation6 + $0x318] sm:$0xf0] }
 0x192   :  { %v2627_v8 = vsel %vm2624_vm15, %v2626_v12, %v2622_v33  ;;  %4532 = vmatpush.bf16.msrb.mxu0 %v9627_v42  ;;  %v2289_v24 = vadd.f32 %v2288_v4, %v2275_v10  ;;  %v2302_v7 = vpop.f32.mrf.mxu2  ;;  %4491 = vmatpush.bf16.msra.mxu1 %v10175_v19  ;;  %v9583_v45 = vor.u32 %v12018_v30, %v9582_v52  ;;  %v9534_v4 = vld [vmem:[#allocation6 + $0x368] sm:$0xf]  ;;  %v9504_v10 = vld [vmem:[#allocation6 + $0x348] sm:$0xf0] }
 0x193   :  { %v2668_v46 = vmul.f32 %v2627_v8, %v13257_v59  ;;  %v12020_v59 = vld [vmem:[#allocation6 + $0x3f4] sm:$0xf]  ;;  %v12161_v8 = vld [vmem:[#allocation6 + $0x854] sm:$0xf0]  ;;  %v2316_v13 = vpop.f32.mrf.mxu3  ;;  %v12143_v30 = vld [vmem:[#allocation6 + $0x7c4] sm:$0xf0] }
 0x194   :  { %4562 = vmatpush.bf16.msrb.mxu2 %v9963_v50  ;;  %v9867_v50 = vor.u32 %v12086_v34, %v9864_v38  ;;  %v9603_v3 = vor.u32 %v12020_v59, %v9600_v54  ;;  %v2303_v38 = vadd.f32 %v2302_v7, %v2289_v24  ;;  %v10128_v59 = vld [vmem:[#allocation6 + $0x828] sm:$0xf0]  ;;  %v12006_v54 = vld [vmem:[#allocation6 + $0x37c] sm:$0xf0] }
 0x195   :  { %v13296_v63 = vpack.c.bf16 %v2668_v46, %v2662_v1  ;;  %v9558_v1 = vld [vmem:[#allocation6 + $0x398] sm:$0xf]  ;;  %v10151_v46 = vor.u32 %v12161_v8, %v10150_v40  ;;  %v9535_v23 = vor.u32 %v12006_v54, %v9534_v4  ;;  %v9816_v4 = vld [vmem:[#allocation6 + $0x5b8] sm:$0xf0] }
 0x196   :  { %4533 = vmatpush.bf16.msrb.mxu0 %v9603_v3  ;;  %v11996_v3 = vld [vmem:[#allocation6 + $0x334] sm:$0xf]  ;;  %v12137_v40 = vld [vmem:[#allocation6 + $0x794] sm:$0xf0]  ;;  %v9819_v54 = vor.u32 %v12074_v55, %v9816_v4 }
 0x197   :  { %4469 = vmatmul.bf16.vlgmr.msrb.gmra.mxu3 %v13296_v63  ;;  %4492 = vmatpush.bf16.msra.mxu1 %v10151_v46  ;;  %v9507_v47 = vor.u32 %v11996_v3, %v9504_v10  ;;  %v12068_v10 = vld [vmem:[#allocation6 + $0x574] sm:$0xf] }
 0x198   :  { %4563 = vmatpush.bf16.msrb.mxu2 %v9939_v5  ;;  %v10227_v5 = vor.u32 %v12176_v58, %v10224_v41  ;;  %v9531_v58 = vor.u32 %v12002_v56, %v9528_v49  ;;  %v9559_v41 = vor.u32 %v12012_v61, %v9558_v1  ;;  %v12080_v1 = vld [vmem:[#allocation6 + $0x5d4] sm:$0xf]  ;;  %v9846_v61 = vld [vmem:[#allocation6 + $0x5d8] sm:$0xf]  ;;  %v450_v49 = vperm.slane %v13278_v16, 5 }
 0x19a   :  { %4573 = vmatpush.bf16.msrb.mxu3 %v10227_v5  ;;  %v12152_v5 = vld [vmem:[#allocation6 + $0x814] sm:$0xf] }
 0x19b   :  { %v10131_v2 = vor.u32 %v12152_v5, %v10128_v59  ;;  %4493 = vmatpush.bf16.msra.mxu1 %v10127_v15  ;;  %v9822_v15 = vld [vmem:[#allocation6 + $0x5a8] sm:$0xf]  ;;  %v12078_v5 = vld [vmem:[#allocation6 + $0x5bc] sm:$0xf0] }
 0x19c   :  { %4564 = vmatpush.bf16.msrb.mxu2 %v9915_v20  ;;  %v9576_v20 = vld [vmem:[#allocation6 + $0x3d8] sm:$0xf0] }
 0x19d   :  { %v9579_v21 = vor.u32 %v12014_v6, %v9576_v20  ;;  %v10104_v6 = vld [vmem:[#allocation6 + $0x7f8] sm:$0xf0] }
 0x19e   :  { %4574 = vmatpush.bf16.msrb.mxu3 %v10203_v11  ;;  %v10107_v24 = vor.u32 %v12146_v18, %v10104_v6 }
 0x19f   :  { %4534 = vmatpush.bf16.msrb.mxu0 %v9579_v21  ;;  %v12000_v21 = vld [vmem:[#allocation6 + $0x34c] sm:$0xf0] }
 0x1a0   :  { %4565 = vmatpush.bf16.msrb.mxu2 %v9891_v43  ;;  %v9555_v43 = vor.u32 %v12008_v32, %v9552_v51  ;;  %v9511_v19 = vor.u32 %v12000_v21, %v9510_v35  ;;  %v10079_v32 = vor.u32 %v12143_v30, %v10078_v27  ;;  %v12140_v51 = vld [vmem:[#allocation6 + $0x7b4] sm:$0xf]  ;;  %v12062_v21 = vld [vmem:[#allocation6 + $0x544] sm:$0xf] }
 0x1a2   :  { %v2328_v12 = vpop.f32.mrf.mxu0  ;;  %4575 = vmatpush.bf16.msrb.mxu3 %v10179_v9  ;;  %v11994_v9 = vld [vmem:[#allocation6 + $0x31c] sm:$0xf0] }
 0x1a3   :  { %v2329_v33 = vadd.f32 %v2328_v12, %v2315_v17  ;;  %v2342_v34 = vpop.f32.mrf.mxu1  ;;  %4535 = vmatpush.bf16.msrb.mxu0 %v9555_v43  ;;  %v11990_v17 = vld [vmem:[#allocation6 + $0x304] sm:$0xf]  ;;  %v10080_v12 = vld [vmem:[#allocation6 + $0x7c8] sm:$0xf0] }
 0x1a4   :  { %4566 = vmatpush.bf16.msrb.mxu2 %v9867_v50  ;;  %v10155_v50 = vor.u32 %v12158_v29, %v10152_v48  ;;  %v9483_v39 = vor.u32 %v11990_v17, %v9480_v25  ;;  %v10083_v43 = vor.u32 %v12140_v51, %v10080_v12  ;;  %v9840_v48 = vld [vmem:[#allocation6 + $0x5e8] sm:$0xf0]  ;;  %v9774_v17 = vld [vmem:[#allocation6 + $0x548] sm:$0xf] }
 0x1a5   :  { %v13301_v42 = vadd.f32 %v2342_v34, %v2329_v33 }
 0x1a6   :  { %4576 = vmatpush.bf16.msrb.mxu3 %v10155_v50  ;;  %v12084_v50 = vld [vmem:[#allocation6 + $0x5ec] sm:$0xf0] }
 0x1a7   :  { %v9084_v28 = vmul.f32 -1.442695, %v13301_v42  ;;  %4536 = vmatpush.bf16.msrb.mxu0 %v9531_v58  ;;  %4525 = vmatmul.bf16.vlgmr.msra.gmra.mxu3 %v13223_v31  ;;  %v9843_v58 = vor.u32 %v12080_v1, %v9840_v48 }
 0x1a8   :  { %4615 = vmatpush.bf16.msra.mxu2 %v9655_v60  ;;  %v2317_v60 = vadd.f32 %v2316_v13, %v2303_v38  ;;  %v10054_v38 = vld [vmem:[#allocation6 + $0x780] sm:$0xf]  ;;  %v12134_v13 = vld [vmem:[#allocation6 + $0x784] sm:$0xf] }
 0x1a9   :  { %12563 = vpow2.f32 %v9084_v28  ;;  %v10055_v29 = vor.u32 %v12137_v40, %v10054_v38  ;;  %v9847_v28 = vor.u32 %v12084_v50, %v9846_v61  ;;  %v9744_v38 = vld [vmem:[#allocation6 + $0x528] sm:$0xf0]  ;;  %v9750_v40 = vld [vmem:[#allocation6 + $0x518] sm:$0xf] }
 0x1aa   :  { %v2330_v44 = vpop.f32.mrf.mxu0  ;;  %4577 = vmatpush.bf16.msrb.mxu3 %v10131_v2  ;;  %v2356_v33 = vpop.f32.mrf.mxu2  ;;  %v9823_v2 = vor.u32 %v12078_v5, %v9822_v15  ;;  %v12050_v15 = vld [vmem:[#allocation6 + $0x4e4] sm:$0xf]  ;;  %v9720_v5 = vld [vmem:[#allocation6 + $0x4f8] sm:$0xf0] }
 0x1ab   :  { %v2331_v57 = vadd.f32 %v2330_v44, %v2317_v60  ;;  %v2344_v0 = vpop.f32.mrf.mxu1  ;;  %4537 = vmatpush.bf16.msrb.mxu0 %v9507_v47  ;;  %v2370_v8 = vpop.f32.mrf.mxu3  ;;  %v2357_v59 = vadd.f32 %v2356_v33, %v450_v49  ;;  %v9792_v44 = vld [vmem:[#allocation6 + $0x588] sm:$0xf0] }
 0x1ac   :  { %4616 = vmatpush.bf16.msra.mxu2 %v9631_v22  ;;  %v10102_v22 = vld [vmem:[#allocation6 + $0x7e0] sm:$0xf] }
 0x1ad   :  { %v10103_v11 = vor.u32 %v12149_v14, %v10102_v22  ;;  %v13305_v20 = vadd.f32 %v2344_v0, %v2331_v57  ;;  %v9795_v57 = vor.u32 %v12068_v10, %v9792_v44  ;;  %v9798_v0 = vld [vmem:[#allocation6 + $0x578] sm:$0xf]  ;;  %v12072_v22 = vld [vmem:[#allocation6 + $0x58c] sm:$0xf0]  ;;  %v2371_v18 = vadd.f32 %v2370_v8, %v2357_v59  ;;  %v9272_v10 = vld [vmem:[#allocation6 + $0x170] sm:$0xf0] }
 0x1ae   :  { %4578 = vmatpush.bf16.msrb.mxu3 %v10107_v24  ;;  %v9768_v24 = vld [vmem:[#allocation6 + $0x558] sm:$0xf0]  ;;  %v9723_v44 = vor.u32 %v12050_v15, %v9720_v5  ;;  %v9176_v15 = vld [vmem:[#allocation6 + $0xb0] sm:$0xf0] }
 0x1af   :  { %4494 = vmatpush.bf16.msra.mxu1 %v10103_v11  ;;  %v12564_v62 = vpop.eup %12563  ;;  %v9090_v7 = vmul.f32 -1.442695, %v13305_v20  ;;  %4538 = vmatpush.bf16.msrb.mxu0 %v9483_v39  ;;  %v9799_v11 = vor.u32 %v12072_v22, %v9798_v0 }
 0x1b0   :  { %4617 = vmatpush.bf16.msra.mxu2 %v9607_v26  ;;  %v9486_v26 = vld [vmem:[#allocation6 + $0x308] sm:$0xf]  ;;  %v13308_v52 = vadd.f32 1.0, %v12564_v62 }
 0x1b1   :  { %12565 = vpow2.f32 %v9090_v7  ;;  %v9487_v34 = vor.u32 %v11994_v9, %v9486_v26  ;;  %v9771_v7 = vor.u32 %v12062_v21, %v9768_v24  ;;  %v12066_v26 = vld [vmem:[#allocation6 + $0x55c] sm:$0xf0]  ;;  %v11931_v24 = vld [vmem:[#allocation6 + $0x12c] sm:$0xf] }
 0x1b2   :  { %12567 = vrcp.f32 %v13308_v52  ;;  %4579 = vmatpush.bf16.msrb.mxu3 %v10083_v43  ;;  %v2358_v47 = vpop.f32.mrf.mxu2  ;;  %v2548_v14 = vand.u32 2147483647, %v13308_v52  ;;  %vm2544_vm0 = vweird.f32 %v13308_v52  ;;  %v9775_v9 = vor.u32 %v12066_v26, %v9774_v17  ;;  %v11934_v21 = vld [vmem:[#allocation6 + $0x13c] sm:$0xf0]  ;;  %v9248_v17 = vld [vmem:[#allocation6 + $0x140] sm:$0xf0] }
 0x1b3   :  { %4495 = vmatpush.bf16.msra.mxu1 %v10079_v32  ;;  %v2359_v27 = vadd.f32 %v2358_v47, %v450_v49  ;;  %v12054_v47 = vld [vmem:[#allocation6 + $0x4fc] sm:$0xf0]  ;;  %v9702_v26 = vld [vmem:[#allocation6 + $0x4b8] sm:$0xf] }
 0x1b4   :  { %4618 = vmatpush.bf16.msra.mxu2 %v9583_v45  ;;  %v10056_v45 = vld [vmem:[#allocation6 + $0x798] sm:$0xf0]  ;;  %vm13334_vm3 = vcmp.eq.f32.partialorder %v2548_v14, 8.507059e+37  ;;  %v11922_v49 = vld [vmem:[#allocation6 + $0xdc] sm:$0xf0] }
 0x1b5   :  { %v10059_v46 = vor.u32 %v12134_v13, %v10056_v45  ;;  %v12060_v45 = vld [vmem:[#allocation6 + $0x52c] sm:$0xf0] }
 0x1b6   :  { %v9751_v61 = vor.u32 %v12060_v45, %v9750_v40 }
 0x1b7   :  { %v12566_v56 = vpop.eup %12565  ;;  %4496 = vmatpush.bf16.msra.mxu1 %v10055_v29  ;;  %4580 = vmatpush.bf16.msrb.mxu3 %v10059_v46 }
 0x1b8   :  { %4619 = vmatpush.bf16.msra.mxu2 %v9559_v41  ;;  %v13312_v60 = vpop.eup %12567  ;;  %v13314_v37 = vadd.f32 1.0, %v12566_v56  ;;  %v9198_v56 = vld [vmem:[#allocation6 + $0xc8] sm:$0xf] }
 0x1b9   :  { %v2540_v41 = vmul.f32 %v13312_v60, %v13308_v52  ;;  %vm2545_vm1 = vweird.f32 %v13312_v60 }
 0x1ba   :  { %12569 = vrcp.f32 %v13314_v37  ;;  %vm13330_vm2 = vmor %vm2544_vm0, %vm2545_vm1  ;;  %v2638_v43 = vand.u32 2147483647, %v13314_v37  ;;  %v2640_v33 = vand.u32 2147483648, %v13314_v37  ;;  %vm2634_vm5 = vweird.f32 %v13314_v37 }
 0x1bb   :  { %4545 = vmatpush.bf16.msrb.mxu1 %v9843_v58  ;;  %4629 = vmatpush.bf16.msra.mxu3 %v9847_v28  ;;  %v2541_v16 = vsub.f32 1.0, %v2540_v41  ;;  %v9270_v41 = vld [vmem:[#allocation6 + $0x158] sm:$0xf] }
 0x1bc   :  { %4620 = vmatpush.bf16.msra.mxu2 %v9535_v23  ;;  %v2372_v23 = vpop.f32.mrf.mxu3  ;;  %vm13349_vm7 = vcmp.eq.f32.partialorder %v2638_v43, 8.507059e+37  ;;  %v2641_v58 = vor.u32 1.1754944e-38, %v2640_v33  ;;  %v9251_v43 = vor.u32 %v11931_v24, %v9248_v17  ;;  %v11925_v33 = vld [vmem:[#allocation6 + $0xfc] sm:$0xf]  ;;  %v9102_v24 = vld [vmem:[#allocation6 + $0x8] sm:$0xf] }
 0x1bd   :  { %v2542_v3 = vmul.f32 %v13312_v60, %v2541_v16  ;;  %v2373_v46 = vadd.f32 %v2372_v23, %v2359_v27  ;;  %v9726_v16 = vld [vmem:[#allocation6 + $0x4e8] sm:$0xf]  ;;  %v11898_v17 = vld [vmem:[#allocation6 + $0x1c] sm:$0xf0] }
 0x1be   :  { %v9727_v0 = vor.u32 %v12054_v47, %v9726_v16  ;;  %v9246_v23 = vld [vmem:[#allocation6 + $0x128] sm:$0xf]  ;;  %v11910_v47 = vld [vmem:[#allocation6 + $0x7c] sm:$0xf0] }
 0x1bf   :  { %4546 = vmatpush.bf16.msrb.mxu1 %v9819_v54  ;;  %4630 = vmatpush.bf16.msra.mxu3 %v9823_v2  ;;  %v2543_v25 = vadd.f32 %v13312_v60, %v2542_v3  ;;  %v11937_v3 = vld [vmem:[#allocation6 + $0x15c] sm:$0xf] }
 0x1c0   :  { %4621 = vmatpush.bf16.msra.mxu2 %v9511_v19  ;;  %v12570_v6 = vpop.eup %12569  ;;  %v2550_v19 = vand.u32 2147483648, %v13308_v52 }
 0x1c1   :  { %v2630_v39 = vmul.f32 %v12570_v6, %v13314_v37  ;;  %vm2635_vm4 = vweird.f32 %v12570_v6  ;;  %v2547_v52 = vsel %vm13330_vm2, %v13312_v60, %v2543_v25  ;;  %v11940_v37 = vld [vmem:[#allocation6 + $0x16c] sm:$0xf0] }
 0x1c2   :  { %v2384_v35 = vpop.f32.mrf.mxu0  ;;  %v2551_v1 = vor.u32 1.1754944e-38, %v2550_v19  ;;  %vm13345_vm6 = vmor %vm2634_vm5, %vm2635_vm4  ;;  %v12048_v19 = vld [vmem:[#allocation6 + $0x4cc] sm:$0xf0] }
 0x1c3   :  { %v2385_v62 = vadd.f32 %v2384_v35, %v2371_v18  ;;  %4547 = vmatpush.bf16.msrb.mxu1 %v9795_v57  ;;  %v2398_v30 = vpop.f32.mrf.mxu1  ;;  %4631 = vmatpush.bf16.msra.mxu3 %v9799_v11  ;;  %v2631_v12 = vsub.f32 1.0, %v2630_v39  ;;  %v9271_v11 = vor.u32 %v11940_v37, %v9270_v41  ;;  %v9703_v32 = vor.u32 %v12048_v19, %v9702_v26  ;;  %v9174_v41 = vld [vmem:[#allocation6 + $0x98] sm:$0xf]  ;;  %v11916_v37 = vld [vmem:[#allocation6 + $0xac] sm:$0xf0] }
 0x1c4   :  { %4622 = vmatpush.bf16.msra.mxu2 %v9487_v34  ;;  %v12056_v34 = vld [vmem:[#allocation6 + $0x514] sm:$0xf]  ;;  %v2552_v4 = vsel %vm13334_vm3, %v2551_v1, %v2547_v52  ;;  %v11895_v26 = vld [vmem:[#allocation6 + $0xc] sm:$0xf] }
 0x1c5   :  { %v2632_v8 = vmul.f32 %v12570_v6, %v2631_v12  ;;  %v2399_v29 = vadd.f32 %v2398_v30, %v2385_v62  ;;  %v9747_v13 = vor.u32 %v12056_v34, %v9744_v38  ;;  %v2663_v22 = vmul.f32 %v2552_v4, %v13301_v42  ;;  %v12044_v62 = vld [vmem:[#allocation6 + $0x4b4] sm:$0xf]  ;;  %v9222_v30 = vld [vmem:[#allocation6 + $0xf8] sm:$0xf]  ;;  %v12038_v34 = vld [vmem:[#allocation6 + $0x484] sm:$0xf] }
 0x1c6   :  { %v9247_v12 = vor.u32 %v11934_v21, %v9246_v23  ;;  %v9672_v38 = vld [vmem:[#allocation6 + $0x498] sm:$0xf0]  ;;  %v9224_v52 = vld [vmem:[#allocation6 + $0x110] sm:$0xf0]  ;;  %v9126_v23 = vld [vmem:[#allocation6 + $0x38] sm:$0xf] }
 0x1c7   :  { %4548 = vmatpush.bf16.msrb.mxu1 %v9771_v7  ;;  %4632 = vmatpush.bf16.msra.mxu3 %v9775_v9  ;;  %v2633_v50 = vadd.f32 %v12570_v6, %v2632_v8  ;;  %v9696_v7 = vld [vmem:[#allocation6 + $0x4c8] sm:$0xf0]  ;;  %v11928_v9 = vld [vmem:[#allocation6 + $0x10c] sm:$0xf0]  ;;  %v9675_v8 = vor.u32 %v12038_v34, %v9672_v38  ;;  %v11913_v4 = vld [vmem:[#allocation6 + $0x9c] sm:$0xf] }
 0x1c8   :  { %v9128_v21 = vld [vmem:[#allocation6 + $0x50] sm:$0xf0] }
 0x1c9   :  { %v2637_v59 = vsel %vm13345_vm6, %v12570_v6, %v2633_v50  ;;  %v9275_v6 = vor.u32 %v11937_v3, %v9272_v10  ;;  %v9227_v50 = vor.u32 %v11925_v33, %v9224_v52  ;;  %v9179_v3 = vor.u32 %v11913_v4, %v9176_v15  ;;  %v9150_v10 = vld [vmem:[#allocation6 + $0x68] sm:$0xf] }
 0x1ca   :  { %v2412_v48 = vpop.f32.mrf.mxu2  ;;  %v2386_v55 = vpop.f32.mrf.mxu0  ;;  %v2642_v57 = vsel %vm13349_vm7, %v2641_v58, %v2637_v59  ;;  %v11919_v58 = vld [vmem:[#allocation6 + $0xcc] sm:$0xf]  ;;  %v9103_v33 = vor.u32 %v11898_v17, %v9102_v24 }
 0x1cb   :  { %v2413_v28 = vadd.f32 %v2412_v48, %v2399_v29  ;;  %v2426_v60 = vpop.f32.mrf.mxu3  ;;  %v2387_v2 = vadd.f32 %v2386_v55, %v2373_v46  ;;  %4549 = vmatpush.bf16.msrb.mxu1 %v9747_v13  ;;  %4633 = vmatpush.bf16.msra.mxu3 %v9751_v61  ;;  %v2669_v14 = vmul.f32 %v2642_v57, %v13305_v20  ;;  %v2400_v35 = vpop.f32.mrf.mxu1  ;;  %v9678_v29 = vld [vmem:[#allocation6 + $0x488] sm:$0xf]  ;;  %v12042_v13 = vld [vmem:[#allocation6 + $0x49c] sm:$0xf0]  ;;  %v11907_v57 = vld [vmem:[#allocation6 + $0x6c] sm:$0xf] }
 0x1cc   :  { %v9699_v20 = vor.u32 %v12044_v62, %v9696_v7  ;;  %v9679_v45 = vor.u32 %v12042_v13, %v9678_v29  ;;  %v9223_v61 = vor.u32 %v11928_v9, %v9222_v30  ;;  %v12132_v30 = vld [vmem:[#allocation6 + $0x76c] sm:$0xf0]  ;;  %v12129_v9 = vld [vmem:[#allocation6 + $0x75c] sm:$0xf]  ;;  %v12111_v24 = vld [vmem:[#allocation6 + $0x6cc] sm:$0xf] }
 0x1cd   :  { %v13357_v54 = vadd.f32 %v2426_v60, %v2413_v28  ;;  %v13364_v25 = vpack.c.bf16 %v2669_v14, %v2663_v22  ;;  %v2401_v39 = vadd.f32 %v2400_v35, %v2387_v2  ;;  %v9200_v28 = vld [vmem:[#allocation6 + $0xe0] sm:$0xf0]  ;;  %v9199_v60 = vor.u32 %v11922_v49, %v9198_v56 }
 0x1ce   :  { %v9203_v55 = vor.u32 %v11919_v58, %v9200_v28  ;;  %v9175_v2 = vor.u32 %v11916_v37, %v9174_v41  ;;  %v9151_v14 = vor.u32 %v11910_v47, %v9150_v10  ;;  %v10016_v56 = vld [vmem:[#allocation6 + $0x740] sm:$0xf0]  ;;  %v9462_v58 = vld [vmem:[#allocation6 + $0x2d8] sm:$0xf]  ;;  %v11985_v41 = vld [vmem:[#allocation6 + $0x2dc] sm:$0xf] }
 0x1cf   :  { %v9085_v18 = vmul.f32 -1.442695, %v13357_v54  ;;  %4550 = vmatpush.bf16.msrb.mxu1 %v9723_v44  ;;  %4634 = vmatpush.bf16.msra.mxu3 %v9727_v0  ;;  %v9152_v0 = vld [vmem:[#allocation6 + $0x80] sm:$0xf0]  ;;  %v12117_v10 = vld [vmem:[#allocation6 + $0x6fc] sm:$0xf] }
 0x1d0   :  { %4483 = vmatmul.bf16.vlgmr.msra.gmra.mxu0 %v13364_v25  ;;  %4567 = vmatmul.bf16.vlgmr.msrb.gmra.mxu2 %v13364_v25 }
 0x1d1   :  { %12571 = vpow2.f32 %v9085_v18  ;;  %4587 = vmatpush.bf16.msra.mxu0 %v9271_v11  ;;  %4671 = vmatpush.bf16.msrb.mxu2 %v9275_v6  ;;  %v9155_v18 = vor.u32 %v11907_v57, %v9152_v0  ;;  %v11904_v11 = vld [vmem:[#allocation6 + $0x4c] sm:$0xf0]  ;;  %v11901_v6 = vld [vmem:[#allocation6 + $0x3c] sm:$0xf] }
 0x1d2   :  { %v2414_v42 = vpop.f32.mrf.mxu2  ;;  %v9127_v62 = vor.u32 %v11904_v11, %v9126_v23  ;;  %v9131_v7 = vor.u32 %v11901_v6, %v9128_v21  ;;  %v11979_v11 = vld [vmem:[#allocation6 + $0x2ac] sm:$0xf]  ;;  %v9440_v6 = vld [vmem:[#allocation6 + $0x2c0] sm:$0xf0]  ;;  %v9966_v21 = vld [vmem:[#allocation6 + $0x6c8] sm:$0xf] }
 0x1d3   :  { %v2415_v27 = vadd.f32 %v2414_v42, %v2401_v39  ;;  %v2428_v51 = vpop.f32.mrf.mxu3  ;;  %4551 = vmatpush.bf16.msrb.mxu1 %v9699_v20  ;;  %4635 = vmatpush.bf16.msra.mxu3 %v9703_v32  ;;  %v9104_v42 = vld [vmem:[#allocation6 + $0x20] sm:$0xf0]  ;;  %v10038_v20 = vld [vmem:[#allocation6 + $0x758] sm:$0xf]  ;;  %v10040_v32 = vld [vmem:[#allocation6 + $0x770] sm:$0xf0] }
 0x1d4   :  { %v9107_v52 = vor.u32 %v11895_v26, %v9104_v42  ;;  %v10043_v29 = vor.u32 %v12129_v9, %v10040_v32  ;;  %v12105_v9 = vld [vmem:[#allocation6 + $0x69c] sm:$0xf]  ;;  %v9944_v32 = vld [vmem:[#allocation6 + $0x6b0] sm:$0xf0] }
 0x1d5   :  { %v13368_v40 = vadd.f32 %v2428_v51, %v2415_v27  ;;  %4588 = vmatpush.bf16.msra.mxu0 %v9247_v12  ;;  %4672 = vmatpush.bf16.msrb.mxu2 %v9251_v43 }
 0x1d7   :  { %v12572_v1 = vpop.eup %12571  ;;  %v9091_v46 = vmul.f32 -1.442695, %v13368_v40  ;;  %4552 = vmatpush.bf16.msrb.mxu1 %v9675_v8  ;;  %4636 = vmatpush.bf16.msra.mxu3 %v9679_v45  ;;  %v10039_v8 = vor.u32 %v12132_v30, %v10038_v20  ;;  %v11973_v20 = vld [vmem:[#allocation6 + $0x27c] sm:$0xf]  ;;  %v12108_v30 = vld [vmem:[#allocation6 + $0x6ac] sm:$0xf0] }
 0x1d8   :  { %v13371_v48 = vadd.f32 1.0, %v12572_v1 }
 0x1d9   :  { %12573 = vpow2.f32 %v9091_v46  ;;  %4589 = vmatpush.bf16.msra.mxu0 %v9223_v61  ;;  %4673 = vmatpush.bf16.msrb.mxu2 %v9227_v50  ;;  %v10014_v46 = vld [vmem:[#allocation6 + $0x728] sm:$0xf]  ;;  %v12123_v50 = vld [vmem:[#allocation6 + $0x72c] sm:$0xf] }
 0x1da   :  { %12575 = vrcp.f32 %v13371_v48  ;;  %v2565_v51 = vand.u32 2147483648, %v13371_v48  ;;  %vm2559_vm9 = vweird.f32 %v13371_v48  ;;  %v2563_v12 = vand.u32 2147483647, %v13371_v48 }
 0x1db   :  { %v10019_v15 = vor.u32 %v12123_v50, %v10016_v56  ;;  %v11964_v50 = vld [vmem:[#allocation6 + $0x22c] sm:$0xf0] }
 0x1dc   :  { %v2566_v61 = vor.u32 1.1754944e-38, %v2565_v51  ;;  %vm2564_vm12 = vcmp.eq.f32.partialorder %v2563_v12, 8.507059e+37 }
 0x1dd   :  { %4590 = vmatpush.bf16.msra.mxu0 %v9199_v60  ;;  %4674 = vmatpush.bf16.msrb.mxu2 %v9203_v55  ;;  %v11988_v55 = vld [vmem:[#allocation6 + $0x2ec] sm:$0xf0] }
 0x1de   :  { %v9463_v57 = vor.u32 %v11988_v55, %v9462_v58  ;;  %v11961_v58 = vld [vmem:[#allocation6 + $0x21c] sm:$0xf]  ;;  %v12096_v55 = vld [vmem:[#allocation6 + $0x64c] sm:$0xf0] }
 0x1df   :  { %v12574_v5 = vpop.eup %12573 }
 0x1e0   :  { %v13374_v16 = vpop.eup %12575  ;;  %v13376_v59 = vadd.f32 1.0, %v12574_v5  ;;  %4539 = vmatmul.bf16.vlgmr.msrb.gmra.mxu0 %v13254_v53  ;;  %4623 = vmatmul.bf16.vlgmr.msra.gmra.mxu2 %v13254_v53  ;;  %v9464_v5 = vld [vmem:[#allocation6 + $0x2f0] sm:$0xf0] }
 0x1e1   :  { %v2555_v44 = vmul.f32 %v13374_v16, %v13371_v48  ;;  %4591 = vmatpush.bf16.msra.mxu0 %v9175_v2  ;;  %4675 = vmatpush.bf16.msrb.mxu2 %v9179_v3  ;;  %vm2560_vm8 = vweird.f32 %v13374_v16  ;;  %v12126_v48 = vld [vmem:[#allocation6 + $0x73c] sm:$0xf0]  ;;  %v12120_v3 = vld [vmem:[#allocation6 + $0x70c] sm:$0xf0]  ;;  %v9467_v0 = vor.u32 %v11985_v41, %v9464_v5  ;;  %v12093_v41 = vld [vmem:[#allocation6 + $0x63c] sm:$0xf] }
 0x1e2   :  { %12577 = vrcp.f32 %v13376_v59  ;;  %vm13390_vm10 = vmor %vm2559_vm9, %vm2560_vm8  ;;  %v2655_v38 = vand.u32 2147483648, %v13376_v59  ;;  %v2653_v1 = vand.u32 2147483647, %v13376_v59  ;;  %vm2649_vm13 = vweird.f32 %v13376_v59  ;;  %v9342_v5 = vld [vmem:[#allocation6 + $0x1e8] sm:$0xf] }
 0x1e3   :  { %v2556_v22 = vsub.f32 1.0, %v2555_v44  ;;  %v10015_v4 = vor.u32 %v12126_v48, %v10014_v46 }
 0x1e4   :  { %v2656_v60 = vor.u32 1.1754944e-38, %v2655_v38  ;;  %vm2654_vm15 = vcmp.eq.f32.partialorder %v2653_v1, 8.507059e+37  ;;  %v9947_v38 = vor.u32 %v12105_v9, %v9944_v32  ;;  %v9920_v1 = vld [vmem:[#allocation6 + $0x680] sm:$0xf0]  ;;  %v9294_v9 = vld [vmem:[#allocation6 + $0x188] sm:$0xf] }
 0x1e5   :  { %v2557_v35 = vmul.f32 %v13374_v16, %v2556_v22  ;;  %4592 = vmatpush.bf16.msra.mxu0 %v9151_v14  ;;  %4676 = vmatpush.bf16.msrb.mxu2 %v9155_v18  ;;  %v9438_v22 = vld [vmem:[#allocation6 + $0x2a8] sm:$0xf]  ;;  %v11982_v14 = vld [vmem:[#allocation6 + $0x2bc] sm:$0xf0] }
 0x1e6   :  { %v9439_v17 = vor.u32 %v11982_v14, %v9438_v22  ;;  %v12033_v22 = vld [vmem:[#allocation6 + $0x45c] sm:$0xf]  ;;  %v9656_v14 = vld [vmem:[#allocation6 + $0x470] sm:$0xf0]  ;;  %v11946_v32 = vld [vmem:[#allocation6 + $0x19c] sm:$0xf0] }
 0x1e7   :  { %v2558_v19 = vadd.f32 %v13374_v16, %v2557_v35 }
 0x1e8   :  { %v12578_v39 = vpop.eup %12577 }
 0x1e9   :  { %v2645_v27 = vmul.f32 %v12578_v39, %v13376_v59  ;;  %4593 = vmatpush.bf16.msra.mxu0 %v9127_v62  ;;  %4677 = vmatpush.bf16.msrb.mxu2 %v9131_v7  ;;  %v2562_v13 = vsel %vm13390_vm10, %v13374_v16, %v2558_v19  ;;  %vm2650_vm11 = vweird.f32 %v12578_v39  ;;  %v9990_v16 = vld [vmem:[#allocation6 + $0x6f8] sm:$0xf]  ;;  %v9992_v59 = vld [vmem:[#allocation6 + $0x710] sm:$0xf0]  ;;  %v11976_v7 = vld [vmem:[#allocation6 + $0x28c] sm:$0xf0] }
 0x1ea   :  { %v2567_v28 = vsel %vm2564_vm12, %v2566_v61, %v2562_v13  ;;  %vm2651_vm14 = vmor %vm2649_vm13, %vm2650_vm11  ;;  %v9991_v23 = vor.u32 %v12120_v3, %v9990_v16  ;;  %v9995_v35 = vor.u32 %v12117_v10, %v9992_v59  ;;  %v9414_v62 = vld [vmem:[#allocation6 + $0x278] sm:$0xf]  ;;  %v9416_v19 = vld [vmem:[#allocation6 + $0x290] sm:$0xf0] }
 0x1eb   :  { %v2646_v43 = vsub.f32 1.0, %v2645_v27  ;;  %v2664_v44 = vmul.f32 %v2567_v28, %v13357_v54  ;;  %v12114_v54 = vld [vmem:[#allocation6 + $0x6dc] sm:$0xf0]  ;;  %v9942_v27 = vld [vmem:[#allocation6 + $0x698] sm:$0xf]  ;;  %v9415_v51 = vor.u32 %v11976_v7, %v9414_v62  ;;  %v9419_v12 = vor.u32 %v11973_v20, %v9416_v19 }
 0x1ec   :  { %v9967_v26 = vor.u32 %v12114_v54, %v9966_v21  ;;  %v9943_v34 = vor.u32 %v12108_v30, %v9942_v27  ;;  %v12102_v13 = vld [vmem:[#allocation6 + $0x67c] sm:$0xf0]  ;;  %v9366_v61 = vld [vmem:[#allocation6 + $0x218] sm:$0xf]  ;;  %v9368_v28 = vld [vmem:[#allocation6 + $0x230] sm:$0xf0]  ;;  %v9659_v62 = vor.u32 %v12033_v22, %v9656_v14 }
 0x1ed   :  { %v2647_v45 = vmul.f32 %v12578_v39, %v2646_v43  ;;  %4594 = vmatpush.bf16.msra.mxu0 %v9103_v33  ;;  %4678 = vmatpush.bf16.msrb.mxu2 %v9107_v52  ;;  %v9390_v43 = vld [vmem:[#allocation6 + $0x248] sm:$0xf]  ;;  %v11970_v33 = vld [vmem:[#allocation6 + $0x25c] sm:$0xf0]  ;;  %v11967_v52 = vld [vmem:[#allocation6 + $0x24c] sm:$0xf] }
 0x1ee   :  { %v9391_v46 = vor.u32 %v11970_v33, %v9390_v43  ;;  %v11958_v16 = vld [vmem:[#allocation6 + $0x1fc] sm:$0xf0]  ;;  %v9344_v59 = vld [vmem:[#allocation6 + $0x200] sm:$0xf0]  ;;  %v9318_v21 = vld [vmem:[#allocation6 + $0x1b8] sm:$0xf] }
 0x1ef   :  { %v2648_v49 = vadd.f32 %v12578_v39, %v2647_v45  ;;  %v12099_v45 = vld [vmem:[#allocation6 + $0x66c] sm:$0xf]  ;;  %v9638_v20 = vld [vmem:[#allocation6 + $0x430] sm:$0xf]  ;;  %v12031_v19 = vld [vmem:[#allocation6 + $0x444] sm:$0xf0] }
 0x1f0   :  { %4595 = vmatmul.bf16.vlgmr.msra.gmra.mxu0 %v13219_v36  ;;  %4679 = vmatmul.bf16.vlgmr.msrb.gmra.mxu2 %v13219_v36  ;;  %v10230_v43 = vld [vmem:[#allocation6 + $0x8d8] sm:$0xf]  ;;  %v12180_v33 = vld [vmem:[#allocation6 + $0x8ec] sm:$0xf0]  ;;  %v9566_v22 = vld [vmem:[#allocation6 + $0x3a0] sm:$0xf] }
 0x1f1   :  { %v2652_v37 = vsel %vm2651_vm14, %v12578_v39, %v2648_v49  ;;  %4643 = vmatpush.bf16.msrb.mxu0 %v10039_v8  ;;  %4727 = vmatpush.bf16.msra.mxu2 %v10043_v29  ;;  %v9443_v39 = vor.u32 %v11979_v11, %v9440_v6  ;;  %v9392_v8 = vld [vmem:[#allocation6 + $0x260] sm:$0xf0]  ;;  %v9918_v29 = vld [vmem:[#allocation6 + $0x668] sm:$0xf]  ;;  %v9923_v49 = vor.u32 %v12099_v45, %v9920_v1  ;;  %v9614_v45 = vld [vmem:[#allocation6 + $0x400] sm:$0xf] }
 0x1f2   :  { %v2657_v2 = vsel %vm2654_vm15, %v2656_v60, %v2652_v37  ;;  %v9395_v48 = vor.u32 %v11967_v52, %v9392_v8  ;;  %v9919_v56 = vor.u32 %v12102_v13, %v9918_v29  ;;  %v9894_v60 = vld [vmem:[#allocation6 + $0x638] sm:$0xf]  ;;  %v9896_v37 = vld [vmem:[#allocation6 + $0x650] sm:$0xf0]  ;;  %v9343_v11 = vor.u32 %v11958_v16, %v9342_v5  ;;  %v12177_v52 = vld [vmem:[#allocation6 + $0x8dc] sm:$0xf] }
 0x1f3   :  { %v2670_v47 = vmul.f32 %v2657_v2, %v13368_v40  ;;  %v9968_v40 = vld [vmem:[#allocation6 + $0x6e0] sm:$0xf0]  ;;  %v11955_v2 = vld [vmem:[#allocation6 + $0x1ec] sm:$0xf]  ;;  %v9895_v3 = vor.u32 %v12096_v55, %v9894_v60  ;;  %v9899_v10 = vor.u32 %v12093_v41, %v9896_v37  ;;  %v10232_v8 = vld [vmem:[#allocation6 + $0x8f0] sm:$0xf0] }
 0x1f4   :  { %v9971_v42 = vor.u32 %v12111_v24, %v9968_v40  ;;  %v9347_v6 = vor.u32 %v11955_v2, %v9344_v59  ;;  %v11952_v40 = vld [vmem:[#allocation6 + $0x1cc] sm:$0xf0]  ;;  %v12021_v29 = vld [vmem:[#allocation6 + $0x3fc] sm:$0xf]  ;;  %v9608_v13 = vld [vmem:[#allocation6 + $0x410] sm:$0xf0] }
 0x1f5   :  { %v13404_v18 = vpack.c.bf16 %v2670_v47, %v2664_v44  ;;  %4644 = vmatpush.bf16.msrb.mxu0 %v10015_v4  ;;  %4728 = vmatpush.bf16.msra.mxu2 %v10019_v15  ;;  %v9367_v4 = vor.u32 %v11964_v50, %v9366_v61  ;;  %v9371_v15 = vor.u32 %v11961_v58, %v9368_v28  ;;  %v9870_v44 = vld [vmem:[#allocation6 + $0x608] sm:$0xf]  ;;  %v12090_v47 = vld [vmem:[#allocation6 + $0x61c] sm:$0xf0]  ;;  %v12025_v1 = vld [vmem:[#allocation6 + $0x414] sm:$0xf0] }
 0x1f6   :  { %v9871_v54 = vor.u32 %v12090_v47, %v9870_v44  ;;  %v9319_v27 = vor.u32 %v11952_v40, %v9318_v21  ;;  %v10231_v61 = vor.u32 %v12180_v33, %v10230_v43  ;;  %v10235_v50 = vor.u32 %v12177_v52, %v10232_v8  ;;  %v12171_v60 = vld [vmem:[#allocation6 + $0x8ac] sm:$0xf]  ;;  %v10208_v55 = vld [vmem:[#allocation6 + $0x8c0] sm:$0xf0]  ;;  %v10182_v2 = vld [vmem:[#allocation6 + $0x878] sm:$0xf] }
 0x1f7   :  { %4497 = vmatmul.bf16.vlgmr.msra.gmra.mxu1 %v13404_v18  ;;  %4581 = vmatmul.bf16.vlgmr.msrb.gmra.mxu3 %v13404_v18  ;;  %v9611_v58 = vor.u32 %v12021_v29, %v9608_v13  ;;  %v9615_v28 = vor.u32 %v12025_v1, %v9614_v45  ;;  %v12015_v41 = vld [vmem:[#allocation6 + $0x3cc] sm:$0xf]  ;;  %v9584_v37 = vld [vmem:[#allocation6 + $0x3e0] sm:$0xf0]  ;;  %v10211_v16 = vor.u32 %v12171_v60, %v10208_v55  ;;  %v12165_v44 = vld [vmem:[#allocation6 + $0x87c] sm:$0xf] }
 0x1f8   :  { %4601 = vmatpush.bf16.msra.mxu1 %v9463_v57  ;;  %4685 = vmatpush.bf16.msrb.mxu3 %v9467_v0  ;;  %v12087_v57 = vld [vmem:[#allocation6 + $0x60c] sm:$0xf]  ;;  %v9872_v0 = vld [vmem:[#allocation6 + $0x620] sm:$0xf0]  ;;  %v10184_v47 = vld [vmem:[#allocation6 + $0x890] sm:$0xf0] }
 0x1f9   :  { %4645 = vmatpush.bf16.msrb.mxu0 %v9991_v23  ;;  %4729 = vmatpush.bf16.msra.mxu2 %v9995_v35  ;;  %v9662_v23 = vld [vmem:[#allocation6 + $0x460] sm:$0xf]  ;;  %v12037_v35 = vld [vmem:[#allocation6 + $0x474] sm:$0xf0]  ;;  %v9875_v24 = vor.u32 %v12087_v57, %v9872_v0  ;;  %v12009_v57 = vld [vmem:[#allocation6 + $0x39c] sm:$0xf] }
 0x1fa   :  { %v9663_v7 = vor.u32 %v12037_v35, %v9662_v23  ;;  %v9560_v0 = vld [vmem:[#allocation6 + $0x3b0] sm:$0xf0]  ;;  %v12013_v14 = vld [vmem:[#allocation6 + $0x3b4] sm:$0xf0]  ;;  %v10187_v35 = vor.u32 %v12165_v44, %v10184_v47  ;;  %v10160_v40 = vld [vmem:[#allocation6 + $0x860] sm:$0xf0] }
 0x1fb   :  { %v9563_v21 = vor.u32 %v12009_v57, %v9560_v0  ;;  %v9518_v43 = vld [vmem:[#allocation6 + $0x340] sm:$0xf]  ;;  %v12001_v33 = vld [vmem:[#allocation6 + $0x354] sm:$0xf0]  ;;  %v10110_v52 = vld [vmem:[#allocation6 + $0x7e8] sm:$0xf] }
 0x1fc   :  { %4602 = vmatpush.bf16.msra.mxu1 %v9439_v17  ;;  %4686 = vmatpush.bf16.msrb.mxu3 %v9443_v39  ;;  %v11949_v17 = vld [vmem:[#allocation6 + $0x1bc] sm:$0xf]  ;;  %v9320_v39 = vld [vmem:[#allocation6 + $0x1d0] sm:$0xf0]  ;;  %v12150_v8 = vld [vmem:[#allocation6 + $0x7fc] sm:$0xf0]  ;;  %v9519_v45 = vor.u32 %v12001_v33, %v9518_v43 }
 0x1fd   :  { %4646 = vmatpush.bf16.msrb.mxu0 %v9967_v26  ;;  %4730 = vmatpush.bf16.msra.mxu2 %v9971_v42  ;;  %v12027_v26 = vld [vmem:[#allocation6 + $0x42c] sm:$0xf]  ;;  %v9632_v42 = vld [vmem:[#allocation6 + $0x440] sm:$0xf0]  ;;  %v9323_v30 = vor.u32 %v11949_v17, %v9320_v39  ;;  %v10111_v60 = vor.u32 %v12150_v8, %v10110_v52  ;;  %v11932_v44 = vld [vmem:[#allocation6 + $0x134] sm:$0xf] }
 0x1fe   :  { %v12003_v17 = vld [vmem:[#allocation6 + $0x36c] sm:$0xf]  ;;  %v9536_v39 = vld [vmem:[#allocation6 + $0x380] sm:$0xf0]  ;;  %v9206_v43 = vld [vmem:[#allocation6 + $0xd0] sm:$0xf] }
 0x1ff   :  { %v12147_v29 = vld [vmem:[#allocation6 + $0x7ec] sm:$0xf]  ;;  %v10112_v1 = vld [vmem:[#allocation6 + $0x800] sm:$0xf0]  ;;  %v11923_v33 = vld [vmem:[#allocation6 + $0xe4] sm:$0xf0] }
 0x200   :  { %4603 = vmatpush.bf16.msra.mxu1 %v9415_v51  ;;  %4687 = vmatpush.bf16.msrb.mxu3 %v9419_v12  ;;  %v11943_v51 = vld [vmem:[#allocation6 + $0x18c] sm:$0xf]  ;;  %v9296_v12 = vld [vmem:[#allocation6 + $0x1a0] sm:$0xf0]  ;;  %v10115_v55 = vor.u32 %v12147_v29, %v10112_v1  ;;  %v12069_v29 = vld [vmem:[#allocation6 + $0x57c] sm:$0xf] }
 0x201   :  { %4647 = vmatpush.bf16.msrb.mxu0 %v9943_v34  ;;  %4731 = vmatpush.bf16.msra.mxu2 %v9947_v38  ;;  %v9635_v34 = vor.u32 %v12027_v26, %v9632_v42  ;;  %v9639_v38 = vor.u32 %v12031_v19, %v9638_v20  ;;  %v10134_v20 = vld [vmem:[#allocation6 + $0x818] sm:$0xf]  ;;  %v12156_v19 = vld [vmem:[#allocation6 + $0x82c] sm:$0xf0]  ;;  %v9256_v47 = vld [vmem:[#allocation6 + $0x148] sm:$0xf0] }
 0x204   :  { %4604 = vmatpush.bf16.msra.mxu1 %v9391_v46  ;;  %4688 = vmatpush.bf16.msrb.mxu3 %v9395_v48  ;;  %v9295_v46 = vor.u32 %v11946_v32, %v9294_v9  ;;  %v9299_v48 = vor.u32 %v11943_v51, %v9296_v12  ;;  %v12153_v9 = vld [vmem:[#allocation6 + $0x81c] sm:$0xf]  ;;  %v10136_v32 = vld [vmem:[#allocation6 + $0x830] sm:$0xf0] }
 0x205   :  { %4648 = vmatpush.bf16.msrb.mxu0 %v9919_v56  ;;  %4732 = vmatpush.bf16.msra.mxu2 %v9923_v49  ;;  %v10206_v56 = vld [vmem:[#allocation6 + $0x8a8] sm:$0xf]  ;;  %v12174_v49 = vld [vmem:[#allocation6 + $0x8bc] sm:$0xf0]  ;;  %v11997_v51 = vld [vmem:[#allocation6 + $0x33c] sm:$0xf] }
 0x206   :  { %v10207_v5 = vor.u32 %v12174_v49, %v10206_v56  ;;  %v9512_v12 = vld [vmem:[#allocation6 + $0x350] sm:$0xf0]  ;;  %v9278_v56 = vld [vmem:[#allocation6 + $0x160] sm:$0xf]  ;;  %v11941_v49 = vld [vmem:[#allocation6 + $0x174] sm:$0xf0] }
 0x207   :  { %4553 = vmatmul.bf16.vlgmr.msrb.gmra.mxu1 %v13296_v63  ;;  %4637 = vmatmul.bf16.vlgmr.msra.gmra.mxu3 %v13296_v63  ;;  %v9515_v13 = vor.u32 %v11997_v51, %v9512_v12  ;;  %v9830_v51 = vld [vmem:[#allocation6 + $0x5b0] sm:$0xf]  ;;  %v12079_v12 = vld [vmem:[#allocation6 + $0x5c4] sm:$0xf0] }
 0x208   :  { %4605 = vmatpush.bf16.msra.mxu1 %v9367_v4  ;;  %4689 = vmatpush.bf16.msrb.mxu3 %v9371_v15  ;;  %v9590_v4 = vld [vmem:[#allocation6 + $0x3d0] sm:$0xf]  ;;  %v12019_v15 = vld [vmem:[#allocation6 + $0x3e4] sm:$0xf0]  ;;  %v9831_v8 = vor.u32 %v12079_v12, %v9830_v51 }
 0x209   :  { %4649 = vmatpush.bf16.msrb.mxu0 %v9895_v3  ;;  %4733 = vmatpush.bf16.msra.mxu2 %v9899_v10  ;;  %v12168_v3 = vld [vmem:[#allocation6 + $0x88c] sm:$0xf0]  ;;  %v9587_v10 = vor.u32 %v12015_v41, %v9584_v37  ;;  %v9591_v59 = vor.u32 %v12019_v15, %v9590_v4  ;;  %v10086_v41 = vld [vmem:[#allocation6 + $0x7b8] sm:$0xf] }
 0x20a   :  { %v10183_v23 = vor.u32 %v12168_v3, %v10182_v2  ;;  %v12144_v15 = vld [vmem:[#allocation6 + $0x7cc] sm:$0xf0]  ;;  %v9279_v2 = vor.u32 %v11941_v49, %v9278_v56  ;;  %v11914_v56 = vld [vmem:[#allocation6 + $0xa4] sm:$0xf]  ;;  %v9184_v49 = vld [vmem:[#allocation6 + $0xb8] sm:$0xf0] }
 0x20b   :  { %v10087_v57 = vor.u32 %v12144_v15, %v10086_v41  ;;  %v12067_v15 = vld [vmem:[#allocation6 + $0x564] sm:$0xf0] }
 0x20c   :  { %4606 = vmatpush.bf16.msra.mxu1 %v9343_v11  ;;  %4690 = vmatpush.bf16.msrb.mxu3 %v9347_v6  ;;  %v10158_v11 = vld [vmem:[#allocation6 + $0x848] sm:$0xf]  ;;  %v12162_v6 = vld [vmem:[#allocation6 + $0x85c] sm:$0xf0] }
 0x20d   :  { %4650 = vmatpush.bf16.msrb.mxu0 %v9871_v54  ;;  %4734 = vmatpush.bf16.msra.mxu2 %v9875_v24  ;;  %v9567_v54 = vor.u32 %v12013_v14, %v9566_v22  ;;  %v12159_v24 = vld [vmem:[#allocation6 + $0x84c] sm:$0xf]  ;;  %v10159_v26 = vor.u32 %v12162_v6, %v10158_v11  ;;  %v10062_v22 = vld [vmem:[#allocation6 + $0x788] sm:$0xf]  ;;  %v12138_v14 = vld [vmem:[#allocation6 + $0x79c] sm:$0xf0] }
 0x20e   :  { %v10163_v42 = vor.u32 %v12159_v24, %v10160_v40  ;;  %v12081_v11 = vld [vmem:[#allocation6 + $0x5dc] sm:$0xf]  ;;  %v9848_v6 = vld [vmem:[#allocation6 + $0x5f0] sm:$0xf0]  ;;  %v9854_v24 = vld [vmem:[#allocation6 + $0x5e0] sm:$0xf] }
 0x20f   :  { %v12085_v40 = vld [vmem:[#allocation6 + $0x5f4] sm:$0xf0] }
 0x210   :  { %4607 = vmatpush.bf16.msra.mxu1 %v9319_v27  ;;  %4691 = vmatpush.bf16.msrb.mxu3 %v9323_v30  ;;  %v9539_v27 = vor.u32 %v12003_v17, %v9536_v39  ;;  %v9230_v17 = vld [vmem:[#allocation6 + $0x100] sm:$0xf]  ;;  %v11929_v39 = vld [vmem:[#allocation6 + $0x114] sm:$0xf0] }
 0x211   :  { %4699 = vmatpush.bf16.msra.mxu0 %v9659_v62  ;;  %4783 = vmatpush.bf16.msrb.mxu2 %v9663_v7  ;;  %v9542_v62 = vld [vmem:[#allocation6 + $0x370] sm:$0xf]  ;;  %v12007_v7 = vld [vmem:[#allocation6 + $0x384] sm:$0xf0] }
 0x212   :  { %4651 = vmatmul.bf16.vlgmr.msrb.gmra.mxu0 %v13364_v25  ;;  %4735 = vmatmul.bf16.vlgmr.msra.gmra.mxu2 %v13364_v25  ;;  %v9543_v30 = vor.u32 %v12007_v7, %v9542_v62  ;;  %v11926_v62 = vld [vmem:[#allocation6 + $0x104] sm:$0xf]  ;;  %v9232_v7 = vld [vmem:[#allocation6 + $0x118] sm:$0xf0] }
 0x214   :  { %4608 = vmatpush.bf16.msra.mxu1 %v9295_v46  ;;  %4692 = vmatpush.bf16.msrb.mxu3 %v9299_v48  ;;  %v11991_v46 = vld [vmem:[#allocation6 + $0x30c] sm:$0xf]  ;;  %v9488_v48 = vld [vmem:[#allocation6 + $0x320] sm:$0xf0] }
 0x215   :  { %4700 = vmatpush.bf16.msra.mxu0 %v9635_v34  ;;  %4784 = vmatpush.bf16.msrb.mxu2 %v9639_v38  ;;  %v10135_v34 = vor.u32 %v12156_v19, %v10134_v20  ;;  %v10139_v38 = vor.u32 %v12153_v9, %v10136_v32  ;;  %v9491_v37 = vor.u32 %v11991_v46, %v9488_v48  ;;  %v9806_v46 = vld [vmem:[#allocation6 + $0x580] sm:$0xf]  ;;  %v12073_v48 = vld [vmem:[#allocation6 + $0x594] sm:$0xf0] }
 0x216   :  { %v9851_v20 = vor.u32 %v12081_v11, %v9848_v6  ;;  %v9855_v19 = vor.u32 %v12085_v40, %v9854_v24  ;;  %v9231_v9 = vor.u32 %v11929_v39, %v9230_v17  ;;  %v9235_v32 = vor.u32 %v11926_v62, %v9232_v7  ;;  %v11902_v11 = vld [vmem:[#allocation6 + $0x44] sm:$0xf]  ;;  %v9136_v6 = vld [vmem:[#allocation6 + $0x58] sm:$0xf0]  ;;  %v12051_v24 = vld [vmem:[#allocation6 + $0x4ec] sm:$0xf] }
 0x217   :  { %4609 = vmatmul.bf16.vlgmr.msra.gmra.mxu1 %v13223_v31  ;;  %4693 = vmatmul.bf16.vlgmr.msrb.gmra.mxu3 %v13223_v31  ;;  %v9728_v40 = vld [vmem:[#allocation6 + $0x500] sm:$0xf0]  ;;  %v9734_v17 = vld [vmem:[#allocation6 + $0x4f0] sm:$0xf]  ;;  %v9139_v62 = vor.u32 %v11902_v11, %v9136_v6  ;;  %v12055_v7 = vld [vmem:[#allocation6 + $0x504] sm:$0xf0] }
 0x218   :  { %4657 = vmatpush.bf16.msrb.mxu1 %v10231_v61  ;;  %4741 = vmatpush.bf16.msra.mxu3 %v10235_v50  ;;  %v9494_v61 = vld [vmem:[#allocation6 + $0x310] sm:$0xf]  ;;  %v11995_v50 = vld [vmem:[#allocation6 + $0x324] sm:$0xf0]  ;;  %v9731_v51 = vor.u32 %v12051_v24, %v9728_v40  ;;  %v9735_v12 = vor.u32 %v12055_v7, %v9734_v17  ;;  %v9422_v40 = vld [vmem:[#allocation6 + $0x280] sm:$0xf] }
 0x219   :  { %4701 = vmatpush.bf16.msra.mxu0 %v9611_v58  ;;  %4785 = vmatpush.bf16.msrb.mxu2 %v9615_v28  ;;  %v11938_v58 = vld [vmem:[#allocation6 + $0x164] sm:$0xf]  ;;  %v9280_v28 = vld [vmem:[#allocation6 + $0x178] sm:$0xf0]  ;;  %v9495_v4 = vor.u32 %v11995_v50, %v9494_v61  ;;  %v9182_v61 = vld [vmem:[#allocation6 + $0xa0] sm:$0xf] }
 0x21a   :  { %v9283_v3 = vor.u32 %v11938_v58, %v9280_v28  ;;  %v11917_v50 = vld [vmem:[#allocation6 + $0xb4] sm:$0xf0]  ;;  %v9807_v28 = vor.u32 %v12073_v48, %v9806_v46  ;;  %v12124_v46 = vld [vmem:[#allocation6 + $0x734] sm:$0xf]  ;;  %v10024_v48 = vld [vmem:[#allocation6 + $0x748] sm:$0xf0] }
 0x21b   :  { %v9183_v41 = vor.u32 %v11917_v50, %v9182_v61  ;;  %v9974_v11 = vld [vmem:[#allocation6 + $0x6d0] sm:$0xf]  ;;  %v12115_v6 = vld [vmem:[#allocation6 + $0x6e4] sm:$0xf0]  ;;  %v11977_v17 = vld [vmem:[#allocation6 + $0x294] sm:$0xf0] }
 0x21c   :  { %4658 = vmatpush.bf16.msrb.mxu1 %v10207_v5  ;;  %4742 = vmatpush.bf16.msra.mxu3 %v10211_v16  ;;  %v12141_v5 = vld [vmem:[#allocation6 + $0x7bc] sm:$0xf]  ;;  %v10088_v16 = vld [vmem:[#allocation6 + $0x7d0] sm:$0xf0]  ;;  %v11974_v7 = vld [vmem:[#allocation6 + $0x284] sm:$0xf] }
 0x21d   :  { %4702 = vmatpush.bf16.msra.mxu0 %v9587_v10  ;;  %4786 = vmatpush.bf16.msrb.mxu2 %v9591_v59  ;;  %v9254_v10 = vld [vmem:[#allocation6 + $0x130] sm:$0xf]  ;;  %v11935_v59 = vld [vmem:[#allocation6 + $0x144] sm:$0xf0]  ;;  %v10091_v0 = vor.u32 %v12141_v5, %v10088_v16 }
 0x21e   :  { %v9158_v5 = vld [vmem:[#allocation6 + $0x70] sm:$0xf]  ;;  %v11911_v16 = vld [vmem:[#allocation6 + $0x84] sm:$0xf0] }
 0x220   :  { %4659 = vmatpush.bf16.msrb.mxu1 %v10183_v23  ;;  %4743 = vmatpush.bf16.msra.mxu3 %v10187_v35  ;;  %v12135_v23 = vld [vmem:[#allocation6 + $0x78c] sm:$0xf]  ;;  %v10064_v35 = vld [vmem:[#allocation6 + $0x7a0] sm:$0xf0] }
 0x221   :  { %4703 = vmatpush.bf16.msra.mxu0 %v9563_v21  ;;  %4787 = vmatpush.bf16.msrb.mxu2 %v9567_v54  ;;  %v9255_v21 = vor.u32 %v11935_v59, %v9254_v10  ;;  %v9259_v54 = vor.u32 %v11932_v44, %v9256_v47  ;;  %v12057_v44 = vld [vmem:[#allocation6 + $0x51c] sm:$0xf]  ;;  %v9752_v47 = vld [vmem:[#allocation6 + $0x530] sm:$0xf0] }
 0x224   :  { %4660 = vmatpush.bf16.msrb.mxu1 %v10159_v26  ;;  %4744 = vmatpush.bf16.msra.mxu3 %v10163_v42  ;;  %v10063_v26 = vor.u32 %v12138_v14, %v10062_v22  ;;  %v10067_v42 = vor.u32 %v12135_v23, %v10064_v35  ;;  %v9758_v22 = vld [vmem:[#allocation6 + $0x520] sm:$0xf]  ;;  %v12061_v14 = vld [vmem:[#allocation6 + $0x534] sm:$0xf0] }
 0x225   :  { %4704 = vmatpush.bf16.msra.mxu0 %v9539_v27  ;;  %4788 = vmatpush.bf16.msrb.mxu2 %v9543_v30  ;;  %v12075_v27 = vld [vmem:[#allocation6 + $0x5ac] sm:$0xf]  ;;  %v9824_v30 = vld [vmem:[#allocation6 + $0x5c0] sm:$0xf0]  ;;  %v9134_v23 = vld [vmem:[#allocation6 + $0x40] sm:$0xf] }
 0x226   :  { %v9827_v52 = vor.u32 %v12075_v27, %v9824_v30  ;;  %v11905_v35 = vld [vmem:[#allocation6 + $0x54] sm:$0xf0]  ;;  %v10046_v27 = vld [vmem:[#allocation6 + $0x760] sm:$0xf] }
 0x227   :  { %v9135_v39 = vor.u32 %v11905_v35, %v9134_v23  ;;  %v12133_v30 = vld [vmem:[#allocation6 + $0x774] sm:$0xf0]  ;;  %v11980_v23 = vld [vmem:[#allocation6 + $0x2b4] sm:$0xf]  ;;  %v9448_v35 = vld [vmem:[#allocation6 + $0x2c8] sm:$0xf0] }
 0x228   :  { %4661 = vmatpush.bf16.msrb.mxu1 %v10135_v34  ;;  %4745 = vmatpush.bf16.msra.mxu3 %v10139_v38  ;;  %v11920_v34 = vld [vmem:[#allocation6 + $0xd4] sm:$0xf]  ;;  %v9208_v38 = vld [vmem:[#allocation6 + $0xe8] sm:$0xf0] }
 0x229   :  { %4705 = vmatpush.bf16.msra.mxu0 %v9515_v13  ;;  %4789 = vmatpush.bf16.msrb.mxu2 %v9519_v45  ;;  %v9800_v13 = vld [vmem:[#allocation6 + $0x590] sm:$0xf0]  ;;  %v9207_v45 = vor.u32 %v11923_v33, %v9206_v43  ;;  %v9211_v1 = vor.u32 %v11920_v34, %v9208_v38  ;;  %v12045_v43 = vld [vmem:[#allocation6 + $0x4bc] sm:$0xf] }
 0x22a   :  { %v9803_v58 = vor.u32 %v12069_v29, %v9800_v13  ;;  %v9704_v38 = vld [vmem:[#allocation6 + $0x4d0] sm:$0xf0]  ;;  %v10047_v29 = vor.u32 %v12133_v30, %v10046_v27  ;;  %v9952_v27 = vld [vmem:[#allocation6 + $0x6b8] sm:$0xf0]  ;;  %v9423_v30 = vor.u32 %v11977_v17, %v9422_v40 }
 0x22b   :  { %v9707_v61 = vor.u32 %v12045_v43, %v9704_v38  ;;  %v9926_v38 = vld [vmem:[#allocation6 + $0x670] sm:$0xf]  ;;  %v9328_v40 = vld [vmem:[#allocation6 + $0x1d8] sm:$0xf0] }
 0x22c   :  { %4662 = vmatpush.bf16.msrb.mxu1 %v10111_v60  ;;  %4746 = vmatpush.bf16.msra.mxu3 %v10115_v55  ;;  %v12063_v60 = vld [vmem:[#allocation6 + $0x54c] sm:$0xf]  ;;  %v9776_v55 = vld [vmem:[#allocation6 + $0x560] sm:$0xf0] }
 0x22d   :  { %4706 = vmatpush.bf16.msra.mxu0 %v9491_v37  ;;  %4790 = vmatpush.bf16.msrb.mxu2 %v9495_v4  ;;  %v9187_v37 = vor.u32 %v11914_v56, %v9184_v49  ;;  %v9782_v4 = vld [vmem:[#allocation6 + $0x550] sm:$0xf]  ;;  %v9779_v10 = vor.u32 %v12063_v60, %v9776_v55  ;;  %v12039_v56 = vld [vmem:[#allocation6 + $0x48c] sm:$0xf]  ;;  %v9680_v49 = vld [vmem:[#allocation6 + $0x4a0] sm:$0xf0] }
 0x22e   :  { %v9783_v59 = vor.u32 %v12067_v15, %v9782_v4  ;;  %v9470_v60 = vld [vmem:[#allocation6 + $0x2e0] sm:$0xf]  ;;  %v11989_v55 = vld [vmem:[#allocation6 + $0x2f4] sm:$0xf0]  ;;  %v11986_v4 = vld [vmem:[#allocation6 + $0x2e4] sm:$0xf] }
 0x22f   :  { %v9472_v15 = vld [vmem:[#allocation6 + $0x2f8] sm:$0xf0] }
 0x230   :  { %4663 = vmatpush.bf16.msrb.mxu1 %v10087_v57  ;;  %4747 = vmatpush.bf16.msra.mxu3 %v10091_v0  ;;  %v9159_v57 = vor.u32 %v11911_v16, %v9158_v5  ;;  %v9998_v5 = vld [vmem:[#allocation6 + $0x700] sm:$0xf]  ;;  %v12121_v16 = vld [vmem:[#allocation6 + $0x714] sm:$0xf0] }
 0x231   :  { %4755 = vmatpush.bf16.msrb.mxu0 %v9279_v2  ;;  %4839 = vmatpush.bf16.msra.mxu2 %v9283_v3  ;;  %v11908_v2 = vld [vmem:[#allocation6 + $0x74] sm:$0xf]  ;;  %v9160_v3 = vld [vmem:[#allocation6 + $0x88] sm:$0xf0] }
 0x232   :  { %4707 = vmatmul.bf16.vlgmr.msra.gmra.mxu0 %v13254_v53  ;;  %4791 = vmatmul.bf16.vlgmr.msrb.gmra.mxu2 %v13254_v53  ;;  %v9163_v0 = vor.u32 %v11908_v2, %v9160_v3  ;;  %v12118_v2 = vld [vmem:[#allocation6 + $0x704] sm:$0xf]  ;;  %v10000_v3 = vld [vmem:[#allocation6 + $0x718] sm:$0xf0] }
 0x234   :  { %4664 = vmatpush.bf16.msrb.mxu1 %v10063_v26  ;;  %4748 = vmatpush.bf16.msra.mxu3 %v10067_v42  ;;  %v9110_v26 = vld [vmem:[#allocation6 + $0x10] sm:$0xf]  ;;  %v11899_v42 = vld [vmem:[#allocation6 + $0x24] sm:$0xf0] }
 0x235   :  { %4756 = vmatpush.bf16.msrb.mxu0 %v9255_v21  ;;  %4840 = vmatpush.bf16.msra.mxu2 %v9259_v54  ;;  %v9755_v21 = vor.u32 %v12057_v44, %v9752_v47  ;;  %v9759_v54 = vor.u32 %v12061_v14, %v9758_v22  ;;  %v9111_v33 = vor.u32 %v11899_v42, %v9110_v26  ;;  %v9424_v26 = vld [vmem:[#allocation6 + $0x298] sm:$0xf0]  ;;  %v9950_v42 = vld [vmem:[#allocation6 + $0x6a0] sm:$0xf] }
 0x236   :  { %v9471_v44 = vor.u32 %v11989_v55, %v9470_v60  ;;  %v9475_v47 = vor.u32 %v11986_v4, %v9472_v15  ;;  %v9999_v22 = vor.u32 %v12121_v16, %v9998_v5  ;;  %v10003_v14 = vor.u32 %v12118_v2, %v10000_v3  ;;  %v12094_v60 = vld [vmem:[#allocation6 + $0x644] sm:$0xf]  ;;  %v9904_v55 = vld [vmem:[#allocation6 + $0x658] sm:$0xf0]  ;;  %v9350_v4 = vld [vmem:[#allocation6 + $0x1f0] sm:$0xf] }
 0x237   :  { %4665 = vmatmul.bf16.vlgmr.msrb.gmra.mxu1 %v13404_v18  ;;  %4749 = vmatmul.bf16.vlgmr.msra.gmra.mxu3 %v13404_v18  ;;  %v11959_v15 = vld [vmem:[#allocation6 + $0x204] sm:$0xf0]  ;;  %v9907_v16 = vor.u32 %v12094_v60, %v9904_v55  ;;  %v11956_v2 = vld [vmem:[#allocation6 + $0x1f4] sm:$0xf]  ;;  %v9352_v3 = vld [vmem:[#allocation6 + $0x208] sm:$0xf0] }
 0x238   :  { %4713 = vmatpush.bf16.msra.mxu1 %v9851_v20  ;;  %4797 = vmatpush.bf16.msrb.mxu3 %v9855_v19  ;;  %v11896_v20 = vld [vmem:[#allocation6 + $0x14] sm:$0xf]  ;;  %v9112_v19 = vld [vmem:[#allocation6 + $0x28] sm:$0xf0] }
 0x239   :  { %4757 = vmatpush.bf16.msrb.mxu0 %v9231_v9  ;;  %4841 = vmatpush.bf16.msra.mxu2 %v9235_v32  ;;  %v12130_v9 = vld [vmem:[#allocation6 + $0x764] sm:$0xf]  ;;  %v10048_v32 = vld [vmem:[#allocation6 + $0x778] sm:$0xf0]  ;;  %v9115_v34 = vor.u32 %v11896_v20, %v9112_v19  ;;  %v12109_v20 = vld [vmem:[#allocation6 + $0x6b4] sm:$0xf0] }
 0x23a   :  { %v10051_v13 = vor.u32 %v12130_v9, %v10048_v32  ;;  %v12106_v19 = vld [vmem:[#allocation6 + $0x6a4] sm:$0xf]  ;;  %v9427_v9 = vor.u32 %v11974_v7, %v9424_v26  ;;  %v9398_v32 = vld [vmem:[#allocation6 + $0x250] sm:$0xf]  ;;  %v12028_v7 = vld [vmem:[#allocation6 + $0x434] sm:$0xf] }
 0x23b   :  { %v9955_v43 = vor.u32 %v12106_v19, %v9952_v27  ;;  %v9640_v26 = vld [vmem:[#allocation6 + $0x448] sm:$0xf0]  ;;  %v9302_v27 = vld [vmem:[#allocation6 + $0x190] sm:$0xf]  ;;  %v12016_v55 = vld [vmem:[#allocation6 + $0x3d4] sm:$0xf] }
 0x23c   :  { %4714 = vmatpush.bf16.msra.mxu1 %v9827_v52  ;;  %4798 = vmatpush.bf16.msrb.mxu3 %v9831_v8  ;;  %v9710_v52 = vld [vmem:[#allocation6 + $0x4c0] sm:$0xf]  ;;  %v12049_v8 = vld [vmem:[#allocation6 + $0x4d4] sm:$0xf0] }
 0x23d   :  { %4758 = vmatpush.bf16.msrb.mxu0 %v9207_v45  ;;  %4842 = vmatpush.bf16.msra.mxu2 %v9211_v1  ;;  %v10022_v45 = vld [vmem:[#allocation6 + $0x730] sm:$0xf]  ;;  %v12127_v1 = vld [vmem:[#allocation6 + $0x744] sm:$0xf0]  ;;  %v9711_v50 = vor.u32 %v12049_v8, %v9710_v52  ;;  %v12100_v8 = vld [vmem:[#allocation6 + $0x674] sm:$0xf] }
 0x23e   :  { %v12103_v52 = vld [vmem:[#allocation6 + $0x684] sm:$0xf0] }
 0x240   :  { %4715 = vmatpush.bf16.msra.mxu1 %v9803_v58  ;;  %4799 = vmatpush.bf16.msrb.mxu3 %v9807_v28  ;;  %v9686_v58 = vld [vmem:[#allocation6 + $0x490] sm:$0xf]  ;;  %v12043_v28 = vld [vmem:[#allocation6 + $0x4a4] sm:$0xf0] }
 0x241   :  { %4759 = vmatpush.bf16.msrb.mxu0 %v9183_v41  ;;  %4843 = vmatpush.bf16.msra.mxu2 %v9187_v37  ;;  %v10023_v41 = vor.u32 %v12127_v1, %v10022_v45  ;;  %v10027_v37 = vor.u32 %v12124_v46, %v10024_v48  ;;  %v9374_v1 = vld [vmem:[#allocation6 + $0x220] sm:$0xf]  ;;  %v11965_v46 = vld [vmem:[#allocation6 + $0x234] sm:$0xf0]  ;;  %v13422_v48 = vpop.f32.mrf.mxu0 }
 0x244   :  { %4716 = vmatpush.bf16.msra.mxu1 %v9779_v10  ;;  %4800 = vmatpush.bf16.msrb.mxu3 %v9783_v59  ;;  %v9683_v10 = vor.u32 %v12039_v56, %v9680_v49  ;;  %v9687_v59 = vor.u32 %v12043_v28, %v9686_v58  ;;  %v11962_v56 = vld [vmem:[#allocation6 + $0x224] sm:$0xf]  ;;  %v9376_v49 = vld [vmem:[#allocation6 + $0x238] sm:$0xf0]  ;;  %v9902_v58 = vld [vmem:[#allocation6 + $0x640] sm:$0xf] }
 0x245   :  { %4760 = vmatpush.bf16.msrb.mxu0 %v9159_v57  ;;  %4844 = vmatpush.bf16.msra.mxu2 %v9163_v0  ;;  %v9446_v57 = vld [vmem:[#allocation6 + $0x2b0] sm:$0xf]  ;;  %v11983_v0 = vld [vmem:[#allocation6 + $0x2c4] sm:$0xf0]  ;;  %v12097_v28 = vld [vmem:[#allocation6 + $0x654] sm:$0xf0] }
 0x246   :  { %v9447_v24 = vor.u32 %v11983_v0, %v9446_v57  ;;  %v9903_v5 = vor.u32 %v12097_v28, %v9902_v58  ;;  %v13424_v57 = vpop.f32.mrf.mxu2  ;;  %v12034_v0 = vld [vmem:[#allocation6 + $0x464] sm:$0xf]  ;;  %v12172_v58 = vld [vmem:[#allocation6 + $0x8b4] sm:$0xf]  ;;  %v10216_v28 = vld [vmem:[#allocation6 + $0x8c8] sm:$0xf0] }
 0x248   :  { %4717 = vmatpush.bf16.msra.mxu1 %v9755_v21  ;;  %4801 = vmatpush.bf16.msrb.mxu3 %v9759_v54  ;;  %v12112_v21 = vld [vmem:[#allocation6 + $0x6d4] sm:$0xf]  ;;  %v9976_v54 = vld [vmem:[#allocation6 + $0x6e8] sm:$0xf0] }
 0x249   :  { %4761 = vmatpush.bf16.msrb.mxu0 %v9135_v39  ;;  %4845 = vmatpush.bf16.msra.mxu2 %v9139_v62  ;;  %v9975_v39 = vor.u32 %v12115_v6, %v9974_v11  ;;  %v9979_v62 = vor.u32 %v12112_v21, %v9976_v54  ;;  %v9355_v11 = vor.u32 %v11956_v2, %v9352_v3  ;;  %v9326_v6 = vld [vmem:[#allocation6 + $0x1c0] sm:$0xf]  ;;  %v12166_v2 = vld [vmem:[#allocation6 + $0x884] sm:$0xf]  ;;  %v10192_v3 = vld [vmem:[#allocation6 + $0x898] sm:$0xf0] }
 0x24c   :  { %4718 = vmatpush.bf16.msra.mxu1 %v9731_v51  ;;  %4802 = vmatpush.bf16.msrb.mxu3 %v9735_v12  ;;  %v11971_v51 = vld [vmem:[#allocation6 + $0x264] sm:$0xf0]  ;;  %v9951_v12 = vor.u32 %v12109_v20, %v9950_v42 }
 0x24d   :  { %4762 = vmatpush.bf16.msrb.mxu0 %v9111_v33  ;;  %4846 = vmatpush.bf16.msra.mxu2 %v9115_v34  ;;  %v11968_v33 = vld [vmem:[#allocation6 + $0x254] sm:$0xf]  ;;  %v9400_v34 = vld [vmem:[#allocation6 + $0x268] sm:$0xf0] }
 0x24e   :  { %v9403_v45 = vor.u32 %v11968_v33, %v9400_v34  ;;  %v12178_v33 = vld [vmem:[#allocation6 + $0x8e4] sm:$0xf]  ;;  %v10240_v34 = vld [vmem:[#allocation6 + $0x8f8] sm:$0xf0] }
 0x250   :  { %4719 = vmatpush.bf16.msra.mxu1 %v9707_v61  ;;  %4803 = vmatpush.bf16.msrb.mxu3 %v9711_v50  ;;  %v9927_v61 = vor.u32 %v12103_v52, %v9926_v38  ;;  %v12022_v38 = vld [vmem:[#allocation6 + $0x404] sm:$0xf]  ;;  %v9616_v52 = vld [vmem:[#allocation6 + $0x418] sm:$0xf0] }
 0x251   :  { %4811 = vmatpush.bf16.msra.mxu0 %v10047_v29  ;;  %4895 = vmatpush.bf16.msrb.mxu2 %v10051_v13  ;;  %v9928_v29 = vld [vmem:[#allocation6 + $0x688] sm:$0xf0]  ;;  %v9399_v13 = vor.u32 %v11971_v51, %v9398_v32  ;;  %v10238_v51 = vld [vmem:[#allocation6 + $0x8e0] sm:$0xf] }
 0x252   :  { %4763 = vmatmul.bf16.vlgmr.msrb.gmra.mxu0 %v13219_v36  ;;  %4847 = vmatmul.bf16.vlgmr.msra.gmra.mxu2 %v13219_v36  ;;  %v9451_v36 = vor.u32 %v11980_v23, %v9448_v35  ;;  %v9931_v50 = vor.u32 %v12100_v8, %v9928_v29  ;;  %v13428_v23 = vpop.f32.mrf.mxu3  ;;  %v9351_v35 = vor.u32 %v11959_v15, %v9350_v4  ;;  %v9304_v32 = vld [vmem:[#allocation6 + $0x1a8] sm:$0xf0]  ;;  %v10190_v15 = vld [vmem:[#allocation6 + $0x880] sm:$0xf] }
 0x253   :  { %v10219_v4 = vor.u32 %v12172_v58, %v10216_v28  ;;  %v12227_v58 = vld [vmem:[#allocation9 + $0x164] sm:$0xf0] }
 0x254   :  { %4720 = vmatpush.bf16.msra.mxu1 %v9683_v10  ;;  %4804 = vmatpush.bf16.msrb.mxu3 %v9687_v59  ;;  %v9878_v10 = vld [vmem:[#allocation6 + $0x610] sm:$0xf]  ;;  %v12091_v59 = vld [vmem:[#allocation6 + $0x624] sm:$0xf0] }
 0x255   :  { %4812 = vmatpush.bf16.msra.mxu0 %v10023_v41  ;;  %4896 = vmatpush.bf16.msrb.mxu2 %v10027_v37  ;;  %v9375_v41 = vor.u32 %v11965_v46, %v9374_v1  ;;  %v9379_v37 = vor.u32 %v11962_v56, %v9376_v49  ;;  %v9879_v21 = vor.u32 %v12091_v59, %v9878_v10  ;;  %v10214_v46 = vld [vmem:[#allocation6 + $0x8b0] sm:$0xf]  ;;  %v12175_v49 = vld [vmem:[#allocation6 + $0x8c4] sm:$0xf0]  ;;  %v12010_v10 = vld [vmem:[#allocation6 + $0x3a4] sm:$0xf] }
 0x256   :  { %v10243_v1 = vor.u32 %v12178_v33, %v10240_v34  ;;  %v9619_v56 = vor.u32 %v12022_v38, %v9616_v52  ;;  %v9568_v59 = vld [vmem:[#allocation6 + $0x3b8] sm:$0xf0]  ;;  %v10118_v38 = vld [vmem:[#allocation6 + $0x7f0] sm:$0xf] }
 0x257   :  { %4721 = vmatmul.bf16.vlgmr.msra.gmra.mxu1 %v13296_v63  ;;  %4805 = vmatmul.bf16.vlgmr.msrb.gmra.mxu3 %v13296_v63 }
 0x258   :  { %4769 = vmatpush.bf16.msrb.mxu1 %v9471_v44  ;;  %4853 = vmatpush.bf16.msra.mxu3 %v9475_v47  ;;  %v12088_v44 = vld [vmem:[#allocation6 + $0x614] sm:$0xf]  ;;  %v9880_v47 = vld [vmem:[#allocation6 + $0x628] sm:$0xf0] }
 0x259   :  { %4813 = vmatpush.bf16.msra.mxu0 %v9999_v22  ;;  %4897 = vmatpush.bf16.msrb.mxu2 %v10003_v14  ;;  %v9664_v22 = vld [vmem:[#allocation6 + $0x478] sm:$0xf0]  ;;  %v13426_v14 = vld [vmem:[#allocation7] sm:$0x3f]  ;;  %v9883_v54 = vor.u32 %v12088_v44, %v9880_v47 }
 0x25a   :  { %v9667_v17 = vor.u32 %v12034_v0, %v9664_v22  ;;  %v2967_v42 = vperm.slane %v13426_v14, 0  ;;  %v10195_v0 = vor.u32 %v12166_v2, %v10192_v3  ;;  %v10166_v22 = vld [vmem:[#allocation6 + $0x850] sm:$0xf] }
 0x25c   :  { %4770 = vmatpush.bf16.msrb.mxu1 %v9447_v24  ;;  %4854 = vmatpush.bf16.msra.mxu3 %v9451_v36  ;;  %v11953_v24 = vld [vmem:[#allocation6 + $0x1d4] sm:$0xf0]  ;;  %v11950_v36 = vld [vmem:[#allocation6 + $0x1c4] sm:$0xf] }
 0x25d   :  { %4814 = vmatpush.bf16.msra.mxu0 %v9975_v39  ;;  %4898 = vmatpush.bf16.msrb.mxu2 %v9979_v62  ;;  %v4442_v39 = vpop.f32.mrf.mxu1  ;;  %v13430_v62 = vpop.f32.mrf.mxu0  ;;  %v9327_v20 = vor.u32 %v11953_v24, %v9326_v6  ;;  %v9331_v19 = vor.u32 %v11950_v36, %v9328_v40  ;;  %v9571_v6 = vor.u32 %v12010_v10, %v9568_v59  ;;  %v12004_v36 = vld [vmem:[#allocation6 + $0x374] sm:$0xf]  ;;  %v9544_v40 = vld [vmem:[#allocation6 + $0x388] sm:$0xf0] }
 0x260   :  { %4771 = vmatpush.bf16.msrb.mxu1 %v9423_v30  ;;  %4855 = vmatpush.bf16.msra.mxu3 %v9427_v9  ;;  %v11947_v30 = vld [vmem:[#allocation6 + $0x1a4] sm:$0xf0]  ;;  %v11944_v9 = vld [vmem:[#allocation6 + $0x194] sm:$0xf] }
 0x261   :  { %4815 = vmatpush.bf16.msra.mxu0 %v9951_v12  ;;  %4899 = vmatpush.bf16.msrb.mxu2 %v9955_v43  ;;  %v9643_v12 = vor.u32 %v12028_v7, %v9640_v26  ;;  %v12181_v43 = vld [vmem:[#allocation6 + $0x8f4] sm:$0xf0]  ;;  %v9303_v8 = vor.u32 %v11947_v30, %v9302_v27  ;;  %v9307_v29 = vor.u32 %v11944_v9, %v9304_v32  ;;  %v12154_v30 = vld [vmem:[#allocation6 + $0x824] sm:$0xf]  ;;  %v10144_v9 = vld [vmem:[#allocation6 + $0x838] sm:$0xf0] }
 0x262   :  { %v12157_v27 = vld [vmem:[#allocation6 + $0x834] sm:$0xf0]  ;;  %v11998_v32 = vld [vmem:[#allocation6 + $0x344] sm:$0xf]  ;;  %v10147_v34 = vor.u32 %v12154_v30, %v10144_v9  ;;  %v12076_v9 = vld [vmem:[#allocation6 + $0x5b4] sm:$0xf] }
 0x264   :  { %4772 = vmatpush.bf16.msrb.mxu1 %v9399_v13  ;;  %4856 = vmatpush.bf16.msra.mxu3 %v9403_v45  ;;  %v13433_v13 = vpop.f32.mrf.mxu2  ;;  %v10239_v45 = vor.u32 %v12181_v43, %v10238_v51  ;;  %v9520_v51 = vld [vmem:[#allocation6 + $0x358] sm:$0xf0] }
 0x265   :  { %4816 = vmatpush.bf16.msra.mxu0 %v9927_v61  ;;  %4900 = vmatpush.bf16.msrb.mxu2 %v9931_v50  ;;  %v4429_v61 = vadd.f32 %v13422_v48, %v2967_v42  ;;  %v13440_v50 = vpop.f32.mrf.mxu3  ;;  %v4484_v60 = vpop.f32.mrf.mxu0 }
 0x268   :  { %4773 = vmatpush.bf16.msrb.mxu1 %v9375_v41  ;;  %4857 = vmatpush.bf16.msra.mxu3 %v9379_v37  ;;  %v9592_v41 = vld [vmem:[#allocation6 + $0x3e8] sm:$0xf0]  ;;  %v10215_v37 = vor.u32 %v12175_v49, %v10214_v46  ;;  %v11992_v46 = vld [vmem:[#allocation6 + $0x314] sm:$0xf] }
 0x269   :  { %4817 = vmatpush.bf16.msra.mxu0 %v9903_v5  ;;  %4901 = vmatpush.bf16.msrb.mxu2 %v9907_v16  ;;  %v4443_v5 = vadd.f32 %v4442_v39, %v4429_v61  ;;  %v9595_v48 = vor.u32 %v12016_v55, %v9592_v41  ;;  %v12169_v16 = vld [vmem:[#allocation6 + $0x894] sm:$0xf0]  ;;  %v9496_v61 = vld [vmem:[#allocation6 + $0x328] sm:$0xf0] }
 0x26a   :  { %v10191_v47 = vor.u32 %v12169_v16, %v10190_v15  ;;  %v10426_v49 = vld [vmem:[#allocation9 + $0x150] sm:$0xf]  ;;  %v12142_v15 = vld [vmem:[#allocation6 + $0x7c4] sm:$0xf] }
 0x26b   :  { %v4457_v44 = vadd.f32 %v13424_v57, %v4443_v5  ;;  %v10096_v5 = vld [vmem:[#allocation6 + $0x7d8] sm:$0xf0]  ;;  %v10427_v2 = vor.u32 %v12227_v58, %v10426_v49  ;;  %v10330_v49 = vld [vmem:[#allocation9 + $0x90] sm:$0xf]  ;;  %v12203_v58 = vld [vmem:[#allocation9 + $0xa4] sm:$0xf0] }
 0x26c   :  { %4774 = vmatpush.bf16.msrb.mxu1 %v9351_v35  ;;  %4858 = vmatpush.bf16.msra.mxu3 %v9355_v11  ;;  %v4431_v35 = vadd.f32 %v13430_v62, %v2967_v42  ;;  %v4512_v24 = vpop.f32.mrf.mxu2  ;;  %v10142_v62 = vld [vmem:[#allocation6 + $0x820] sm:$0xf] }
 0x26d   :  { %4818 = vmatpush.bf16.msra.mxu0 %v9879_v21  ;;  %4902 = vmatpush.bf16.msrb.mxu2 %v9883_v54  ;;  %v4471_v11 = vadd.f32 %v13428_v23, %v4457_v44  ;;  %v12163_v21 = vld [vmem:[#allocation6 + $0x864] sm:$0xf0]  ;;  %v12160_v54 = vld [vmem:[#allocation6 + $0x854] sm:$0xf]  ;;  %v13449_v57 = vpop.f32.mrf.mxu3  ;;  %v4486_v39 = vpop.f32.mrf.mxu0  ;;  %v10143_v33 = vor.u32 %v12157_v27, %v10142_v62 }
 0x26e   :  { %v10167_v26 = vor.u32 %v12163_v21, %v10166_v22  ;;  %v10402_v44 = vld [vmem:[#allocation9 + $0x120] sm:$0xf] }
 0x26f   :  { %v12139_v21 = vld [vmem:[#allocation6 + $0x7a4] sm:$0xf0] }
 0x270   :  { %4775 = vmatpush.bf16.msrb.mxu1 %v9327_v20  ;;  %4859 = vmatpush.bf16.msra.mxu3 %v9331_v19  ;;  %v9547_v19 = vor.u32 %v12004_v36, %v9544_v40  ;;  %v12082_v36 = vld [vmem:[#allocation6 + $0x5e4] sm:$0xf]  ;;  %v9856_v40 = vld [vmem:[#allocation6 + $0x5f8] sm:$0xf0] }
 0x271   :  { %4867 = vmatpush.bf16.msrb.mxu0 %v9667_v17  ;;  %4903 = vmatmul.bf16.vlgmr.msrb.gmra.mxu2 %v13364_v25  ;;  %v4485_v17 = vadd.f32 %v4484_v60, %v4471_v11  ;;  %v10070_v11 = vld [vmem:[#allocation6 + $0x790] sm:$0xf] }
 0x272   :  { %4819 = vmatmul.bf16.vlgmr.msra.gmra.mxu0 %v13364_v25  ;;  %v4444_v25 = vpop.f32.mrf.mxu1  ;;  %v10071_v62 = vor.u32 %v12139_v21, %v10070_v11 }
 0x273   :  { %v4445_v42 = vadd.f32 %v4444_v25, %v4431_v35  ;;  %v10099_v35 = vor.u32 %v12142_v15, %v10096_v5  ;;  %v10331_v15 = vor.u32 %v12203_v58, %v10330_v49  ;;  %v12064_v5 = vld [vmem:[#allocation6 + $0x554] sm:$0xf]  ;;  %v12046_v58 = vld [vmem:[#allocation6 + $0x4c4] sm:$0xf] }
 0x274   :  { %4776 = vmatpush.bf16.msrb.mxu1 %v9303_v8  ;;  %4860 = vmatpush.bf16.msra.mxu3 %v9307_v29  ;;  %v9523_v8 = vor.u32 %v11998_v32, %v9520_v51  ;;  %v12151_v29 = vld [vmem:[#allocation6 + $0x804] sm:$0xf0]  ;;  %v4514_v28 = vpop.f32.mrf.mxu2  ;;  %v9832_v32 = vld [vmem:[#allocation6 + $0x5c8] sm:$0xf0] }
 0x275   :  { %4868 = vmatpush.bf16.msrb.mxu0 %v9643_v12  ;;  %v4459_v12 = vadd.f32 %v13433_v13, %v4445_v42  ;;  %v10119_v55 = vor.u32 %v12151_v29, %v10118_v38  ;;  %v4540_v16 = vpop.f32.mrf.mxu0 }
 0x277   :  { %4777 = vmatmul.bf16.vlgmr.msrb.gmra.mxu1 %v13223_v31  ;;  %4861 = vmatmul.bf16.vlgmr.msra.gmra.mxu3 %v13223_v31  ;;  %v10168_v31 = vld [vmem:[#allocation6 + $0x868] sm:$0xf0]  ;;  %v4473_v52 = vadd.f32 %v13440_v50, %v4459_v12  ;;  %v10094_v50 = vld [vmem:[#allocation6 + $0x7c0] sm:$0xf] }
 0x278   :  { %4825 = vmatpush.bf16.msra.mxu1 %v10239_v45  ;;  %4909 = vmatpush.bf16.msrb.mxu3 %v10243_v1  ;;  %v10171_v20 = vor.u32 %v12160_v54, %v10168_v31  ;;  %v12148_v45 = vld [vmem:[#allocation6 + $0x7f4] sm:$0xf]  ;;  %v10120_v1 = vld [vmem:[#allocation6 + $0x808] sm:$0xf0] }
 0x279   :  { %4869 = vmatpush.bf16.msrb.mxu0 %v9619_v56  ;;  %v2968_v56 = vperm.slane %v13426_v14, 1  ;;  %v4487_v13 = vadd.f32 %v4486_v39, %v4473_v52  ;;  %v10123_v41 = vor.u32 %v12148_v45, %v10120_v1  ;;  %v12136_v54 = vld [vmem:[#allocation6 + $0x794] sm:$0xf]  ;;  %v10072_v31 = vld [vmem:[#allocation6 + $0x7a8] sm:$0xf0]  ;;  %v9835_v45 = vor.u32 %v12076_v9, %v9832_v32 }
 0x27a   :  { %v4498_v7 = vpop.f32.mrf.mxu1  ;;  %v10378_v39 = vld [vmem:[#allocation9 + $0xf0] sm:$0xf]  ;;  %v12311_v9 = vld [vmem:[#allocation9 + $0x404] sm:$0xf0] }
 0x27b   :  { %v13451_v23 = vadd.f32 %v4498_v7, %v4485_v17  ;;  %v4513_v10 = vadd.f32 %v4512_v24, %v2968_v56  ;;  %v12215_v7 = vld [vmem:[#allocation9 + $0x104] sm:$0xf0]  ;;  %v4515_v12 = vadd.f32 %v4514_v28, %v2968_v56 }
 0x27c   :  { %4826 = vmatpush.bf16.msra.mxu1 %v10215_v37  ;;  %4910 = vmatpush.bf16.msrb.mxu3 %v10219_v4  ;;  %v9499_v37 = vor.u32 %v11992_v46, %v9496_v61  ;;  %v12145_v4 = vld [vmem:[#allocation6 + $0x7d4] sm:$0xf0]  ;;  %v10379_v30 = vor.u32 %v12215_v7, %v10378_v39  ;;  %v12070_v46 = vld [vmem:[#allocation6 + $0x584] sm:$0xf]  ;;  %v9808_v61 = vld [vmem:[#allocation6 + $0x598] sm:$0xf0] }
 0x27d   :  { %4870 = vmatpush.bf16.msrb.mxu0 %v9595_v48  ;;  %v10244_v43 = vmul.f32 -1.442695, %v13451_v23  ;;  %v4528_v48 = vpop.f32.mrf.mxu3  ;;  %v10095_v22 = vor.u32 %v12145_v4, %v10094_v50  ;;  %v4542_v38 = vpop.f32.mrf.mxu0  ;;  %v10810_v50 = vld [vmem:[#allocation9 + $0x450] sm:$0xf] }
 0x27e   :  { %v4529_v29 = vadd.f32 %v4528_v48, %v4515_v12  ;;  %v9784_v48 = vld [vmem:[#allocation6 + $0x568] sm:$0xf0]  ;;  %v12052_v12 = vld [vmem:[#allocation6 + $0x4f4] sm:$0xf] }
 0x27f   :  { %12579 = vpow2.f32 %v10244_v43  ;;  %v10354_v43 = vld [vmem:[#allocation9 + $0xc0] sm:$0xf]  ;;  %v9787_v21 = vor.u32 %v12064_v5, %v9784_v48  ;;  %v10714_v48 = vld [vmem:[#allocation9 + $0x390] sm:$0xf] }
 0x280   :  { %4827 = vmatpush.bf16.msra.mxu1 %v10191_v47  ;;  %4911 = vmatpush.bf16.msrb.mxu3 %v10195_v0  ;;  %v12221_v47 = vld [vmem:[#allocation9 + $0x134] sm:$0xf0]  ;;  %v4543_v56 = vadd.f32 %v4542_v38, %v4529_v29 }
 0x281   :  { %4871 = vmatpush.bf16.msrb.mxu0 %v9571_v6  ;;  %v4527_v6 = vadd.f32 %v13449_v57, %v4513_v10  ;;  %v10403_v24 = vor.u32 %v12221_v47, %v10402_v44  ;;  %v10075_v57 = vor.u32 %v12136_v54, %v10072_v31  ;;  %v12197_v10 = vld [vmem:[#allocation9 + $0x74] sm:$0xf0]  ;;  %v10786_v54 = vld [vmem:[#allocation9 + $0x420] sm:$0xf] }
 0x282   :  { %v4500_v60 = vpop.f32.mrf.mxu1  ;;  %v9760_v44 = vld [vmem:[#allocation6 + $0x538] sm:$0xf0] }
 0x283   :  { %v13457_v25 = vadd.f32 %v4500_v60, %v4487_v13  ;;  %v4541_v17 = vadd.f32 %v4540_v16, %v4527_v6  ;;  %v10306_v16 = vld [vmem:[#allocation9 + $0x60] sm:$0xf]  ;;  %v12317_v31 = vld [vmem:[#allocation9 + $0x434] sm:$0xf0] }
 0x284   :  { %4828 = vmatpush.bf16.msra.mxu1 %v10167_v26  ;;  %4912 = vmatpush.bf16.msrb.mxu3 %v10171_v20  ;;  %v4568_v26 = vpop.f32.mrf.mxu2  ;;  %v12185_v29 = vld [vmem:[#allocation9 + $0x14] sm:$0xf0] }
 0x285   :  { %4872 = vmatpush.bf16.msrb.mxu0 %v9547_v19  ;;  %v12580_v3 = vpop.eup %12579  ;;  %v10250_v59 = vmul.f32 -1.442695, %v13457_v25  ;;  %v9859_v19 = vor.u32 %v12082_v36, %v9856_v40  ;;  %v4582_v27 = vpop.f32.mrf.mxu3  ;;  %v10282_v40 = vld [vmem:[#allocation9 + $0x30] sm:$0xf] }
 0x286   :  { %v13460_v0 = vadd.f32 1.0, %v12580_v3 }
 0x287   :  { %12581 = vpow2.f32 %v10250_v59  ;;  %v12058_v59 = vld [vmem:[#allocation6 + $0x524] sm:$0xf] }
 0x288   :  { %4829 = vmatpush.bf16.msra.mxu1 %v10143_v33  ;;  %4913 = vmatpush.bf16.msrb.mxu3 %v10147_v34  ;;  %12583 = vrcp.f32 %v13460_v0  ;;  %v12209_v33 = vld [vmem:[#allocation9 + $0xd4] sm:$0xf0]  ;;  %vm4976_vm0 = vweird.f32 %v13460_v0  ;;  %v9763_v36 = vor.u32 %v12058_v59, %v9760_v44 }
 0x289   :  { %4873 = vmatpush.bf16.msrb.mxu0 %v9523_v8  ;;  %v10355_v1 = vor.u32 %v12209_v33, %v10354_v43  ;;  %v9736_v43 = vld [vmem:[#allocation6 + $0x508] sm:$0xf0] }
 0x28a   :  { %v4554_v20 = vpop.f32.mrf.mxu1 }
 0x28b   :  { %v4555_v42 = vadd.f32 %v4554_v20, %v4541_v17  ;;  %v10787_v17 = vor.u32 %v12317_v31, %v10786_v54  ;;  %v12191_v20 = vld [vmem:[#allocation9 + $0x44] sm:$0xf0] }
 0x28c   :  { %4830 = vmatpush.bf16.msra.mxu1 %v10119_v55  ;;  %4914 = vmatpush.bf16.msrb.mxu3 %v10123_v41  ;;  %v9811_v41 = vor.u32 %v12070_v46, %v9808_v61  ;;  %v4570_v4 = vpop.f32.mrf.mxu2  ;;  %v9739_v46 = vor.u32 %v12052_v12, %v9736_v43  ;;  %v10738_v61 = vld [vmem:[#allocation9 + $0x3c0] sm:$0xf]  ;;  %v12281_v43 = vld [vmem:[#allocation9 + $0x314] sm:$0xf0] }
 0x28d   :  { %4874 = vmatpush.bf16.msrb.mxu0 %v9499_v37  ;;  %v12582_v51 = vpop.eup %12581  ;;  %v4569_v8 = vadd.f32 %v4568_v26, %v4555_v42  ;;  %v12323_v37 = vld [vmem:[#allocation9 + $0x464] sm:$0xf0]  ;;  %v10642_v12 = vld [vmem:[#allocation9 + $0x300] sm:$0xf] }
 0x28e   :  { %v13465_v34 = vpop.eup %12583  ;;  %v13467_v52 = vadd.f32 1.0, %v12582_v51  ;;  %v10283_v51 = vor.u32 %v12191_v20, %v10282_v40 }
 0x28f   :  { %v13474_v28 = vadd.f32 %v4582_v27, %v4569_v8  ;;  %vm4977_vm1 = vweird.f32 %v13465_v34  ;;  %v10258_v8 = vld [vmem:[#allocation9] sm:$0xf] }
 0x290   :  { %4831 = vmatpush.bf16.msra.mxu1 %v10095_v22  ;;  %4915 = vmatpush.bf16.msrb.mxu3 %v10099_v35  ;;  %12585 = vrcp.f32 %v13467_v52  ;;  %v4584_v22 = vpop.f32.mrf.mxu3  ;;  %v5072_v42 = vand.u32 2147483648, %v13467_v52  ;;  %v5070_v27 = vand.u32 2147483647, %v13467_v52  ;;  %vm13493_vm3 = vmor %vm4976_vm0, %vm4977_vm1  ;;  %vm5066_vm4 = vweird.f32 %v13467_v52 }
 0x291   :  { %6911 = vmatpush.bf16.msra.mxu0 %v10427_v2  ;;  %v10811_v2 = vor.u32 %v12323_v37, %v10810_v50  ;;  %v10245_v35 = vmul.f32 -1.442695, %v13474_v28  ;;  %v4596_v50 = vpop.f32.mrf.mxu0 }
 0x292   :  { %4875 = vmatmul.bf16.vlgmr.msrb.gmra.mxu0 %v13254_v53  ;;  %v4972_v53 = vmul.f32 %v13465_v34, %v13460_v0  ;;  %v4556_v60 = vpop.f32.mrf.mxu1  ;;  %vm5071_vm7 = vcmp.eq.f32.partialorder %v5070_v27, 8.507059e+37 }
 0x293   :  { %v4557_v55 = vadd.f32 %v4556_v60, %v4543_v56  ;;  %6939 = vmatpush.bf16.msra.mxu2 %v10811_v2  ;;  %12587 = vpow2.f32 %v10245_v35  ;;  %v12305_v56 = vld [vmem:[#allocation9 + $0x3d4] sm:$0xf0]  ;;  %v2969_v2 = vperm.slane %v13426_v14, 2  ;;  %v10690_v35 = vld [vmem:[#allocation9 + $0x360] sm:$0xf] }
 0x294   :  { %4832 = vmatpush.bf16.msra.mxu1 %v10071_v62  ;;  %4916 = vmatpush.bf16.msrb.mxu3 %v10075_v57  ;;  %v4973_v13 = vsub.f32 1.0, %v4972_v53  ;;  %v4980_v62 = vand.u32 2147483647, %v13460_v0  ;;  %v4982_v57 = vand.u32 2147483648, %v13460_v0  ;;  %v5073_v0 = vor.u32 1.1754944e-38, %v5072_v42 }
 0x295   :  { %6912 = vmatpush.bf16.msra.mxu0 %v10403_v24  ;;  %v10307_v24 = vor.u32 %v12197_v10, %v10306_v16  ;;  %v9712_v60 = vld [vmem:[#allocation6 + $0x4d8] sm:$0xf0]  ;;  %v12299_v16 = vld [vmem:[#allocation9 + $0x3a4] sm:$0xf0]  ;;  %v10570_v42 = vld [vmem:[#allocation9 + $0x270] sm:$0xf] }
 0x296   :  { %v4974_v3 = vmul.f32 %v13465_v34, %v4973_v13  ;;  %v12586_v47 = vpop.eup %12585  ;;  %vm4981_vm6 = vcmp.eq.f32.partialorder %v4980_v62, 8.507059e+37  ;;  %v9715_v5 = vor.u32 %v12046_v58, %v9712_v60  ;;  %v9688_v10 = vld [vmem:[#allocation6 + $0x4a8] sm:$0xf0] }
 0x297   :  { %4833 = vmatmul.bf16.vlgmr.msra.gmra.mxu1 %v13404_v18  ;;  %4917 = vmatmul.bf16.vlgmr.msrb.gmra.mxu3 %v13404_v18  ;;  %v4571_v18 = vadd.f32 %v4570_v4, %v4557_v55  ;;  %v5062_v11 = vmul.f32 %v12586_v47, %v13467_v52  ;;  %vm5067_vm2 = vweird.f32 %v12586_v47  ;;  %v10259_v52 = vor.u32 %v12185_v29, %v10258_v8  ;;  %v12224_v29 = vld [vmem:[#allocation9 + $0x154] sm:$0xf]  ;;  %v12371_v58 = vld [vmem:[#allocation9 + $0x5e4] sm:$0xf0]  ;;  %v12218_v60 = vld [vmem:[#allocation9 + $0x124] sm:$0xf] }
 0x298   :  { %4881 = vmatpush.bf16.msrb.mxu1 %v9859_v19  ;;  %v4975_v39 = vadd.f32 %v13465_v34, %v4974_v3  ;;  %6940 = vmatpush.bf16.msra.mxu2 %v10787_v17  ;;  %vm5068_vm5 = vmor %vm5066_vm4, %vm5067_vm2  ;;  %v10739_v55 = vor.u32 %v12305_v56, %v10738_v61  ;;  %v4624_v17 = vpop.f32.mrf.mxu2  ;;  %v10643_v8 = vor.u32 %v12281_v43, %v10642_v12  ;;  %v10356_v12 = vld [vmem:[#allocation9 + $0xd8] sm:$0xf0] }
 0x299   :  { %6913 = vmatpush.bf16.msra.mxu0 %v10379_v30  ;;  %v13479_v6 = vadd.f32 %v4584_v22, %v4571_v18  ;;  %v5063_v7 = vsub.f32 1.0, %v5062_v11  ;;  %v10762_v30 = vld [vmem:[#allocation9 + $0x3f0] sm:$0xf]  ;;  %v12588_v13 = vpop.eup %12587  ;;  %v10715_v22 = vor.u32 %v12299_v16, %v10714_v48  ;;  %v12293_v11 = vld [vmem:[#allocation9 + $0x374] sm:$0xf0] }
 0x29a   :  { %v4979_v33 = vsel %vm13493_vm3, %v13465_v34, %v4975_v39  ;;  %v10763_v53 = vor.u32 %v12311_v9, %v10762_v30  ;;  %v13507_v3 = vadd.f32 1.0, %v12588_v13  ;;  %v12040_v18 = vld [vmem:[#allocation6 + $0x494] sm:$0xf]  ;;  %v4610_v44 = vpop.f32.mrf.mxu1  ;;  %v10691_v31 = vor.u32 %v12293_v11, %v10690_v35  ;;  %v4598_v39 = vpop.f32.mrf.mxu0  ;;  %v10498_v11 = vld [vmem:[#allocation9 + $0x1e0] sm:$0xf] }
 0x29b   :  { %v10251_v26 = vmul.f32 -1.442695, %v13479_v6  ;;  %v5064_v19 = vmul.f32 %v12586_v47, %v5063_v7  ;;  %v10666_v7 = vld [vmem:[#allocation9 + $0x330] sm:$0xf]  ;;  %v4638_v9 = vpop.f32.mrf.mxu3 }
 0x29c   :  { %4882 = vmatpush.bf16.msrb.mxu1 %v9835_v45  ;;  %v4983_v45 = vor.u32 1.1754944e-38, %v4982_v57  ;;  %6941 = vmatpush.bf16.msra.mxu2 %v10763_v53  ;;  %v10428_v53 = vld [vmem:[#allocation9 + $0x168] sm:$0xf0]  ;;  %vm4991_vm11 = vweird.f32 %v13507_v3  ;;  %v4997_v43 = vand.u32 2147483648, %v13507_v3 }
 0x29d   :  { %6914 = vmatpush.bf16.msra.mxu0 %v10355_v1  ;;  %12589 = vpow2.f32 %v10251_v26  ;;  %v5065_v38 = vadd.f32 %v12586_v47, %v5064_v19  ;;  %v12287_v26 = vld [vmem:[#allocation9 + $0x344] sm:$0xf0] }
 0x29e   :  { %v4984_v34 = vsel %vm4981_vm6, %v4983_v45, %v4979_v33  ;;  %v10667_v57 = vor.u32 %v12287_v26, %v10666_v7  ;;  %v12263_v19 = vld [vmem:[#allocation9 + $0x284] sm:$0xf0]  ;;  %v4599_v33 = vadd.f32 %v4598_v39, %v2969_v2  ;;  %v10474_v7 = vld [vmem:[#allocation9 + $0x1b0] sm:$0xf] }
 0x29f   :  { %v5069_v1 = vsel %vm5068_vm5, %v12586_v47, %v5065_v38  ;;  %v12275_v47 = vld [vmem:[#allocation9 + $0x2e4] sm:$0xf0]  ;;  %v10571_v38 = vor.u32 %v12263_v19, %v10570_v42  ;;  %v12206_v42 = vld [vmem:[#allocation9 + $0xc4] sm:$0xf] }
 0x2a0   :  { %4883 = vmatpush.bf16.msrb.mxu1 %v9811_v41  ;;  %v5074_v49 = vsel %vm5071_vm7, %v5073_v0, %v5069_v1  ;;  %6942 = vmatpush.bf16.msra.mxu2 %v10739_v55  ;;  %v10546_v0 = vld [vmem:[#allocation9 + $0x240] sm:$0xf]  ;;  %v12257_v1 = vld [vmem:[#allocation9 + $0x254] sm:$0xf0]  ;;  %v4626_v55 = vpop.f32.mrf.mxu2 }
 0x2a1   :  { %6915 = vmatpush.bf16.msra.mxu0 %v10331_v15  ;;  %v5157_v37 = vmul.f32 %v5074_v49, %v13457_v25  ;;  %v5151_v15 = vmul.f32 %v4984_v34, %v13451_v23  ;;  %v10618_v25 = vld [vmem:[#allocation9 + $0x2d0] sm:$0xf]  ;;  %v9691_v23 = vor.u32 %v12040_v18, %v9688_v10  ;;  %v10547_v49 = vor.u32 %v12257_v1, %v10546_v0  ;;  %v10450_v1 = vld [vmem:[#allocation9 + $0x180] sm:$0xf] }
 0x2a2   :  { %v10619_v54 = vor.u32 %v12275_v47, %v10618_v25  ;;  %v4652_v13 = vpop.f32.mrf.mxu0  ;;  %v10522_v34 = vld [vmem:[#allocation9 + $0x210] sm:$0xf]  ;;  %v10978_v25 = vld [vmem:[#allocation9 + $0x5a0] sm:$0xf]  ;;  %v12365_v47 = vld [vmem:[#allocation9 + $0x5b4] sm:$0xf0] }
 0x2a3   :  { %v12590_v41 = vpop.eup %12589  ;;  %v13509_v59 = vpack.c.bf16 %v5157_v37, %v5151_v15  ;;  %v10404_v15 = vld [vmem:[#allocation9 + $0x138] sm:$0xf0]  ;;  %v4640_v35 = vpop.f32.mrf.mxu3 }
 0x2a4   :  { %4884 = vmatpush.bf16.msrb.mxu1 %v9787_v21  ;;  %v13503_v4 = vadd.f32 1.0, %v12590_v41  ;;  %v4597_v21 = vadd.f32 %v4596_v50, %v2969_v2  ;;  %6943 = vmatpush.bf16.msra.mxu2 %v10715_v22  ;;  %v12251_v50 = vld [vmem:[#allocation9 + $0x224] sm:$0xf0]  ;;  %v10407_v16 = vor.u32 %v12218_v60, %v10404_v15  ;;  %v12212_v22 = vld [vmem:[#allocation9 + $0xf4] sm:$0xf]  ;;  %v4998_v60 = vor.u32 1.1754944e-38, %v4997_v43 }
 0x2a5   :  { %6916 = vmatpush.bf16.msra.mxu0 %v10307_v24  ;;  %v10594_v24 = vld [vmem:[#allocation9 + $0x2a0] sm:$0xf]  ;;  %v12329_v43 = vld [vmem:[#allocation9 + $0x494] sm:$0xf0] }
 0x2a6   :  { %12591 = vrcp.f32 %v13503_v4  ;;  %v4611_v40 = vadd.f32 %v4610_v44, %v4597_v21  ;;  %v10523_v44 = vor.u32 %v12251_v50, %v10522_v34  ;;  %v12245_v21 = vld [vmem:[#allocation9 + $0x1f4] sm:$0xf0]  ;;  %v5087_v39 = vand.u32 2147483648, %v13503_v4 }
 0x2a7   :  { %12593 = vrcp.f32 %v13507_v3  ;;  %v10499_v26 = vor.u32 %v12245_v21, %v10498_v11  ;;  %vm5081_vm10 = vweird.f32 %v13503_v4  ;;  %v12188_v11 = vld [vmem:[#allocation9 + $0x34] sm:$0xf] }
 0x2a8   :  { %4885 = vmatpush.bf16.msrb.mxu1 %v9763_v36  ;;  %v12269_v36 = vld [vmem:[#allocation9 + $0x2b4] sm:$0xf0]  ;;  %6944 = vmatpush.bf16.msra.mxu2 %v10691_v31  ;;  %v4625_v30 = vadd.f32 %v4624_v17, %v4611_v40  ;;  %v10380_v31 = vld [vmem:[#allocation9 + $0x108] sm:$0xf0] }
 0x2a9   :  { %6917 = vmatpush.bf16.msra.mxu0 %v10283_v51  ;;  %v10595_v62 = vor.u32 %v12269_v36, %v10594_v24  ;;  %v4612_v51 = vpop.f32.mrf.mxu1  ;;  %v10383_v40 = vor.u32 %v12212_v22, %v10380_v31  ;;  %v10284_v31 = vld [vmem:[#allocation9 + $0x48] sm:$0xf0] }
 0x2aa   :  { %v4639_v61 = vadd.f32 %v4638_v9, %v4625_v30  ;;  %v5085_v30 = vand.u32 2147483647, %v13503_v4  ;;  %v4654_v9 = vpop.f32.mrf.mxu0 }
 0x2ac   :  { %4886 = vmatpush.bf16.msrb.mxu1 %v9739_v46  ;;  %v13514_v20 = vpop.eup %12591  ;;  %6945 = vmatpush.bf16.msra.mxu2 %v10667_v57  ;;  %v4613_v46 = vadd.f32 %v4612_v51, %v4599_v33  ;;  %v4653_v48 = vadd.f32 %v4652_v13, %v4639_v61  ;;  %v12359_v57 = vld [vmem:[#allocation9 + $0x584] sm:$0xf0]  ;;  %v10930_v61 = vld [vmem:[#allocation9 + $0x540] sm:$0xf]  ;;  %v12200_v13 = vld [vmem:[#allocation9 + $0x94] sm:$0xf] }
 0x2ad   :  { %6918 = vmatpush.bf16.msra.mxu0 %v10259_v52  ;;  %v13516_v27 = vpop.eup %12593  ;;  %v5077_v32 = vmul.f32 %v13514_v20, %v13503_v4  ;;  %v11002_v52 = vld [vmem:[#allocation9 + $0x5d0] sm:$0xf]  ;;  %vm5082_vm8 = vweird.f32 %v13514_v20  ;;  %vm5086_vm14 = vcmp.eq.f32.partialorder %v5085_v30, 8.507059e+37  ;;  %v10620_v4 = vld [vmem:[#allocation9 + $0x2e8] sm:$0xf0] }
 0x2ae   :  { %v4987_v45 = vmul.f32 %v13516_v27, %v13507_v3  ;;  %v11003_v37 = vor.u32 %v12371_v58, %v11002_v52  ;;  %vm4992_vm9 = vweird.f32 %v13516_v27  ;;  %vm13539_vm12 = vmor %vm5081_vm10, %vm5082_vm8  ;;  %v4680_v58 = vpop.f32.mrf.mxu2 }
 0x2af   :  { %v5078_v56 = vsub.f32 1.0, %v5077_v32  ;;  %v12239_v32 = vld [vmem:[#allocation9 + $0x1c4] sm:$0xf0]  ;;  %vm13545_vm13 = vmor %vm4991_vm11, %vm4992_vm9 }
 0x2b0   :  { %4887 = vmatpush.bf16.msrb.mxu1 %v9715_v5  ;;  %6919 = vmatmul.bf16.vlgmr.msra.gmra.mxu0 %v13509_v59  ;;  %v4988_v41 = vsub.f32 1.0, %v4987_v45  ;;  %v4627_v5 = vadd.f32 %v4626_v55, %v4613_v46  ;;  %v5088_v45 = vor.u32 1.1754944e-38, %v5087_v39  ;;  %v10475_v46 = vor.u32 %v12239_v32, %v10474_v7 }
 0x2b1   :  { %6946 = vmatpush.bf16.msra.mxu2 %v10643_v8  ;;  %v5079_v2 = vmul.f32 %v13514_v20, %v5078_v56  ;;  %6953 = vmatpush.bf16.msra.mxu3 %v11003_v37  ;;  %v10359_v8 = vor.u32 %v12206_v42, %v10356_v12  ;;  %v12353_v56 = vld [vmem:[#allocation9 + $0x554] sm:$0xf0]  ;;  %v10260_v42 = vld [vmem:[#allocation9 + $0x18] sm:$0xf0]  ;;  %v10834_v12 = vld [vmem:[#allocation9 + $0x480] sm:$0xf] }
 0x2b2   :  { %v4641_v36 = vadd.f32 %v4640_v35, %v4627_v5  ;;  %v4694_v5 = vpop.f32.mrf.mxu3  ;;  %v12341_v35 = vld [vmem:[#allocation9 + $0x4f4] sm:$0xf0]  ;;  %v4708_v39 = vpop.f32.mrf.mxu0 }
 0x2b3   :  { %v5080_v17 = vadd.f32 %v13514_v20, %v5079_v2  ;;  %v12194_v2 = vld [vmem:[#allocation9 + $0x64] sm:$0xf] }
 0x2b4   :  { %4888 = vmatpush.bf16.msrb.mxu1 %v9691_v23  ;;  %v4666_v18 = vpop.f32.mrf.mxu1  ;;  %v4989_v23 = vmul.f32 %v13516_v27, %v4988_v41 }
 0x2b5   :  { %v13524_v10 = vadd.f32 %v4666_v18, %v4653_v48  ;;  %v10906_v48 = vld [vmem:[#allocation9 + $0x510] sm:$0xf] }
 0x2b6   :  { %v4990_v19 = vadd.f32 %v13516_v27, %v4989_v23  ;;  %v10882_v23 = vld [vmem:[#allocation9 + $0x4e0] sm:$0xf] }
 0x2b7   :  { %4889 = vmatmul.bf16.vlgmr.msrb.gmra.mxu1 %v13296_v63  ;;  %v10431_v63 = vor.u32 %v12224_v29, %v10428_v53  ;;  %v10246_v24 = vmul.f32 -1.442695, %v13524_v10  ;;  %v4995_v29 = vand.u32 2147483647, %v13507_v3  ;;  %v5084_v53 = vsel %vm13539_vm12, %v13514_v20, %v5080_v17  ;;  %v12233_v3 = vld [vmem:[#allocation9 + $0x194] sm:$0xf0] }
 0x2b8   :  { %6925 = vmatpush.bf16.msra.mxu1 %v10619_v54  ;;  %v10979_v54 = vor.u32 %v12365_v47, %v10978_v25  ;;  %v4994_v34 = vsel %vm13545_vm13, %v13516_v27, %v4990_v19  ;;  %v10332_v20 = vld [vmem:[#allocation9 + $0xa8] sm:$0xf0]  ;;  %v5089_v55 = vsel %vm5086_vm14, %v5088_v45, %v5084_v53  ;;  %v10451_v27 = vor.u32 %v12233_v3, %v10450_v1  ;;  %v12266_v3 = vld [vmem:[#allocation9 + $0x2a4] sm:$0xf] }
 0x2b9   :  { %6995 = vmatpush.bf16.msrb.mxu2 %v10431_v63  ;;  %12595 = vpow2.f32 %v10246_v24  ;;  %v10335_v50 = vor.u32 %v12200_v13, %v10332_v20  ;;  %vm4996_vm15 = vcmp.eq.f32.partialorder %v4995_v29, 8.507059e+37  ;;  %v5158_v18 = vmul.f32 %v5089_v55, %v13479_v6 }
 0x2ba   :  { %6954 = vmatpush.bf16.msra.mxu3 %v10979_v54  ;;  %v4999_v15 = vsel %vm4996_vm15, %v4998_v60, %v4994_v34  ;;  %v10883_v54 = vor.u32 %v12341_v35, %v10882_v23  ;;  %v10287_v6 = vor.u32 %v12188_v11, %v10284_v31  ;;  %v4696_v19 = vpop.f32.mrf.mxu3 }
 0x2bb   :  { %v5152_v22 = vmul.f32 %v4999_v15, %v13474_v28  ;;  %v4682_v28 = vpop.f32.mrf.mxu2 }
 0x2bc   :  { %6926 = vmatpush.bf16.msra.mxu1 %v10595_v62  ;;  %v10954_v62 = vld [vmem:[#allocation9 + $0x570] sm:$0xf]  ;;  %v4668_v0 = vpop.f32.mrf.mxu1 }
 0x2bd   :  { %6996 = vmatpush.bf16.msrb.mxu2 %v10407_v16  ;;  %v10955_v51 = vor.u32 %v12359_v57, %v10954_v62  ;;  %v12347_v16 = vld [vmem:[#allocation9 + $0x524] sm:$0xf0]  ;;  %v13564_v21 = vpack.c.bf16 %v5158_v18, %v5152_v22  ;;  %v12182_v57 = vld [vmem:[#allocation9 + $0x4] sm:$0xf] }
 0x2be   :  { %v10907_v25 = vor.u32 %v12347_v16, %v10906_v48  ;;  %v12335_v62 = vld [vmem:[#allocation9 + $0x4c4] sm:$0xf0] }
 0x2bf   :  { %6955 = vmatpush.bf16.msra.mxu3 %v10955_v51  ;;  %v12596_v52 = vpop.eup %12595 }
 0x2c0   :  { %6927 = vmatpush.bf16.msra.mxu1 %v10571_v38  ;;  %v4655_v38 = vadd.f32 %v4654_v9, %v4641_v36  ;;  %v13559_v37 = vadd.f32 1.0, %v12596_v52  ;;  %v10263_v9 = vor.u32 %v12182_v57, %v10260_v42  ;;  %v4710_v52 = vpop.f32.mrf.mxu0 }
 0x2c1   :  { %6997 = vmatpush.bf16.msrb.mxu2 %v10383_v40  ;;  %v2970_v40 = vperm.slane %v13426_v14, 3 }
 0x2c2   :  { %v13553_v63 = vadd.f32 %v4668_v0, %v4655_v38  ;;  %v10835_v38 = vor.u32 %v12329_v43, %v10834_v12  ;;  %v5012_v13 = vand.u32 2147483648, %v13559_v37  ;;  %vm5006_vm1 = vweird.f32 %v13559_v37  ;;  %v12413_v12 = vld [vmem:[#allocation9 + $0x734] sm:$0xf0]  ;;  %v12410_v43 = vld [vmem:[#allocation9 + $0x724] sm:$0xf] }
 0x2c3   :  { %v4681_v32 = vadd.f32 %v4680_v58, %v2970_v40  ;;  %v4736_v0 = vpop.f32.mrf.mxu2  ;;  %v5010_v20 = vand.u32 2147483647, %v13559_v37  ;;  %v4750_v58 = vpop.f32.mrf.mxu3 }
 0x2c4   :  { %6928 = vmatpush.bf16.msra.mxu1 %v10547_v49  ;;  %v10931_v49 = vor.u32 %v12353_v56, %v10930_v61  ;;  %v10252_v41 = vmul.f32 -1.442695, %v13553_v63  ;;  %v4683_v56 = vadd.f32 %v4682_v28, %v2970_v40  ;;  %v5013_v16 = vor.u32 1.1754944e-38, %v5012_v13  ;;  %v11148_v13 = vld [vmem:[#allocation9 + $0x708] sm:$0xf0] }
 0x2c5   :  { %6998 = vmatpush.bf16.msrb.mxu2 %v10359_v8  ;;  %v4695_v33 = vadd.f32 %v4694_v5, %v4681_v32  ;;  %v12272_v8 = vld [vmem:[#allocation9 + $0x2d4] sm:$0xf]  ;;  %vm5011_vm4 = vcmp.eq.f32.partialorder %v5010_v20, 8.507059e+37 }
 0x2c6   :  { %6956 = vmatpush.bf16.msra.mxu3 %v10931_v49  ;;  %12597 = vpow2.f32 %v10252_v41  ;;  %v10623_v29 = vor.u32 %v12272_v8, %v10620_v4  ;;  %v10596_v49 = vld [vmem:[#allocation9 + $0x2b8] sm:$0xf0]  ;;  %v4697_v41 = vadd.f32 %v4696_v19, %v4683_v56  ;;  %v12248_v4 = vld [vmem:[#allocation9 + $0x214] sm:$0xf] }
 0x2c7   :  { %12599 = vrcp.f32 %v13559_v37  ;;  %v4709_v45 = vadd.f32 %v4708_v39, %v4695_v33  ;;  %v10599_v55 = vor.u32 %v12266_v3, %v10596_v49  ;;  %v11196_v39 = vld [vmem:[#allocation9 + $0x768] sm:$0xf0]  ;;  %v11172_v8 = vld [vmem:[#allocation9 + $0x738] sm:$0xf0]  ;;  %v12404_v56 = vld [vmem:[#allocation9 + $0x6f4] sm:$0xf] }
 0x2c8   :  { %6929 = vmatpush.bf16.msra.mxu1 %v10523_v44  ;;  %v10308_v44 = vld [vmem:[#allocation9 + $0x78] sm:$0xf0]  ;;  %v11151_v49 = vor.u32 %v12404_v56, %v11148_v13  ;;  %v12320_v56 = vld [vmem:[#allocation9 + $0x454] sm:$0xf]  ;;  %v10812_v13 = vld [vmem:[#allocation9 + $0x468] sm:$0xf0] }
 0x2c9   :  { %6999 = vmatpush.bf16.msrb.mxu2 %v10335_v50  ;;  %v10311_v47 = vor.u32 %v12194_v2, %v10308_v44  ;;  %v4711_v2 = vadd.f32 %v4710_v52, %v4697_v41  ;;  %v12260_v44 = vld [vmem:[#allocation9 + $0x274] sm:$0xf]  ;;  %v10500_v3 = vld [vmem:[#allocation9 + $0x1f8] sm:$0xf0]  ;;  %v11122_v52 = vld [vmem:[#allocation9 + $0x6c0] sm:$0xf] }
 0x2ca   :  { %6957 = vmatpush.bf16.msra.mxu3 %v10907_v25  ;;  %v10572_v25 = vld [vmem:[#allocation9 + $0x288] sm:$0xf0]  ;;  %v11124_v41 = vld [vmem:[#allocation9 + $0x6d8] sm:$0xf0]  ;;  %v12236_v50 = vld [vmem:[#allocation9 + $0x1b4] sm:$0xf] }
 0x2cb   :  { %v10575_v22 = vor.u32 %v12260_v44, %v10572_v25  ;;  %v4752_v32 = vpop.f32.mrf.mxu3  ;;  %v12395_v44 = vld [vmem:[#allocation9 + $0x6a4] sm:$0xf0] }
 0x2cc   :  { %6930 = vmatpush.bf16.msra.mxu1 %v10499_v26  ;;  %v12598_v24 = vpop.eup %12597  ;;  %v10858_v26 = vld [vmem:[#allocation9 + $0x4b0] sm:$0xf] }
 0x2cd   :  { %7000 = vmatpush.bf16.msrb.mxu2 %v10311_v47  ;;  %v13566_v36 = vpop.eup %12599  ;;  %v13569_v17 = vadd.f32 1.0, %v12598_v24  ;;  %v10859_v14 = vor.u32 %v12335_v62, %v10858_v26  ;;  %v11194_v24 = vld [vmem:[#allocation9 + $0x750] sm:$0xf]  ;;  %v10548_v26 = vld [vmem:[#allocation9 + $0x258] sm:$0xf0] }
 0x2ce   :  { %v5002_v7 = vmul.f32 %v13566_v36, %v13559_v37  ;;  %6958 = vmatpush.bf16.msra.mxu3 %v10883_v54  ;;  %vm5007_vm0 = vweird.f32 %v13566_v36 }
 0x2cf   :  { %12601 = vrcp.f32 %v13569_v17  ;;  %vm13584_vm2 = vmor %vm5006_vm1, %vm5007_vm0  ;;  %v5100_v15 = vand.u32 2147483647, %v13569_v17  ;;  %v5102_v5 = vand.u32 2147483648, %v13569_v17  ;;  %vm5096_vm5 = vweird.f32 %v13569_v17 }
 0x2d0   :  { %6931 = vmatpush.bf16.msra.mxu1 %v10475_v46  ;;  %v5003_v30 = vsub.f32 1.0, %v5002_v7  ;;  %v12254_v7 = vld [vmem:[#allocation9 + $0x244] sm:$0xf] }
 0x2d1   :  { %7001 = vmatpush.bf16.msrb.mxu2 %v10287_v6  ;;  %vm5101_vm7 = vcmp.eq.f32.partialorder %v5100_v15, 8.507059e+37  ;;  %v5103_v35 = vor.u32 1.1754944e-38, %v5102_v5  ;;  %v12419_v6 = vld [vmem:[#allocation9 + $0x764] sm:$0xf0]  ;;  %v10551_v19 = vor.u32 %v12254_v7, %v10548_v26  ;;  %v10476_v15 = vld [vmem:[#allocation9 + $0x1c8] sm:$0xf0] }
 0x2d2   :  { %v5004_v51 = vmul.f32 %v13566_v36, %v5003_v30  ;;  %6959 = vmatpush.bf16.msra.mxu3 %v10859_v14  ;;  %v11195_v42 = vor.u32 %v12419_v6, %v11194_v24  ;;  %v11074_v6 = vld [vmem:[#allocation9 + $0x660] sm:$0xf]  ;;  %v11076_v7 = vld [vmem:[#allocation9 + $0x678] sm:$0xf0] }
 0x2d4   :  { %6932 = vmatpush.bf16.msra.mxu1 %v10451_v27  ;;  %v5005_v1 = vadd.f32 %v13566_v36, %v5004_v51  ;;  %v4722_v61 = vpop.f32.mrf.mxu1  ;;  %6967 = vmatpush.bf16.msrb.mxu0 %v11195_v42  ;;  %v11170_v51 = vld [vmem:[#allocation9 + $0x720] sm:$0xf]  ;;  %v12380_v42 = vld [vmem:[#allocation9 + $0x634] sm:$0xf] }
 0x2d5   :  { %7002 = vmatpush.bf16.msrb.mxu2 %v10263_v9  ;;  %v12602_v53 = vpop.eup %12601  ;;  %v4723_v34 = vadd.f32 %v4722_v61, %v4709_v45  ;;  %v11175_v45 = vor.u32 %v12410_v43, %v11172_v8  ;;  %v11338_v43 = vld [vmem:[#allocation9 + $0x870] sm:$0xf] }
 0x2d6   :  { %v5092_v46 = vmul.f32 %v12602_v53, %v13569_v17  ;;  %6960 = vmatpush.bf16.msra.mxu3 %v10835_v38  ;;  %v5009_v37 = vsel %vm13584_vm2, %v13566_v36, %v5005_v1  ;;  %vm5097_vm3 = vweird.f32 %v12602_v53  ;;  %v12416_v36 = vld [vmem:[#allocation9 + $0x754] sm:$0xf]  ;;  %v4738_v17 = vpop.f32.mrf.mxu2  ;;  %v11171_v38 = vor.u32 %v12413_v12, %v11170_v51  ;;  %v12407_v1 = vld [vmem:[#allocation9 + $0x704] sm:$0xf0] }
 0x2d7   :  { %6933 = vmatmul.bf16.vlgmr.msra.gmra.mxu1 %v13564_v21  ;;  %v4737_v27 = vadd.f32 %v4736_v0, %v4723_v34  ;;  %v5014_v23 = vsel %vm5011_vm4, %v5013_v16, %v5009_v37  ;;  %vm5098_vm6 = vmor %vm5096_vm5, %vm5097_vm3  ;;  %v11199_v14 = vor.u32 %v12416_v36, %v11196_v39  ;;  %v11146_v0 = vld [vmem:[#allocation9 + $0x6f0] sm:$0xf]  ;;  %v12242_v34 = vld [vmem:[#allocation9 + $0x1e4] sm:$0xf]  ;;  %v10479_v37 = vor.u32 %v12236_v50, %v10476_v15 }
 0x2d8   :  { %v5093_v60 = vsub.f32 1.0, %v5092_v46  ;;  %v5153_v62 = vmul.f32 %v5014_v23, %v13524_v10  ;;  %v10524_v10 = vld [vmem:[#allocation9 + $0x228] sm:$0xf0]  ;;  %6968 = vmatpush.bf16.msrb.mxu0 %v11171_v38  ;;  %v11147_v61 = vor.u32 %v12407_v1, %v11146_v0  ;;  %v10503_v20 = vor.u32 %v12242_v34, %v10500_v3  ;;  %v12389_v36 = vld [vmem:[#allocation9 + $0x674] sm:$0xf0] }
 0x2d9   :  { %v13593_v18 = vadd.f32 %v4750_v58, %v4737_v27  ;;  %v12401_v58 = vld [vmem:[#allocation9 + $0x6d4] sm:$0xf0]  ;;  %v11100_v23 = vld [vmem:[#allocation9 + $0x6a8] sm:$0xf0]  ;;  %v12386_v39 = vld [vmem:[#allocation9 + $0x664] sm:$0xf] }
 0x2da   :  { %7009 = vmatpush.bf16.msrb.mxu3 %v10623_v29  ;;  %v5094_v48 = vmul.f32 %v12602_v53, %v5093_v60  ;;  %v11123_v60 = vor.u32 %v12401_v58, %v11122_v52  ;;  %v11079_v26 = vor.u32 %v12386_v39, %v11076_v7  ;;  %v13632_v34 = vld [vmem:[#allocation7] sm:$0x3f]  ;;  %v12324_v58 = vld [vmem:[#allocation9 + $0x46c] sm:$0xf0]  ;;  %v11362_v39 = vld [vmem:[#allocation9 + $0x8a0] sm:$0xf] }
 0x2db   :  { %v10247_v11 = vmul.f32 -1.442695, %v13593_v18  ;;  %v2971_v3 = vperm.slane %v13632_v34, 4  ;;  %v10818_v52 = vld [vmem:[#allocation9 + $0x458] sm:$0xf] }
 0x2dc   :  { %v5095_v47 = vadd.f32 %v12602_v53, %v5094_v48  ;;  %v4724_v31 = vpop.f32.mrf.mxu1  ;;  %6969 = vmatpush.bf16.msrb.mxu0 %v11147_v61  ;;  %v11028_v61 = vld [vmem:[#allocation9 + $0x618] sm:$0xf0]  ;;  %v12461_v7 = vld [vmem:[#allocation9 + $0x8b4] sm:$0xf0] }
 0x2dd   :  { %12603 = vpow2.f32 %v10247_v11  ;;  %v4725_v28 = vadd.f32 %v4724_v31, %v4711_v2  ;;  %v11098_v2 = vld [vmem:[#allocation9 + $0x690] sm:$0xf]  ;;  %v10452_v11 = vld [vmem:[#allocation9 + $0x198] sm:$0xf0] }
 0x2de   :  { %7010 = vmatpush.bf16.msrb.mxu3 %v10599_v55  ;;  %v5099_v54 = vsel %vm5098_vm6, %v12602_v53, %v5095_v47  ;;  %v12398_v55 = vld [vmem:[#allocation9 + $0x6c4] sm:$0xf]  ;;  %v11099_v47 = vor.u32 %v12395_v44, %v11098_v2 }
 0x2df   :  { %v5104_v40 = vsel %vm5101_vm7, %v5103_v35, %v5099_v54  ;;  %v4739_v30 = vadd.f32 %v4738_v17, %v4725_v28  ;;  %v11127_v27 = vor.u32 %v12398_v55, %v11124_v41  ;;  %v12230_v35 = vld [vmem:[#allocation9 + $0x184] sm:$0xf]  ;;  %v11075_v28 = vor.u32 %v12389_v36, %v11074_v6 }
 0x2e0   :  { %v5159_v57 = vmul.f32 %v5104_v40, %v13553_v63  ;;  %v10527_v63 = vor.u32 %v12248_v4, %v10524_v10  ;;  %6970 = vmatpush.bf16.msrb.mxu0 %v11123_v60  ;;  %v10455_v24 = vor.u32 %v12230_v35, %v10452_v11  ;;  %v12314_v2 = vld [vmem:[#allocation9 + $0x424] sm:$0xf] }
 0x2e1   :  { %v13601_v33 = vadd.f32 %v4752_v32, %v4739_v30  ;;  %v11052_v32 = vld [vmem:[#allocation9 + $0x648] sm:$0xf0] }
 0x2e2   :  { %7011 = vmatpush.bf16.msrb.mxu3 %v10575_v22  ;;  %v13599_v9 = vpack.c.bf16 %v5159_v57, %v5153_v62  ;;  %v12392_v22 = vld [vmem:[#allocation9 + $0x694] sm:$0xf]  ;;  %v11050_v62 = vld [vmem:[#allocation9 + $0x630] sm:$0xf]  ;;  %v12383_v57 = vld [vmem:[#allocation9 + $0x644] sm:$0xf0]  ;;  %v11055_v10 = vor.u32 %v12380_v42, %v11052_v32 }
 0x2e3   :  { %v12604_v29 = vpop.eup %12603  ;;  %v10253_v53 = vmul.f32 -1.442695, %v13601_v33  ;;  %v11103_v31 = vor.u32 %v12392_v22, %v11100_v23  ;;  %v12464_v22 = vld [vmem:[#allocation9 + $0x8d4] sm:$0xf]  ;;  %v11364_v42 = vld [vmem:[#allocation9 + $0x8b8] sm:$0xf0] }
 0x2e4   :  { %6947 = vmatmul.bf16.vlgmr.msra.gmra.mxu2 %v13599_v9  ;;  %v13605_v46 = vadd.f32 1.0, %v12604_v29  ;;  %6971 = vmatpush.bf16.msrb.mxu0 %v11099_v47  ;;  %v11026_v29 = vld [vmem:[#allocation9 + $0x600] sm:$0xf]  ;;  %v10788_v47 = vld [vmem:[#allocation9 + $0x438] sm:$0xf0] }
 0x2e5   :  { %7051 = vmatpush.bf16.msra.mxu2 %v11199_v14  ;;  %12605 = vpow2.f32 %v10253_v53  ;;  %v11051_v14 = vor.u32 %v12383_v57, %v11050_v62  ;;  %v12377_v53 = vld [vmem:[#allocation9 + $0x614] sm:$0xf0]  ;;  %v10764_v57 = vld [vmem:[#allocation9 + $0x408] sm:$0xf0] }
 0x2e6   :  { %7012 = vmatpush.bf16.msrb.mxu3 %v10551_v19  ;;  %12607 = vrcp.f32 %v13605_v46  ;;  %vm5021_vm9 = vweird.f32 %v13605_v46  ;;  %v5025_v51 = vand.u32 2147483647, %v13605_v46  ;;  %v5027_v12 = vand.u32 2147483648, %v13605_v46 }
 0x2e8   :  { %6972 = vmatpush.bf16.msrb.mxu0 %v11075_v28  ;;  %vm5026_vm12 = vcmp.eq.f32.partialorder %v5025_v51, 8.507059e+37 }
 0x2e9   :  { %7052 = vmatpush.bf16.msra.mxu2 %v11175_v45  ;;  %v12374_v45 = vld [vmem:[#allocation9 + $0x604] sm:$0xf] }
 0x2ea   :  { %7013 = vmatpush.bf16.msrb.mxu3 %v10527_v63  ;;  %v4764_v63 = vpop.f32.mrf.mxu0  ;;  %v11031_v55 = vor.u32 %v12374_v45, %v11028_v61  ;;  %v11340_v45 = vld [vmem:[#allocation9 + $0x888] sm:$0xf0]  ;;  %v12306_v61 = vld [vmem:[#allocation9 + $0x3dc] sm:$0xf0] }
 0x2eb   :  { %v12606_v5 = vpop.eup %12605  ;;  %v4765_v23 = vadd.f32 %v4764_v63, %v2971_v3 }
 0x2ec   :  { %v13608_v48 = vpop.eup %12607  ;;  %v13610_v16 = vadd.f32 1.0, %v12606_v5  ;;  %6973 = vmatpush.bf16.msrb.mxu0 %v11051_v14  ;;  %v10819_v5 = vor.u32 %v12324_v58, %v10818_v52  ;;  %v12312_v14 = vld [vmem:[#allocation9 + $0x40c] sm:$0xf0]  ;;  %v11314_v52 = vld [vmem:[#allocation9 + $0x840] sm:$0xf] }
 0x2ed   :  { %7053 = vmatpush.bf16.msra.mxu2 %v11151_v49  ;;  %v5017_v25 = vmul.f32 %v13608_v48, %v13605_v46  ;;  %vm5022_vm8 = vweird.f32 %v13608_v48  ;;  %v11027_v46 = vor.u32 %v12377_v53, %v11026_v29  ;;  %v5028_v49 = vor.u32 1.1754944e-38, %v5027_v12  ;;  %v10740_v29 = vld [vmem:[#allocation9 + $0x3d8] sm:$0xf0]  ;;  %v12452_v53 = vld [vmem:[#allocation9 + $0x874] sm:$0xf] }
 0x2ee   :  { %7014 = vmatpush.bf16.msrb.mxu3 %v10503_v20  ;;  %12609 = vrcp.f32 %v13610_v16  ;;  %vm13623_vm10 = vmor %vm5021_vm9, %vm5022_vm8  ;;  %v5115_v8 = vand.u32 2147483647, %v13610_v16  ;;  %v5117_v4 = vand.u32 2147483648, %v13610_v16  ;;  %v10815_v20 = vor.u32 %v12320_v56, %v10812_v13  ;;  %v12449_v58 = vld [vmem:[#allocation9 + $0x854] sm:$0xf0] }
 0x2ef   :  { %v5018_v54 = vsub.f32 1.0, %v5017_v25  ;;  %vm5111_vm13 = vweird.f32 %v13610_v16  ;;  %v11343_v56 = vor.u32 %v12452_v53, %v11340_v45  ;;  %v12278_v53 = vld [vmem:[#allocation9 + $0x304] sm:$0xf] }
 0x2f0   :  { %vm5116_vm15 = vcmp.eq.f32.partialorder %v5115_v8, 8.507059e+37  ;;  %v5118_v50 = vor.u32 1.1754944e-38, %v5117_v4  ;;  %6974 = vmatpush.bf16.msrb.mxu0 %v11027_v46  ;;  %v12302_v8 = vld [vmem:[#allocation9 + $0x3c4] sm:$0xf]  ;;  %v4806_v4 = vpop.f32.mrf.mxu3  ;;  %v10746_v46 = vld [vmem:[#allocation9 + $0x3c8] sm:$0xf] }
 0x2f1   :  { %7054 = vmatpush.bf16.msra.mxu2 %v11127_v27  ;;  %v5019_v40 = vmul.f32 %v13608_v48, %v5018_v54  ;;  %v10791_v54 = vor.u32 %v12314_v2, %v10788_v47  ;;  %v10747_v13 = vor.u32 %v12306_v61, %v10746_v46  ;;  %v12428_v46 = vld [vmem:[#allocation9 + $0x7b4] sm:$0xf]  ;;  %v11244_v61 = vld [vmem:[#allocation9 + $0x7c8] sm:$0xf0] }
 0x2f2   :  { %7015 = vmatpush.bf16.msrb.mxu3 %v10479_v37  ;;  %v11386_v37 = vld [vmem:[#allocation9 + $0x8d0] sm:$0xf]  ;;  %v4766_v62 = vpop.f32.mrf.mxu0 }
 0x2f3   :  { %v5020_v19 = vadd.f32 %v13608_v48, %v5019_v40 }
 0x2f4   :  { %7003 = vmatmul.bf16.vlgmr.msrb.gmra.mxu2 %v13509_v59  ;;  %v12610_v17 = vpop.eup %12609  ;;  %v4778_v15 = vpop.f32.mrf.mxu1  ;;  %7023 = vmatpush.bf16.msra.mxu0 %v10815_v20 }
 0x2f5   :  { %7055 = vmatpush.bf16.msra.mxu2 %v11103_v31  ;;  %v5107_v30 = vmul.f32 %v12610_v17, %v13610_v16  ;;  %v5024_v0 = vsel %vm13623_vm10, %v13608_v48, %v5020_v19  ;;  %vm5112_vm11 = vweird.f32 %v12610_v17  ;;  %v12467_v48 = vld [vmem:[#allocation9 + $0x8e4] sm:$0xf0]  ;;  %v11388_v16 = vld [vmem:[#allocation9 + $0x8e8] sm:$0xf0]  ;;  %v4779_v28 = vadd.f32 %v4778_v15, %v4765_v23  ;;  %v12446_v15 = vld [vmem:[#allocation9 + $0x844] sm:$0xf] }
 0x2f6   :  { %7016 = vmatpush.bf16.msrb.mxu3 %v10455_v24  ;;  %v5029_v41 = vsel %vm5026_vm12, %v5028_v49, %v5024_v0  ;;  %vm5113_vm14 = vmor %vm5111_vm13, %vm5112_vm11  ;;  %v11387_v25 = vor.u32 %v12467_v48, %v11386_v37  ;;  %v10794_v31 = vld [vmem:[#allocation9 + $0x428] sm:$0xf]  ;;  %v12318_v24 = vld [vmem:[#allocation9 + $0x43c] sm:$0xf0]  ;;  %v11391_v6 = vor.u32 %v12464_v22, %v11388_v16  ;;  %v4767_v0 = vadd.f32 %v4766_v62, %v2971_v3 }
 0x2f7   :  { %v5108_v38 = vsub.f32 1.0, %v5107_v30  ;;  %v5154_v35 = vmul.f32 %v5029_v41, %v13593_v18  ;;  %v10795_v36 = vor.u32 %v12318_v24, %v10794_v31  ;;  %v11363_v18 = vor.u32 %v12461_v7, %v11362_v39  ;;  %v10770_v30 = vld [vmem:[#allocation9 + $0x3f8] sm:$0xf]  ;;  %v12300_v37 = vld [vmem:[#allocation9 + $0x3ac] sm:$0xf0] }
 0x2f8   :  { %6981 = vmatpush.bf16.msrb.mxu1 %v11387_v25  ;;  %7024 = vmatpush.bf16.msra.mxu0 %v10791_v54  ;;  %v10771_v51 = vor.u32 %v12312_v14, %v10770_v30  ;;  %v11315_v41 = vor.u32 %v12449_v58, %v11314_v52  ;;  %v11290_v22 = vld [vmem:[#allocation9 + $0x810] sm:$0xf]  ;;  %v12443_v16 = vld [vmem:[#allocation9 + $0x824] sm:$0xf0]  ;;  %v12290_v23 = vld [vmem:[#allocation9 + $0x364] sm:$0xf]  ;;  %v4808_v7 = vpop.f32.mrf.mxu3  ;;  %v11247_v52 = vor.u32 %v12428_v46, %v11244_v61 }
 0x2f9   :  { %7056 = vmatpush.bf16.msra.mxu2 %v11079_v26  ;;  %v5109_v1 = vmul.f32 %v12610_v17, %v5108_v38  ;;  %v12308_v26 = vld [vmem:[#allocation9 + $0x3f4] sm:$0xf]  ;;  %v12455_v38 = vld [vmem:[#allocation9 + $0x884] sm:$0xf0]  ;;  %v10692_v54 = vld [vmem:[#allocation9 + $0x378] sm:$0xf0] }
 0x2fa   :  { %v10767_v19 = vor.u32 %v12308_v26, %v10764_v57  ;;  %v11339_v63 = vor.u32 %v12455_v38, %v11338_v43  ;;  %v12440_v31 = vld [vmem:[#allocation9 + $0x814] sm:$0xf]  ;;  %v11292_v24 = vld [vmem:[#allocation9 + $0x828] sm:$0xf0]  ;;  %v12294_v39 = vld [vmem:[#allocation9 + $0x37c] sm:$0xf0] }
 0x2fb   :  { %v5110_v60 = vadd.f32 %v12610_v17, %v5109_v1  ;;  %v10743_v1 = vor.u32 %v12302_v8, %v10740_v29  ;;  %v11295_v26 = vor.u32 %v12440_v31, %v11292_v24  ;;  %v11266_v57 = vld [vmem:[#allocation9 + $0x7e0] sm:$0xf]  ;;  %v10668_v30 = vld [vmem:[#allocation9 + $0x348] sm:$0xf0]  ;;  %v12434_v14 = vld [vmem:[#allocation9 + $0x7e4] sm:$0xf] }
 0x2fc   :  { %6982 = vmatpush.bf16.msrb.mxu1 %v11363_v18  ;;  %7025 = vmatpush.bf16.msra.mxu0 %v10767_v19  ;;  %v12284_v19 = vld [vmem:[#allocation9 + $0x334] sm:$0xf]  ;;  %v12288_v43 = vld [vmem:[#allocation9 + $0x34c] sm:$0xf0]  ;;  %v12431_v29 = vld [vmem:[#allocation9 + $0x7c4] sm:$0xf0] }
 0x2fd   :  { %7057 = vmatpush.bf16.msra.mxu2 %v11055_v10  ;;  %v5114_v27 = vsel %vm5113_vm14, %v12610_v17, %v5110_v60  ;;  %v4792_v17 = vpop.f32.mrf.mxu2  ;;  %v4780_v10 = vpop.f32.mrf.mxu1  ;;  %v12296_v60 = vld [vmem:[#allocation9 + $0x394] sm:$0xf]  ;;  %v10986_v31 = vld [vmem:[#allocation9 + $0x5a8] sm:$0xf] }
 0x2fe   :  { %v5119_v44 = vsel %vm5116_vm15, %v5118_v50, %v5114_v27  ;;  %v4793_v12 = vadd.f32 %v4792_v17, %v4779_v28  ;;  %v4781_v49 = vadd.f32 %v4780_v10, %v4767_v0  ;;  %v10716_v50 = vld [vmem:[#allocation9 + $0x3a8] sm:$0xf0]  ;;  %v10722_v27 = vld [vmem:[#allocation9 + $0x398] sm:$0xf]  ;;  %v10698_v28 = vld [vmem:[#allocation9 + $0x368] sm:$0xf] }
 0x2ff   :  { %v5160_v11 = vmul.f32 %v5119_v44, %v13601_v33  ;;  %v12458_v33 = vld [vmem:[#allocation9 + $0x8a4] sm:$0xf]  ;;  %v10719_v3 = vor.u32 %v12296_v60, %v10716_v50  ;;  %v10723_v44 = vor.u32 %v12300_v37, %v10722_v27  ;;  %v10699_v17 = vor.u32 %v12294_v39, %v10698_v28 }
 0x300   :  { %v11367_v32 = vor.u32 %v12458_v33, %v11364_v42  ;;  %v4807_v20 = vadd.f32 %v4806_v4, %v4793_v12  ;;  %6983 = vmatpush.bf16.msrb.mxu1 %v11339_v63  ;;  %7026 = vmatpush.bf16.msra.mxu0 %v10743_v1  ;;  %v12437_v33 = vld [vmem:[#allocation9 + $0x7f4] sm:$0xf0]  ;;  %v11242_v63 = vld [vmem:[#allocation9 + $0x7b0] sm:$0xf]  ;;  %v10644_v1 = vld [vmem:[#allocation9 + $0x318] sm:$0xf0] }
 0x301   :  { %7058 = vmatpush.bf16.msra.mxu2 %v11031_v55  ;;  %v13641_v40 = vpack.c.bf16 %v5160_v11, %v5154_v35  ;;  %v4820_v55 = vpop.f32.mrf.mxu0  ;;  %v11291_v11 = vor.u32 %v12443_v16, %v11290_v22  ;;  %v11267_v42 = vor.u32 %v12437_v33, %v11266_v57  ;;  %v10674_v12 = vld [vmem:[#allocation9 + $0x338] sm:$0xf]  ;;  %v11243_v0 = vor.u32 %v12431_v29, %v11242_v63  ;;  %v12422_v37 = vld [vmem:[#allocation9 + $0x784] sm:$0xf]  ;;  %v12372_v16 = vld [vmem:[#allocation9 + $0x5ec] sm:$0xf0] }
 0x302   :  { %v4821_v47 = vadd.f32 %v4820_v55, %v4807_v20  ;;  %v10675_v4 = vor.u32 %v12288_v43, %v10674_v12  ;;  %v12282_v20 = vld [vmem:[#allocation9 + $0x31c] sm:$0xf0]  ;;  %v11010_v22 = vld [vmem:[#allocation9 + $0x5d8] sm:$0xf]  ;;  %v2972_v39 = vperm.slane %v13632_v34, 5 }
 0x303   :  { %6961 = vmatmul.bf16.vlgmr.msra.gmra.mxu3 %v13641_v40  ;;  %v10956_v57 = vld [vmem:[#allocation9 + $0x588] sm:$0xf0]  ;;  %v12350_v43 = vld [vmem:[#allocation9 + $0x544] sm:$0xf]  ;;  %v12354_v63 = vld [vmem:[#allocation9 + $0x55c] sm:$0xf0] }
 0x304   :  { %7065 = vmatpush.bf16.msra.mxu3 %v11391_v6  ;;  %6984 = vmatpush.bf16.msrb.mxu1 %v11315_v41 }
 0x305   :  { %7107 = vmatpush.bf16.msrb.mxu2 %v10819_v5  ;;  %v11316_v5 = vld [vmem:[#allocation9 + $0x858] sm:$0xf0]  ;;  %v4794_v48 = vpop.f32.mrf.mxu2  ;;  %7027 = vmatpush.bf16.msra.mxu0 %v10719_v3  ;;  %v4862_v3 = vpop.f32.mrf.mxu3 }
 0x306   :  { %v11319_v2 = vor.u32 %v12446_v15, %v11316_v5  ;;  %v4795_v25 = vadd.f32 %v4794_v48, %v4781_v49  ;;  %v10650_v49 = vld [vmem:[#allocation9 + $0x308] sm:$0xf]  ;;  %v11218_v15 = vld [vmem:[#allocation9 + $0x780] sm:$0xf]  ;;  %v12425_v5 = vld [vmem:[#allocation9 + $0x794] sm:$0xf0] }
 0x307   :  { %v10651_v58 = vor.u32 %v12282_v20, %v10650_v49  ;;  %v11219_v27 = vor.u32 %v12425_v5, %v11218_v15  ;;  %v11220_v48 = vld [vmem:[#allocation9 + $0x798] sm:$0xf0]  ;;  %v10908_v49 = vld [vmem:[#allocation9 + $0x528] sm:$0xf0]  ;;  %v12348_v5 = vld [vmem:[#allocation9 + $0x52c] sm:$0xf0] }
 0x308   :  { %7066 = vmatpush.bf16.msra.mxu3 %v11367_v32  ;;  %v4809_v18 = vadd.f32 %v4808_v7, %v4795_v25  ;;  %6985 = vmatpush.bf16.msrb.mxu1 %v11291_v11  ;;  %v10671_v32 = vor.u32 %v12284_v19, %v10668_v30  ;;  %v11223_v25 = vor.u32 %v12422_v37, %v11220_v48  ;;  %v10980_v11 = vld [vmem:[#allocation9 + $0x5b8] sm:$0xf0] }
 0x309   :  { %7108 = vmatpush.bf16.msrb.mxu2 %v10795_v36  ;;  %v10695_v36 = vor.u32 %v12290_v23, %v10692_v54  ;;  %v4822_v38 = vpop.f32.mrf.mxu0  ;;  %v11011_v23 = vor.u32 %v12372_v16, %v11010_v22  ;;  %v12338_v22 = vld [vmem:[#allocation9 + $0x4e4] sm:$0xf]  ;;  %v10884_v16 = vld [vmem:[#allocation9 + $0x4f8] sm:$0xf0] }
 0x30a   :  { %v4823_v10 = vadd.f32 %v4822_v38, %v4809_v18  ;;  %v12356_v18 = vld [vmem:[#allocation9 + $0x574] sm:$0xf]  ;;  %v10932_v38 = vld [vmem:[#allocation9 + $0x558] sm:$0xf0] }
 0x30b   :  { %7028 = vmatpush.bf16.msra.mxu0 %v10695_v36  ;;  %v12366_v36 = vld [vmem:[#allocation9 + $0x5bc] sm:$0xf0]  ;;  %v10959_v30 = vor.u32 %v12356_v18, %v10956_v57 }
 0x30c   :  { %7067 = vmatpush.bf16.msra.mxu3 %v11343_v56  ;;  %6986 = vmatpush.bf16.msrb.mxu1 %v11267_v42 }
 0x30d   :  { %7109 = vmatpush.bf16.msrb.mxu2 %v10771_v51  ;;  %v11268_v51 = vld [vmem:[#allocation9 + $0x7f8] sm:$0xf0]  ;;  %v4848_v55 = vpop.f32.mrf.mxu2  ;;  %v4864_v33 = vpop.f32.mrf.mxu3 }
 0x30e   :  { %v11271_v8 = vor.u32 %v12434_v14, %v11268_v51  ;;  %v10962_v14 = vld [vmem:[#allocation9 + $0x578] sm:$0xf]  ;;  %v4849_v34 = vadd.f32 %v4848_v55, %v2972_v39 }
 0x30f   :  { %7029 = vmatpush.bf16.msra.mxu0 %v10671_v32  ;;  %v12360_v32 = vld [vmem:[#allocation9 + $0x58c] sm:$0xf0] }
 0x310   :  { %7068 = vmatpush.bf16.msra.mxu3 %v11319_v2  ;;  %6987 = vmatpush.bf16.msrb.mxu1 %v11243_v0  ;;  %v12368_v2 = vld [vmem:[#allocation9 + $0x5d4] sm:$0xf]  ;;  %v10963_v51 = vor.u32 %v12360_v32, %v10962_v14  ;;  %v10860_v32 = vld [vmem:[#allocation9 + $0x4c8] sm:$0xf0] }
 0x311   :  { %7110 = vmatpush.bf16.msrb.mxu2 %v10747_v13  ;;  %v10647_v13 = vor.u32 %v12278_v53, %v10644_v1  ;;  %v4876_v42 = vpop.f32.mrf.mxu0  ;;  %v12332_v14 = vld [vmem:[#allocation9 + $0x4b4] sm:$0xf] }
 0x313   :  { %7017 = vmatmul.bf16.vlgmr.msrb.gmra.mxu3 %v13564_v21  ;;  %7030 = vmatpush.bf16.msra.mxu0 %v10647_v13  ;;  %v12344_v13 = vld [vmem:[#allocation9 + $0x514] sm:$0xf] }
 0x314   :  { %v4834_v35 = vpop.f32.mrf.mxu1  ;;  %7069 = vmatpush.bf16.msra.mxu3 %v11295_v26  ;;  %6988 = vmatpush.bf16.msrb.mxu1 %v11219_v27  ;;  %v10987_v26 = vor.u32 %v12366_v36, %v10986_v31  ;;  %v10890_v31 = vld [vmem:[#allocation9 + $0x4e8] sm:$0xf] }
 0x315   :  { %v13646_v6 = vadd.f32 %v4834_v35, %v4821_v47  ;;  %7111 = vmatpush.bf16.msrb.mxu2 %v10723_v44  ;;  %v11004_v44 = vld [vmem:[#allocation9 + $0x5e8] sm:$0xf0]  ;;  %v12362_v35 = vld [vmem:[#allocation9 + $0x5a4] sm:$0xf] }
 0x316   :  { %v11007_v47 = vor.u32 %v12368_v2, %v11004_v44  ;;  %v10983_v54 = vor.u32 %v12362_v35, %v10980_v11 }
 0x317   :  { %v10248_v62 = vmul.f32 -1.442695, %v13646_v6 }
 0x318   :  { %7070 = vmatpush.bf16.msra.mxu3 %v11271_v8  ;;  %7037 = vmatpush.bf16.msra.mxu1 %v11007_v47  ;;  %v4863_v8 = vadd.f32 %v4862_v3, %v4849_v34 }
 0x319   :  { %12611 = vpow2.f32 %v10248_v62  ;;  %7112 = vmatpush.bf16.msrb.mxu2 %v10699_v17  ;;  %v4850_v17 = vpop.f32.mrf.mxu2 }
 0x31a   :  { %v4851_v3 = vadd.f32 %v4850_v17, %v2972_v39  ;;  %v12228_v39 = vld [vmem:[#allocation9 + $0x16c] sm:$0xf0] }
 0x31c   :  { %v4836_v45 = vpop.f32.mrf.mxu1  ;;  %7071 = vmatpush.bf16.msra.mxu3 %v11247_v52  ;;  %7038 = vmatpush.bf16.msra.mxu1 %v10983_v54  ;;  %v10887_v54 = vor.u32 %v12338_v22, %v10884_v16  ;;  %v12207_v22 = vld [vmem:[#allocation9 + $0xcc] sm:$0xf]  ;;  %v10364_v16 = vld [vmem:[#allocation9 + $0xe0] sm:$0xf0] }
 0x31d   :  { %v13650_v56 = vadd.f32 %v4836_v45, %v4823_v10  ;;  %7113 = vmatpush.bf16.msrb.mxu2 %v10675_v4  ;;  %v10935_v4 = vor.u32 %v12350_v43, %v10932_v38  ;;  %v10938_v10 = vld [vmem:[#allocation9 + $0x548] sm:$0xf]  ;;  %v4877_v45 = vadd.f32 %v4876_v42, %v4863_v8  ;;  %v10436_v42 = vld [vmem:[#allocation9 + $0x170] sm:$0xf0]  ;;  %v12336_v43 = vld [vmem:[#allocation9 + $0x4cc] sm:$0xf0] }
 0x31e   :  { %v10939_v29 = vor.u32 %v12354_v63, %v10938_v10 }
 0x31f   :  { %v12612_v60 = vpop.eup %12611  ;;  %v10254_v41 = vmul.f32 -1.442695, %v13650_v56 }
 0x320   :  { %v13653_v50 = vadd.f32 1.0, %v12612_v60  ;;  %7072 = vmatpush.bf16.msra.mxu3 %v11223_v25  ;;  %7039 = vmatpush.bf16.msra.mxu1 %v10959_v30  ;;  %v10914_v60 = vld [vmem:[#allocation9 + $0x518] sm:$0xf] }
 0x321   :  { %12613 = vpow2.f32 %v10254_v41  ;;  %7114 = vmatpush.bf16.msrb.mxu2 %v10651_v58  ;;  %v4904_v0 = vpop.f32.mrf.mxu2  ;;  %v10911_v58 = vor.u32 %v12344_v13, %v10908_v49  ;;  %v4918_v41 = vpop.f32.mrf.mxu3  ;;  %v10915_v2 = vor.u32 %v12348_v5, %v10914_v60  ;;  %v12326_v49 = vld [vmem:[#allocation9 + $0x484] sm:$0xf]  ;;  %v10386_v5 = vld [vmem:[#allocation9 + $0xf8] sm:$0xf] }
 0x322   :  { %12615 = vrcp.f32 %v13653_v50  ;;  %v5042_v20 = vand.u32 2147483648, %v13653_v50  ;;  %vm5036_vm1 = vweird.f32 %v13653_v50  ;;  %v5040_v55 = vand.u32 2147483647, %v13653_v50 }
 0x324   :  { %7121 = vmatpush.bf16.msrb.mxu3 %v11011_v23  ;;  %7040 = vmatpush.bf16.msra.mxu1 %v10935_v4  ;;  %v4865_v23 = vadd.f32 %v4864_v33, %v4851_v3  ;;  %v5043_v35 = vor.u32 1.1754944e-38, %v5042_v20  ;;  %vm5041_vm4 = vcmp.eq.f32.partialorder %v5040_v55, 8.507059e+37  ;;  %v10836_v20 = vld [vmem:[#allocation9 + $0x498] sm:$0xf0]  ;;  %v12216_v3 = vld [vmem:[#allocation9 + $0x10c] sm:$0xf0] }
 0x327   :  { %v12614_v24 = vpop.eup %12613 }
 0x328   :  { %v13656_v28 = vpop.eup %12615  ;;  %v13659_v7 = vadd.f32 1.0, %v12614_v24  ;;  %7122 = vmatpush.bf16.msrb.mxu3 %v10987_v26  ;;  %7041 = vmatpush.bf16.msra.mxu1 %v10911_v58  ;;  %v12342_v24 = vld [vmem:[#allocation9 + $0x4fc] sm:$0xf0]  ;;  %v12225_v26 = vld [vmem:[#allocation9 + $0x15c] sm:$0xf] }
 0x329   :  { %v5032_v62 = vmul.f32 %v13656_v28, %v13653_v50  ;;  %vm5037_vm0 = vweird.f32 %v13656_v28  ;;  %v4878_v50 = vpop.f32.mrf.mxu0  ;;  %v10891_v17 = vor.u32 %v12342_v24, %v10890_v31  ;;  %v4906_v38 = vpop.f32.mrf.mxu2  ;;  %v10842_v58 = vld [vmem:[#allocation9 + $0x488] sm:$0xf]  ;;  %v10338_v31 = vld [vmem:[#allocation9 + $0x98] sm:$0xf]  ;;  %v12204_v24 = vld [vmem:[#allocation9 + $0xac] sm:$0xf0] }
 0x32a   :  { %12617 = vrcp.f32 %v13659_v7  ;;  %vm13673_vm2 = vmor %vm5036_vm1, %vm5037_vm0  ;;  %v5132_v37 = vand.u32 2147483648, %v13659_v7  ;;  %v5130_v47 = vand.u32 2147483647, %v13659_v7  ;;  %vm5126_vm5 = vweird.f32 %v13659_v7 }
 0x32b   :  { %v5033_v19 = vsub.f32 1.0, %v5032_v62  ;;  %v4879_v18 = vadd.f32 %v4878_v50, %v4865_v23 }
 0x32c   :  { %7123 = vmatpush.bf16.msrb.mxu3 %v10963_v51  ;;  %v5133_v57 = vor.u32 1.1754944e-38, %v5132_v37  ;;  %vm5131_vm7 = vcmp.eq.f32.partialorder %v5130_v47, 8.507059e+37  ;;  %7042 = vmatpush.bf16.msra.mxu1 %v10887_v54  ;;  %v10863_v51 = vor.u32 %v12332_v14, %v10860_v32  ;;  %v12213_v37 = vld [vmem:[#allocation9 + $0xfc] sm:$0xf]  ;;  %v12210_v47 = vld [vmem:[#allocation9 + $0xdc] sm:$0xf0]  ;;  %v10367_v54 = vor.u32 %v12207_v22, %v10364_v16 }
 0x32d   :  { %v5034_v12 = vmul.f32 %v13656_v28, %v5033_v19  ;;  %v11178_v22 = vld [vmem:[#allocation9 + $0x728] sm:$0xf] }
 0x32f   :  { %v5035_v1 = vadd.f32 %v13656_v28, %v5034_v12  ;;  %v10866_v12 = vld [vmem:[#allocation9 + $0x4b8] sm:$0xf] }
 0x330   :  { %v12618_v53 = vpop.eup %12617  ;;  %7124 = vmatpush.bf16.msrb.mxu3 %v10939_v29  ;;  %v10439_v29 = vor.u32 %v12225_v26, %v10436_v42  ;;  %7043 = vmatpush.bf16.msra.mxu1 %v10863_v51  ;;  %v10867_v13 = vor.u32 %v12336_v43, %v10866_v12  ;;  %v10340_v26 = vld [vmem:[#allocation9 + $0xb0] sm:$0xf0]  ;;  %v12198_v42 = vld [vmem:[#allocation9 + $0x7c] sm:$0xf0]  ;;  %v12192_v51 = vld [vmem:[#allocation9 + $0x4c] sm:$0xf0] }
 0x331   :  { %v5122_v46 = vmul.f32 %v12618_v53, %v13659_v7  ;;  %v5039_v44 = vsel %vm13673_vm2, %v13656_v28, %v5035_v1  ;;  %vm5127_vm3 = vweird.f32 %v12618_v53  ;;  %v10434_v28 = vld [vmem:[#allocation9 + $0x158] sm:$0xf]  ;;  %v12189_v43 = vld [vmem:[#allocation9 + $0x3c] sm:$0xf] }
 0x332   :  { %v5044_v62 = vsel %vm5041_vm4, %v5043_v35, %v5039_v44  ;;  %vm5128_vm6 = vmor %vm5126_vm5, %vm5127_vm3  ;;  %v10435_v63 = vor.u32 %v12228_v39, %v10434_v28  ;;  %v10387_v44 = vor.u32 %v12216_v3, %v10386_v5  ;;  %v12201_v39 = vld [vmem:[#allocation9 + $0x9c] sm:$0xf] }
 0x333   :  { %v5123_v15 = vsub.f32 1.0, %v5122_v46  ;;  %v5155_v8 = vmul.f32 %v5044_v62, %v13646_v6  ;;  %v4920_v46 = vpop.f32.mrf.mxu3  ;;  %v10839_v6 = vor.u32 %v12326_v49, %v10836_v20 }
 0x334   :  { %v4890_v61 = vpop.f32.mrf.mxu1  ;;  %7125 = vmatpush.bf16.msrb.mxu3 %v10915_v2 }
 0x335   :  { %v4891_v52 = vadd.f32 %v4890_v61, %v4877_v45  ;;  %v5124_v25 = vmul.f32 %v12618_v53, %v5123_v15  ;;  %v12222_v45 = vld [vmem:[#allocation9 + $0x13c] sm:$0xf0]  ;;  %v10412_v61 = vld [vmem:[#allocation9 + $0x140] sm:$0xf0]  ;;  %7044 = vmatpush.bf16.msra.mxu1 %v10839_v6  ;;  %v11202_v6 = vld [vmem:[#allocation9 + $0x758] sm:$0xf] }
 0x337   :  { %v4905_v48 = vadd.f32 %v4904_v0, %v4891_v52  ;;  %v5125_v36 = vadd.f32 %v12618_v53, %v5124_v25  ;;  %v12219_v0 = vld [vmem:[#allocation9 + $0x12c] sm:$0xf]  ;;  %v10362_v25 = vld [vmem:[#allocation9 + $0xc8] sm:$0xf] }
 0x338   :  { %7126 = vmatpush.bf16.msrb.mxu3 %v10891_v17  ;;  %v10415_v15 = vor.u32 %v12219_v0, %v10412_v61  ;;  %v10363_v35 = vor.u32 %v12210_v47, %v10362_v25  ;;  %v12276_v47 = vld [vmem:[#allocation9 + $0x2ec] sm:$0xf0] }
 0x339   :  { %v13682_v11 = vadd.f32 %v4918_v41, %v4905_v48  ;;  %v5129_v19 = vsel %vm5128_vm6, %v12618_v53, %v5125_v36  ;;  %v10410_v53 = vld [vmem:[#allocation9 + $0x128] sm:$0xf]  ;;  %v10388_v48 = vld [vmem:[#allocation9 + $0x110] sm:$0xf0] }
 0x33a   :  { %v5134_v7 = vsel %vm5131_vm7, %v5133_v57, %v5129_v19  ;;  %v10411_v41 = vor.u32 %v12222_v45, %v10410_v53  ;;  %v10391_v50 = vor.u32 %v12213_v37, %v10388_v48  ;;  %v10343_v57 = vor.u32 %v12201_v39, %v10340_v26  ;;  %v12195_v19 = vld [vmem:[#allocation9 + $0x6c] sm:$0xf]  ;;  %v12186_v53 = vld [vmem:[#allocation9 + $0x1c] sm:$0xf0]  ;;  %v10626_v48 = vld [vmem:[#allocation9 + $0x2d8] sm:$0xf] }
 0x33b   :  { %v10249_v33 = vmul.f32 -1.442695, %v13682_v11  ;;  %v5161_v4 = vmul.f32 %v5134_v7, %v13650_v56  ;;  %v12330_v56 = vld [vmem:[#allocation9 + $0x49c] sm:$0xf0]  ;;  %v12183_v45 = vld [vmem:[#allocation9 + $0xc] sm:$0xf]  ;;  %v10627_v26 = vor.u32 %v12276_v47, %v10626_v48 }
 0x33c   :  { %v4892_v30 = vpop.f32.mrf.mxu1  ;;  %7127 = vmatpush.bf16.msrb.mxu3 %v10867_v13  ;;  %v10843_v2 = vor.u32 %v12330_v56, %v10842_v58  ;;  %v10268_v13 = vld [vmem:[#allocation9 + $0x20] sm:$0xf0]  ;;  %v12420_v58 = vld [vmem:[#allocation9 + $0x76c] sm:$0xf0]  ;;  %v11082_v48 = vld [vmem:[#allocation9 + $0x668] sm:$0xf] }
 0x33d   :  { %12619 = vpow2.f32 %v10249_v33  ;;  %v4893_v34 = vadd.f32 %v4892_v30, %v4879_v18  ;;  %v13689_v1 = vpack.c.bf16 %v5161_v4, %v5155_v8  ;;  %v10339_v18 = vor.u32 %v12204_v24, %v10338_v31  ;;  %v10314_v33 = vld [vmem:[#allocation9 + $0x68] sm:$0xf]  ;;  %v10316_v30 = vld [vmem:[#allocation9 + $0x80] sm:$0xf0]  ;;  %v10628_v31 = vld [vmem:[#allocation9 + $0x2f0] sm:$0xf0] }
 0x33e   :  { %v10315_v32 = vor.u32 %v12198_v42, %v10314_v33  ;;  %v10319_v7 = vor.u32 %v12195_v19, %v10316_v30  ;;  %v10271_v37 = vor.u32 %v12183_v45, %v10268_v13  ;;  %v12411_v24 = vld [vmem:[#allocation9 + $0x72c] sm:$0xf]  ;;  %v11154_v19 = vld [vmem:[#allocation9 + $0x6f8] sm:$0xf]  ;;  %v12408_v30 = vld [vmem:[#allocation9 + $0x70c] sm:$0xf0] }
 0x33f   :  { %v4907_v10 = vadd.f32 %v4906_v38, %v4893_v34  ;;  %6975 = vmatmul.bf16.vlgmr.msrb.gmra.mxu0 %v13689_v1  ;;  %7059 = vmatmul.bf16.vlgmr.msra.gmra.mxu2 %v13689_v1  ;;  %v10290_v34 = vld [vmem:[#allocation9 + $0x38] sm:$0xf]  ;;  %v10292_v38 = vld [vmem:[#allocation9 + $0x50] sm:$0xf0]  ;;  %v11084_v47 = vld [vmem:[#allocation9 + $0x680] sm:$0xf0] }
 0x340   :  { %7079 = vmatpush.bf16.msrb.mxu0 %v10435_v63  ;;  %7163 = vmatpush.bf16.msra.mxu2 %v10439_v29  ;;  %v10291_v29 = vor.u32 %v12192_v51, %v10290_v34  ;;  %v10295_v61 = vor.u32 %v12189_v43, %v10292_v38  ;;  %v11155_v34 = vor.u32 %v12408_v30, %v11154_v19  ;;  %v10578_v51 = vld [vmem:[#allocation9 + $0x278] sm:$0xf]  ;;  %v11034_v19 = vld [vmem:[#allocation9 + $0x608] sm:$0xf] }
 0x341   :  { %v13691_v52 = vadd.f32 %v4920_v46, %v4907_v10  ;;  %7128 = vmatpush.bf16.msrb.mxu3 %v10843_v2  ;;  %v10266_v10 = vld [vmem:[#allocation9 + $0x8] sm:$0xf] }
 0x342   :  { %v10267_v3 = vor.u32 %v12186_v53, %v10266_v10  ;;  %v12261_v10 = vld [vmem:[#allocation9 + $0x27c] sm:$0xf]  ;;  %v11132_v53 = vld [vmem:[#allocation9 + $0x6e0] sm:$0xf0] }
 0x343   :  { %v12620_v60 = vpop.eup %12619  ;;  %v10255_v55 = vmul.f32 -1.442695, %v13691_v52 }
 0x344   :  { %v13696_v27 = vadd.f32 1.0, %v12620_v60  ;;  %7080 = vmatpush.bf16.msrb.mxu0 %v10411_v41  ;;  %7164 = vmatpush.bf16.msra.mxu2 %v10415_v15  ;;  %v12417_v41 = vld [vmem:[#allocation9 + $0x75c] sm:$0xf]  ;;  %v11204_v15 = vld [vmem:[#allocation9 + $0x770] sm:$0xf0] }
 0x345   :  { %12621 = vpow2.f32 %v10255_v55  ;;  %v11207_v25 = vor.u32 %v12417_v41, %v11204_v15 }
 0x346   :  { %12623 = vrcp.f32 %v13696_v27  ;;  %v5057_v63 = vand.u32 2147483648, %v13696_v27  ;;  %vm5051_vm9 = vweird.f32 %v13696_v27  ;;  %v5055_v0 = vand.u32 2147483647, %v13696_v27 }
 0x348   :  { %7081 = vmatpush.bf16.msrb.mxu0 %v10387_v44  ;;  %7165 = vmatpush.bf16.msra.mxu2 %v10391_v50  ;;  %v5058_v5 = vor.u32 1.1754944e-38, %v5057_v63  ;;  %vm5056_vm12 = vcmp.eq.f32.partialorder %v5055_v0, 8.507059e+37  ;;  %v11203_v50 = vor.u32 %v12420_v58, %v11202_v6  ;;  %v10580_v63 = vld [vmem:[#allocation9 + $0x290] sm:$0xf0]  ;;  %v12396_v6 = vld [vmem:[#allocation9 + $0x6ac] sm:$0xf0] }
 0x349   :  { %v10583_v13 = vor.u32 %v12261_v10, %v10580_v63  ;;  %v12255_v58 = vld [vmem:[#allocation9 + $0x24c] sm:$0xf]  ;;  %v10458_v10 = vld [vmem:[#allocation9 + $0x188] sm:$0xf] }
 0x34b   :  { %v12622_v23 = vpop.eup %12621 }
 0x34c   :  { %v13699_v36 = vpop.eup %12623  ;;  %v13701_v28 = vadd.f32 1.0, %v12622_v23  ;;  %7082 = vmatpush.bf16.msrb.mxu0 %v10363_v35  ;;  %7166 = vmatpush.bf16.msra.mxu2 %v10367_v54  ;;  %v12414_v23 = vld [vmem:[#allocation9 + $0x73c] sm:$0xf0]  ;;  %v12273_v35 = vld [vmem:[#allocation9 + $0x2dc] sm:$0xf] }
 0x34d   :  { %v5047_v17 = vmul.f32 %v13699_v36, %v13696_v27  ;;  %vm5052_vm8 = vweird.f32 %v13699_v36  ;;  %v10631_v33 = vor.u32 %v12273_v35, %v10628_v31  ;;  %v12246_v35 = vld [vmem:[#allocation9 + $0x1fc] sm:$0xf0] }
 0x34e   :  { %12625 = vrcp.f32 %v13701_v28  ;;  %vm13715_vm10 = vmor %vm5051_vm9, %vm5052_vm8  ;;  %v5147_v20 = vand.u32 2147483648, %v13701_v28  ;;  %v5145_v55 = vand.u32 2147483647, %v13701_v28  ;;  %vm5141_vm13 = vweird.f32 %v13701_v28 }
 0x34f   :  { %v5048_v62 = vsub.f32 1.0, %v5047_v17  ;;  %7031 = vmatmul.bf16.vlgmr.msra.gmra.mxu0 %v13599_v9  ;;  %7115 = vmatmul.bf16.vlgmr.msrb.gmra.mxu2 %v13599_v9  ;;  %v11179_v17 = vor.u32 %v12414_v23, %v11178_v22  ;;  %v10506_v23 = vld [vmem:[#allocation9 + $0x1e8] sm:$0xf] }
 0x350   :  { %7083 = vmatpush.bf16.msrb.mxu0 %v10339_v18  ;;  %7167 = vmatpush.bf16.msra.mxu2 %v10343_v57  ;;  %v5148_v44 = vor.u32 1.1754944e-38, %v5147_v20  ;;  %vm5146_vm15 = vcmp.eq.f32.partialorder %v5145_v55, 8.507059e+37  ;;  %v12270_v18 = vld [vmem:[#allocation9 + $0x2bc] sm:$0xf0]  ;;  %v11106_v20 = vld [vmem:[#allocation9 + $0x698] sm:$0xf] }
 0x351   :  { %v5049_v14 = vmul.f32 %v13699_v36, %v5048_v62  ;;  %v10602_v62 = vld [vmem:[#allocation9 + $0x2a8] sm:$0xf]  ;;  %v11108_v55 = vld [vmem:[#allocation9 + $0x6b0] sm:$0xf0]  ;;  %v11107_v15 = vor.u32 %v12396_v6, %v11106_v20  ;;  %v12315_v20 = vld [vmem:[#allocation9 + $0x42c] sm:$0xf] }
 0x352   :  { %v10796_v6 = vld [vmem:[#allocation9 + $0x440] sm:$0xf0] }
 0x353   :  { %v5050_v8 = vadd.f32 %v13699_v36, %v5049_v14  ;;  %v12267_v14 = vld [vmem:[#allocation9 + $0x2ac] sm:$0xf] }
 0x354   :  { %v12626_v12 = vpop.eup %12625  ;;  %7084 = vmatpush.bf16.msrb.mxu0 %v10315_v32  ;;  %7168 = vmatpush.bf16.msra.mxu2 %v10319_v7  ;;  %v11156_v32 = vld [vmem:[#allocation9 + $0x710] sm:$0xf0]  ;;  %v10603_v7 = vor.u32 %v12270_v18, %v10602_v62  ;;  %v10507_v62 = vor.u32 %v12246_v35, %v10506_v23 }
 0x355   :  { %v5137_v4 = vmul.f32 %v12626_v12, %v13701_v28  ;;  %v5054_v56 = vsel %vm13715_vm10, %v13699_v36, %v5050_v8  ;;  %vm5142_vm11 = vweird.f32 %v12626_v12  ;;  %v11180_v36 = vld [vmem:[#allocation9 + $0x740] sm:$0xf0]  ;;  %v11130_v8 = vld [vmem:[#allocation9 + $0x6c8] sm:$0xf] }
 0x356   :  { %v5059_v2 = vsel %vm5056_vm12, %v5058_v5, %v5054_v56  ;;  %vm5143_vm14 = vmor %vm5141_vm13, %vm5142_vm11  ;;  %v11183_v42 = vor.u32 %v12411_v24, %v11180_v36  ;;  %v10556_v56 = vld [vmem:[#allocation9 + $0x260] sm:$0xf0]  ;;  %v10530_v5 = vld [vmem:[#allocation9 + $0x218] sm:$0xf] }
 0x357   :  { %v5138_v46 = vsub.f32 1.0, %v5137_v4  ;;  %v5156_v28 = vmul.f32 %v5059_v2, %v13682_v11  ;;  %v10604_v11 = vld [vmem:[#allocation9 + $0x2c0] sm:$0xf0]  ;;  %v12402_v4 = vld [vmem:[#allocation9 + $0x6dc] sm:$0xf0] }
 0x358   :  { %7085 = vmatpush.bf16.msrb.mxu0 %v10291_v29  ;;  %7169 = vmatpush.bf16.msra.mxu2 %v10295_v61  ;;  %v10607_v43 = vor.u32 %v12267_v14, %v10604_v11  ;;  %v12399_v29 = vld [vmem:[#allocation9 + $0x6cc] sm:$0xf]  ;;  %v11131_v0 = vor.u32 %v12402_v4, %v11130_v8  ;;  %v12258_v61 = vld [vmem:[#allocation9 + $0x25c] sm:$0xf0]  ;;  %v11058_v24 = vld [vmem:[#allocation9 + $0x638] sm:$0xf] }
 0x359   :  { %v5139_v60 = vmul.f32 %v12626_v12, %v5138_v46  ;;  %v10554_v46 = vld [vmem:[#allocation9 + $0x248] sm:$0xf]  ;;  %v11135_v49 = vor.u32 %v12399_v29, %v11132_v53  ;;  %v12390_v2 = vld [vmem:[#allocation9 + $0x67c] sm:$0xf0]  ;;  %v12384_v36 = vld [vmem:[#allocation9 + $0x64c] sm:$0xf0] }
 0x35a   :  { %v10555_v41 = vor.u32 %v12258_v61, %v10554_v46  ;;  %v11059_v18 = vor.u32 %v12384_v36, %v11058_v24  ;;  %v12378_v11 = vld [vmem:[#allocation9 + $0x61c] sm:$0xf0]  ;;  %v12456_v24 = vld [vmem:[#allocation9 + $0x88c] sm:$0xf0]  ;;  %v12303_v36 = vld [vmem:[#allocation9 + $0x3cc] sm:$0xf] }
 0x35b   :  { %v5140_v27 = vadd.f32 %v12626_v12, %v5139_v60  ;;  %v12393_v60 = vld [vmem:[#allocation9 + $0x69c] sm:$0xf]  ;;  %v11035_v4 = vor.u32 %v12378_v11, %v11034_v19  ;;  %v12234_v53 = vld [vmem:[#allocation9 + $0x19c] sm:$0xf0] }
 0x35c   :  { %7086 = vmatpush.bf16.msrb.mxu0 %v10267_v3  ;;  %7170 = vmatpush.bf16.msra.mxu2 %v10271_v37  ;;  %v12252_v3 = vld [vmem:[#allocation9 + $0x22c] sm:$0xf0]  ;;  %v11111_v37 = vor.u32 %v12393_v60, %v11108_v55  ;;  %v10459_v60 = vor.u32 %v12234_v53, %v10458_v10  ;;  %v12297_v11 = vld [vmem:[#allocation9 + $0x39c] sm:$0xf]  ;;  %v10700_v53 = vld [vmem:[#allocation9 + $0x380] sm:$0xf0] }
 0x35d   :  { %v5144_v16 = vsel %vm5143_vm14, %v12626_v12, %v5140_v27  ;;  %v12264_v12 = vld [vmem:[#allocation9 + $0x28c] sm:$0xf0]  ;;  %v10559_v27 = vor.u32 %v12255_v58, %v10556_v56  ;;  %v10531_v22 = vor.u32 %v12252_v3, %v10530_v5  ;;  %v12465_v58 = vld [vmem:[#allocation9 + $0x8dc] sm:$0xf]  ;;  %v11396_v56 = vld [vmem:[#allocation9 + $0x8f0] sm:$0xf0]  ;;  %v10799_v3 = vor.u32 %v12315_v20, %v10796_v6 }
 0x35e   :  { %v5149_v54 = vsel %vm5146_vm15, %v5148_v44, %v5144_v16  ;;  %v10579_v45 = vor.u32 %v12264_v12, %v10578_v51  ;;  %v12249_v44 = vld [vmem:[#allocation9 + $0x21c] sm:$0xf]  ;;  %v11083_v16 = vor.u32 %v12390_v2, %v11082_v48  ;;  %v10820_v12 = vld [vmem:[#allocation9 + $0x470] sm:$0xf0]  ;;  %v10802_v55 = vld [vmem:[#allocation9 + $0x430] sm:$0xf] }
 0x35f   :  { %v5162_v39 = vmul.f32 %v5149_v54, %v13691_v52  ;;  %7087 = vmatmul.bf16.vlgmr.msrb.gmra.mxu0 %v13509_v59  ;;  %7171 = vmatmul.bf16.vlgmr.msra.gmra.mxu2 %v13509_v59  ;;  %v12405_v52 = vld [vmem:[#allocation9 + $0x6fc] sm:$0xf]  ;;  %v12462_v48 = vld [vmem:[#allocation9 + $0x8bc] sm:$0xf0]  ;;  %v12444_v10 = vld [vmem:[#allocation9 + $0x82c] sm:$0xf0] }
 0x360   :  { %7135 = vmatpush.bf16.msra.mxu0 %v11203_v50  ;;  %7219 = vmatpush.bf16.msrb.mxu2 %v11207_v25  ;;  %v11159_v38 = vor.u32 %v12405_v52, %v11156_v32  ;;  %v10532_v50 = vld [vmem:[#allocation9 + $0x230] sm:$0xf0]  ;;  %v12387_v25 = vld [vmem:[#allocation9 + $0x66c] sm:$0xf]  ;;  %v12237_v52 = vld [vmem:[#allocation9 + $0x1bc] sm:$0xf] }
 0x361   :  { %v13727_v57 = vpack.c.bf16 %v5162_v39, %v5156_v28  ;;  %v10535_v54 = vor.u32 %v12249_v44, %v10532_v50  ;;  %v11087_v31 = vor.u32 %v12387_v25, %v11084_v47  ;;  %v12243_v28 = vld [vmem:[#allocation9 + $0x1ec] sm:$0xf]  ;;  %v10508_v39 = vld [vmem:[#allocation9 + $0x200] sm:$0xf0]  ;;  %v10484_v32 = vld [vmem:[#allocation9 + $0x1d0] sm:$0xf0] }
 0x362   :  { %v10511_v30 = vor.u32 %v12243_v28, %v10508_v39  ;;  %v12321_v51 = vld [vmem:[#allocation9 + $0x45c] sm:$0xf]  ;;  %v10487_v63 = vor.u32 %v12237_v52, %v10484_v32  ;;  %v10772_v50 = vld [vmem:[#allocation9 + $0x410] sm:$0xf0]  ;;  %v12459_v25 = vld [vmem:[#allocation9 + $0x8ac] sm:$0xf] }
 0x363   :  { %6989 = vmatmul.bf16.vlgmr.msrb.gmra.mxu1 %v13727_v57  ;;  %7073 = vmatmul.bf16.vlgmr.msra.gmra.mxu3 %v13727_v57  ;;  %v10823_v46 = vor.u32 %v12321_v51, %v10820_v12  ;;  %v12309_v2 = vld [vmem:[#allocation9 + $0x3fc] sm:$0xf]  ;;  %v11372_v47 = vld [vmem:[#allocation9 + $0x8c0] sm:$0xf0]  ;;  %v10724_v32 = vld [vmem:[#allocation9 + $0x3b0] sm:$0xf0] }
 0x364   :  { %7093 = vmatpush.bf16.msrb.mxu1 %v10627_v26  ;;  %7136 = vmatpush.bf16.msra.mxu0 %v11179_v17  ;;  %v12381_v26 = vld [vmem:[#allocation9 + $0x63c] sm:$0xf]  ;;  %v11060_v17 = vld [vmem:[#allocation9 + $0x650] sm:$0xf0]  ;;  %v10775_v35 = vor.u32 %v12309_v2, %v10772_v50  ;;  %v10748_v39 = vld [vmem:[#allocation9 + $0x3e0] sm:$0xf0] }
 0x365   :  { %7177 = vmatpush.bf16.msra.mxu3 %v10631_v33  ;;  %7220 = vmatpush.bf16.msrb.mxu2 %v11183_v42  ;;  %v10482_v33 = vld [vmem:[#allocation9 + $0x1b8] sm:$0xf]  ;;  %v12240_v42 = vld [vmem:[#allocation9 + $0x1cc] sm:$0xf0]  ;;  %v11063_v14 = vor.u32 %v12381_v26, %v11060_v17  ;;  %v12453_v26 = vld [vmem:[#allocation9 + $0x87c] sm:$0xf] }
 0x366   :  { %v10483_v8 = vor.u32 %v12240_v42, %v10482_v33  ;;  %v11348_v17 = vld [vmem:[#allocation9 + $0x890] sm:$0xf0]  ;;  %v10751_v42 = vor.u32 %v12303_v36, %v10748_v39  ;;  %v10730_v51 = vld [vmem:[#allocation9 + $0x3a0] sm:$0xf]  ;;  %v12301_v12 = vld [vmem:[#allocation9 + $0x3b4] sm:$0xf0] }
 0x367   :  { %v11351_v19 = vor.u32 %v12453_v26, %v11348_v17  ;;  %v11274_v6 = vld [vmem:[#allocation9 + $0x7e8] sm:$0xf]  ;;  %v12279_v50 = vld [vmem:[#allocation9 + $0x30c] sm:$0xf]  ;;  %v12226_v36 = vld [vmem:[#allocation9 + $0x164] sm:$0xf] }
 0x368   :  { %7094 = vmatpush.bf16.msrb.mxu1 %v10603_v7  ;;  %7137 = vmatpush.bf16.msra.mxu0 %v11155_v34  ;;  %v12375_v7 = vld [vmem:[#allocation9 + $0x60c] sm:$0xf]  ;;  %v11036_v34 = vld [vmem:[#allocation9 + $0x620] sm:$0xf0]  ;;  %v11226_v17 = vld [vmem:[#allocation9 + $0x788] sm:$0xf] }
 0x369   :  { %7178 = vmatpush.bf16.msra.mxu3 %v10607_v43  ;;  %7221 = vmatpush.bf16.msrb.mxu2 %v11159_v38  ;;  %v10826_v43 = vld [vmem:[#allocation9 + $0x460] sm:$0xf]  ;;  %v12325_v38 = vld [vmem:[#allocation9 + $0x474] sm:$0xf0]  ;;  %v11039_v29 = vor.u32 %v12375_v7, %v11036_v34  ;;  %v12447_v7 = vld [vmem:[#allocation9 + $0x84c] sm:$0xf] }
 0x36a   :  { %v10827_v61 = vor.u32 %v12325_v38, %v10826_v43  ;;  %v11324_v34 = vld [vmem:[#allocation9 + $0x860] sm:$0xf0]  ;;  %v10727_v38 = vor.u32 %v12297_v11, %v10724_v32  ;;  %v12223_v32 = vld [vmem:[#allocation9 + $0x144] sm:$0xf0] }
 0x36c   :  { %7095 = vmatpush.bf16.msrb.mxu1 %v10579_v45  ;;  %7138 = vmatpush.bf16.msra.mxu0 %v11131_v0  ;;  %v12231_v45 = vld [vmem:[#allocation9 + $0x18c] sm:$0xf]  ;;  %v10460_v0 = vld [vmem:[#allocation9 + $0x1a0] sm:$0xf0] }
 0x36d   :  { %7179 = vmatpush.bf16.msra.mxu3 %v10583_v13  ;;  %7222 = vmatpush.bf16.msrb.mxu2 %v11135_v49  ;;  %v11394_v13 = vld [vmem:[#allocation9 + $0x8d8] sm:$0xf]  ;;  %v12468_v49 = vld [vmem:[#allocation9 + $0x8ec] sm:$0xf0] }
 0x36e   :  { %v11395_v5 = vor.u32 %v12468_v49, %v11394_v13 }
 0x370   :  { %7096 = vmatpush.bf16.msrb.mxu1 %v10555_v41  ;;  %7139 = vmatpush.bf16.msra.mxu0 %v11107_v15  ;;  %v12319_v41 = vld [vmem:[#allocation9 + $0x444] sm:$0xf0]  ;;  %v10463_v15 = vor.u32 %v12231_v45, %v10460_v0  ;;  %v12441_v45 = vld [vmem:[#allocation9 + $0x81c] sm:$0xf]  ;;  %v11300_v0 = vld [vmem:[#allocation9 + $0x830] sm:$0xf0] }
 0x371   :  { %7180 = vmatpush.bf16.msra.mxu3 %v10559_v27  ;;  %7223 = vmatpush.bf16.msrb.mxu2 %v11111_v37  ;;  %v11399_v27 = vor.u32 %v12465_v58, %v11396_v56  ;;  %v11370_v37 = vld [vmem:[#allocation9 + $0x8a8] sm:$0xf]  ;;  %v10803_v44 = vor.u32 %v12319_v41, %v10802_v55  ;;  %v11303_v20 = vor.u32 %v12441_v45, %v11300_v0  ;;  %v12438_v58 = vld [vmem:[#allocation9 + $0x7fc] sm:$0xf0]  ;;  %v12285_v56 = vld [vmem:[#allocation9 + $0x33c] sm:$0xf] }
 0x372   :  { %v11371_v23 = vor.u32 %v12462_v48, %v11370_v37  ;;  %v10676_v55 = vld [vmem:[#allocation9 + $0x350] sm:$0xf0]  ;;  %v12435_v41 = vld [vmem:[#allocation9 + $0x7ec] sm:$0xf]  ;;  %v11250_v37 = vld [vmem:[#allocation9 + $0x7b8] sm:$0xf] }
 0x373   :  { %7045 = vmatmul.bf16.vlgmr.msra.gmra.mxu1 %v13641_v40  ;;  %7129 = vmatmul.bf16.vlgmr.msrb.gmra.mxu3 %v13641_v40  ;;  %v10679_v48 = vor.u32 %v12285_v56, %v10676_v55  ;;  %v10394_v45 = vld [vmem:[#allocation9 + $0x100] sm:$0xf]  ;;  %v12217_v0 = vld [vmem:[#allocation9 + $0x114] sm:$0xf0]  ;;  %v10964_v56 = vld [vmem:[#allocation9 + $0x590] sm:$0xf0] }
 0x374   :  { %7097 = vmatpush.bf16.msrb.mxu1 %v10531_v22  ;;  %7140 = vmatpush.bf16.msra.mxu0 %v11083_v16  ;;  %v10778_v22 = vld [vmem:[#allocation9 + $0x400] sm:$0xf]  ;;  %v12313_v16 = vld [vmem:[#allocation9 + $0x414] sm:$0xf0] }
 0x375   :  { %7181 = vmatpush.bf16.msra.mxu3 %v10535_v54  ;;  %7224 = vmatpush.bf16.msrb.mxu2 %v11087_v31  ;;  %v11375_v54 = vor.u32 %v12459_v25, %v11372_v47  ;;  %v11346_v31 = vld [vmem:[#allocation9 + $0x878] sm:$0xf]  ;;  %v10779_v28 = vor.u32 %v12313_v16, %v10778_v22  ;;  %v10652_v25 = vld [vmem:[#allocation9 + $0x320] sm:$0xf0]  ;;  %v12429_v22 = vld [vmem:[#allocation9 + $0x7bc] sm:$0xf] }
 0x376   :  { %v11347_v33 = vor.u32 %v12456_v24, %v11346_v31  ;;  %v11252_v16 = vld [vmem:[#allocation9 + $0x7d0] sm:$0xf0]  ;;  %v12229_v31 = vld [vmem:[#allocation9 + $0x174] sm:$0xf0]  ;;  %v10655_v39 = vor.u32 %v12279_v50, %v10652_v25  ;;  %v10940_v50 = vld [vmem:[#allocation9 + $0x560] sm:$0xf0] }
 0x377   :  { %v11255_v26 = vor.u32 %v12429_v22, %v11252_v16  ;;  %v10346_v22 = vld [vmem:[#allocation9 + $0xa0] sm:$0xf]  ;;  %v12205_v16 = vld [vmem:[#allocation9 + $0xb4] sm:$0xf0] }
 0x378   :  { %7098 = vmatpush.bf16.msrb.mxu1 %v10507_v62  ;;  %7141 = vmatpush.bf16.msra.mxu0 %v11059_v18  ;;  %v10754_v62 = vld [vmem:[#allocation9 + $0x3d0] sm:$0xf]  ;;  %v12307_v18 = vld [vmem:[#allocation9 + $0x3e4] sm:$0xf0] }
 0x379   :  { %7182 = vmatpush.bf16.msra.mxu3 %v10511_v30  ;;  %7225 = vmatpush.bf16.msrb.mxu2 %v11063_v14  ;;  %v11322_v30 = vld [vmem:[#allocation9 + $0x848] sm:$0xf]  ;;  %v12450_v14 = vld [vmem:[#allocation9 + $0x85c] sm:$0xf0]  ;;  %v10755_v52 = vor.u32 %v12307_v18, %v10754_v62  ;;  %v12423_v18 = vld [vmem:[#allocation9 + $0x78c] sm:$0xf] }
 0x37a   :  { %v11323_v43 = vor.u32 %v12450_v14, %v11322_v30  ;;  %v12426_v62 = vld [vmem:[#allocation9 + $0x79c] sm:$0xf0]  ;;  %v12369_v30 = vld [vmem:[#allocation9 + $0x5dc] sm:$0xf]  ;;  %v11012_v14 = vld [vmem:[#allocation9 + $0x5f0] sm:$0xf0] }
 0x37c   :  { %7099 = vmatpush.bf16.msrb.mxu1 %v10483_v8  ;;  %7142 = vmatpush.bf16.msra.mxu0 %v11035_v4  ;;  %v11327_v8 = vor.u32 %v12447_v7, %v11324_v34  ;;  %v11298_v4 = vld [vmem:[#allocation9 + $0x818] sm:$0xf]  ;;  %v11018_v7 = vld [vmem:[#allocation9 + $0x5e0] sm:$0xf]  ;;  %v11227_v34 = vor.u32 %v12426_v62, %v11226_v17  ;;  %v10322_v62 = vld [vmem:[#allocation9 + $0x70] sm:$0xf] }
 0x37d   :  { %7183 = vmatpush.bf16.msra.mxu3 %v10487_v63  ;;  %7226 = vmatpush.bf16.msrb.mxu2 %v11039_v29  ;;  %v12291_v63 = vld [vmem:[#allocation9 + $0x36c] sm:$0xf]  ;;  %v10731_v29 = vor.u32 %v12301_v12, %v10730_v51  ;;  %v11299_v13 = vor.u32 %v12444_v10, %v11298_v4  ;;  %v12373_v51 = vld [vmem:[#allocation9 + $0x5f4] sm:$0xf0]  ;;  %v12220_v12 = vld [vmem:[#allocation9 + $0x134] sm:$0xf] }
 0x37e   :  { %v10703_v49 = vor.u32 %v12291_v63, %v10700_v53  ;;  %v12363_v10 = vld [vmem:[#allocation9 + $0x5ac] sm:$0xf]  ;;  %v10988_v63 = vld [vmem:[#allocation9 + $0x5c0] sm:$0xf0] }
 0x37f   :  { %7143 = vmatmul.bf16.vlgmr.msra.gmra.mxu0 %v13689_v1 }
 0x380   :  { %7191 = vmatpush.bf16.msrb.mxu0 %v10823_v46  ;;  %7227 = vmatmul.bf16.vlgmr.msrb.gmra.mxu2 %v13689_v1  ;;  %v10706_v46 = vld [vmem:[#allocation9 + $0x370] sm:$0xf] }
 0x381   :  { %7275 = vmatpush.bf16.msra.mxu2 %v10827_v61  ;;  %7100 = vmatpush.bf16.msrb.mxu1 %v10459_v60  ;;  %v12295_v61 = vld [vmem:[#allocation9 + $0x384] sm:$0xf0] }
 0x382   :  { %7184 = vmatpush.bf16.msra.mxu3 %v10463_v15  ;;  %v10707_v60 = vor.u32 %v12295_v61, %v10706_v46  ;;  %v11276_v15 = vld [vmem:[#allocation9 + $0x800] sm:$0xf0]  ;;  %v10994_v46 = vld [vmem:[#allocation9 + $0x5b0] sm:$0xf]  ;;  %v12367_v61 = vld [vmem:[#allocation9 + $0x5c4] sm:$0xf0] }
 0x383   :  { %v11279_v2 = vor.u32 %v12435_v41, %v11276_v15  ;;  %v10370_v41 = vld [vmem:[#allocation9 + $0xd0] sm:$0xf]  ;;  %v12211_v15 = vld [vmem:[#allocation9 + $0xe4] sm:$0xf0] }
 0x384   :  { %7192 = vmatpush.bf16.msrb.mxu0 %v10799_v3  ;;  %7101 = vmatmul.bf16.vlgmr.msrb.gmra.mxu1 %v13564_v21  ;;  %v12289_v3 = vld [vmem:[#allocation9 + $0x354] sm:$0xf0] }
 0x385   :  { %7149 = vmatpush.bf16.msra.mxu1 %v11395_v5  ;;  %7276 = vmatpush.bf16.msra.mxu2 %v10803_v44  ;;  %v10682_v5 = vld [vmem:[#allocation9 + $0x340] sm:$0xf]  ;;  %v12432_v44 = vld [vmem:[#allocation9 + $0x7cc] sm:$0xf0] }
 0x386   :  { %7233 = vmatpush.bf16.msrb.mxu3 %v11399_v27  ;;  %v11275_v27 = vor.u32 %v12438_v58, %v11274_v6  ;;  %v10683_v47 = vor.u32 %v12289_v3, %v10682_v5  ;;  %v11251_v24 = vor.u32 %v12432_v44, %v11250_v37  ;;  %v10395_v6 = vor.u32 %v12217_v0, %v10394_v45  ;;  %v12357_v58 = vld [vmem:[#allocation9 + $0x57c] sm:$0xf]  ;;  %v10970_v5 = vld [vmem:[#allocation9 + $0x580] sm:$0xf]  ;;  %v12361_v3 = vld [vmem:[#allocation9 + $0x594] sm:$0xf0] }
 0x387   :  { %7185 = vmatmul.bf16.vlgmr.msra.gmra.mxu3 %v13564_v21  ;;  %v10372_v37 = vld [vmem:[#allocation9 + $0xe8] sm:$0xf0]  ;;  %v10971_v25 = vor.u32 %v12361_v3, %v10970_v5  ;;  %v10274_v45 = vld [vmem:[#allocation9 + $0x10] sm:$0xf] }
 0x388   :  { %7193 = vmatpush.bf16.msrb.mxu0 %v10775_v35  ;;  %v12283_v35 = vld [vmem:[#allocation9 + $0x324] sm:$0xf0]  ;;  %v12351_v44 = vld [vmem:[#allocation9 + $0x54c] sm:$0xf] }
 0x389   :  { %7150 = vmatpush.bf16.msra.mxu1 %v11371_v23  ;;  %7277 = vmatpush.bf16.msra.mxu2 %v10779_v28  ;;  %v10658_v23 = vld [vmem:[#allocation9 + $0x310] sm:$0xf]  ;;  %v10444_v28 = vld [vmem:[#allocation9 + $0x178] sm:$0xf0]  ;;  %v12327_v5 = vld [vmem:[#allocation9 + $0x48c] sm:$0xf] }
 0x38a   :  { %7234 = vmatpush.bf16.msrb.mxu3 %v11375_v54  ;;  %v10442_v54 = vld [vmem:[#allocation9 + $0x160] sm:$0xf]  ;;  %v10447_v11 = vor.u32 %v12226_v36, %v10444_v28  ;;  %v10347_v36 = vor.u32 %v12205_v16, %v10346_v22  ;;  %v12345_v28 = vld [vmem:[#allocation9 + $0x51c] sm:$0xf]  ;;  %v11186_v22 = vld [vmem:[#allocation9 + $0x730] sm:$0xf] }
 0x38b   :  { %v12415_v16 = vld [vmem:[#allocation9 + $0x744] sm:$0xf0] }
 0x38c   :  { %7194 = vmatpush.bf16.msrb.mxu0 %v10751_v42  ;;  %v10443_v42 = vor.u32 %v12229_v31, %v10442_v54  ;;  %v12202_v54 = vld [vmem:[#allocation9 + $0xa4] sm:$0xf]  ;;  %v10348_v31 = vld [vmem:[#allocation9 + $0xb8] sm:$0xf0] }
 0x38d   :  { %7151 = vmatpush.bf16.msra.mxu1 %v11347_v33  ;;  %7278 = vmatpush.bf16.msra.mxu2 %v10755_v52  ;;  %v10659_v33 = vor.u32 %v12283_v35, %v10658_v23  ;;  %v10418_v52 = vld [vmem:[#allocation9 + $0x130] sm:$0xf]  ;;  %v12355_v35 = vld [vmem:[#allocation9 + $0x564] sm:$0xf0]  ;;  %v10351_v17 = vor.u32 %v12202_v54, %v10348_v31  ;;  %v12412_v31 = vld [vmem:[#allocation9 + $0x734] sm:$0xf] }
 0x38e   :  { %7235 = vmatpush.bf16.msrb.mxu3 %v11351_v19  ;;  %v11228_v19 = vld [vmem:[#allocation9 + $0x7a0] sm:$0xf0]  ;;  %v10419_v4 = vor.u32 %v12223_v32, %v10418_v52  ;;  %v10946_v23 = vld [vmem:[#allocation9 + $0x550] sm:$0xf]  ;;  %v12339_v52 = vld [vmem:[#allocation9 + $0x4ec] sm:$0xf] }
 0x38f   :  { %v10892_v32 = vld [vmem:[#allocation9 + $0x500] sm:$0xf0] }
 0x390   :  { %7195 = vmatpush.bf16.msrb.mxu0 %v10727_v38  ;;  %v11231_v38 = vor.u32 %v12423_v18, %v11228_v19  ;;  %v12199_v18 = vld [vmem:[#allocation9 + $0x84] sm:$0xf0]  ;;  %v12196_v19 = vld [vmem:[#allocation9 + $0x74] sm:$0xf] }
 0x391   :  { %7152 = vmatpush.bf16.msra.mxu1 %v11323_v43  ;;  %7279 = vmatpush.bf16.msra.mxu2 %v10731_v29  ;;  %v10420_v43 = vld [vmem:[#allocation9 + $0x148] sm:$0xf0]  ;;  %v11019_v29 = vor.u32 %v12373_v51, %v11018_v7  ;;  %v10298_v51 = vld [vmem:[#allocation9 + $0x40] sm:$0xf] }
 0x392   :  { %7236 = vmatpush.bf16.msrb.mxu3 %v11327_v8  ;;  %v11015_v8 = vor.u32 %v12369_v30, %v11012_v14  ;;  %v10423_v53 = vor.u32 %v12220_v12, %v10420_v43  ;;  %v10324_v30 = vld [vmem:[#allocation9 + $0x88] sm:$0xf0]  ;;  %v12193_v12 = vld [vmem:[#allocation9 + $0x54] sm:$0xf0]  ;;  %v10898_v43 = vld [vmem:[#allocation9 + $0x4f0] sm:$0xf] }
 0x394   :  { %7196 = vmatpush.bf16.msrb.mxu0 %v10703_v49  ;;  %v10396_v49 = vld [vmem:[#allocation9 + $0x118] sm:$0xf0] }
 0x395   :  { %7153 = vmatpush.bf16.msra.mxu1 %v11299_v13  ;;  %7280 = vmatpush.bf16.msra.mxu2 %v10707_v60  ;;  %v12214_v13 = vld [vmem:[#allocation9 + $0x104] sm:$0xf]  ;;  %v10995_v60 = vor.u32 %v12367_v61, %v10994_v46  ;;  %v12187_v61 = vld [vmem:[#allocation9 + $0x24] sm:$0xf0] }
 0x396   :  { %7237 = vmatpush.bf16.msrb.mxu3 %v11303_v20  ;;  %v10991_v20 = vor.u32 %v12363_v10, %v10988_v63  ;;  %v10399_v55 = vor.u32 %v12214_v13, %v10396_v49  ;;  %v10895_v10 = vor.u32 %v12339_v52, %v10892_v32  ;;  %v10299_v63 = vor.u32 %v12193_v12, %v10298_v51  ;;  %v10874_v13 = vld [vmem:[#allocation9 + $0x4c0] sm:$0xf]  ;;  %v12337_v49 = vld [vmem:[#allocation9 + $0x4d4] sm:$0xf0]  ;;  %v11138_v12 = vld [vmem:[#allocation9 + $0x6d0] sm:$0xf] }
 0x397   :  { %v10875_v3 = vor.u32 %v12337_v49, %v10874_v13  ;;  %v12265_v51 = vld [vmem:[#allocation9 + $0x294] sm:$0xf0]  ;;  %v12256_v49 = vld [vmem:[#allocation9 + $0x254] sm:$0xf] }
 0x398   :  { %7197 = vmatpush.bf16.msrb.mxu0 %v10679_v48  ;;  %v10967_v48 = vor.u32 %v12357_v58, %v10964_v56  ;;  %v11210_v58 = vld [vmem:[#allocation9 + $0x760] sm:$0xf]  ;;  %v12421_v56 = vld [vmem:[#allocation9 + $0x774] sm:$0xf0] }
 0x399   :  { %7154 = vmatpush.bf16.msra.mxu1 %v11275_v27  ;;  %7281 = vmatpush.bf16.msra.mxu2 %v10683_v47  ;;  %v12208_v27 = vld [vmem:[#allocation9 + $0xd4] sm:$0xf]  ;;  %v12397_v13 = vld [vmem:[#allocation9 + $0x6b4] sm:$0xf0] }
 0x39a   :  { %7238 = vmatpush.bf16.msrb.mxu3 %v11279_v2  ;;  %v10371_v2 = vor.u32 %v12211_v15, %v10370_v41  ;;  %v10375_v47 = vor.u32 %v12208_v27, %v10372_v37  ;;  %v10275_v15 = vor.u32 %v12187_v61, %v10274_v45  ;;  %v10844_v37 = vld [vmem:[#allocation9 + $0x4a0] sm:$0xf0]  ;;  %v10562_v45 = vld [vmem:[#allocation9 + $0x250] sm:$0xf] }
 0x39b   :  { %v10847_v54 = vor.u32 %v12327_v5, %v10844_v37  ;;  %v11090_v5 = vld [vmem:[#allocation9 + $0x670] sm:$0xf]  ;;  %v12250_v37 = vld [vmem:[#allocation9 + $0x224] sm:$0xf] }
 0x39c   :  { %7198 = vmatpush.bf16.msrb.mxu0 %v10655_v39  ;;  %v10916_v39 = vld [vmem:[#allocation9 + $0x530] sm:$0xf0] }
 0x39d   :  { %7155 = vmatpush.bf16.msra.mxu1 %v11251_v24  ;;  %7282 = vmatpush.bf16.msra.mxu2 %v10659_v33  ;;  %v10943_v24 = vor.u32 %v12351_v44, %v10940_v50  ;;  %v10922_v33 = vld [vmem:[#allocation9 + $0x520] sm:$0xf]  ;;  %v10919_v14 = vor.u32 %v12345_v28, %v10916_v39  ;;  %v11211_v44 = vor.u32 %v12421_v56, %v11210_v58  ;;  %v11116_v58 = vld [vmem:[#allocation9 + $0x6b8] sm:$0xf0] }
 0x39e   :  { %7239 = vmatpush.bf16.msrb.mxu3 %v11255_v26  ;;  %v10947_v26 = vor.u32 %v12355_v35, %v10946_v23  ;;  %v12274_v23 = vld [vmem:[#allocation9 + $0x2e4] sm:$0xf]  ;;  %v10636_v35 = vld [vmem:[#allocation9 + $0x2f8] sm:$0xf0]  ;;  %v11187_v39 = vor.u32 %v12415_v16, %v11186_v22  ;;  %v10514_v22 = vld [vmem:[#allocation9 + $0x1f0] sm:$0xf] }
 0x39f   :  { %7199 = vmatmul.bf16.vlgmr.msrb.gmra.mxu0 %v13599_v9  ;;  %v12247_v16 = vld [vmem:[#allocation9 + $0x204] sm:$0xf0] }
 0x3a0   :  { %7247 = vmatpush.bf16.msra.mxu0 %v10443_v42  ;;  %7283 = vmatmul.bf16.vlgmr.msra.gmra.mxu2 %v13599_v9  ;;  %v12349_v42 = vld [vmem:[#allocation9 + $0x534] sm:$0xf0] }
 0x3a1   :  { %7331 = vmatpush.bf16.msrb.mxu2 %v10447_v11  ;;  %7156 = vmatpush.bf16.msra.mxu1 %v11227_v34  ;;  %v10323_v11 = vor.u32 %v12199_v18, %v10322_v62  ;;  %v10923_v7 = vor.u32 %v12349_v42, %v10922_v33  ;;  %v10327_v34 = vor.u32 %v12196_v19, %v10324_v30  ;;  %v12271_v62 = vld [vmem:[#allocation9 + $0x2c4] sm:$0xf0]  ;;  %v11162_v18 = vld [vmem:[#allocation9 + $0x700] sm:$0xf]  ;;  %v12409_v42 = vld [vmem:[#allocation9 + $0x714] sm:$0xf0] }
 0x3a2   :  { %7240 = vmatpush.bf16.msrb.mxu3 %v11231_v38  ;;  %v12343_v38 = vld [vmem:[#allocation9 + $0x504] sm:$0xf0]  ;;  %v12268_v19 = vld [vmem:[#allocation9 + $0x2b4] sm:$0xf]  ;;  %v10612_v30 = vld [vmem:[#allocation9 + $0x2c8] sm:$0xf0]  ;;  %v11163_v32 = vor.u32 %v12409_v42, %v11162_v18 }
 0x3a3   :  { %v10899_v0 = vor.u32 %v12343_v38, %v10898_v43  ;;  %v12403_v38 = vld [vmem:[#allocation9 + $0x6e4] sm:$0xf0]  ;;  %v12241_v18 = vld [vmem:[#allocation9 + $0x1d4] sm:$0xf0] }
 0x3a4   :  { %7248 = vmatpush.bf16.msra.mxu0 %v10419_v4  ;;  %7157 = vmatmul.bf16.vlgmr.msra.gmra.mxu1 %v13727_v57  ;;  %v10300_v4 = vld [vmem:[#allocation9 + $0x58] sm:$0xf0]  ;;  %v12379_v42 = vld [vmem:[#allocation9 + $0x624] sm:$0xf0] }
 0x3a5   :  { %7205 = vmatpush.bf16.msrb.mxu1 %v11015_v8  ;;  %7332 = vmatpush.bf16.msrb.mxu2 %v10423_v53  ;;  %v12190_v8 = vld [vmem:[#allocation9 + $0x44] sm:$0xf]  ;;  %v10868_v53 = vld [vmem:[#allocation9 + $0x4d0] sm:$0xf0] }
 0x3a6   :  { %7289 = vmatpush.bf16.msra.mxu3 %v11019_v29  ;;  %v12333_v29 = vld [vmem:[#allocation9 + $0x4bc] sm:$0xf]  ;;  %v10303_v46 = vor.u32 %v12190_v8, %v10300_v4  ;;  %v12262_v8 = vld [vmem:[#allocation9 + $0x284] sm:$0xf]  ;;  %v12400_v4 = vld [vmem:[#allocation9 + $0x6d4] sm:$0xf] }
 0x3a7   :  { %7241 = vmatmul.bf16.vlgmr.msrb.gmra.mxu3 %v13727_v57  ;;  %v10871_v41 = vor.u32 %v12333_v29, %v10868_v53  ;;  %v11139_v29 = vor.u32 %v12403_v38, %v11138_v12  ;;  %v10466_v38 = vld [vmem:[#allocation9 + $0x190] sm:$0xf] }
 0x3a8   :  { %7249 = vmatpush.bf16.msra.mxu0 %v10395_v6  ;;  %v10276_v6 = vld [vmem:[#allocation9 + $0x28] sm:$0xf0] }
 0x3a9   :  { %7206 = vmatpush.bf16.msrb.mxu1 %v10991_v20  ;;  %7333 = vmatpush.bf16.msrb.mxu2 %v10399_v55  ;;  %v12184_v20 = vld [vmem:[#allocation9 + $0x14] sm:$0xf]  ;;  %v11212_v55 = vld [vmem:[#allocation9 + $0x778] sm:$0xf0] }
 0x3aa   :  { %7290 = vmatpush.bf16.msra.mxu3 %v10995_v60  ;;  %v12418_v60 = vld [vmem:[#allocation9 + $0x764] sm:$0xf]  ;;  %v10279_v27 = vor.u32 %v12184_v20, %v10276_v6  ;;  %v10564_v20 = vld [vmem:[#allocation9 + $0x268] sm:$0xf0] }
 0x3ab   :  { %v11215_v50 = vor.u32 %v12418_v60, %v11212_v55  ;;  %v12394_v6 = vld [vmem:[#allocation9 + $0x6a4] sm:$0xf]  ;;  %v10567_v55 = vor.u32 %v12256_v49, %v10564_v20  ;;  %v11404_v49 = vld [vmem:[#allocation9 + $0x8f8] sm:$0xf0] }
 0x3ac   :  { %7250 = vmatpush.bf16.msra.mxu0 %v10371_v2  ;;  %v12331_v2 = vld [vmem:[#allocation9 + $0x4a4] sm:$0xf0] }
 0x3ad   :  { %7207 = vmatpush.bf16.msrb.mxu1 %v10967_v48  ;;  %7334 = vmatpush.bf16.msrb.mxu2 %v10375_v47  ;;  %v10850_v48 = vld [vmem:[#allocation9 + $0x490] sm:$0xf]  ;;  %v12277_v47 = vld [vmem:[#allocation9 + $0x2f4] sm:$0xf0] }
 0x3ae   :  { %7291 = vmatpush.bf16.msra.mxu3 %v10971_v25  ;;  %v10634_v25 = vld [vmem:[#allocation9 + $0x2e0] sm:$0xf] }
 0x3af   :  { %v10635_v28 = vor.u32 %v12277_v47, %v10634_v25 }
 0x3b0   :  { %7251 = vmatpush.bf16.msra.mxu0 %v10347_v36  ;;  %v10851_v36 = vor.u32 %v12331_v2, %v10850_v48  ;;  %v10540_v48 = vld [vmem:[#allocation9 + $0x238] sm:$0xf0]  ;;  %v12388_v2 = vld [vmem:[#allocation9 + $0x674] sm:$0xf] }
 0x3b1   :  { %7208 = vmatpush.bf16.msrb.mxu1 %v10943_v24  ;;  %7335 = vmatpush.bf16.msrb.mxu2 %v10351_v17  ;;  %v11188_v24 = vld [vmem:[#allocation9 + $0x748] sm:$0xf0]  ;;  %v10610_v17 = vld [vmem:[#allocation9 + $0x2b0] sm:$0xf]  ;;  %v10543_v47 = vor.u32 %v12250_v37, %v10540_v48 }
 0x3b2   :  { %7292 = vmatpush.bf16.msra.mxu3 %v10947_v26  ;;  %v10639_v26 = vor.u32 %v12274_v23, %v10636_v35  ;;  %v11191_v33 = vor.u32 %v12412_v31, %v11188_v24  ;;  %v10611_v52 = vor.u32 %v12271_v62, %v10610_v17  ;;  %v11066_v23 = vld [vmem:[#allocation9 + $0x640] sm:$0xf]  ;;  %v12244_v31 = vld [vmem:[#allocation9 + $0x1f4] sm:$0xf]  ;;  %v10516_v24 = vld [vmem:[#allocation9 + $0x208] sm:$0xf0] }
 0x3b3   :  { %v10519_v62 = vor.u32 %v12244_v31, %v10516_v24  ;;  %v11380_v37 = vld [vmem:[#allocation9 + $0x8c8] sm:$0xf0]  ;;  %v11330_v24 = vld [vmem:[#allocation9 + $0x850] sm:$0xf] }
 0x3b4   :  { %7252 = vmatpush.bf16.msra.mxu0 %v10323_v11  ;;  %v11164_v11 = vld [vmem:[#allocation9 + $0x718] sm:$0xf0] }
 0x3b5   :  { %7209 = vmatpush.bf16.msrb.mxu1 %v10919_v14  ;;  %7336 = vmatpush.bf16.msrb.mxu2 %v10327_v34  ;;  %v12406_v14 = vld [vmem:[#allocation9 + $0x704] sm:$0xf]  ;;  %v10586_v34 = vld [vmem:[#allocation9 + $0x280] sm:$0xf] }
 0x3b6   :  { %7293 = vmatpush.bf16.msra.mxu3 %v10923_v7  ;;  %v10615_v7 = vor.u32 %v12268_v19, %v10612_v30  ;;  %v11167_v43 = vor.u32 %v12406_v14, %v11164_v11  ;;  %v13747_v19 = vpop.f32.mrf.mxu0  ;;  %v12238_v14 = vld [vmem:[#allocation9 + $0x1c4] sm:$0xf]  ;;  %v10492_v11 = vld [vmem:[#allocation9 + $0x1d8] sm:$0xf0] }
 0x3b8   :  { %7253 = vmatpush.bf16.msra.mxu0 %v10299_v63  ;;  %v10587_v63 = vor.u32 %v12265_v51, %v10586_v34  ;;  %v10828_v34 = vld [vmem:[#allocation9 + $0x478] sm:$0xf0] }
 0x3b9   :  { %7210 = vmatpush.bf16.msrb.mxu1 %v10895_v10  ;;  %7337 = vmatpush.bf16.msrb.mxu2 %v10303_v46  ;;  %v11140_v10 = vld [vmem:[#allocation9 + $0x6e8] sm:$0xf0]  ;;  %v11114_v46 = vld [vmem:[#allocation9 + $0x6a0] sm:$0xf] }
 0x3ba   :  { %7294 = vmatpush.bf16.msra.mxu3 %v10899_v0  ;;  %v12259_v0 = vld [vmem:[#allocation9 + $0x264] sm:$0xf0]  ;;  %v11143_v61 = vor.u32 %v12400_v4, %v11140_v10  ;;  %v11115_v60 = vor.u32 %v12397_v13, %v11114_v46  ;;  %v10804_v46 = vld [vmem:[#allocation9 + $0x448] sm:$0xf0]  ;;  %v12466_v13 = vld [vmem:[#allocation9 + $0x8e4] sm:$0xf] }
 0x3bb   :  { %v10563_v56 = vor.u32 %v12259_v0, %v10562_v45  ;;  %v12469_v45 = vld [vmem:[#allocation9 + $0x8f4] sm:$0xf0]  ;;  %v12316_v0 = vld [vmem:[#allocation9 + $0x434] sm:$0xf] }
 0x3bc   :  { %7254 = vmatpush.bf16.msra.mxu0 %v10275_v15  ;;  %v12253_v15 = vld [vmem:[#allocation9 + $0x234] sm:$0xf0] }
 0x3bd   :  { %7211 = vmatpush.bf16.msrb.mxu1 %v10871_v41  ;;  %7338 = vmatpush.bf16.msrb.mxu2 %v10279_v27  ;;  %v10538_v41 = vld [vmem:[#allocation9 + $0x220] sm:$0xf]  ;;  %v12391_v27 = vld [vmem:[#allocation9 + $0x684] sm:$0xf0] }
 0x3be   :  { %7295 = vmatpush.bf16.msra.mxu3 %v10875_v3  ;;  %v11119_v3 = vor.u32 %v12394_v6, %v11116_v58  ;;  %v11091_v25 = vor.u32 %v12391_v27, %v11090_v5  ;;  %v10807_v58 = vor.u32 %v12316_v0, %v10804_v46  ;;  %v13751_v5 = vpop.f32.mrf.mxu0  ;;  %v12460_v27 = vld [vmem:[#allocation9 + $0x8b4] sm:$0xf] }
 0x3bf   :  { %7255 = vmatmul.bf16.vlgmr.msra.gmra.mxu0 %v13509_v59 }
 0x3c0   :  { %7303 = vmatpush.bf16.msrb.mxu0 %v11211_v44  ;;  %7339 = vmatmul.bf16.vlgmr.msrb.gmra.mxu2 %v13509_v59  ;;  %v10588_v59 = vld [vmem:[#allocation9 + $0x298] sm:$0xf0]  ;;  %v11092_v44 = vld [vmem:[#allocation9 + $0x688] sm:$0xf0] }
 0x3c1   :  { %7387 = vmatpush.bf16.msra.mxu2 %v11215_v50  ;;  %7212 = vmatpush.bf16.msrb.mxu1 %v10847_v54  ;;  %v10591_v53 = vor.u32 %v12262_v8, %v10588_v59  ;;  %v10539_v50 = vor.u32 %v12253_v15, %v10538_v41  ;;  %v11095_v35 = vor.u32 %v12388_v2, %v11092_v44  ;;  %v12385_v54 = vld [vmem:[#allocation9 + $0x654] sm:$0xf0]  ;;  %v12235_v8 = vld [vmem:[#allocation9 + $0x1a4] sm:$0xf0]  ;;  %v13749_v59 = vpop.f32.mrf.mxu1  ;;  %v12310_v41 = vld [vmem:[#allocation9 + $0x404] sm:$0xf] }
 0x3c2   :  { %7296 = vmatpush.bf16.msra.mxu3 %v10851_v36  ;;  %v12382_v36 = vld [vmem:[#allocation9 + $0x644] sm:$0xf]  ;;  %v11067_v17 = vor.u32 %v12385_v54, %v11066_v23  ;;  %v10780_v15 = vld [vmem:[#allocation9 + $0x418] sm:$0xf0]  ;;  %v11354_v44 = vld [vmem:[#allocation9 + $0x880] sm:$0xf]  ;;  %v13760_v23 = vpop.f32.mrf.mxu3 }
 0x3c3   :  { %v10783_v2 = vor.u32 %v12310_v41, %v10780_v15  ;;  %v12493_v41 = vld [vmem:[#allocation12 + $0xb8] sm:$0xff] }
 0x3c4   :  { %7304 = vmatpush.bf16.msrb.mxu0 %v11187_v39  ;;  %7213 = vmatmul.bf16.vlgmr.msrb.gmra.mxu1 %v13641_v40  ;;  %v10515_v39 = vor.u32 %v12247_v16, %v10514_v22  ;;  %v10756_v22 = vld [vmem:[#allocation9 + $0x3e8] sm:$0xf0] }
 0x3c5   :  { %7261 = vmatpush.bf16.msra.mxu1 %v10635_v28  ;;  %7388 = vmatpush.bf16.msra.mxu2 %v11191_v33  ;;  %v11068_v28 = vld [vmem:[#allocation9 + $0x658] sm:$0xf0]  ;;  %v11042_v33 = vld [vmem:[#allocation9 + $0x610] sm:$0xf] }
 0x3c6   :  { %7345 = vmatpush.bf16.msrb.mxu3 %v10639_v26  ;;  %v10490_v26 = vld [vmem:[#allocation9 + $0x1c0] sm:$0xf]  ;;  %v11071_v30 = vor.u32 %v12382_v36, %v11068_v28  ;;  %v11043_v12 = vor.u32 %v12379_v42, %v11042_v33  ;;  %v12451_v28 = vld [vmem:[#allocation9 + $0x864] sm:$0xf0] }
 0x3c7   :  { %7297 = vmatmul.bf16.vlgmr.msra.gmra.mxu3 %v13641_v40  ;;  %v10491_v51 = vor.u32 %v12241_v18, %v10490_v26  ;;  %v10732_v26 = vld [vmem:[#allocation9 + $0x3b8] sm:$0xf0]  ;;  %v11332_v18 = vld [vmem:[#allocation9 + $0x868] sm:$0xf0] }
 0x3c8   :  { %7305 = vmatpush.bf16.msrb.mxu0 %v11163_v32  ;;  %v11044_v32 = vld [vmem:[#allocation9 + $0x628] sm:$0xf0] }
 0x3c9   :  { %7262 = vmatpush.bf16.msra.mxu1 %v10611_v52  ;;  %7389 = vmatpush.bf16.msra.mxu2 %v11167_v43  ;;  %v12376_v52 = vld [vmem:[#allocation9 + $0x614] sm:$0xf]  ;;  %v10495_v43 = vor.u32 %v12238_v14, %v10492_v11  ;;  %v13758_v16 = vpop.f32.mrf.mxu1  ;;  %v12445_v11 = vld [vmem:[#allocation9 + $0x834] sm:$0xf0] }
 0x3ca   :  { %7346 = vmatpush.bf16.msrb.mxu3 %v10615_v7  ;;  %v12322_v7 = vld [vmem:[#allocation9 + $0x464] sm:$0xf]  ;;  %v11047_v4 = vor.u32 %v12376_v52, %v11044_v32  ;;  %v12292_v52 = vld [vmem:[#allocation9 + $0x374] sm:$0xf]  ;;  %v10708_v32 = vld [vmem:[#allocation9 + $0x388] sm:$0xf0] }
 0x3cb   :  { %v10831_v10 = vor.u32 %v12322_v7, %v10828_v34  ;;  %v12442_v34 = vld [vmem:[#allocation9 + $0x824] sm:$0xf] }
 0x3cc   :  { %7306 = vmatpush.bf16.msrb.mxu0 %v11139_v29  ;;  %v10468_v29 = vld [vmem:[#allocation9 + $0x1a8] sm:$0xf0] }
 0x3cd   :  { %7263 = vmatpush.bf16.msra.mxu1 %v10587_v63  ;;  %7390 = vmatpush.bf16.msra.mxu2 %v11143_v61  ;;  %v12232_v63 = vld [vmem:[#allocation9 + $0x194] sm:$0xf]  ;;  %v10467_v61 = vor.u32 %v12235_v8, %v10466_v38  ;;  %v10711_v38 = vor.u32 %v12292_v52, %v10708_v32  ;;  %v11282_v8 = vld [vmem:[#allocation9 + $0x7f0] sm:$0xf]  ;;  %v10972_v52 = vld [vmem:[#allocation9 + $0x598] sm:$0xf0] }
 0x3ce   :  { %7347 = vmatpush.bf16.msrb.mxu3 %v10591_v53  ;;  %v11402_v53 = vld [vmem:[#allocation9 + $0x8e0] sm:$0xf]  ;;  %v10471_v20 = vor.u32 %v12232_v63, %v10468_v29  ;;  %v12286_v63 = vld [vmem:[#allocation9 + $0x344] sm:$0xf]  ;;  %v10684_v29 = vld [vmem:[#allocation9 + $0x358] sm:$0xf0] }
 0x3cf   :  { %v11403_v6 = vor.u32 %v12469_v45, %v11402_v53  ;;  %v12436_v53 = vld [vmem:[#allocation9 + $0x7f4] sm:$0xf]  ;;  %v11284_v45 = vld [vmem:[#allocation9 + $0x808] sm:$0xf0] }
 0x3d0   :  { %7307 = vmatpush.bf16.msrb.mxu0 %v11115_v60  ;;  %v11407_v60 = vor.u32 %v12466_v13, %v11404_v49  ;;  %v11258_v13 = vld [vmem:[#allocation9 + $0x7c0] sm:$0xf]  ;;  %v11287_v49 = vor.u32 %v12436_v53, %v11284_v45  ;;  %v12490_v32 = vld [vmem:[#allocation12 + $0xa0] sm:$0xff] }
 0x3d1   :  { %7264 = vmatpush.bf16.msra.mxu1 %v10563_v56  ;;  %7391 = vmatpush.bf16.msra.mxu2 %v11119_v3  ;;  %v11378_v56 = vld [vmem:[#allocation9 + $0x8b0] sm:$0xf]  ;;  %v13753_v3 = vpop.f32.mrf.mxu2  ;;  %v12473_v53 = vld [vmem:[#allocation12 + $0x18] sm:$0xff] }
 0x3d2   :  { %7348 = vmatpush.bf16.msrb.mxu3 %v10567_v55  ;;  %v12463_v55 = vld [vmem:[#allocation9 + $0x8c4] sm:$0xf0]  ;;  %v12346_v45 = vld [vmem:[#allocation9 + $0x524] sm:$0xf] }
 0x3d3   :  { %v11379_v48 = vor.u32 %v12463_v55, %v11378_v56  ;;  %v11260_v55 = vld [vmem:[#allocation9 + $0x7d8] sm:$0xf0] }
 0x3d4   :  { %7308 = vmatpush.bf16.msrb.mxu0 %v11091_v25  ;;  %v12457_v25 = vld [vmem:[#allocation9 + $0x894] sm:$0xf0] }
 0x3d5   :  { %7265 = vmatpush.bf16.msra.mxu1 %v10539_v50  ;;  %7392 = vmatpush.bf16.msra.mxu2 %v11095_v35  ;;  %v11383_v50 = vor.u32 %v12460_v27, %v11380_v37  ;;  %v11356_v35 = vld [vmem:[#allocation9 + $0x898] sm:$0xf0]  ;;  %v11355_v54 = vor.u32 %v12457_v25, %v11354_v44  ;;  %v12424_v25 = vld [vmem:[#allocation9 + $0x794] sm:$0xf] }
 0x3d6   :  { %7349 = vmatpush.bf16.msrb.mxu3 %v10543_v47  ;;  %v12304_v47 = vld [vmem:[#allocation9 + $0x3d4] sm:$0xf] }
 0x3d7   :  { %v10759_v31 = vor.u32 %v12304_v47, %v10756_v22  ;;  %v11236_v47 = vld [vmem:[#allocation9 + $0x7a8] sm:$0xf0] }
 0x3d8   :  { %7309 = vmatpush.bf16.msrb.mxu0 %v11067_v17  ;;  %v13763_v17 = vpop.f32.mrf.mxu0 }
 0x3d9   :  { %7266 = vmatpush.bf16.msra.mxu1 %v10515_v39  ;;  %7393 = vmatpush.bf16.msra.mxu2 %v11071_v30  ;;  %v12298_v39 = vld [vmem:[#allocation9 + $0x3a4] sm:$0xf]  ;;  %v13765_v33 = vpop.f32.mrf.mxu2  ;;  %v11306_v30 = vld [vmem:[#allocation9 + $0x820] sm:$0xf] }
 0x3da   :  { %7350 = vmatpush.bf16.msrb.mxu3 %v10519_v62  ;;  %v12448_v62 = vld [vmem:[#allocation9 + $0x854] sm:$0xf]  ;;  %v10735_v42 = vor.u32 %v12298_v39, %v10732_v26 }
 0x3db   :  { %v11335_v14 = vor.u32 %v12448_v62, %v11332_v18  ;;  %v12364_v26 = vld [vmem:[#allocation9 + $0x5b4] sm:$0xf]  ;;  %v10996_v62 = vld [vmem:[#allocation9 + $0x5c8] sm:$0xf0] }
 0x3dc   :  { %7310 = vmatpush.bf16.msrb.mxu0 %v11043_v12  ;;  %v13769_v12 = vpop.f32.mrf.mxu3  ;;  %v12491_v18 = vld [vmem:[#allocation12 + $0xa8] sm:$0xff] }
 0x3dd   :  { %7267 = vmatpush.bf16.msra.mxu1 %v10491_v51  ;;  %7394 = vmatpush.bf16.msra.mxu2 %v11047_v4  ;;  %v11308_v51 = vld [vmem:[#allocation9 + $0x838] sm:$0xf0] }
 0x3de   :  { %7351 = vmatpush.bf16.msrb.mxu3 %v10495_v43  ;;  %v11307_v43 = vor.u32 %v12445_v11, %v11306_v30  ;;  %v11311_v4 = vor.u32 %v12442_v34, %v11308_v51  ;;  %v12475_v30 = vld [vmem:[#allocation12 + $0x28] sm:$0xff]  ;;  %v12358_v11 = vld [vmem:[#allocation9 + $0x584] sm:$0xf] }
 0x3df   :  { %7311 = vmatmul.bf16.vlgmr.msrb.gmra.mxu0 %v13689_v1  ;;  %v12474_v51 = vld [vmem:[#allocation12 + $0x20] sm:$0xff] }
 0x3e0   :  { %7359 = vmatpush.bf16.msra.mxu0 %v10831_v10  ;;  %7395 = vmatmul.bf16.vlgmr.msra.gmra.mxu2 %v13689_v1  ;;  %v12454_v1 = vld [vmem:[#allocation9 + $0x884] sm:$0xf]  ;;  %v13767_v7 = vpop.f32.mrf.mxu1  ;;  %v12439_v10 = vld [vmem:[#allocation9 + $0x804] sm:$0xf0]  ;;  %v13771_v0 = vpop.f32.mrf.mxu0 }
 0x3e1   :  { %7268 = vmatpush.bf16.msra.mxu1 %v10467_v61  ;;  %v11359_v36 = vor.u32 %v12454_v1, %v11356_v35  ;;  %v11283_v46 = vor.u32 %v12439_v10, %v11282_v8  ;;  %v10687_v61 = vor.u32 %v12286_v63, %v10684_v29  ;;  %v13773_v56 = vpop.f32.mrf.mxu2  ;;  %7837 = vmatpush.bf16.msrb.mxu2 %v12493_v41  ;;  %v12370_v1 = vld [vmem:[#allocation9 + $0x5e4] sm:$0xf]  ;;  %v11020_v35 = vld [vmem:[#allocation9 + $0x5f8] sm:$0xf0]  ;;  %v12487_v41 = vld [vmem:[#allocation12 + $0x88] sm:$0xff] }
 0x3e2   :  { %7352 = vmatpush.bf16.msrb.mxu3 %v10471_v20  ;;  %v12433_v20 = vld [vmem:[#allocation9 + $0x7d4] sm:$0xf0]  ;;  %v12489_v8 = vld [vmem:[#allocation12 + $0x98] sm:$0xff] }
 0x3e3   :  { %v11259_v27 = vor.u32 %v12433_v20, %v11258_v13 }
 0x3e4   :  { %7360 = vmatpush.bf16.msra.mxu0 %v10807_v58  ;;  %7269 = vmatmul.bf16.vlgmr.msra.gmra.mxu1 %v13564_v21  ;;  %v10660_v58 = vld [vmem:[#allocation9 + $0x328] sm:$0xf0]  ;;  %v13777_v22 = vpop.f32.mrf.mxu3 }
 0x3e5   :  { %7317 = vmatpush.bf16.msrb.mxu1 %v11403_v6  ;;  %7353 = vmatmul.bf16.vlgmr.msrb.gmra.mxu3 %v13564_v21  ;;  %v11331_v21 = vor.u32 %v12451_v28, %v11330_v24  ;;  %v12280_v6 = vld [vmem:[#allocation9 + $0x314] sm:$0xf]  ;;  %v11239_v24 = vor.u32 %v12424_v25, %v11236_v47  ;;  %v12334_v47 = vld [vmem:[#allocation9 + $0x4c4] sm:$0xf] }
 0x3e6   :  { %7401 = vmatpush.bf16.msra.mxu3 %v11407_v60  ;;  %v12430_v60 = vld [vmem:[#allocation9 + $0x7c4] sm:$0xf]  ;;  %v10663_v37 = vor.u32 %v12280_v6, %v10660_v58  ;;  %v12476_v28 = vld [vmem:[#allocation12 + $0x30] sm:$0xff] }
 0x3e7   :  { %v11263_v44 = vor.u32 %v12430_v60, %v11260_v55  ;;  %v12472_v58 = vld [vmem:[#allocation12 + $0x10] sm:$0xff]  ;;  %v10900_v55 = vld [vmem:[#allocation9 + $0x508] sm:$0xf0] }
 0x3e8   :  { %7361 = vmatpush.bf16.msra.mxu0 %v10783_v2  ;;  %v13775_v15 = vpop.f32.mrf.mxu1  ;;  %v11234_v2 = vld [vmem:[#allocation9 + $0x790] sm:$0xf]  ;;  %v13779_v39 = vpop.f32.mrf.mxu0  ;;  %v12340_v60 = vld [vmem:[#allocation9 + $0x4f4] sm:$0xf] }
 0x3e9   :  { %7318 = vmatpush.bf16.msrb.mxu1 %v11379_v48  ;;  %v12477_v48 = vld [vmem:[#allocation12 + $0x38] sm:$0xff] }
 0x3ea   :  { %7402 = vmatpush.bf16.msra.mxu3 %v11383_v50  ;;  %v12427_v50 = vld [vmem:[#allocation9 + $0x7a4] sm:$0xf0] }
 0x3ec   :  { %7362 = vmatpush.bf16.msra.mxu0 %v10759_v31  ;;  %v11235_v31 = vor.u32 %v12427_v50, %v11234_v2  ;;  %v13787_v34 = vpop.f32.mrf.mxu3  ;;  %v12471_v50 = vld [vmem:[#allocation12 + $0x8] sm:$0xff] }
 0x3ed   :  { %7319 = vmatpush.bf16.msrb.mxu1 %v11355_v54  ;;  %v12492_v54 = vld [vmem:[#allocation12 + $0xb0] sm:$0xff] }
 0x3ee   :  { %7403 = vmatpush.bf16.msra.mxu3 %v11359_v36  ;;  %v11023_v36 = vor.u32 %v12370_v1, %v11020_v35  ;;  %7838 = vmatpush.bf16.msrb.mxu2 %v12492_v54  ;;  %v10876_v1 = vld [vmem:[#allocation9 + $0x4d8] sm:$0xf0]  ;;  %v12486_v35 = vld [vmem:[#allocation12 + $0x80] sm:$0xff] }
 0x3f0   :  { %7363 = vmatpush.bf16.msra.mxu0 %v10735_v42  ;;  %v10999_v42 = vor.u32 %v12364_v26, %v10996_v62  ;;  %v13794_v63 = vpop.f32.mrf.mxu0  ;;  %v10852_v26 = vld [vmem:[#allocation9 + $0x4a8] sm:$0xf0]  ;;  %v12501_v62 = vld [vmem:[#allocation12 + $0xf8] sm:$0xff] }
 0x3f1   :  { %7320 = vmatpush.bf16.msrb.mxu1 %v11331_v21  ;;  %v13782_v21 = vpop.f32.mrf.mxu2 }
 0x3f2   :  { %7404 = vmatpush.bf16.msra.mxu3 %v11335_v14  ;;  %v13784_v14 = vpop.f32.mrf.mxu1  ;;  %7839 = vmatpush.bf16.msrb.mxu2 %v12491_v18 }
 0x3f4   :  { %7364 = vmatpush.bf16.msra.mxu0 %v10711_v38  ;;  %v10948_v38 = vld [vmem:[#allocation9 + $0x568] sm:$0xf0]  ;;  %v13797_v13 = vpop.f32.mrf.mxu3 }
 0x3f5   :  { %7321 = vmatpush.bf16.msrb.mxu1 %v11307_v43  ;;  %v12352_v43 = vld [vmem:[#allocation9 + $0x554] sm:$0xf] }
 0x3f6   :  { %7405 = vmatpush.bf16.msra.mxu3 %v11311_v4  ;;  %7840 = vmatpush.bf16.msrb.mxu2 %v12490_v32  ;;  %v13790_v4 = vld [vmem:[#allocation10] sm:$0x3f]  ;;  %v10951_v29 = vor.u32 %v12352_v43, %v10948_v38  ;;  %v12483_v38 = vld [vmem:[#allocation12 + $0x68] sm:$0xff] }
 0x3f7   :  { %v5461_v32 = vperm.slane %v13790_v4, 2 }
 0x3f8   :  { %7365 = vmatpush.bf16.msra.mxu0 %v10687_v61  ;;  %v5459_v61 = vperm.slane %v13790_v4, 0  ;;  %v7088_v25 = vpop.f32.mrf.mxu0 }
 0x3f9   :  { %7322 = vmatpush.bf16.msrb.mxu1 %v11283_v46  ;;  %v13792_v10 = vpop.f32.mrf.mxu2  ;;  %v12488_v46 = vld [vmem:[#allocation12 + $0x90] sm:$0xff] }
 0x3fa   :  { %7406 = vmatpush.bf16.msra.mxu3 %v11287_v49  ;;  %7841 = vmatpush.bf16.msrb.mxu2 %v12489_v8  ;;  %v13799_v49 = vpop.f32.mrf.mxu1  ;;  %v6923_v20 = vadd.f32 %v13751_v5, %v5459_v61  ;;  %v12498_v8 = vld [vmem:[#allocation12 + $0xe0] sm:$0xff] }
 0x3fc   :  { %7366 = vmatpush.bf16.msra.mxu0 %v10663_v37  ;;  %v6937_v37 = vadd.f32 %v13758_v16, %v6923_v20 }
 0x3fd   :  { %7323 = vmatpush.bf16.msrb.mxu1 %v11259_v27  ;;  %v6921_v27 = vadd.f32 %v13747_v19, %v5459_v61  ;;  %v5460_v61 = vperm.slane %v13790_v4, 1 }
 0x3fe   :  { %7407 = vmatpush.bf16.msra.mxu3 %v11263_v44  ;;  %7842 = vmatpush.bf16.msrb.mxu2 %v12488_v46  ;;  %v6951_v2 = vadd.f32 %v13765_v33, %v6937_v37  ;;  %v10903_v44 = vor.u32 %v12340_v60, %v10900_v55  ;;  %v10879_v33 = vor.u32 %v12334_v47, %v10876_v1  ;;  %v12482_v46 = vld [vmem:[#allocation12 + $0x60] sm:$0xff]  ;;  %v12480_v1 = vld [vmem:[#allocation12 + $0x50] sm:$0xff] }
 0x3ff   :  { %7367 = vmatmul.bf16.vlgmr.msra.gmra.mxu0 %v13599_v9  ;;  %v10975_v9 = vor.u32 %v12358_v11, %v10972_v52 }
 0x400   :  { %7809 = vmatpush.bf16.msrb.mxu0 %v12477_v48  ;;  %v6935_v48 = vadd.f32 %v13749_v59, %v6921_v27  ;;  %v6965_v19 = vadd.f32 %v13769_v12, %v6951_v2  ;;  %v7090_v52 = vpop.f32.mrf.mxu0  ;;  %v7005_v27 = vadd.f32 %v13773_v56, %v5460_v61  ;;  %v12495_v56 = vld [vmem:[#allocation12 + $0xc8] sm:$0xff] }
 0x401   :  { %7324 = vmatpush.bf16.msrb.mxu1 %v11235_v31  ;;  %v13806_v5 = vpop.f32.mrf.mxu2  ;;  %v12470_v31 = vld [vmem:[#allocation12] sm:$0xff]  ;;  %v7091_v43 = vadd.f32 %v7090_v52, %v5461_v32 }
 0x402   :  { %7408 = vmatpush.bf16.msra.mxu3 %v11239_v24  ;;  %7843 = vmatpush.bf16.msrb.mxu2 %v12487_v41  ;;  %v6949_v54 = vadd.f32 %v13753_v3, %v6935_v48  ;;  %v6979_v59 = vadd.f32 %v13771_v0, %v6965_v19  ;;  %v13812_v24 = vpop.f32.mrf.mxu3  ;;  %v12485_v0 = vld [vmem:[#allocation12 + $0x78] sm:$0xff] }
 0x403   :  { %v12481_v41 = vld [vmem:[#allocation12 + $0x58] sm:$0xff] }
 0x404   :  { %7810 = vmatpush.bf16.msrb.mxu0 %v12476_v28  ;;  %7325 = vmatmul.bf16.vlgmr.msrb.gmra.mxu1 %v13727_v57  ;;  %v6963_v16 = vadd.f32 %v13760_v23, %v6949_v54  ;;  %v12328_v28 = vld [vmem:[#allocation9 + $0x494] sm:$0xf]  ;;  %v6993_v3 = vadd.f32 %v13775_v15, %v6979_v59 }
 0x405   :  { %7373 = vmatpush.bf16.msra.mxu1 %v11023_v36  ;;  %7409 = vmatmul.bf16.vlgmr.msra.gmra.mxu3 %v13727_v57  ;;  %v10924_v57 = vld [vmem:[#allocation9 + $0x538] sm:$0xf0]  ;;  %v7102_v36 = vpop.f32.mrf.mxu1  ;;  %v10855_v12 = vor.u32 %v12328_v28, %v10852_v26  ;;  %v12494_v28 = vld [vmem:[#allocation12 + $0xc0] sm:$0xff] }
 0x406   :  { %v10927_v6 = vor.u32 %v12346_v45, %v10924_v57  ;;  %7844 = vmatpush.bf16.msrb.mxu2 %v12486_v35  ;;  %v6977_v18 = vadd.f32 %v13763_v17, %v6963_v16  ;;  %7851 = vmatpush.bf16.msrb.mxu3 %v12501_v62  ;;  %v12484_v17 = vld [vmem:[#allocation12 + $0x70] sm:$0xff] }
 0x408   :  { %7811 = vmatpush.bf16.msrb.mxu0 %v12475_v30  ;;  %v6991_v23 = vadd.f32 %v13767_v7, %v6977_v18  ;;  %v7089_v7 = vadd.f32 %v7088_v25, %v5461_v32  ;;  %v7144_v45 = vpop.f32.mrf.mxu0 }
 0x409   :  { %7374 = vmatpush.bf16.msra.mxu1 %v10999_v42  ;;  %v12500_v42 = vld [vmem:[#allocation12 + $0xf0] sm:$0xff]  ;;  %v7116_v11 = vpop.f32.mrf.mxu2 }
 0x40a   :  { %v7415_v30 = vpack.c.bf16 %v6993_v3, %v6991_v23  ;;  %7852 = vmatpush.bf16.msrb.mxu3 %v12500_v42  ;;  %v7130_v15 = vpop.f32.mrf.mxu3 }
 0x40c   :  { %7812 = vmatpush.bf16.msrb.mxu0 %v12474_v51 }
 0x40d   :  { %7375 = vmatpush.bf16.msra.mxu1 %v10975_v9  ;;  %v12499_v9 = vld [vmem:[#allocation12 + $0xe8] sm:$0xff]  ;;  %v7104_v51 = vpop.f32.mrf.mxu1 }
 0x40e   :  { %7853 = vmatpush.bf16.msrb.mxu3 %v12499_v9 }
 0x410   :  { %7813 = vmatpush.bf16.msrb.mxu0 %v12473_v53  ;;  %v7105_v53 = vadd.f32 %v7104_v51, %v7091_v43  ;;  %v7146_v47 = vpop.f32.mrf.mxu0  ;;  %v12509_v51 = vld [vmem:[#allocation12 + $0x138] sm:$0xff] }
 0x411   :  { %7376 = vmatpush.bf16.msra.mxu1 %v10951_v29  ;;  %v7103_v29 = vadd.f32 %v7102_v36, %v7089_v7  ;;  %v7118_v57 = vpop.f32.mrf.mxu2 }
 0x412   :  { %7854 = vmatpush.bf16.msrb.mxu3 %v12498_v8  ;;  %v7132_v55 = vpop.f32.mrf.mxu3 }
 0x413   :  { %v7117_v20 = vadd.f32 %v7116_v11, %v7103_v29 }
 0x414   :  { %7814 = vmatpush.bf16.msrb.mxu0 %v12472_v58  ;;  %v12497_v58 = vld [vmem:[#allocation12 + $0xd8] sm:$0xff] }
 0x415   :  { %7377 = vmatpush.bf16.msra.mxu1 %v10927_v6  ;;  %v7119_v6 = vadd.f32 %v7118_v57, %v7105_v53  ;;  %v7131_v48 = vadd.f32 %v7130_v15, %v7117_v20  ;;  %v12508_v53 = vld [vmem:[#allocation12 + $0x130] sm:$0xff]  ;;  %v12506_v20 = vld [vmem:[#allocation12 + $0x120] sm:$0xff] }
 0x416   :  { %7855 = vmatpush.bf16.msrb.mxu3 %v12497_v58  ;;  %v12504_v58 = vld [vmem:[#allocation12 + $0x110] sm:$0xff] }
 0x417   :  { %v7133_v2 = vadd.f32 %v7132_v55, %v7119_v6  ;;  %v7145_v54 = vadd.f32 %v7144_v45, %v7131_v48  ;;  %v12505_v6 = vld [vmem:[#allocation12 + $0x118] sm:$0xff] }
 0x418   :  { %7815 = vmatpush.bf16.msrb.mxu0 %v12471_v50  ;;  %v7019_v50 = vadd.f32 %v13777_v22, %v7005_v27  ;;  %v12479_v22 = vld [vmem:[#allocation12 + $0x48] sm:$0xff]  ;;  %v12517_v27 = vld [vmem:[#allocation12 + $0x178] sm:$0xff] }
 0x419   :  { %7378 = vmatpush.bf16.msra.mxu1 %v10903_v44  ;;  %v12496_v44 = vld [vmem:[#allocation12 + $0xd0] sm:$0xff]  ;;  %v7147_v19 = vadd.f32 %v7146_v47, %v7133_v2 }
 0x41a   :  { %7856 = vmatpush.bf16.msrb.mxu3 %v12496_v44  ;;  %v7186_v26 = vpop.f32.mrf.mxu3  ;;  %v12515_v44 = vld [vmem:[#allocation12 + $0x168] sm:$0xff] }
 0x41c   :  { %7816 = vmatpush.bf16.msrb.mxu0 %v12470_v31 }
 0x41d   :  { %7379 = vmatpush.bf16.msra.mxu1 %v10879_v33 }
 0x41e   :  { %7857 = vmatpush.bf16.msrb.mxu3 %v12495_v56 }
 0x41f   :  { %7817 = vmatmul.bf16.vlgmr.msrb.gmra.mxu0 %v7415_v30 }
 0x420   :  { %7865 = vmatpush.bf16.msra.mxu0 %v12509_v51 }
 0x421   :  { %7380 = vmatpush.bf16.msra.mxu1 %v10855_v12  ;;  %v7158_v60 = vpop.f32.mrf.mxu1  ;;  %v7200_v12 = vpop.f32.mrf.mxu0 }
 0x422   :  { %v7159_v59 = vadd.f32 %v7158_v60, %v7145_v54  ;;  %7858 = vmatpush.bf16.msrb.mxu3 %v12494_v28  ;;  %v7188_v23 = vpop.f32.mrf.mxu3  ;;  %v12503_v60 = vld [vmem:[#allocation12 + $0x108] sm:$0xff] }
 0x424   :  { %7381 = vmatmul.bf16.vlgmr.msra.gmra.mxu1 %v13641_v40  ;;  %v7007_v40 = vadd.f32 %v13782_v21, %v5460_v61  ;;  %v7033_v21 = vadd.f32 %v13779_v39, %v7019_v50  ;;  %7866 = vmatpush.bf16.msra.mxu0 %v12508_v53  ;;  %v5463_v50 = vperm.slane %v13790_v4, 4 }
 0x425   :  { %7823 = vmatpush.bf16.msrb.mxu1 %v12485_v0 }
 0x426   :  { %v7021_v37 = vadd.f32 %v13787_v34, %v7007_v40  ;;  %v7047_v34 = vadd.f32 %v13784_v14, %v7033_v21  ;;  %v12502_v40 = vld [vmem:[#allocation12 + $0x100] sm:$0xff] }
 0x428   :  { %v7035_v25 = vadd.f32 %v13794_v63, %v7021_v37  ;;  %v7172_v63 = vpop.f32.mrf.mxu2  ;;  %v7061_v39 = vadd.f32 %v13792_v10, %v7047_v34  ;;  %v12516_v37 = vld [vmem:[#allocation12 + $0x170] sm:$0xff]  ;;  %v12513_v34 = vld [vmem:[#allocation12 + $0x158] sm:$0xff] }
 0x429   :  { %7824 = vmatpush.bf16.msrb.mxu1 %v12484_v17  ;;  %v7160_v16 = vpop.f32.mrf.mxu1  ;;  %v7202_v9 = vpop.f32.mrf.mxu0 }
 0x42a   :  { %v7049_v35 = vadd.f32 %v13799_v49, %v7035_v25  ;;  %v7161_v33 = vadd.f32 %v7160_v16, %v7147_v19  ;;  %v12478_v49 = vld [vmem:[#allocation12 + $0x40] sm:$0xff]  ;;  %v7075_v14 = vadd.f32 %v13797_v13, %v7061_v39  ;;  %v7242_v11 = vpop.f32.mrf.mxu3 }
 0x42c   :  { %v7063_v31 = vadd.f32 %v13806_v5, %v7049_v35  ;;  %v7417_v36 = vpack.c.bf16 %v7161_v33, %v7159_v59  ;;  %v5462_v5 = vperm.slane %v13790_v4, 3  ;;  %v12514_v35 = vld [vmem:[#allocation12 + $0x160] sm:$0xff] }
 0x42d   :  { %7825 = vmatpush.bf16.msrb.mxu1 %v12483_v38 }
 0x42e   :  { %7845 = vmatmul.bf16.vlgmr.msrb.gmra.mxu2 %v7417_v36  ;;  %v7077_v62 = vadd.f32 %v13812_v24, %v7063_v31  ;;  %v7173_v0 = vadd.f32 %v7172_v63, %v5462_v5  ;;  %v12512_v31 = vld [vmem:[#allocation12 + $0x150] sm:$0xff] }
 0x430   :  { %v7416_v18 = vpack.c.bf16 %v7077_v62, %v7075_v14  ;;  %v7174_v3 = vpop.f32.mrf.mxu2  ;;  %v7187_v30 = vadd.f32 %v7186_v26, %v7173_v0  ;;  %v12511_v26 = vld [vmem:[#allocation12 + $0x148] sm:$0xff] }
 0x431   :  { %7826 = vmatpush.bf16.msrb.mxu1 %v12482_v46  ;;  %v7175_v52 = vadd.f32 %v7174_v3, %v5462_v5  ;;  %v12507_v46 = vld [vmem:[#allocation12 + $0x128] sm:$0xff] }
 0x432   :  { %v7201_v32 = vadd.f32 %v7200_v12, %v7187_v30  ;;  %v7244_v29 = vpop.f32.mrf.mxu3  ;;  %7867 = vmatpush.bf16.msra.mxu0 %v12507_v46 }
 0x433   :  { %v7189_v17 = vadd.f32 %v7188_v23, %v7175_v52  ;;  %v12510_v23 = vld [vmem:[#allocation12 + $0x140] sm:$0xff] }
 0x435   :  { %7827 = vmatpush.bf16.msrb.mxu1 %v12481_v41  ;;  %v7203_v15 = vadd.f32 %v7202_v9, %v7189_v17 }
 0x436   :  { %7868 = vmatpush.bf16.msra.mxu0 %v12506_v20 }
 0x438   :  { %v7228_v42 = vpop.f32.mrf.mxu2 }
 0x439   :  { %7828 = vmatpush.bf16.msrb.mxu1 %v12480_v1 }
 0x43a   :  { %7869 = vmatpush.bf16.msra.mxu0 %v12505_v6 }
 0x43c   :  { %v7256_v55 = vpop.f32.mrf.mxu0 }
 0x43d   :  { %7829 = vmatpush.bf16.msrb.mxu1 %v12479_v22  ;;  %v7257_v1 = vadd.f32 %v7256_v55, %v5463_v50 }
 0x43e   :  { %7870 = vmatpush.bf16.msra.mxu0 %v12504_v58 }
 0x440   :  { %v7230_v38 = vpop.f32.mrf.mxu2 }
 0x441   :  { %7830 = vmatpush.bf16.msrb.mxu1 %v12478_v49  ;;  %v7214_v10 = vpop.f32.mrf.mxu1 }
 0x442   :  { %v7215_v24 = vadd.f32 %v7214_v10, %v7201_v32  ;;  %7871 = vmatpush.bf16.msra.mxu0 %v12503_v60  ;;  %v12530_v60 = vld [vmem:[#allocation13] ss:$0 sm:$0xff] }
 0x444   :  { %7831 = vmatmul.bf16.vlgmr.msrb.gmra.mxu1 %v7416_v18  ;;  %v7229_v7 = vadd.f32 %v7228_v42, %v7215_v24  ;;  %v7258_v2 = vpop.f32.mrf.mxu0 }
 0x445   :  { %7879 = vmatpush.bf16.msra.mxu1 %v12517_v27  ;;  %v7259_v21 = vadd.f32 %v7258_v2, %v5463_v50 }
 0x446   :  { %v7243_v45 = vadd.f32 %v7242_v11, %v7229_v7  ;;  %7872 = vmatpush.bf16.msra.mxu0 %v12502_v40  ;;  %v5464_v11 = vperm.slane %v13790_v4, 5 }
 0x448   :  { %v7284_v48 = vpop.f32.mrf.mxu2 }
 0x449   :  { %v7216_v13 = vpop.f32.mrf.mxu1  ;;  %7880 = vmatpush.bf16.msra.mxu1 %v12516_v37 }
 0x44a   :  { %v7217_v43 = vadd.f32 %v7216_v13, %v7203_v15  ;;  %v7298_v25 = vpop.f32.mrf.mxu3 }
 0x44c   :  { %v7231_v8 = vadd.f32 %v7230_v38, %v7217_v43 }
 0x44d   :  { %7881 = vmatpush.bf16.msra.mxu1 %v12515_v44 }
 0x44e   :  { %v7245_v57 = vadd.f32 %v7244_v29, %v7231_v8 }
 0x450   :  { %v7418_v61 = vpack.c.bf16 %v7245_v57, %v7243_v45  ;;  %v7286_v16 = vpop.f32.mrf.mxu2 }
 0x451   :  { %7882 = vmatpush.bf16.msra.mxu1 %v12514_v35 }
 0x452   :  { %7859 = vmatmul.bf16.vlgmr.msrb.gmra.mxu3 %v7418_v61  ;;  %v7300_v63 = vpop.f32.mrf.mxu3 }
 0x455   :  { %7883 = vmatpush.bf16.msra.mxu1 %v12513_v34 }
 0x458   :  { %v7340_v12 = vpop.f32.mrf.mxu2 }
 0x459   :  { %7884 = vmatpush.bf16.msra.mxu1 %v12512_v31  ;;  %v7341_v52 = vadd.f32 %v7340_v12, %v5464_v11 }
 0x45c   :  { %v7312_v56 = vpop.f32.mrf.mxu0 }
 0x45d   :  { %7885 = vmatpush.bf16.msra.mxu1 %v12511_v26 }
 0x460   :  { %v7342_v42 = vpop.f32.mrf.mxu2 }
 0x461   :  { %v7270_v41 = vpop.f32.mrf.mxu1  ;;  %7886 = vmatpush.bf16.msra.mxu1 %v12510_v23  ;;  %v7343_v15 = vadd.f32 %v7342_v42, %v5464_v11 }
 0x462   :  { %v7271_v54 = vadd.f32 %v7270_v41, %v7257_v1 }
 0x464   :  { %v7285_v59 = vadd.f32 %v7284_v48, %v7271_v54  ;;  %v7314_v39 = vpop.f32.mrf.mxu0 }
 0x466   :  { %v7299_v36 = vadd.f32 %v7298_v25, %v7285_v59 }
 0x468   :  { %v7313_v49 = vadd.f32 %v7312_v56, %v7299_v36  ;;  %v7354_v0 = vpop.f32.mrf.mxu3  ;;  %v7396_v32 = vpop.f32.mrf.mxu2 }
 0x469   :  { %v7272_v47 = vpop.f32.mrf.mxu1  ;;  %v7355_v17 = vadd.f32 %v7354_v0, %v7341_v52 }
 0x46a   :  { %v7273_v19 = vadd.f32 %v7272_v47, %v7259_v21 }
 0x46c   :  { %v7287_v33 = vadd.f32 %v7286_v16, %v7273_v19 }
 0x46e   :  { %v7301_v28 = vadd.f32 %v7300_v63, %v7287_v33 }
 0x470   :  { %v7315_v62 = vadd.f32 %v7314_v39, %v7301_v28  ;;  %v7356_v10 = vpop.f32.mrf.mxu3  ;;  %v7398_v45 = vpop.f32.mrf.mxu2 }
 0x471   :  { %v7357_v7 = vadd.f32 %v7356_v10, %v7343_v15 }
 0x47c   :  { %v7368_v30 = vpop.f32.mrf.mxu0 }
 0x47d   :  { %v7369_v13 = vadd.f32 %v7368_v30, %v7355_v17 }
 0x481   :  { %v7326_v22 = vpop.f32.mrf.mxu1 }
 0x482   :  { %v7327_v18 = vadd.f32 %v7326_v22, %v7313_v49 }
 0x484   :  { %v7370_v51 = vpop.f32.mrf.mxu0 }
 0x485   :  { %v7371_v38 = vadd.f32 %v7370_v51, %v7357_v7 }
 0x488   :  { %v7410_v24 = vpop.f32.mrf.mxu3 }
 0x489   :  { %v7328_v14 = vpop.f32.mrf.mxu1 }
 0x48a   :  { %v7329_v3 = vadd.f32 %v7328_v14, %v7315_v62 }
 0x48c   :  { %v7419_v5 = vpack.c.bf16 %v7329_v3, %v7327_v18 }
 0x48e   :  { %7873 = vmatmul.bf16.vlgmr.msra.gmra.mxu0 %v7419_v5 }
 0x490   :  { %v7412_v46 = vpop.f32.mrf.mxu3 }
 0x49c   :  { %v7818_v6 = vpop.f32.mrf.mxu0 }
 0x49d   :  { %v7819_v55 = vadd.f32 %v12530_v60, %v7818_v6 }
 0x4a1   :  { %v7382_v9 = vpop.f32.mrf.mxu1 }
 0x4a2   :  { %v7383_v43 = vadd.f32 %v7382_v9, %v7369_v13 }
 0x4a4   :  { %v7397_v29 = vadd.f32 %v7396_v32, %v7383_v43  ;;  %v7820_v40 = vpop.f32.mrf.mxu0 }
 0x4a5   :  { %v7821_v50 = vadd.f32 %v12530_v60, %v7820_v40 }
 0x4a6   :  { %v7411_v61 = vadd.f32 %v7410_v24, %v7397_v29 }
 0x4a9   :  { %v7384_v8 = vpop.f32.mrf.mxu1 }
 0x4aa   :  { %v7385_v53 = vadd.f32 %v7384_v8, %v7371_v38 }
 0x4ac   :  { %v7399_v57 = vadd.f32 %v7398_v45, %v7385_v53 }
 0x4ae   :  { %v7413_v20 = vadd.f32 %v7412_v46, %v7399_v57 }
 0x4b0   :  { %v7420_v4 = vpack.c.bf16 %v7413_v20, %v7411_v61 }
 0x4b1   :  { %v7846_v41 = vpop.f32.mrf.mxu2 }
 0x4b2   :  { %7887 = vmatmul.bf16.vlgmr.msra.gmra.mxu1 %v7420_v4 }
 0x4b9   :  { %v7848_v54 = vpop.f32.mrf.mxu2 }
 0x4c1   :  { %v7832_v58 = vpop.f32.mrf.mxu1 }
 0x4c2   :  { %v7833_v27 = vadd.f32 %v7832_v58, %v7819_v55 }
 0x4c4   :  { %v7847_v44 = vadd.f32 %v7846_v41, %v7833_v27 }
 0x4c9   :  { %v7834_v37 = vpop.f32.mrf.mxu1 }
 0x4ca   :  { %v7835_v47 = vadd.f32 %v7834_v37, %v7821_v50 }
 0x4cc   :  { %v7849_v56 = vadd.f32 %v7848_v54, %v7835_v47 }
 0x4d5   :  { %v7860_v48 = vpop.f32.mrf.mxu3 }
 0x4d6   :  { %v7861_v25 = vadd.f32 %v7860_v48, %v7847_v44 }
 0x4dd   :  { %v7862_v19 = vpop.f32.mrf.mxu3 }
 0x4de   :  { %v7863_v34 = vadd.f32 %v7862_v19, %v7849_v56 }
 0x50b   :  { %v7874_v2 = vpop.f32.mrf.mxu0 }
 0x50c   :  { %v7875_v1 = vadd.f32 %v7874_v2, %v7861_v25 }
 0x513   :  { %v7876_v16 = vpop.f32.mrf.mxu0 }
 0x514   :  { %v7877_v59 = vadd.f32 %v7876_v16, %v7863_v34 }
 0x52f   :  { %v7888_v21 = vpop.f32.mrf.mxu1 }
 0x530   :  { %v7889_v35 = vadd.f32 %v7888_v21, %v7875_v1 }
 0x532   :  { %7893 = vst [vmem:[%s13850_s9] sm:$0xff] %v7889_v35 }
 0x537   :  { %v7890_v33 = vpop.f32.mrf.mxu1 }
 0x538   :  { %v7891_v22 = vadd.f32 %v7890_v33, %v7877_v59 }
 0x53a   :  { %7894 = vst [vmem:[%s13850_s9 + $0x8] sm:$0xff] %v7891_v22 }
 0x53b   :  { %7899 = vsyncpa [#allocation3], 1 }
 0x53c   :  { %7900 = vsyncpa [#allocation5], 1 }
 0x53d   :  { %7901 = vsyncpa [#allocation8], 1 }
 0x53e   :  { %7902 = vsyncpa [#allocation11], 1 }
 0x53f   :  { %7903 = vsyncpa [#allocation14], 1 }

</bundles_post_ra>
